<compile_context>
chip_gen: v5e
topology: v5e:2x2
jax: 0.10.0
libtpu: 0.0.40
codegen_flags: <defaults>
</compile_context>

<pallas_src>
import functools

import jax
import jax.numpy as jnp
import numpy as np
from jax import lax
from jax.experimental import pallas as pl
from jax.experimental.pallas import tpu as pltpu


# ---------------------------------------------------------------------------
# Kernel
# ---------------------------------------------------------------------------
def _gram_kernel(src_ref, pred_ref, acc_ref, *, S, L, tile_l):
    """Accumulate the fused Gram accumulator over the L (lane) axis.

    src_ref : (Bt, S, tile_l)       sources tile (native dtype)
    pred_ref: (Bt, 1, tile_l)       prediction tile (native dtype)
    acc_ref : (Bt, S+1, S+1) f32    resident accumulator across the L axis:
                 acc[:, :S, :S] = sources @ sources^T   (G)
                 acc[:, :S,  S] = acc[:, S, :S]^T = sources @ pred   (b)
                 acc[:,  S,  S] = pred . pred           (pp)
    """
    k = pl.program_id(1)

    @pl.when(k == 0)
    def _init():
        acc_ref[...] = jnp.zeros_like(acc_ref)

    # In-kernel upcast: inputs stream in their native dtype (halves HBM read
    # bytes for bf16/int16 audio); the accumulator stays f32.
    s = src_ref[...].astype(jnp.float32)       # (Bt, S, tile_l)
    p = pred_ref[...].astype(jnp.float32)      # (Bt, 1, tile_l)

    if L % tile_l != 0:
        # Ragged tail: zero lanes past L.  Pallas does not zero-fill
        # out-of-bounds edge-block reads, so mask before accumulating.
        # Static no-op (no code emitted) when L is tile-aligned.
        lane = lax.broadcasted_iota(jnp.int32, (1, 1, tile_l), 2)
        valid = lane < (L - k * tile_l)
        s = jnp.where(valid, s, 0.0)
        p = jnp.where(valid, p, 0.0)

    # Pure VPU multiply + lane reduce (no MXU, no lane-axis dot_general
    # transpose): with S ~ 2 the MXU output would be 2x2 and the operand
    # transpose could become the binding unit.  Compute hides under the DMA.
    rows = [s[:, i:i + 1, :] for i in range(S)] + [p]     # (S+1) x (Bt,1,tl)
    for i in range(S + 1):
        for j in range(i, S + 1):
            v = jnp.sum(rows[i] * rows[j], axis=-1, keepdims=True)  # (Bt,1,1)
            acc_ref[:, i:i + 1, j:j + 1] += v
            if i != j:
                acc_ref[:, j:j + 1, i:i + 1] += v


# ---------------------------------------------------------------------------
# Sizing helpers (padding-corrected VMEM accounting)
# ---------------------------------------------------------------------------
def _pick_block_batch(B):
    """Batch elements per grid step.

    Bt only amortizes the ~0.35 us per-grid-step overhead — only the last two
    block dims map to sublane/lane, so Bt does not change vector density.
    Prefer >= 2 batch blocks so v7x's two TensorCores both get work through
    the 'parallel' batch axis (harmless on single-TC v5e/v6e).
    """
    for bt in (8, 4, 2, 1):
        if B % bt == 0 and B // bt >= 2:
            return bt
    for bt in (8, 4, 2, 1):
        if B % bt == 0:
            return bt
    return 1


def _padded_sublanes(rows, itemsize):
    """Second-to-last dim rounded up to the dtype's sublane multiple."""
    sub = max(8, 32 // itemsize)
    return pl.cdiv(rows, sub) * sub


def _bytes_per_lane(Bt, S, src_itemsize, pred_itemsize):
    """Double-buffered, sublane-padded input bytes per lane of tile_l."""
    src = Bt * _padded_sublanes(S, src_itemsize) * src_itemsize
    prd = Bt * _padded_sublanes(1, pred_itemsize) * pred_itemsize
    return 2 * (src + prd)          # x2: double-buffered pipeline


def _pick_tile_l(L, bytes_per_lane, budget_bytes):
    """Largest multiple of 128 whose padding-corrected, double-buffered input
    footprint fits the budget (default 24 MiB: safe for v7x's 64 MiB physical
    VMEM, ample headroom on v5e/v6e's 128 MiB)."""
    max_tile = max(128, (budget_bytes // bytes_per_lane) // 128 * 128)
    return int(min(max_tile, pl.cdiv(L, 128) * 128))


# ---------------------------------------------------------------------------
# pallas_call wrapper
# ---------------------------------------------------------------------------
def batched_gram(sources, preds, *, vmem_budget_bytes=24 << 20):
    """sources (B,S,L), preds (B,L) -> fused accumulator M (B, S+1, S+1) f32:
    M[:, :S, :S] = G = s@s^T,  M[:, :S, S] = b = s@p,  M[:, S, S] = p.p."""
    B, S, L = sources.shape
    assert preds.shape == (B, L)

    src_item = jnp.dtype(sources.dtype).itemsize
    pred_item = jnp.dtype(preds.dtype).itemsize

    Bt = _pick_block_batch(B)
    per_lane = _bytes_per_lane(Bt, S, src_item, pred_item)
    tile_l = _pick_tile_l(L, per_lane, vmem_budget_bytes)

    in_footprint = per_lane * tile_l
    vmem_limit = int(max(in_footprint + (4 << 20), 16 << 20))

    grid = (B // Bt, pl.cdiv(L, tile_l))   # (parallel batch blocks, L reduction last)
    kernel = functools.partial(_gram_kernel, S=S, L=L, tile_l=tile_l)

    return pl.pallas_call(
        kernel,
        out_shape=jax.ShapeDtypeStruct((B, S + 1, S + 1), jnp.float32),
        grid_spec=pltpu.PrefetchScalarGridSpec(
            num_scalar_prefetch=0,
            grid=grid,
            in_specs=[
                pl.BlockSpec((Bt, S, tile_l), lambda i, k: (i, 0, k)),
                pl.BlockSpec((Bt, 1, tile_l), lambda i, k: (i, 0, k)),
            ],
            out_specs=pl.BlockSpec((Bt, S + 1, S + 1), lambda i, k: (i, 0, 0)),
        ),
        compiler_params=pltpu.CompilerParams(
            dimension_semantics=("parallel", "arbitrary"),
            vmem_limit_bytes=vmem_limit,
        ),
    )(sources, preds[:, None, :])          # (B,1,L) reshape view — no HBM copy


# ---------------------------------------------------------------------------
# bss_eval math on the Gram blocks (plain-JAX scalar glue)
# ---------------------------------------------------------------------------
def bss_eval_batch_pallas(preds, source_tensor):
    """preds: (B, L), source_tensor: (B, S, L) -> (sdrs, sirs, sars), each (B,)."""
    B, S, L = source_tensor.shape
    M = batched_gram(source_tensor, preds)             # (B, S+1, S+1) f32

    G = M[:, :S, :S]                                   # sources @ sources^T
    b = M[:, :S, S]                                    # sources @ pred
    pp = M[:, S, S]                                    # pred . pred

    # pinv(sources^T) @ pred via the normal equations.  A tiny Tikhonov ridge
    # keeps the solve well-behaved if G is near-singular (duplicate sources);
    # torch.pinverse's SVD-cutoff for genuinely rank-deficient sources is not
    # reproduced exactly.
    ridge = (1e-7 / S) * jnp.trace(G, axis1=1, axis2=2) + 1e-30
    G_reg = G + ridge[:, None, None] * jnp.eye(S, dtype=G.dtype)
    x = jnp.linalg.solve(G_reg, b[..., None])[..., 0]  # (B, S)

    b0 = b[:, 0]
    g00 = G[:, 0, 0]
    st_norm = b0 * b0 / g00                  # ||s_target||^2
    proj_norm = jnp.sum(x * b, axis=-1)      # ||source_projection||^2

    # Residual energies via Gram identities; clamp so f32 cancellation at very
    # high SDR/SIR/SAR cannot push a denominator to <= 0 (NaN/inf).
    tiny = jnp.float32(1e-30)
    e_total = jnp.maximum(pp - st_norm, tiny)          # ||pred - s_target||^2
    e_inter = jnp.maximum(proj_norm - st_norm, tiny)   # ||e_inter||^2
    e_art = jnp.maximum(pp - proj_norm, tiny)          # ||e_art||^2

    sdr = 10.0 * jnp.log10(st_norm / e_total)
    sir = 10.0 * jnp.log10(st_norm / e_inter)
    sar = 10.0 * jnp.log10(proj_norm / e_art)
    return sdr, sir, sar


class BSSEvaluate:
    """Mirror of the PyTorch BSSEvaluate.forward (metrics dict instead of list obj)."""

    def __init__(self, fs=16000):
        self.fs = fs
        # TODO(synk): ShortTimeObjectiveIntelligibility (STOI) needs resampling +
        # 1/3-octave filterbanks from the external `sepcosts` module; no clean
        # Pallas equivalent here, so `stois` is left empty.

    def __call__(self, preds, source_tensor, target_idx=0):
        sdrs, sirs, sars = bss_eval_batch_pallas(preds, source_tensor)
        return {"sdrs": sdrs, "sirs": sirs, "sars": sars, "stois": []}


# ---------------------------------------------------------------------------
# Pure-JAX reference (follows the PyTorch code literally)
# ---------------------------------------------------------------------------
def _reference(preds, sources):
    sdrs, sirs, sars = [], [], []
    for i in range(preds.shape[0]):
        p = preds[i]
        A = sources[i].T                     # (L, S)
        t = A[:, 0]
        s_target = (jnp.sum(t * p) / jnp.sum(t * t)) * t
        proj = A @ (jnp.linalg.pinv(A) @ p)
        e_inter = proj - s_target
        e_art = p - proj
        sdrs.append(10 * jnp.log10(jnp.sum(s_target**2) / jnp.sum((p - s_target) ** 2)))
        sirs.append(10 * jnp.log10(jnp.sum(s_target**2) / jnp.sum(e_inter**2)))
        sars.append(10 * jnp.log10(jnp.sum(proj**2) / jnp.sum(e_art**2)))
    return (jnp.stack(sdrs), jnp.stack(sirs), jnp.stack(sars))


if __name__ == "__main__":
    # Non-128-aligned L exercises the in-kernel ragged-tail masking path.
    B, S, L = 2, 2, 16001
    key = jax.random.PRNGKey(0)
    k1, k2 = jax.random.split(key)
    source_tensor = jax.random.normal(k1, (B, S, L), dtype=jnp.float32)
    # A plausible "prediction": noisy mixture leaning toward source 0.
    preds = (0.8 * source_tensor[:, 0]
             + 0.3 * source_tensor[:, 1]
             + 0.1 * jax.random.normal(k2, (B, L), dtype=jnp.float32))

    evaluator = BSSEvaluate(fs=16000)
    metrics = evaluator(preds, source_tensor)
    metrics = jax.block_until_ready(metrics)

    ref = _reference(preds, source_tensor)
    for got, want in zip((metrics["sdrs"], metrics["sirs"], metrics["sars"]), ref):
        np.testing.assert_allclose(np.asarray(got), np.asarray(want),
                                   rtol=1e-2, atol=1e-3)

    print("KERNEL_OK")
</pallas_src>

<mosaic_0001>
module attributes {stable_mosaic.version = 11 : i64} {
  func.func @_gram_kernel(%arg0: i32, %arg1: i32, %arg2: memref<1x2x16128xf32, #tpu.memory_space<vmem>>, %arg3: memref<1x1x16128xf32, #tpu.memory_space<vmem>>, %arg4: memref<1x3x3xf32, #tpu.memory_space<vmem>>) attributes {dimension_semantics = [#tpu.dimension_semantics<parallel>, #tpu.dimension_semantics<arbitrary>], iteration_bounds = array<i64: 2, 1>, scalar_prefetch = 0 : i64, scratch_operands = 0 : i64, tpu.core_type = #tpu.core_type<tc>, window_params = [{transform_indices = @transform_0, window_bounds = array<i64: 1, 2, 16128>}, {transform_indices = @transform_1, window_bounds = array<i64: 1, 1, 16128>}, {transform_indices = @transform_2, window_bounds = array<i64: 1, 3, 3>}]} {
    %c0_i32 = arith.constant 0 : i32
    %0 = arith.cmpi eq, %arg1, %c0_i32 : i32
    %1 = arith.extui %0 : i1 to i32
    %c0_i32_0 = arith.constant 0 : i32
    %2 = arith.cmpi ne, %1, %c0_i32_0 : i32
    scf.if %2 {
      %cst_65 = arith.constant 0.000000e+00 : f32
      %63 = vector.broadcast %cst_65 : f32 to vector<1x3x3xf32>
      %c0_66 = arith.constant 0 : index
      %c0_67 = arith.constant 0 : index
      %c0_68 = arith.constant 0 : index
      %64 = vector.load %arg4[%c0_66, %c0_67, %c0_68] : memref<1x3x3xf32, #tpu.memory_space<vmem>>, vector<1x3x3xf32>
      tpu.vector_store %arg4[%c0_66, %c0_67, %c0_68], %63 {strides = array<i32>} : memref<1x3x3xf32, #tpu.memory_space<vmem>>, vector<1x3x3xf32>,
    } else {
    }
    %c0 = arith.constant 0 : index
    %c0_1 = arith.constant 0 : index
    %c0_2 = arith.constant 0 : index
    %3 = vector.load %arg2[%c0, %c0_1, %c0_2] : memref<1x2x16128xf32, #tpu.memory_space<vmem>>, vector<1x2x16128xf32>
    %c0_3 = arith.constant 0 : index
    %c0_4 = arith.constant 0 : index
    %c0_5 = arith.constant 0 : index
    %4 = vector.load %arg3[%c0_3, %c0_4, %c0_5] : memref<1x1x16128xf32, #tpu.memory_space<vmem>>, vector<1x1x16128xf32>
    %5 = tpu.iota {dimensions = array<i32: 2>} : vector<1x1x16128xi32>
    %c16128_i32 = arith.constant 16128 : i32
    %6 = arith.muli %arg1, %c16128_i32 : i32
    %c16001_i32 = arith.constant 16001 : i32
    %7 = arith.subi %c16001_i32, %6 : i32
    %8 = vector.broadcast %7 : i32 to vector<1x1x16128xi32>
    %9 = arith.cmpi slt, %5, %8 : vector<1x1x16128xi32>
    %cst = arith.constant 0.000000e+00 : f32
    %10 = vector.shape_cast %9 : vector<1x1x16128xi1> to vector<1x1x16128xi1>
    %11 = vector.broadcast %10 : vector<1x1x16128xi1> to vector<1x2x16128xi1>
    %12 = vector.broadcast %cst : f32 to vector<1x2x16128xf32>
    %13 = arith.select %11, %3, %12 : vector<1x2x16128xi1>, vector<1x2x16128xf32>
    %cst_6 = arith.constant 0.000000e+00 : f32
    %14 = vector.broadcast %cst_6 : f32 to vector<1x1x16128xf32>
    %15 = arith.select %9, %4, %14 : vector<1x1x16128xi1>, vector<1x1x16128xf32>
    %16 = vector.extract_strided_slice %13 {offsets = [0, 0, 0], sizes = [1, 1, 16128], strides = [1, 1, 1]} : vector<1x2x16128xf32> to vector<1x1x16128xf32>
    %17 = vector.extract_strided_slice %13 {offsets = [0, 1, 0], sizes = [1, 1, 16128], strides = [1, 1, 1]} : vector<1x2x16128xf32> to vector<1x1x16128xf32>
    %18 = arith.mulf %16, %16 : vector<1x1x16128xf32>
    %cst_7 = arith.constant dense<0.000000e+00> : vector<1x1xf32>
    %19 = vector.multi_reduction <add>, %18, %cst_7 [2] : vector<1x1x16128xf32> to vector<1x1xf32>
    %20 = vector.shape_cast %19 : vector<1x1xf32> to vector<1x1x1xf32>
    %c0_8 = arith.constant 0 : index
    %c0_9 = arith.constant 0 : index
    %c0_10 = arith.constant 0 : index
    %21 = vector.load %arg4[%c0_8, %c0_9, %c0_10] : memref<1x3x3xf32, #tpu.memory_space<vmem>>, vector<1x1x1xf32>
    %22 = arith.addf %21, %20 : vector<1x1x1xf32>
    %c0_11 = arith.constant 0 : index
    %c0_12 = arith.constant 0 : index
    %c0_13 = arith.constant 0 : index
    %23 = vector.load %arg4[%c0_11, %c0_12, %c0_13] : memref<1x3x3xf32, #tpu.memory_space<vmem>>, vector<1x1x1xf32>
    tpu.vector_store %arg4[%c0_11, %c0_12, %c0_13], %22 {strides = array<i32>} : memref<1x3x3xf32, #tpu.memory_space<vmem>>, vector<1x1x1xf32>,
    %24 = arith.mulf %16, %17 : vector<1x1x16128xf32>
    %cst_14 = arith.constant dense<0.000000e+00> : vector<1x1xf32>
    %25 = vector.multi_reduction <add>, %24, %cst_14 [2] : vector<1x1x16128xf32> to vector<1x1xf32>
    %26 = vector.shape_cast %25 : vector<1x1xf32> to vector<1x1x1xf32>
    %c0_15 = arith.constant 0 : index
    %c0_16 = arith.constant 0 : index
    %c1 = arith.constant 1 : index
    %27 = vector.load %arg4[%c0_15, %c0_16, %c1] : memref<1x3x3xf32, #tpu.memory_space<vmem>>, vector<1x1x1xf32>
    %28 = arith.addf %27, %26 : vector<1x1x1xf32>
    %c0_17 = arith.constant 0 : index
    %c0_18 = arith.constant 0 : index
    %c1_19 = arith.constant 1 : index
    %29 = vector.load %arg4[%c0_17, %c0_18, %c1_19] : memref<1x3x3xf32, #tpu.memory_space<vmem>>, vector<1x1x1xf32>
    tpu.vector_store %arg4[%c0_17, %c0_18, %c1_19], %28 {strides = array<i32>} : memref<1x3x3xf32, #tpu.memory_space<vmem>>, vector<1x1x1xf32>,
    %c0_20 = arith.constant 0 : index
    %c1_21 = arith.constant 1 : index
    %c0_22 = arith.constant 0 : index
    %30 = vector.load %arg4[%c0_20, %c1_21, %c0_22] : memref<1x3x3xf32, #tpu.memory_space<vmem>>, vector<1x1x1xf32>
    %31 = arith.addf %30, %26 : vector<1x1x1xf32>
    %c0_23 = arith.constant 0 : index
    %c1_24 = arith.constant 1 : index
    %c0_25 = arith.constant 0 : index
    %32 = vector.load %arg4[%c0_23, %c1_24, %c0_25] : memref<1x3x3xf32, #tpu.memory_space<vmem>>, vector<1x1x1xf32>
    tpu.vector_store %arg4[%c0_23, %c1_24, %c0_25], %31 {strides = array<i32>} : memref<1x3x3xf32, #tpu.memory_space<vmem>>, vector<1x1x1xf32>,
    %33 = arith.mulf %16, %15 : vector<1x1x16128xf32>
    %cst_26 = arith.constant dense<0.000000e+00> : vector<1x1xf32>
    %34 = vector.multi_reduction <add>, %33, %cst_26 [2] : vector<1x1x16128xf32> to vector<1x1xf32>
    %35 = vector.shape_cast %34 : vector<1x1xf32> to vector<1x1x1xf32>
    %c0_27 = arith.constant 0 : index
    %c0_28 = arith.constant 0 : index
    %c2 = arith.constant 2 : index
    %36 = vector.load %arg4[%c0_27, %c0_28, %c2] : memref<1x3x3xf32, #tpu.memory_space<vmem>>, vector<1x1x1xf32>
    %37 = arith.addf %36, %35 : vector<1x1x1xf32>
    %c0_29 = arith.constant 0 : index
    %c0_30 = arith.constant 0 : index
    %c2_31 = arith.constant 2 : index
    %38 = vector.load %arg4[%c0_29, %c0_30, %c2_31] : memref<1x3x3xf32, #tpu.memory_space<vmem>>, vector<1x1x1xf32>
    tpu.vector_store %arg4[%c0_29, %c0_30, %c2_31], %37 {strides = array<i32>} : memref<1x3x3xf32, #tpu.memory_space<vmem>>, vector<1x1x1xf32>,
    %c0_32 = arith.constant 0 : index
    %c2_33 = arith.constant 2 : index
    %c0_34 = arith.constant 0 : index
    %39 = vector.load %arg4[%c0_32, %c2_33, %c0_34] : memref<1x3x3xf32, #tpu.memory_space<vmem>>, vector<1x1x1xf32>
    %40 = arith.addf %39, %35 : vector<1x1x1xf32>
    %c0_35 = arith.constant 0 : index
    %c2_36 = arith.constant 2 : index
    %c0_37 = arith.constant 0 : index
    %41 = vector.load %arg4[%c0_35, %c2_36, %c0_37] : memref<1x3x3xf32, #tpu.memory_space<vmem>>, vector<1x1x1xf32>
    tpu.vector_store %arg4[%c0_35, %c2_36, %c0_37], %40 {strides = array<i32>} : memref<1x3x3xf32, #tpu.memory_space<vmem>>, vector<1x1x1xf32>,
    %42 = arith.mulf %17, %17 : vector<1x1x16128xf32>
    %cst_38 = arith.constant dense<0.000000e+00> : vector<1x1xf32>
    %43 = vector.multi_reduction <add>, %42, %cst_38 [2] : vector<1x1x16128xf32> to vector<1x1xf32>
    %44 = vector.shape_cast %43 : vector<1x1xf32> to vector<1x1x1xf32>
    %c0_39 = arith.constant 0 : index
    %c1_40 = arith.constant 1 : index
    %c1_41 = arith.constant 1 : index
    %45 = vector.load %arg4[%c0_39, %c1_40, %c1_41] : memref<1x3x3xf32, #tpu.memory_space<vmem>>, vector<1x1x1xf32>
    %46 = arith.addf %45, %44 : vector<1x1x1xf32>
    %c0_42 = arith.constant 0 : index
    %c1_43 = arith.constant 1 : index
    %c1_44 = arith.constant 1 : index
    %47 = vector.load %arg4[%c0_42, %c1_43, %c1_44] : memref<1x3x3xf32, #tpu.memory_space<vmem>>, vector<1x1x1xf32>
    tpu.vector_store %arg4[%c0_42, %c1_43, %c1_44], %46 {strides = array<i32>} : memref<1x3x3xf32, #tpu.memory_space<vmem>>, vector<1x1x1xf32>,
    %48 = arith.mulf %17, %15 : vector<1x1x16128xf32>
    %cst_45 = arith.constant dense<0.000000e+00> : vector<1x1xf32>
    %49 = vector.multi_reduction <add>, %48, %cst_45 [2] : vector<1x1x16128xf32> to vector<1x1xf32>
    %50 = vector.shape_cast %49 : vector<1x1xf32> to vector<1x1x1xf32>
    %c0_46 = arith.constant 0 : index
    %c1_47 = arith.constant 1 : index
    %c2_48 = arith.constant 2 : index
    %51 = vector.load %arg4[%c0_46, %c1_47, %c2_48] : memref<1x3x3xf32, #tpu.memory_space<vmem>>, vector<1x1x1xf32>
    %52 = arith.addf %51, %50 : vector<1x1x1xf32>
    %c0_49 = arith.constant 0 : index
    %c1_50 = arith.constant 1 : index
    %c2_51 = arith.constant 2 : index
    %53 = vector.load %arg4[%c0_49, %c1_50, %c2_51] : memref<1x3x3xf32, #tpu.memory_space<vmem>>, vector<1x1x1xf32>
    tpu.vector_store %arg4[%c0_49, %c1_50, %c2_51], %52 {strides = array<i32>} : memref<1x3x3xf32, #tpu.memory_space<vmem>>, vector<1x1x1xf32>,
    %c0_52 = arith.constant 0 : index
    %c2_53 = arith.constant 2 : index
    %c1_54 = arith.constant 1 : index
    %54 = vector.load %arg4[%c0_52, %c2_53, %c1_54] : memref<1x3x3xf32, #tpu.memory_space<vmem>>, vector<1x1x1xf32>
    %55 = arith.addf %54, %50 : vector<1x1x1xf32>
    %c0_55 = arith.constant 0 : index
    %c2_56 = arith.constant 2 : index
    %c1_57 = arith.constant 1 : index
    %56 = vector.load %arg4[%c0_55, %c2_56, %c1_57] : memref<1x3x3xf32, #tpu.memory_space<vmem>>, vector<1x1x1xf32>
    tpu.vector_store %arg4[%c0_55, %c2_56, %c1_57], %55 {strides = array<i32>} : memref<1x3x3xf32, #tpu.memory_space<vmem>>, vector<1x1x1xf32>,
    %57 = arith.mulf %15, %15 : vector<1x1x16128xf32>
    %cst_58 = arith.constant dense<0.000000e+00> : vector<1x1xf32>
    %58 = vector.multi_reduction <add>, %57, %cst_58 [2] : vector<1x1x16128xf32> to vector<1x1xf32>
    %59 = vector.shape_cast %58 : vector<1x1xf32> to vector<1x1x1xf32>
    %c0_59 = arith.constant 0 : index
    %c2_60 = arith.constant 2 : index
    %c2_61 = arith.constant 2 : index
    %60 = vector.load %arg4[%c0_59, %c2_60, %c2_61] : memref<1x3x3xf32, #tpu.memory_space<vmem>>, vector<1x1x1xf32>
    %61 = arith.addf %60, %59 : vector<1x1x1xf32>
    %c0_62 = arith.constant 0 : index
    %c2_63 = arith.constant 2 : index
    %c2_64 = arith.constant 2 : index
    %62 = vector.load %arg4[%c0_62, %c2_63, %c2_64] : memref<1x3x3xf32, #tpu.memory_space<vmem>>, vector<1x1x1xf32>
    tpu.vector_store %arg4[%c0_62, %c2_63, %c2_64], %61 {strides = array<i32>} : memref<1x3x3xf32, #tpu.memory_space<vmem>>, vector<1x1x1xf32>,
    return
  }
  func.func @transform_0(%arg0: i32, %arg1: i32) -> (i32, i32, i32) {
    %c0_i32 = arith.constant 0 : i32
    %c0_i32_0 = arith.constant 0 : i32
    return %arg0, %c0_i32, %arg1 : i32, i32, i32
  }
  func.func @transform_1(%arg0: i32, %arg1: i32) -> (i32, i32, i32) {
    %c0_i32 = arith.constant 0 : i32
    %c0_i32_0 = arith.constant 0 : i32
    return %arg0, %c0_i32, %arg1 : i32, i32, i32
  }
  func.func @transform_2(%arg0: i32, %arg1: i32) -> (i32, i32, i32) {
    %c0_i32 = arith.constant 0 : i32
    %c0_i32_0 = arith.constant 0 : i32
    %c0_i32_1 = arith.constant 0 : i32
    return %arg0, %c0_i32, %c0_i32_0 : i32, i32, i32
  }
}

</mosaic_0001>

<bundles_post_ra>
// kernel: tpu_custom_call.1
= control target key start
LH: loop header
LB: loop body
LE: loop exit
PB: predicated region body
PF: predicated region fallthrough
CT: control target
= control target key end

     0   :  { %7 = vsyncpa [#allocation3], 0  ;;  %s9302_s0 = inlined_call_operand.hbm [shape: f32[2,2,16001], index: 0, kind: input, shape index: {}]   ;;  %s9303_s1 = inlined_call_operand.hbm [shape: f32[2,1,16001], index: 1, kind: input, shape index: {}]   ;;  %s9304_s2 = inlined_call_operand.vmem [shape: f32[2,3,3], index: 2, kind: output, shape index: {}]  }
   0x1   :  { %9 = vsyncpa [#allocation3 + $0x1], 0 }
   0x2   :  { %10 = vsyncpa [#allocation5], 0 }
   0x3   :  { %12 = vsyncpa [#allocation5 + $0x1], 0  ;;  %s4883_s9 = smov 0   ;;  %s4885_s10 = smov 0  }
   0x4   :  { %s4887_s11 = smov 0   ;;  %s4889_s12 = smov 0  }
   0x5   :  { %s4891_s13 = smov 0   ;;  %s4893_s14 = smov 0  }
   0x6 LB: > { %s4665_s15 = sadd.s32 4294967295, %s4865_s14   ;;  %s30_s16 = sadd.s32 1, %s4861_s13  ;;  %s4865_s14 = sphi %s4893_s14, %s18_s14   ;;  %s4861_s13 = sphi %s4891_s13, %s11602_s13   ;;  %s4857_s12 = sphi %s4889_s12, %s11601_s12   ;;  %s4853_s11 = sphi %s4887_s11, %s11600_s11   ;;  %s4849_s10 = sphi %s4885_s10, %s11599_s10   ;;  %s4845_s9 = sphi %s4883_s9, %s11598_s9  }
   0x7   : > { %p32_p0 = scmp.ge.s32.totalorder %s30_s16, 2  ;;  %s39_s17 = sadd.s32 1, %s4853_s11 }
   0x8   : > { %p46_p1 = scmp.ne.s32.totalorder %s4853_s11, %s4849_s10  ;;  %p47_p2 = scmp.eq.s32.totalorder %s4865_s14, 0 }
   0x9   : > { %s11604_s16 = smov (%p32_p0, %s30_s16), 0  ;;  %p52_p4 = scmp.ne.s32.totalorder %s4849_s10, %s4845_s9 }
   0xa   : > { %p48_p3 = por %p47_p2, %p46_p1  ;;  %s34_s18 = ssub.s32 %s4861_s13, %s11604_s16 }
   0xb   : > { %p53_p5 = scmp.eq.s32.totalorder %s4665_s15, 0  ;;  %p37_p6 = scmp.eq.s32.totalorder %s34_s18, 0 }
   0xc   : > { %p4691_p8 = scmp.lt.s32.totalorder %s4865_s14, 2  ;;  %s130_s21 = sand.u32 1, %s4853_s11  }
   0xd   : > { %p4922_p7 = por %p53_p5, %p52_p4  ;;  %s4675_s22 = smul.u32 252, %s4861_s13 }
   0xe   : > { %s4928_s20 = scalar_select %p37_p6, %s4853_s11, %s39_s17  }
   0xf   : > { %s4674_s23 = smul.u32 252, %s130_s21  ;;  %s141_s26 = scalar_lea.hbm %s9302_s0, %s4675_s22 }
  0x10   : > { %p4935_p9 = pnand %p4691_p8, %p48_p3  ;;  %s143_s28 = sshll.u32 %s141_s26, 4  ;;  %s144_s28 = int_to_ptr.hbm [resolvable:$true] %s143_s28 }
  0x11   : > { %s134_s29 = scalar_lea.vmem [#allocation2], %s4674_s23  ;;  %s131_s3 = scalar_lea.sflag [#allocation3], %s130_s21 }
  0x12   : > { %s145_s30 = sshll.u32 %s134_s29, 4  ;;  %p4670_p10 = scmp.ge.s32.totalorder %s4865_s14, 1  ;;  %s146_s30 = int_to_ptr.vmem [resolvable:$true] %s145_s30 }
  0x13   : > { %4687 = dma.hbm_to_vmem [thread:$0]  (!%p4935_p9), %s144_s28, 4032, %s146_s30, %s131_s3  }
  0x14   : > { %p171_p11 = scmp.lt.s32.totalorder %s4865_s14, 3  ;;  %s4676_s4 = smul.u32 126, %s130_s21 }
  0x15   : > { %s4677_s5 = smul.u32 126, %s4861_s13  ;;  %s153_s18 = scalar_lea.sflag [#allocation5], %s130_s21 }
  0x16   : > { %p172_p12 = pnand %p4670_p10, %p171_p11  ;;  %s156_s9 = scalar_lea.vmem [#allocation4], %s4676_s4 }
  0x17   : > { %s162_s8 = scalar_lea.hbm %s9303_s1, %s4677_s5  ;;  %s166_s15 = sshll.u32 %s156_s9, 4  ;;  %s167_s15 = int_to_ptr.vmem [resolvable:$true] %s166_s15 }
  0x18   : > { %s164_s17 = sshll.u32 %s162_s8, 4  ;;  %175 = sbr.rel (%p172_p12) target bundleno = 1168 (0x490), region = 28  ;;  %s165_s17 = int_to_ptr.hbm [resolvable:$true] %s164_s17 }
  0x19   : > { %4690 = dma.hbm_to_vmem [thread:$0]  (!%p4935_p9), %s165_s17, 2016, %s167_s15, %s153_s18  }
  0x1d   : > { %s177_s22 = sand.u32 1, %s4849_s10  }
  0x1e   : > { %s4678_s23 = smul.u32 252, %s177_s22  ;;  %s178_s24 = scalar_lea.sflag [#allocation3], %s177_s22 }
  0x20   : > { %s4950_s25 = scalar_lea.vmem [#allocation2], %s4678_s23 }
  0x21   : > { %4836 = dma.done.wait (%p4922_p7), %s178_s24, 4032  }
  0x22   : > { %4838 = vsyncadd (%p4922_p7), %s178_s24, 4294963264  ;;  %s4679_s26 = smul.u32 126, %s177_s22  ;;  %s188_s28 = scalar_lea.sflag [#allocation5], %s177_s22 }
  0x24   : > { %s4956_s29 = scalar_lea.vmem [#allocation4], %s4679_s26 }
  0x25   : > { %4840 = dma.done.wait (%p4922_p7), %s188_s28, 2016  }
  0x26   : > { %4842 = vsyncadd (%p4922_p7), %s188_s28, 4294965280  ;;  %v229_v0 = vld [vmem:[%s4950_s25] sm:$0xff]  ;;  %v230_v1 = vld [vmem:[%s4950_s25 + $0x8] sm:$0xff]  ;;  %vm1748_vm0 = vcmask 1040384   ;;  %vm3156_vm2 = vcmask 1041409   ;;  %p219_p13 = scmp.lt.s32.totalorder %s4857_s12, 1 }
  0x27   : > { %817 = vst [vmem:[#allocation1] ss:$4 sm:$0xff] %v229_v0  ;;  %v231_v2 = vld [vmem:[%s4950_s25 + $0x10] sm:$0xff]  ;;  %v232_v3 = vld [vmem:[%s4950_s25 + $0x18] sm:$0xff]  ;;  %v233_v26 = vld [vmem:[%s4950_s25 + $0x20] sm:$0xff]  ;;  %vm227_vm3 = vcmask 18432  }
  0x28   : > { %819 = vst [vmem:[#allocation1 + $0x20] ss:$4 sm:$0xff] %v230_v1  ;;  %v234_v28 = vld [vmem:[%s4950_s25 + $0x28] sm:$0xff]  ;;  %v5071_v51 = vld [vmem:[%s4956_s29] sm:$0xff]  ;;  %v235_v58 = vld [vmem:[%s4950_s25 + $0x30] sm:$0xff]  ;;  %s11606_s12 = smov (!%p219_p13, %s4857_s12), 1 }
  0x29   : > { %v5078_v55 = vperm.slane %v5071_v51, 0  ;;  %v5081_v56 = vperm.slane %v5071_v51, 1  ;;  %v5084_v57 = vperm.slane %v5071_v51, 2  ;;  %v236_v59 = vld [vmem:[%s4950_s25 + $0x38] sm:$0xff]  ;;  %v5093_v63 = vperm.slane %v5071_v51, 3  ;;  %s4671_s19 = sshll.u32 %s11606_s12, 2 }
  0x2a   : > { %s9263_s30 = scalar_lea.vmem %s9304_s2, %s4671_s19  ;;  %vm2004_vm4 = vcmask 0   ;;  %vm2765_vm5 = vcmask 8200   ;;  %vm3151_vm6 = vcmask 16400  }
  0x2b   : > { %10105 = vst [vmem:[#allocation37_spill] sm:$0xff] %v5078_v55 }
  0x2c   : > { %10106 = vst [vmem:[#allocation38_spill] sm:$0xff] %v5081_v56 }
  0x2d   : > { %10107 = vst [vmem:[#allocation39_spill] sm:$0xff] %v5084_v57 }
  0x2e   : > { %v4966_v4 = vld.sshfl [vmem:[#allocation1] sm:$0xff pattern:$0x73625140]  ;;  %v4968_v5 = vld.sshfl [vmem:[#allocation1 + $0x8] sm:$0xff pattern:$0x73625140] }
  0x2f   : > { %10076 = vst [vmem:[#allocation8_spill] sm:$0xff] %v4966_v4  ;;  %v4970_v6 = vld.sshfl [vmem:[#allocation1 + $0x10] sm:$0xff pattern:$0x73625140]  ;;  %v4974_v7 = vmul.f32 %v4966_v4, %v4966_v4  ;;  %v4982_v10 = vmul.f32 %v4968_v5, %v4968_v5 }
  0x30   : > { %10077 = vst [vmem:[#allocation9_spill] sm:$0xff] %v4968_v5  ;;  %v4976_v8 = vld.sshfl [vmem:[#allocation1 + $0x18] sm:$0xff pattern:$0x73625140]  ;;  %v4986_v11 = vmul.f32 %v4970_v6, %v4970_v6 }
  0x31   : > { %10078 = vst [vmem:[#allocation10_spill] sm:$0xff] %v4970_v6  ;;  %v4978_v9 = vld.sshfl [vmem:[#allocation1 + $0x20] sm:$0xff pattern:$0x73625140]  ;;  %v4994_v14 = vmul.f32 %v4976_v8, %v4976_v8  ;;  %v1749_v16 = vsel %vm1748_vm0, %v4974_v7, 0.0  ;;  %v1750_v18 = vsel %vm1748_vm0, %v4982_v10, 0.0 }
  0x32   : > { %10079 = vst [vmem:[#allocation11_spill] sm:$0xff] %v4974_v7  ;;  %v4988_v12 = vld.sshfl [vmem:[#allocation1 + $0x28] sm:$0xff pattern:$0x73625140]  ;;  %v5002_v17 = vmul.f32 %v4978_v9, %v4978_v9  ;;  %v1752_v19 = vsel %vm1748_vm0, %v4986_v11, 0.0  ;;  %v1751_v20 = vadd.f32 %v1750_v18, %v1749_v16 }
  0x33   : > { %10080 = vst [vmem:[#allocation12_spill] sm:$0xff] %v4976_v8  ;;  %v4990_v13 = vld.sshfl [vmem:[#allocation1 + $0x30] sm:$0xff pattern:$0x73625140]  ;;  %v5010_v21 = vmul.f32 %v4988_v12, %v4988_v12  ;;  %v1754_v23 = vsel %vm1748_vm0, %v4994_v14, 0.0 }
  0x34   : > { %10081 = vst [vmem:[#allocation13_spill] sm:$0xff] %v4978_v9  ;;  %v4996_v15 = vld.sshfl [vmem:[#allocation1 + $0x38] sm:$0xff pattern:$0x73625140]  ;;  %v5014_v22 = vmul.f32 %v4990_v13, %v4990_v13  ;;  %v1753_v24 = vadd.f32 %v1752_v19, %v1751_v20  ;;  %v1756_v25 = vsel %vm1748_vm0, %v5002_v17, 0.0 }
  0x35   : > { %10082 = vst [vmem:[#allocation14_spill] sm:$0xff] %v4982_v10  ;;  %v5026_v30 = vmul.f32 %v4996_v15, %v4996_v15  ;;  %v1758_v31 = vsel %vm1748_vm0, %v5010_v21, 0.0 }
  0x36   : > { %10083 = vst [vmem:[#allocation15_spill] sm:$0xff] %v4986_v11  ;;  %v1755_v27 = vadd.f32 %v1754_v23, %v1753_v24  ;;  %v1760_v32 = vsel %vm1748_vm0, %v5014_v22, 0.0 }
  0x37   : > { %10084 = vst [vmem:[#allocation16_spill] sm:$0xff] %v4988_v12  ;;  %v1762_v44 = vsel %vm1748_vm0, %v5026_v30, 0.0 }
  0x38   : > { %10085 = vst [vmem:[#allocation17_spill] sm:$0xff] %v4990_v13  ;;  %v1757_v35 = vadd.f32 %v1756_v25, %v1755_v27  ;;  %v2770_v27 = vmul.f32 %v5078_v55, %v4966_v4 }
  0x39   : > { %10086 = vst [vmem:[#allocation18_spill] sm:$0xff] %v4994_v14  ;;  %v239_v14 = vld [vmem:[%s4950_s25 + $0x50] sm:$0xff] }
  0x3a   : > { %10087 = vst [vmem:[#allocation19_spill] sm:$0xff] %v4996_v15  ;;  %v1759_v41 = vadd.f32 %v1758_v31, %v1757_v35 }
  0x3b   : > { %828 = vst [vmem:[#allocation1] ss:$4 sm:$0xff] %v231_v2 }
  0x3c   : > { %829 = vst [vmem:[#allocation1 + $0x20] ss:$4 sm:$0xff] %v232_v3  ;;  %v1761_v45 = vadd.f32 %v1760_v32, %v1759_v41  ;;  %v2772_v41 = vmul.f32 %v5084_v57, %v4970_v6 }
  0x3d   : > { %10088 = vst [vmem:[#allocation20_spill] sm:$0xff] %v5002_v17 }
  0x3e   : > { %10089 = vst [vmem:[#allocation21_spill] sm:$0xff] %v5010_v21  ;;  %v1763_v50 = vadd.f32 %v1762_v44, %v1761_v45 }
  0x3f   : > { %10090 = vst [vmem:[#allocation22_spill] sm:$0xff] %v5014_v22 }
  0x40   : > { %10092 = vst [vmem:[#allocation24_spill] sm:$0xff] %v5026_v30 }
  0x41   : > { %10108 = vst [vmem:[#allocation40_spill] sm:$0xff] %v5093_v63 }
  0x42   : > { %v5022_v29 = vld.sshfl [vmem:[#allocation1] sm:$0xff pattern:$0x73625140]  ;;  %v5032_v33 = vld.sshfl [vmem:[#allocation1 + $0x8] sm:$0xff pattern:$0x73625140] }
  0x43   : > { %10091 = vst [vmem:[#allocation23_spill] sm:$0xff] %v5022_v29  ;;  %v5034_v34 = vld.sshfl [vmem:[#allocation1 + $0x10] sm:$0xff pattern:$0x73625140]  ;;  %v5042_v38 = vmul.f32 %v5022_v29, %v5022_v29  ;;  %v5052_v43 = vmul.f32 %v5032_v33, %v5032_v33 }
  0x44   : > { %10093 = vst [vmem:[#allocation25_spill] sm:$0xff] %v5032_v33  ;;  %v5036_v36 = vld.sshfl [vmem:[#allocation1 + $0x18] sm:$0xff pattern:$0x73625140]  ;;  %v5058_v46 = vmul.f32 %v5034_v34, %v5034_v34 }
  0x45   : > { %10094 = vst [vmem:[#allocation26_spill] sm:$0xff] %v5034_v34  ;;  %v5038_v37 = vld.sshfl [vmem:[#allocation1 + $0x20] sm:$0xff pattern:$0x73625140]  ;;  %v1764_v47 = vsel %vm1748_vm0, %v5042_v38, 0.0  ;;  %v5064_v48 = vmul.f32 %v5036_v36, %v5036_v36  ;;  %v1766_v52 = vsel %vm1748_vm0, %v5052_v43, 0.0 }
  0x46   : > { %10095 = vst [vmem:[#allocation27_spill] sm:$0xff] %v5036_v36  ;;  %v5044_v39 = vld.sshfl [vmem:[#allocation1 + $0x28] sm:$0xff pattern:$0x73625140]  ;;  %v5068_v49 = vmul.f32 %v5038_v37, %v5038_v37  ;;  %v1765_v53 = vadd.f32 %v1764_v47, %v1763_v50  ;;  %v1768_v54 = vsel %vm1748_vm0, %v5058_v46, 0.0  ;;  %v2773_v50 = vmul.f32 %v5093_v63, %v4976_v8 }
  0x47   : > { %10096 = vst [vmem:[#allocation28_spill] sm:$0xff] %v5038_v37  ;;  %v5046_v40 = vld.sshfl [vmem:[#allocation1 + $0x30] sm:$0xff pattern:$0x73625140]  ;;  %v1770_v61 = vsel %vm1748_vm0, %v5064_v48, 0.0  ;;  %v5103_v3 = vmul.f32 %v5044_v39, %v5044_v39 }
  0x48   : > { %10097 = vst [vmem:[#allocation29_spill] sm:$0xff] %v5042_v38  ;;  %v5048_v42 = vld.sshfl [vmem:[#allocation1 + $0x38] sm:$0xff pattern:$0x73625140]  ;;  %v1767_v60 = vadd.f32 %v1766_v52, %v1765_v53  ;;  %v1772_v62 = vsel %vm1748_vm0, %v5068_v49, 0.0  ;;  %v5115_v24 = vmul.f32 %v5046_v40, %v5046_v40  ;;  %v2896_v53 = vsel %vm1748_vm0, %v2770_v27, 0.0 }
  0x49   : > { %10098 = vst [vmem:[#allocation30_spill] sm:$0xff] %v5044_v39  ;;  %v5125_v31 = vmul.f32 %v5048_v42, %v5048_v42  ;;  %v1774_v32 = vsel %vm1748_vm0, %v5103_v3, 0.0  ;;  %v238_v27 = vld [vmem:[%s4950_s25 + $0x48] sm:$0xff] }
  0x4a   : > { %10099 = vst [vmem:[#allocation31_spill] sm:$0xff] %v5046_v40  ;;  %v1769_v19 = vadd.f32 %v1768_v54, %v1767_v60  ;;  %v1776_v47 = vsel %vm1748_vm0, %v5115_v24, 0.0 }
  0x4b   : > { %10100 = vst [vmem:[#allocation32_spill] sm:$0xff] %v5048_v42 }
  0x4c   : > { %838 = vst [vmem:[#allocation1] ss:$4 sm:$0xff] %v233_v26  ;;  %v1771_v26 = vadd.f32 %v1770_v61, %v1769_v19  ;;  %v5154_v19 = vperm.slane %v5071_v51, 6 }
  0x4d   : > { %10101 = vst [vmem:[#allocation33_spill] sm:$0xff] %v5052_v43 }
  0x4e   : > { %839 = vst [vmem:[#allocation1 + $0x20] ss:$4 sm:$0xff] %v234_v28  ;;  %v2771_v28 = vmul.f32 %v5081_v56, %v4968_v5  ;;  %v1773_v35 = vadd.f32 %v1772_v62, %v1771_v26  ;;  %v5151_v62 = vperm.slane %v5071_v51, 5  ;;  %v2899_v26 = vsel %vm1748_vm0, %v2772_v41, 0.0 }
  0x4f   : > { %10102 = vst [vmem:[#allocation34_spill] sm:$0xff] %v5058_v46  ;;  %v2776_v38 = vmul.f32 %v5154_v19, %v4990_v13 }
  0x50   : > { %10103 = vst [vmem:[#allocation35_spill] sm:$0xff] %v5064_v48  ;;  %v1775_v52 = vadd.f32 %v1774_v32, %v1773_v35  ;;  %v2897_v54 = vsel %vm1748_vm0, %v2771_v28, 0.0  ;;  %v237_v32 = vld [vmem:[%s4950_s25 + $0x40] sm:$0xff] }
  0x51   : > { %10104 = vst [vmem:[#allocation36_spill] sm:$0xff] %v5068_v49  ;;  %v2898_v60 = vadd.f32 %v2897_v54, %v2896_v53 }
  0x52   : > { %10112 = vst [vmem:[#allocation44_spill] sm:$0xff] %v5103_v3  ;;  %v1777_v61 = vadd.f32 %v1776_v47, %v1775_v52  ;;  %v2901_v52 = vsel %vm1748_vm0, %v2773_v50, 0.0 }
  0x53   : > { %v5095_v0 = vld.sshfl [vmem:[#allocation1] sm:$0xff pattern:$0x73625140]  ;;  %v5097_v1 = vld.sshfl [vmem:[#allocation1 + $0x8] sm:$0xff pattern:$0x73625140] }
  0x54   : > { %10109 = vst [vmem:[#allocation41_spill] sm:$0xff] %v5095_v0  ;;  %v5099_v2 = vld.sshfl [vmem:[#allocation1 + $0x10] sm:$0xff pattern:$0x73625140]  ;;  %v5133_v44 = vmul.f32 %v5095_v0, %v5095_v0  ;;  %v5137_v45 = vmul.f32 %v5097_v1, %v5097_v1 }
  0x55   : > { %10110 = vst [vmem:[#allocation42_spill] sm:$0xff] %v5097_v1  ;;  %v5105_v16 = vld.sshfl [vmem:[#allocation1 + $0x18] sm:$0xff pattern:$0x73625140]  ;;  %v5161_v28 = vmul.f32 %v5099_v2, %v5099_v2 }
  0x56   : > { %10111 = vst [vmem:[#allocation43_spill] sm:$0xff] %v5099_v2  ;;  %v5107_v18 = vld.sshfl [vmem:[#allocation1 + $0x20] sm:$0xff pattern:$0x73625140]  ;;  %v1780_v35 = vsel %vm1748_vm0, %v5133_v44, 0.0  ;;  %v1782_v47 = vsel %vm1748_vm0, %v5137_v45, 0.0  ;;  %v5180_v49 = vmul.f32 %v5105_v16, %v5105_v16 }
  0x57   : > { %10113 = vst [vmem:[#allocation45_spill] sm:$0xff] %v5105_v16  ;;  %v5109_v20 = vld.sshfl [vmem:[#allocation1 + $0x28] sm:$0xff pattern:$0x73625140] }
  0x58   : > { %10114 = vst [vmem:[#allocation46_spill] sm:$0xff] %v5107_v18  ;;  %v5111_v23 = vld.sshfl [vmem:[#allocation1 + $0x30] sm:$0xff pattern:$0x73625140] }
  0x59   : > { %10115 = vst [vmem:[#allocation47_spill] sm:$0xff] %v5109_v20  ;;  %v5117_v25 = vld.sshfl [vmem:[#allocation1 + $0x38] sm:$0xff pattern:$0x73625140] }
  0x5a   : > { %10116 = vst [vmem:[#allocation48_spill] sm:$0xff] %v5111_v23 }
  0x5b   : > { %10117 = vst [vmem:[#allocation49_spill] sm:$0xff] %v5115_v24 }
  0x5c   : > { %10118 = vst [vmem:[#allocation50_spill] sm:$0xff] %v5117_v25 }
  0x5d   : > { %848 = vst [vmem:[#allocation1] ss:$4 sm:$0xff] %v235_v58  ;;  %v1778_v58 = vsel %vm1748_vm0, %v5125_v31, 0.0 }
  0x5e   : > { %849 = vst [vmem:[#allocation1 + $0x20] ss:$4 sm:$0xff] %v236_v59  ;;  %v5148_v59 = vperm.slane %v5071_v51, 4  ;;  %v1779_v41 = vadd.f32 %v1778_v58, %v1777_v61  ;;  %v5190_v58 = vmul.f32 %v5107_v18, %v5107_v18  ;;  %v1784_v61 = vsel %vm1748_vm0, %v5161_v28, 0.0 }
  0x5f   : > { %10119 = vst [vmem:[#allocation51_spill] sm:$0xff] %v5125_v31 }
  0x60   : > { %10120 = vst [vmem:[#allocation52_spill] sm:$0xff] %v5133_v44  ;;  %v2900_v44 = vadd.f32 %v2899_v26, %v2898_v60  ;;  %v1781_v50 = vadd.f32 %v1780_v35, %v1779_v41  ;;  %v2774_v43 = vmul.f32 %v5148_v59, %v4978_v9  ;;  %v2775_v26 = vmul.f32 %v5151_v62, %v4988_v12 }
  0x61   : > { %10121 = vst [vmem:[#allocation53_spill] sm:$0xff] %v5137_v45  ;;  %v5200_v35 = vmul.f32 %v5109_v20, %v5109_v20 }
  0x62   : > { %10122 = vst [vmem:[#allocation54_spill] sm:$0xff] %v5148_v59  ;;  %v1783_v60 = vadd.f32 %v1782_v47, %v1781_v50  ;;  %v2902_v41 = vadd.f32 %v2901_v52, %v2900_v44  ;;  %v5213_v50 = vld [vmem:[%s4956_s29 + $0x8] sm:$0xff]  ;;  %v5220_v44 = vperm.slane %v5071_v51, 7  ;;  %v2903_v52 = vsel %vm1748_vm0, %v2774_v43, 0.0 }
  0x63   : > { %10123 = vst [vmem:[#allocation55_spill] sm:$0xff] %v5151_v62  ;;  %v2905_v22 = vsel %vm1748_vm0, %v2775_v26, 0.0  ;;  %v1790_v21 = vsel %vm1748_vm0, %v5200_v35, 0.0  ;;  %v2907_v26 = vsel %vm1748_vm0, %v2776_v38, 0.0 }
  0x64   : > { %10124 = vst [vmem:[#allocation56_spill] sm:$0xff] %v5154_v19  ;;  %v5168_v53 = vld.sshfl [vmem:[#allocation1] sm:$0xff pattern:$0x73625140]  ;;  %v1785_v47 = vadd.f32 %v1784_v61, %v1783_v60  ;;  %v5227_v61 = vperm.slane %v5213_v50, 0  ;;  %v5230_v60 = vperm.slane %v5213_v50, 1  ;;  %v2904_v17 = vadd.f32 %v2903_v52, %v2902_v41 }
  0x65   : > { %10125 = vst [vmem:[#allocation57_spill] sm:$0xff] %v5161_v28  ;;  %v5170_v54 = vld.sshfl [vmem:[#allocation1 + $0x8] sm:$0xff pattern:$0x73625140]  ;;  %v5206_v28 = vmul.f32 %v5111_v23, %v5111_v23  ;;  %v5247_v41 = vmul.f32 %v5168_v53, %v5168_v53 }
  0x66   : > { %10126 = vst [vmem:[#allocation58_spill] sm:$0xff] %v5168_v53  ;;  %v5172_v31 = vld.sshfl [vmem:[#allocation1 + $0x10] sm:$0xff pattern:$0x73625140]  ;;  %v5261_v7 = vmul.f32 %v5170_v54, %v5170_v54 }
  0x67   : > { %10127 = vst [vmem:[#allocation59_spill] sm:$0xff] %v5170_v54  ;;  %v5174_v24 = vld.sshfl [vmem:[#allocation1 + $0x18] sm:$0xff pattern:$0x73625140]  ;;  %v1792_v51 = vsel %vm1748_vm0, %v5206_v28, 0.0 }
  0x68   : > { %10128 = vst [vmem:[#allocation60_spill] sm:$0xff] %v5172_v31  ;;  %v5176_v3 = vld.sshfl [vmem:[#allocation1 + $0x20] sm:$0xff pattern:$0x73625140] }
  0x69   : > { %10129 = vst [vmem:[#allocation61_spill] sm:$0xff] %v5174_v24  ;;  %v5182_v48 = vld.sshfl [vmem:[#allocation1 + $0x28] sm:$0xff pattern:$0x73625140] }
  0x6a   : > { %10130 = vst [vmem:[#allocation62_spill] sm:$0xff] %v5176_v3  ;;  %v5184_v45 = vld.sshfl [vmem:[#allocation1 + $0x30] sm:$0xff pattern:$0x73625140] }
  0x6b   : > { %10131 = vst [vmem:[#allocation63_spill] sm:$0xff] %v5180_v49  ;;  %v5186_v46 = vld.sshfl [vmem:[#allocation1 + $0x38] sm:$0xff pattern:$0x73625140] }
  0x6c   : > { %10132 = vst [vmem:[#allocation64_spill] sm:$0xff] %v5182_v48 }
  0x6d   : > { %10133 = vst [vmem:[#allocation65_spill] sm:$0xff] %v5184_v45 }
  0x6e   : > { %10134 = vst [vmem:[#allocation66_spill] sm:$0xff] %v5186_v46 }
  0x6f   : > { %858 = vst [vmem:[#allocation1] ss:$4 sm:$0xff] %v237_v32  ;;  %v1786_v32 = vsel %vm1748_vm0, %v5180_v49, 0.0  ;;  %v1788_v49 = vsel %vm1748_vm0, %v5190_v58, 0.0 }
  0x70   : > { %10135 = vst [vmem:[#allocation67_spill] sm:$0xff] %v5190_v58  ;;  %v1787_v30 = vadd.f32 %v1786_v32, %v1785_v47  ;;  %v240_v58 = vld [vmem:[%s4950_s25 + $0x58] sm:$0xff] }
  0x71   : > { %859 = vst [vmem:[#allocation1 + $0x20] ss:$4 sm:$0xff] %v238_v27  ;;  %v5210_v27 = vmul.f32 %v5117_v25, %v5117_v25 }
  0x72   : > { %10136 = vst [vmem:[#allocation68_spill] sm:$0xff] %v5200_v35  ;;  %v1789_v11 = vadd.f32 %v1788_v49, %v1787_v30  ;;  %v2777_v30 = vmul.f32 %v5220_v44, %v4996_v15  ;;  %v2906_v49 = vadd.f32 %v2905_v22, %v2904_v17  ;;  %v2778_v17 = vmul.f32 %v5227_v61, %v5022_v29 }
  0x73   : > { %10137 = vst [vmem:[#allocation69_spill] sm:$0xff] %v5206_v28  ;;  %v1794_v43 = vsel %vm1748_vm0, %v5210_v27, 0.0 }
  0x74   : > { %10138 = vst [vmem:[#allocation70_spill] sm:$0xff] %v5210_v27  ;;  %v1791_v27 = vadd.f32 %v1790_v21, %v1789_v11  ;;  %v2908_v22 = vadd.f32 %v2907_v26, %v2906_v49  ;;  %v5269_v11 = vmul.f32 %v5172_v31, %v5172_v31  ;;  %v1796_v21 = vsel %vm1748_vm0, %v5247_v41, 0.0 }
  0x75   : > { %10139 = vst [vmem:[#allocation71_spill] sm:$0xff] %v5220_v44  ;;  %v2909_v44 = vsel %vm1748_vm0, %v2777_v30, 0.0  ;;  %v2911_v30 = vsel %vm1748_vm0, %v2778_v17, 0.0  ;;  %v242_v17 = vld [vmem:[%s4950_s25 + $0x68] sm:$0xff] }
  0x76   : > { %10140 = vst [vmem:[#allocation72_spill] sm:$0xff] %v5227_v61  ;;  %v5239_v32 = vld.sshfl [vmem:[#allocation1] sm:$0xff pattern:$0x73625140]  ;;  %v1793_v62 = vadd.f32 %v1792_v51, %v1791_v27  ;;  %v5280_v27 = vmul.f32 %v5176_v3, %v5176_v3  ;;  %v2779_v51 = vmul.f32 %v5230_v60, %v5032_v33  ;;  %v2910_v49 = vadd.f32 %v2909_v44, %v2908_v22 }
  0x77   : > { %10141 = vst [vmem:[#allocation73_spill] sm:$0xff] %v5230_v60  ;;  %v5241_v47 = vld.sshfl [vmem:[#allocation1 + $0x8] sm:$0xff pattern:$0x73625140]  ;;  %v5297_v61 = vmul.f32 %v5182_v48, %v5182_v48  ;;  %v5300_v60 = vperm.slane %v5213_v50, 4 }
  0x78   : > { %10142 = vst [vmem:[#allocation74_spill] sm:$0xff] %v5239_v32  ;;  %v5243_v35 = vld.sshfl [vmem:[#allocation1 + $0x10] sm:$0xff pattern:$0x73625140]  ;;  %v1795_v59 = vadd.f32 %v1794_v43, %v1793_v62  ;;  %v1800_v62 = vsel %vm1748_vm0, %v5269_v11, 0.0  ;;  %v5290_v43 = vperm.slane %v5213_v50, 2 }
  0x79   : > { %10143 = vst [vmem:[#allocation75_spill] sm:$0xff] %v5241_v47  ;;  %v5251_v52 = vld.sshfl [vmem:[#allocation1 + $0x18] sm:$0xff pattern:$0x73625140]  ;;  %v241_v44 = vld [vmem:[%s4950_s25 + $0x60] sm:$0xff]  ;;  %v2913_v63 = vsel %vm1748_vm0, %v2779_v51, 0.0 }
  0x7a   : > { %10144 = vst [vmem:[#allocation76_spill] sm:$0xff] %v5243_v35  ;;  %v5253_v28 = vld.sshfl [vmem:[#allocation1 + $0x20] sm:$0xff pattern:$0x73625140]  ;;  %v1797_v26 = vadd.f32 %v1796_v21, %v1795_v59  ;;  %v5303_v59 = vperm.slane %v5213_v50, 5  ;;  %v1804_v21 = vsel %vm1748_vm0, %v5280_v27, 0.0 }
  0x7b   : > { %10145 = vst [vmem:[#allocation77_spill] sm:$0xff] %v5247_v41  ;;  %v5255_v38 = vld.sshfl [vmem:[#allocation1 + $0x28] sm:$0xff pattern:$0x73625140]  ;;  %v5293_v41 = vperm.slane %v5213_v50, 3  ;;  %v5408_v12 = vmul.f32 %v5253_v28, %v5253_v28 }
  0x7c   : > { %10146 = vst [vmem:[#allocation78_spill] sm:$0xff] %v5251_v52  ;;  %v5257_v10 = vld.sshfl [vmem:[#allocation1 + $0x30] sm:$0xff pattern:$0x73625140] }
  0x7d   : > { %10147 = vst [vmem:[#allocation79_spill] sm:$0xff] %v5253_v28  ;;  %v5263_v19 = vld.sshfl [vmem:[#allocation1 + $0x38] sm:$0xff pattern:$0x73625140] }
  0x7e   : > { %10148 = vst [vmem:[#allocation80_spill] sm:$0xff] %v5255_v38 }
  0x7f   : > { %10149 = vst [vmem:[#allocation81_spill] sm:$0xff] %v5257_v10 }
  0x80   : > { %10150 = vst [vmem:[#allocation82_spill] sm:$0xff] %v5261_v7 }
  0x81   : > { %10151 = vst [vmem:[#allocation83_spill] sm:$0xff] %v5263_v19 }
  0x82   : > { %868 = vst [vmem:[#allocation1] ss:$4 sm:$0xff] %v239_v14  ;;  %v5276_v14 = vmul.f32 %v5174_v24, %v5174_v24 }
  0x83   : > { %869 = vst [vmem:[#allocation1 + $0x20] ss:$4 sm:$0xff] %v240_v58  ;;  %v1798_v58 = vsel %vm1748_vm0, %v5261_v7, 0.0 }
  0x84   : > { %10152 = vst [vmem:[#allocation84_spill] sm:$0xff] %v5269_v11  ;;  %v1799_v7 = vadd.f32 %v1798_v58, %v1797_v26  ;;  %v1802_v22 = vsel %vm1748_vm0, %v5276_v14, 0.0  ;;  %v2912_v11 = vadd.f32 %v2911_v30, %v2910_v49  ;;  %v2780_v49 = vmul.f32 %v5290_v43, %v5034_v34 }
  0x85   : > { %10153 = vst [vmem:[#allocation85_spill] sm:$0xff] %v5276_v14  ;;  %v5324_v14 = vmul.f32 %v5184_v45, %v5184_v45 }
  0x86   : > { %10154 = vst [vmem:[#allocation86_spill] sm:$0xff] %v5280_v27  ;;  %v1801_v56 = vadd.f32 %v1800_v62, %v1799_v7  ;;  %v5336_v7 = vmul.f32 %v5186_v46, %v5186_v46  ;;  %v1806_v62 = vsel %vm1748_vm0, %v5297_v61, 0.0  ;;  %v2914_v15 = vadd.f32 %v2913_v63, %v2912_v11 }
  0x87   : > { %10155 = vst [vmem:[#allocation87_spill] sm:$0xff] %v5290_v43  ;;  %v2781_v43 = vmul.f32 %v5293_v41, %v5036_v36  ;;  %v2915_v34 = vsel %vm1748_vm0, %v2780_v49, 0.0  ;;  %v5353_v63 = vmul.f32 %v5241_v47, %v5241_v47  ;;  %v5357_v11 = vmul.f32 %v5243_v35, %v5243_v35 }
  0x88   : > { %10156 = vst [vmem:[#allocation88_spill] sm:$0xff] %v5293_v41  ;;  %v1803_v27 = vadd.f32 %v1802_v22, %v1801_v56  ;;  %v5344_v56 = vmul.f32 %v5239_v32, %v5239_v32  ;;  %v2782_v22 = vmul.f32 %v5300_v60, %v5038_v37  ;;  %v2916_v49 = vadd.f32 %v2915_v34, %v2914_v15  ;;  %v244_v15 = vld [vmem:[%s4950_s25 + $0x78] sm:$0xff] }
  0x89   : > { %10157 = vst [vmem:[#allocation89_spill] sm:$0xff] %v5297_v61  ;;  %v5312_v57 = vld.sshfl [vmem:[#allocation1] sm:$0xff pattern:$0x73625140]  ;;  %v5370_v41 = vperm.slane %v5213_v50, 7  ;;  %v2917_v37 = vsel %vm1748_vm0, %v2781_v43, 0.0 }
  0x8a   : > { %10158 = vst [vmem:[#allocation90_spill] sm:$0xff] %v5300_v60  ;;  %v5314_v58 = vld.sshfl [vmem:[#allocation1 + $0x8] sm:$0xff pattern:$0x73625140]  ;;  %v1805_v13 = vadd.f32 %v1804_v21, %v1803_v27  ;;  %v2783_v21 = vmul.f32 %v5303_v59, %v5044_v39  ;;  %v5367_v60 = vperm.slane %v5213_v50, 6  ;;  %v2919_v39 = vsel %vm1748_vm0, %v2782_v22, 0.0 }
  0x8b   : > { %10159 = vst [vmem:[#allocation91_spill] sm:$0xff] %v5303_v59  ;;  %v5316_v26 = vld.sshfl [vmem:[#allocation1 + $0x10] sm:$0xff pattern:$0x73625140]  ;;  %v2918_v59 = vadd.f32 %v2917_v37, %v2916_v49  ;;  %v1816_v50 = vsel %vm1748_vm0, %v5357_v11, 0.0  ;;  %v5394_v37 = vmul.f32 %v5251_v52, %v5251_v52  ;;  %v5471_v4 = vmul.f32 %v5314_v58, %v5314_v58 }
  0x8c   : > { %10160 = vst [vmem:[#allocation92_spill] sm:$0xff] %v5312_v57  ;;  %v5318_v55 = vld.sshfl [vmem:[#allocation1 + $0x18] sm:$0xff pattern:$0x73625140]  ;;  %v1807_v27 = vadd.f32 %v1806_v62, %v1805_v13  ;;  %v1812_v13 = vsel %vm1748_vm0, %v5344_v56, 0.0  ;;  %v2921_v43 = vsel %vm1748_vm0, %v2783_v21, 0.0 }
  0x8d   : > { %10161 = vst [vmem:[#allocation93_spill] sm:$0xff] %v5314_v58  ;;  %v5320_v33 = vld.sshfl [vmem:[#allocation1 + $0x20] sm:$0xff pattern:$0x73625140]  ;;  %v2920_v22 = vadd.f32 %v2919_v39, %v2918_v59  ;;  %v5414_v59 = vmul.f32 %v5255_v38, %v5255_v38 }
  0x8e   : > { %10162 = vst [vmem:[#allocation94_spill] sm:$0xff] %v5316_v26  ;;  %v5328_v30 = vld.sshfl [vmem:[#allocation1 + $0x28] sm:$0xff pattern:$0x73625140] }
  0x8f   : > { %10163 = vst [vmem:[#allocation95_spill] sm:$0xff] %v5318_v55  ;;  %v5330_v51 = vld.sshfl [vmem:[#allocation1 + $0x30] sm:$0xff pattern:$0x73625140] }
  0x90   : > { %10164 = vst [vmem:[#allocation96_spill] sm:$0xff] %v5320_v33  ;;  %v5332_v29 = vld.sshfl [vmem:[#allocation1 + $0x38] sm:$0xff pattern:$0x73625140] }
  0x91   : > { %10165 = vst [vmem:[#allocation97_spill] sm:$0xff] %v5324_v14 }
  0x92   : > { %10166 = vst [vmem:[#allocation98_spill] sm:$0xff] %v5328_v30 }
  0x93   : > { %10167 = vst [vmem:[#allocation99_spill] sm:$0xff] %v5330_v51 }
  0x94   : > { %10168 = vst [vmem:[#allocation100_spill] sm:$0xff] %v5332_v29 }
  0x95   : > { %878 = vst [vmem:[#allocation1] ss:$4 sm:$0xff] %v241_v44  ;;  %v1808_v44 = vsel %vm1748_vm0, %v5324_v14, 0.0  ;;  %v1810_v14 = vsel %vm1748_vm0, %v5336_v7, 0.0 }
  0x96   : > { %10169 = vst [vmem:[#allocation101_spill] sm:$0xff] %v5336_v7  ;;  %v1809_v61 = vadd.f32 %v1808_v44, %v1807_v27  ;;  %v243_v7 = vld [vmem:[%s4950_s25 + $0x70] sm:$0xff]  ;;  %v1814_v44 = vsel %vm1748_vm0, %v5353_v63, 0.0 }
  0x97   : > { %879 = vst [vmem:[#allocation1 + $0x20] ss:$4 sm:$0xff] %v242_v17  ;;  %v5360_v17 = vld [vmem:[%s4956_s29 + $0x10] sm:$0xff] }
  0x98   : > { %10170 = vst [vmem:[#allocation102_spill] sm:$0xff] %v5344_v56  ;;  %v5376_v62 = vperm.slane %v5360_v17, 0  ;;  %v1811_v34 = vadd.f32 %v1810_v14, %v1809_v61 }
  0x99   : > { %10171 = vst [vmem:[#allocation103_spill] sm:$0xff] %v5353_v63 }
  0x9a   : > { %10172 = vst [vmem:[#allocation104_spill] sm:$0xff] %v5357_v11  ;;  %v1813_v49 = vadd.f32 %v1812_v13, %v1811_v34  ;;  %v2784_v11 = vmul.f32 %v5367_v60, %v5046_v40  ;;  %v1818_v13 = vsel %vm1748_vm0, %v5394_v37, 0.0  ;;  %v2785_v34 = vmul.f32 %v5370_v41, %v5048_v42 }
  0x9b   : > { %10173 = vst [vmem:[#allocation105_spill] sm:$0xff] %v5367_v60  ;;  %v2922_v60 = vadd.f32 %v2921_v43, %v2920_v22  ;;  %v5422_v40 = vmul.f32 %v5257_v10, %v5257_v10  ;;  %v5434_v22 = vperm.slane %v5360_v17, 1  ;;  %v5445_v42 = vperm.slane %v5360_v17, 3 }
  0x9c   : > { %10174 = vst [vmem:[#allocation106_spill] sm:$0xff] %v5370_v41  ;;  %v5386_v27 = vld.sshfl [vmem:[#allocation1] sm:$0xff pattern:$0x73625140]  ;;  %v1815_v39 = vadd.f32 %v1814_v44, %v1813_v49  ;;  %v1820_v44 = vsel %vm1748_vm0, %v5408_v12, 0.0  ;;  %v2786_v49 = vmul.f32 %v5376_v62, %v5095_v0 }
  0x9d   : > { %10175 = vst [vmem:[#allocation107_spill] sm:$0xff] %v5376_v62  ;;  %v5388_v56 = vld.sshfl [vmem:[#allocation1 + $0x8] sm:$0xff pattern:$0x73625140] }
  0x9e   : > { %10176 = vst [vmem:[#allocation108_spill] sm:$0xff] %v5386_v27  ;;  %v5390_v36 = vld.sshfl [vmem:[#allocation1 + $0x10] sm:$0xff pattern:$0x73625140]  ;;  %v1817_v8 = vadd.f32 %v1816_v50, %v1815_v39  ;;  %v1822_v50 = vsel %vm1748_vm0, %v5414_v59, 0.0  ;;  %v5439_v39 = vperm.slane %v5360_v17, 2 }
  0x9f   : > { %10177 = vst [vmem:[#allocation109_spill] sm:$0xff] %v5388_v56  ;;  %v5396_v61 = vld.sshfl [vmem:[#allocation1 + $0x18] sm:$0xff pattern:$0x73625140]  ;;  %v246_v62 = vld [vmem:[%s4950_s25 + $0x88] sm:$0xff] }
  0xa0   : > { %10178 = vst [vmem:[#allocation110_spill] sm:$0xff] %v5390_v36  ;;  %v5398_v14 = vld.sshfl [vmem:[#allocation1 + $0x20] sm:$0xff pattern:$0x73625140]  ;;  %v1819_v43 = vadd.f32 %v1818_v13, %v1817_v8  ;;  %v5448_v8 = vperm.slane %v5360_v17, 4 }
  0xa1   : > { %10179 = vst [vmem:[#allocation111_spill] sm:$0xff] %v5394_v37  ;;  %v5402_v21 = vld.sshfl [vmem:[#allocation1 + $0x28] sm:$0xff pattern:$0x73625140]  ;;  %v2925_v37 = vsel %vm1748_vm0, %v2785_v34, 0.0 }
  0xa2   : > { %10180 = vst [vmem:[#allocation112_spill] sm:$0xff] %v5396_v61  ;;  %v5404_v63 = vld.sshfl [vmem:[#allocation1 + $0x30] sm:$0xff pattern:$0x73625140]  ;;  %v1821_v41 = vadd.f32 %v1820_v44, %v1819_v43  ;;  %v245_v13 = vld [vmem:[%s4950_s25 + $0x80] sm:$0xff] }
  0xa3   : > { %10181 = vst [vmem:[#allocation113_spill] sm:$0xff] %v5398_v14  ;;  %v5410_v9 = vld.sshfl [vmem:[#allocation1 + $0x38] sm:$0xff pattern:$0x73625140] }
  0xa4   : > { %10182 = vst [vmem:[#allocation114_spill] sm:$0xff] %v5402_v21  ;;  %v1823_v0 = vadd.f32 %v1822_v50, %v1821_v41  ;;  %v5485_v50 = vmul.f32 %v5316_v26, %v5316_v26 }
  0xa5   : > { %10183 = vst [vmem:[#allocation115_spill] sm:$0xff] %v5404_v63 }
  0xa6   : > { %10184 = vst [vmem:[#allocation116_spill] sm:$0xff] %v5408_v12  ;;  %v1824_v12 = vsel %vm1748_vm0, %v5422_v40, 0.0 }
  0xa7   : > { %10185 = vst [vmem:[#allocation117_spill] sm:$0xff] %v5410_v9 }
  0xa8   : > { %888 = vst [vmem:[#allocation1] ss:$4 sm:$0xff] %v243_v7  ;;  %v2923_v7 = vsel %vm1748_vm0, %v2784_v11, 0.0 }
  0xa9   : > { %889 = vst [vmem:[#allocation1 + $0x20] ss:$4 sm:$0xff] %v244_v15  ;;  %v5427_v15 = vmul.f32 %v5263_v19, %v5263_v19  ;;  %v2924_v11 = vadd.f32 %v2923_v7, %v2922_v60  ;;  %v2927_v7 = vsel %vm1748_vm0, %v2786_v49, 0.0 }
  0xaa   : > { %10186 = vst [vmem:[#allocation118_spill] sm:$0xff] %v5414_v59  ;;  %v5454_v59 = vmul.f32 %v5312_v57, %v5312_v57  ;;  %v2788_v57 = vmul.f32 %v5439_v39, %v5099_v2  ;;  %v5500_v2 = vperm.slane %v5360_v17, 5 }
  0xab   : > { %10187 = vst [vmem:[#allocation119_spill] sm:$0xff] %v5422_v40  ;;  %v1826_v60 = vsel %vm1748_vm0, %v5427_v15, 0.0  ;;  %v2926_v34 = vadd.f32 %v2925_v37, %v2924_v11  ;;  %v2787_v37 = vmul.f32 %v5434_v22, %v5097_v1 }
  0xac   : > { %10188 = vst [vmem:[#allocation120_spill] sm:$0xff] %v5427_v15  ;;  %v1825_v15 = vadd.f32 %v1824_v12, %v1823_v0  ;;  %v1828_v58 = vsel %vm1748_vm0, %v5454_v59, 0.0  ;;  %v2789_v12 = vmul.f32 %v5445_v42, %v5105_v16  ;;  %v2790_v0 = vmul.f32 %v5448_v8, %v5107_v18 }
  0xad   : > { %10189 = vst [vmem:[#allocation121_spill] sm:$0xff] %v5434_v22  ;;  %v2928_v22 = vadd.f32 %v2927_v7, %v2926_v34  ;;  %v2929_v34 = vsel %vm1748_vm0, %v2787_v37, 0.0  ;;  %v5512_v7 = vld [vmem:[%s4956_s29 + $0x18] sm:$0xff]  ;;  %v5521_v18 = vperm.slane %v5360_v17, 7 }
  0xae   : > { %10190 = vst [vmem:[#allocation122_spill] sm:$0xff] %v5439_v39  ;;  %v1827_v1 = vadd.f32 %v1826_v60, %v1825_v15  ;;  %v5495_v39 = vmul.f32 %v5318_v55, %v5318_v55  ;;  %v5509_v15 = vmul.f32 %v5328_v30, %v5328_v30  ;;  %v2933_v16 = vsel %vm1748_vm0, %v2789_v12, 0.0 }
  0xaf   : > { %10191 = vst [vmem:[#allocation123_spill] sm:$0xff] %v5445_v42  ;;  %v5459_v44 = vld.sshfl [vmem:[#allocation1] sm:$0xff pattern:$0x73625140]  ;;  %v5518_v42 = vperm.slane %v5360_v17, 6  ;;  %v2935_v12 = vsel %vm1748_vm0, %v2790_v0, 0.0  ;;  %v5558_v0 = vmul.f32 %v5332_v29, %v5332_v29 }
  0xb0   : > { %10192 = vst [vmem:[#allocation124_spill] sm:$0xff] %v5448_v8  ;;  %v5461_v43 = vld.sshfl [vmem:[#allocation1 + $0x8] sm:$0xff pattern:$0x73625140]  ;;  %v1829_v60 = vadd.f32 %v1828_v58, %v1827_v1  ;;  %v2930_v8 = vadd.f32 %v2929_v34, %v2928_v22  ;;  %v1834_v1 = vsel %vm1748_vm0, %v5495_v39, 0.0  ;;  %v5527_v58 = vperm.slane %v5512_v7, 0 }
  0xb1   : > { %10193 = vst [vmem:[#allocation125_spill] sm:$0xff] %v5454_v59  ;;  %v5463_v40 = vld.sshfl [vmem:[#allocation1 + $0x10] sm:$0xff pattern:$0x73625140]  ;;  %v1832_v59 = vsel %vm1748_vm0, %v5485_v50, 0.0  ;;  %v1838_v17 = vsel %vm1748_vm0, %v5509_v15, 0.0 }
  0xb2   : > { %10194 = vst [vmem:[#allocation126_spill] sm:$0xff] %v5459_v44  ;;  %v5465_v6 = vld.sshfl [vmem:[#allocation1 + $0x18] sm:$0xff pattern:$0x73625140] }
  0xb3   : > { %10195 = vst [vmem:[#allocation127_spill] sm:$0xff] %v5461_v43  ;;  %v5467_v5 = vld.sshfl [vmem:[#allocation1 + $0x20] sm:$0xff pattern:$0x73625140]  ;;  %v247_v22 = vld [vmem:[%s4950_s25 + $0x90] sm:$0xff] }
  0xb4   : > { %10196 = vst [vmem:[#allocation128_spill] sm:$0xff] %v5463_v40  ;;  %v5475_v11 = vld.sshfl [vmem:[#allocation1 + $0x28] sm:$0xff pattern:$0x73625140] }
  0xb5   : > { %10197 = vst [vmem:[#allocation129_spill] sm:$0xff] %v5465_v6  ;;  %v5477_v49 = vld.sshfl [vmem:[#allocation1 + $0x30] sm:$0xff pattern:$0x73625140] }
  0xb6   : > { %10198 = vst [vmem:[#allocation130_spill] sm:$0xff] %v5467_v5  ;;  %v5481_v41 = vld.sshfl [vmem:[#allocation1 + $0x38] sm:$0xff pattern:$0x73625140] }
  0xb7   : > { %10199 = vst [vmem:[#allocation131_spill] sm:$0xff] %v5471_v4 }
  0xb8   : > { %10200 = vst [vmem:[#allocation132_spill] sm:$0xff] %v5475_v11 }
  0xb9   : > { %10201 = vst [vmem:[#allocation133_spill] sm:$0xff] %v5477_v49 }
  0xba   : > { %10202 = vst [vmem:[#allocation134_spill] sm:$0xff] %v5481_v41 }
  0xbb   : > { %898 = vst [vmem:[#allocation1] ss:$4 sm:$0xff] %v245_v13  ;;  %v1830_v13 = vsel %vm1748_vm0, %v5471_v4, 0.0  ;;  %v2931_v4 = vsel %vm1748_vm0, %v2788_v57, 0.0  ;;  %v2791_v57 = vmul.f32 %v5500_v2, %v5109_v20 }
  0xbc   : > { %10203 = vst [vmem:[#allocation135_spill] sm:$0xff] %v5485_v50  ;;  %v1831_v37 = vadd.f32 %v1830_v13, %v1829_v60  ;;  %v2932_v50 = vadd.f32 %v2931_v4, %v2930_v8  ;;  %v248_v13 = vld [vmem:[%s4950_s25 + $0x98] sm:$0xff]  ;;  %v5546_v4 = vmul.f32 %v5330_v51, %v5330_v51 }
  0xbd   : > { %899 = vst [vmem:[#allocation1 + $0x20] ss:$4 sm:$0xff] %v246_v62  ;;  %v5505_v62 = vmul.f32 %v5320_v33, %v5320_v33 }
  0xbe   : > { %10204 = vst [vmem:[#allocation136_spill] sm:$0xff] %v5495_v39  ;;  %v1833_v34 = vadd.f32 %v1832_v59, %v1831_v37  ;;  %v2934_v8 = vadd.f32 %v2933_v16, %v2932_v50  ;;  %v2937_v16 = vsel %vm1748_vm0, %v2791_v57, 0.0  ;;  %v5565_v50 = vmul.f32 %v5386_v27, %v5386_v27 }
  0xbf   : > { %10205 = vst [vmem:[#allocation137_spill] sm:$0xff] %v5500_v2  ;;  %v1836_v60 = vsel %vm1748_vm0, %v5505_v62, 0.0  ;;  %v5577_v57 = vmul.f32 %v5388_v56, %v5388_v56 }
  0xc0   : > { %10206 = vst [vmem:[#allocation138_spill] sm:$0xff] %v5505_v62  ;;  %v1835_v62 = vadd.f32 %v1834_v1, %v1833_v34  ;;  %v2936_v20 = vadd.f32 %v2935_v12, %v2934_v8  ;;  %v1840_v1 = vsel %vm1748_vm0, %v5546_v4, 0.0  ;;  %v2792_v34 = vmul.f32 %v5518_v42, %v5111_v23 }
  0xc1   : > { %10207 = vst [vmem:[#allocation139_spill] sm:$0xff] %v5509_v15  ;;  %v2793_v12 = vmul.f32 %v5521_v18, %v5117_v25  ;;  %v5588_v8 = vperm.slane %v5512_v7, 1 }
  0xc2   : > { %10208 = vst [vmem:[#allocation140_spill] sm:$0xff] %v5518_v42  ;;  %v5538_v30 = vld.sshfl [vmem:[#allocation1] sm:$0xff pattern:$0x73625140]  ;;  %v1837_v51 = vadd.f32 %v1836_v60, %v1835_v62  ;;  %v2794_v62 = vmul.f32 %v5527_v58, %v5168_v53 }
  0xc3   : > { %10209 = vst [vmem:[#allocation141_spill] sm:$0xff] %v5521_v18  ;;  %v5540_v39 = vld.sshfl [vmem:[#allocation1 + $0x8] sm:$0xff pattern:$0x73625140]  ;;  %v5596_v18 = vmul.f32 %v5396_v61, %v5396_v61 }
  0xc4   : > { %10210 = vst [vmem:[#allocation142_spill] sm:$0xff] %v5527_v58  ;;  %v5542_v33 = vld.sshfl [vmem:[#allocation1 + $0x10] sm:$0xff pattern:$0x73625140]  ;;  %v1839_v29 = vadd.f32 %v1838_v17, %v1837_v51  ;;  %v2938_v51 = vadd.f32 %v2937_v16, %v2936_v20  ;;  %v1844_v17 = vsel %vm1748_vm0, %v5565_v50, 0.0  ;;  %v2939_v58 = vsel %vm1748_vm0, %v2792_v34, 0.0 }
  0xc5   : > { %10211 = vst [vmem:[#allocation143_spill] sm:$0xff] %v5538_v30  ;;  %v5548_v59 = vld.sshfl [vmem:[#allocation1 + $0x18] sm:$0xff pattern:$0x73625140]  ;;  %v249_v20 = vld [vmem:[%s4950_s25 + $0xa0] sm:$0xff]  ;;  %v250_v16 = vld [vmem:[%s4950_s25 + $0xa8] sm:$0xff] }
  0xc6   : > { %10212 = vst [vmem:[#allocation144_spill] sm:$0xff] %v5540_v39  ;;  %v5550_v37 = vld.sshfl [vmem:[#allocation1 + $0x20] sm:$0xff pattern:$0x73625140]  ;;  %v1841_v60 = vadd.f32 %v1840_v1, %v1839_v29  ;;  %v2941_v29 = vsel %vm1748_vm0, %v2793_v12, 0.0  ;;  %v1846_v1 = vsel %vm1748_vm0, %v5577_v57, 0.0  ;;  %v2940_v53 = vadd.f32 %v2939_v58, %v2938_v51 }
  0xc7   : > { %10213 = vst [vmem:[#allocation145_spill] sm:$0xff] %v5542_v33  ;;  %v5552_v2 = vld.sshfl [vmem:[#allocation1 + $0x28] sm:$0xff pattern:$0x73625140]  ;;  %v2943_v34 = vsel %vm1748_vm0, %v2794_v62, 0.0  ;;  %v5617_v12 = vmul.f32 %v5398_v14, %v5398_v14  ;;  %v2795_v58 = vmul.f32 %v5588_v8, %v5170_v54  ;;  %v5633_v14 = vmul.f32 %v5402_v21, %v5402_v21 }
  0xc8   : > { %10214 = vst [vmem:[#allocation146_spill] sm:$0xff] %v5546_v4  ;;  %v5554_v15 = vld.sshfl [vmem:[#allocation1 + $0x30] sm:$0xff pattern:$0x73625140]  ;;  %v5591_v4 = vperm.slane %v5512_v7, 2  ;;  %v2942_v51 = vadd.f32 %v2941_v29, %v2940_v53 }
  0xc9   : > { %10215 = vst [vmem:[#allocation147_spill] sm:$0xff] %v5548_v59  ;;  %v5560_v55 = vld.sshfl [vmem:[#allocation1 + $0x38] sm:$0xff pattern:$0x73625140]  ;;  %v1852_v29 = vsel %vm1748_vm0, %v5617_v12, 0.0 }
  0xca   : > { %10216 = vst [vmem:[#allocation148_spill] sm:$0xff] %v5550_v37 }
  0xcb   : > { %10217 = vst [vmem:[#allocation149_spill] sm:$0xff] %v5552_v2 }
  0xcc   : > { %10218 = vst [vmem:[#allocation150_spill] sm:$0xff] %v5554_v15 }
  0xcd   : > { %10219 = vst [vmem:[#allocation151_spill] sm:$0xff] %v5558_v0 }
  0xce   : > { %10220 = vst [vmem:[#allocation152_spill] sm:$0xff] %v5560_v55 }
  0xcf   : > { %908 = vst [vmem:[#allocation1] ss:$4 sm:$0xff] %v247_v22  ;;  %v5581_v22 = vmul.f32 %v5390_v36, %v5390_v36 }
  0xd0   : > { %909 = vst [vmem:[#allocation1 + $0x20] ss:$4 sm:$0xff] %v248_v13  ;;  %v1842_v13 = vsel %vm1748_vm0, %v5558_v0, 0.0  ;;  %v5599_v0 = vperm.slane %v5512_v7, 3 }
  0xd1   : > { %10221 = vst [vmem:[#allocation153_spill] sm:$0xff] %v5565_v50  ;;  %v1843_v42 = vadd.f32 %v1842_v13, %v1841_v60  ;;  %v1848_v50 = vsel %vm1748_vm0, %v5581_v22, 0.0 }
  0xd2   : > { %10222 = vst [vmem:[#allocation154_spill] sm:$0xff] %v5577_v57 }
  0xd3   : > { %10223 = vst [vmem:[#allocation155_spill] sm:$0xff] %v5581_v22  ;;  %v1845_v60 = vadd.f32 %v1844_v17, %v1843_v42  ;;  %v1850_v42 = vsel %vm1748_vm0, %v5596_v18, 0.0  ;;  %v2796_v17 = vmul.f32 %v5591_v4, %v5172_v31 }
  0xd4   : > { %10224 = vst [vmem:[#allocation156_spill] sm:$0xff] %v5588_v8 }
  0xd5   : > { %10225 = vst [vmem:[#allocation157_spill] sm:$0xff] %v5591_v4  ;;  %v1847_v36 = vadd.f32 %v1846_v1, %v1845_v60  ;;  %v5643_v1 = vmul.f32 %v5404_v63, %v5404_v63  ;;  %v2944_v60 = vadd.f32 %v2943_v34, %v2942_v51  ;;  %v5659_v4 = vperm.slane %v5512_v7, 4 }
  0xd6   : > { %10226 = vst [vmem:[#allocation158_spill] sm:$0xff] %v5596_v18  ;;  %v5609_v25 = vld.sshfl [vmem:[#allocation1] sm:$0xff pattern:$0x73625140]  ;;  %v2945_v18 = vsel %vm1748_vm0, %v2795_v58, 0.0  ;;  %v2947_v31 = vsel %vm1748_vm0, %v2796_v17, 0.0 }
  0xd7   : > { %10227 = vst [vmem:[#allocation159_spill] sm:$0xff] %v5599_v0  ;;  %v5611_v23 = vld.sshfl [vmem:[#allocation1 + $0x8] sm:$0xff pattern:$0x73625140]  ;;  %v1849_v53 = vadd.f32 %v1848_v50, %v1847_v36  ;;  %v2797_v50 = vmul.f32 %v5599_v0, %v5174_v24  ;;  %v2946_v8 = vadd.f32 %v2945_v18, %v2944_v60  ;;  %v1856_v58 = vsel %vm1748_vm0, %v5643_v1, 0.0  ;;  %v252_v0 = vld [vmem:[%s4950_s25 + $0xb8] sm:$0xff] }
  0xd8   : > { %10228 = vst [vmem:[#allocation160_spill] sm:$0xff] %v5609_v25  ;;  %v5613_v13 = vld.sshfl [vmem:[#allocation1 + $0x10] sm:$0xff pattern:$0x73625140]  ;;  %v2798_v54 = vmul.f32 %v5659_v4, %v5176_v3 }
  0xd9   : > { %10229 = vst [vmem:[#allocation161_spill] sm:$0xff] %v5611_v23  ;;  %v5619_v61 = vld.sshfl [vmem:[#allocation1 + $0x18] sm:$0xff pattern:$0x73625140]  ;;  %v1851_v36 = vadd.f32 %v1850_v42, %v1849_v53  ;;  %v5667_v42 = vperm.slane %v5512_v7, 5  ;;  %v5670_v53 = vperm.slane %v5512_v7, 6  ;;  %v2948_v17 = vadd.f32 %v2947_v31, %v2946_v8 }
  0xda   : > { %10230 = vst [vmem:[#allocation162_spill] sm:$0xff] %v5613_v13  ;;  %v5621_v57 = vld.sshfl [vmem:[#allocation1 + $0x20] sm:$0xff pattern:$0x73625140]  ;;  %v2951_v3 = vsel %vm1748_vm0, %v2798_v54, 0.0 }
  0xdb   : > { %10231 = vst [vmem:[#allocation163_spill] sm:$0xff] %v5617_v12  ;;  %v5625_v62 = vld.sshfl [vmem:[#allocation1 + $0x28] sm:$0xff pattern:$0x73625140]  ;;  %v1854_v12 = vsel %vm1748_vm0, %v5633_v14, 0.0  ;;  %v1853_v34 = vadd.f32 %v1852_v29, %v1851_v36  ;;  %v2949_v29 = vsel %vm1748_vm0, %v2797_v50, 0.0 }
  0xdc   : > { %10232 = vst [vmem:[#allocation164_spill] sm:$0xff] %v5619_v61  ;;  %v5627_v22 = vld.sshfl [vmem:[#allocation1 + $0x30] sm:$0xff pattern:$0x73625140] }
  0xdd   : > { %10233 = vst [vmem:[#allocation165_spill] sm:$0xff] %v5621_v57  ;;  %v5629_v56 = vld.sshfl [vmem:[#allocation1 + $0x38] sm:$0xff pattern:$0x73625140]  ;;  %v1855_v24 = vadd.f32 %v1854_v12, %v1853_v34 }
  0xde   : > { %10234 = vst [vmem:[#allocation166_spill] sm:$0xff] %v5625_v62 }
  0xdf   : > { %10235 = vst [vmem:[#allocation167_spill] sm:$0xff] %v5627_v22  ;;  %v1857_v31 = vadd.f32 %v1856_v58, %v1855_v24  ;;  %v2799_v58 = vmul.f32 %v5667_v42, %v5182_v48 }
  0xe0   : > { %10236 = vst [vmem:[#allocation168_spill] sm:$0xff] %v5629_v56 }
  0xe1   : > { %918 = vst [vmem:[#allocation1] ss:$4 sm:$0xff] %v249_v20  ;;  %v5647_v20 = vmul.f32 %v5410_v9, %v5410_v9 }
  0xe2   : > { %10237 = vst [vmem:[#allocation169_spill] sm:$0xff] %v5633_v14  ;;  %v251_v14 = vld [vmem:[%s4950_s25 + $0xb0] sm:$0xff] }
  0xe3   : > { %919 = vst [vmem:[#allocation1 + $0x20] ss:$4 sm:$0xff] %v250_v16  ;;  %v5652_v16 = vmul.f32 %v5459_v44, %v5459_v44  ;;  %v1858_v51 = vsel %vm1748_vm0, %v5647_v20, 0.0 }
  0xe4   : > { %10238 = vst [vmem:[#allocation170_spill] sm:$0xff] %v5643_v1  ;;  %v5685_v1 = vmul.f32 %v5461_v43, %v5461_v43 }
  0xe5   : > { %10239 = vst [vmem:[#allocation171_spill] sm:$0xff] %v5647_v20  ;;  %v1860_v18 = vsel %vm1748_vm0, %v5652_v16, 0.0 }
  0xe6   : > { %10240 = vst [vmem:[#allocation172_spill] sm:$0xff] %v5652_v16  ;;  %v5699_v16 = vmul.f32 %v5463_v40, %v5463_v40  ;;  %v1862_v24 = vsel %vm1748_vm0, %v5685_v1, 0.0 }
  0xe7   : > { %10241 = vst [vmem:[#allocation173_spill] sm:$0xff] %v5659_v4  ;;  %v5705_v4 = vmul.f32 %v5465_v6, %v5465_v6 }
  0xe8   : > { %10242 = vst [vmem:[#allocation174_spill] sm:$0xff] %v5667_v42  ;;  %v5677_v60 = vld.sshfl [vmem:[#allocation1] sm:$0xff pattern:$0x73625140] }
  0xe9   : > { %10243 = vst [vmem:[#allocation175_spill] sm:$0xff] %v5670_v53  ;;  %v5679_v36 = vld.sshfl [vmem:[#allocation1 + $0x8] sm:$0xff pattern:$0x73625140] }
  0xea   : > { %10244 = vst [vmem:[#allocation176_spill] sm:$0xff] %v5677_v60  ;;  %v5681_v20 = vld.sshfl [vmem:[#allocation1 + $0x10] sm:$0xff pattern:$0x73625140]  ;;  %v2950_v60 = vadd.f32 %v2949_v29, %v2948_v17  ;;  %v5723_v17 = vld [vmem:[%s4956_s29 + $0x20] sm:$0xff]  ;;  %v2800_v29 = vmul.f32 %v5670_v53, %v5184_v45 }
  0xeb   : > { %10245 = vst [vmem:[#allocation177_spill] sm:$0xff] %v5679_v36  ;;  %v5689_v12 = vld.sshfl [vmem:[#allocation1 + $0x18] sm:$0xff pattern:$0x73625140]  ;;  %v1859_v36 = vadd.f32 %v1858_v51, %v1857_v31  ;;  %v1864_v51 = vsel %vm1748_vm0, %v5699_v16, 0.0  ;;  %v5734_v48 = vperm.slane %v5723_v17, 0 }
  0xec   : > { %10246 = vst [vmem:[#allocation178_spill] sm:$0xff] %v5681_v20  ;;  %v5691_v34 = vld.sshfl [vmem:[#allocation1 + $0x20] sm:$0xff pattern:$0x73625140]  ;;  %v2952_v54 = vadd.f32 %v2951_v3, %v2950_v60  ;;  %v5743_v3 = vmul.f32 %v5477_v49, %v5477_v49 }
  0xed   : > { %10247 = vst [vmem:[#allocation179_spill] sm:$0xff] %v5685_v1  ;;  %v5693_v8 = vld.sshfl [vmem:[#allocation1 + $0x28] sm:$0xff pattern:$0x73625140]  ;;  %v2953_v1 = vsel %vm1748_vm0, %v2799_v58, 0.0 }
  0xee   : > { %10248 = vst [vmem:[#allocation180_spill] sm:$0xff] %v5689_v12  ;;  %v5695_v50 = vld.sshfl [vmem:[#allocation1 + $0x30] sm:$0xff pattern:$0x73625140]  ;;  %v2954_v53 = vadd.f32 %v2953_v1, %v2952_v54  ;;  %v1872_v1 = vsel %vm1748_vm0, %v5743_v3, 0.0  ;;  %v5776_v54 = vmul.f32 %v5538_v30, %v5538_v30 }
  0xef   : > { %10249 = vst [vmem:[#allocation181_spill] sm:$0xff] %v5691_v34  ;;  %v5701_v20 = vld.sshfl [vmem:[#allocation1 + $0x38] sm:$0xff pattern:$0x73625140] }
  0xf0   : > { %10250 = vst [vmem:[#allocation182_spill] sm:$0xff] %v5693_v8  ;;  %v254_v8 = vld [vmem:[%s4950_s25 + $0xc8] sm:$0xff] }
  0xf1   : > { %10251 = vst [vmem:[#allocation183_spill] sm:$0xff] %v5695_v50  ;;  %v1861_v50 = vadd.f32 %v1860_v18, %v1859_v36  ;;  %v1866_v18 = vsel %vm1748_vm0, %v5705_v4, 0.0  ;;  %v5730_v36 = vperm.slane %v5512_v7, 7 }
  0xf2   : > { %10252 = vst [vmem:[#allocation184_spill] sm:$0xff] %v5699_v16  ;;  %v5737_v16 = vperm.slane %v5723_v17, 1 }
  0xf3   : > { %10253 = vst [vmem:[#allocation185_spill] sm:$0xff] %v5701_v20  ;;  %v1863_v31 = vadd.f32 %v1862_v24, %v1861_v50  ;;  %v253_v20 = vld [vmem:[%s4950_s25 + $0xc0] sm:$0xff]  ;;  %v2955_v50 = vsel %vm1748_vm0, %v2800_v29, 0.0  ;;  %v277_v24 = vlaneseq  ;;  %v2801_v29 = vmul.f32 %v5730_v36, %v5186_v46 }
  0xf4   : > { %928 = vst [vmem:[#allocation1] ss:$4 sm:$0xff] %v251_v14  ;;  %v5714_v14 = vmul.f32 %v5467_v5, %v5467_v5 }
  0xf5   : > { %929 = vst [vmem:[#allocation1 + $0x20] ss:$4 sm:$0xff] %v252_v0  ;;  %v5718_v0 = vmul.f32 %v5475_v11, %v5475_v11  ;;  %v1865_v42 = vadd.f32 %v1864_v51, %v1863_v31 }
  0xf6   : > { %10254 = vst [vmem:[#allocation186_spill] sm:$0xff] %v5705_v4  ;;  %v1868_v60 = vsel %vm1748_vm0, %v5714_v14, 0.0 }
  0xf7   : > { %10255 = vst [vmem:[#allocation187_spill] sm:$0xff] %v5714_v14  ;;  %v1870_v7 = vsel %vm1748_vm0, %v5718_v0, 0.0  ;;  %v1867_v4 = vadd.f32 %v1866_v18, %v1865_v42  ;;  %v5762_v14 = vmul.f32 %v5481_v41, %v5481_v41  ;;  %v278_v42 = vand.u32 127, %v277_v24 }
  0xf8   : > { %10256 = vst [vmem:[#allocation188_spill] sm:$0xff] %v5718_v0  ;;  %v2803_v24 = vmul.f32 %v5737_v16, %v5241_v47 }
  0xf9   : > { %10257 = vst [vmem:[#allocation189_spill] sm:$0xff] %v5730_v36  ;;  %v2956_v36 = vadd.f32 %v2955_v50, %v2954_v53  ;;  %v1874_v46 = vsel %vm1748_vm0, %v5762_v14, 0.0  ;;  %v1876_v50 = vsel %vm1748_vm0, %v5776_v54, 0.0 }
  0xfa   : > { %10258 = vst [vmem:[#allocation190_spill] sm:$0xff] %v5734_v48 }
  0xfb   : > { %10259 = vst [vmem:[#allocation191_spill] sm:$0xff] %v5737_v16  ;;  %v5750_v58 = vld.sshfl [vmem:[#allocation1] sm:$0xff pattern:$0x73625140] }
  0xfc   : > { %10260 = vst [vmem:[#allocation192_spill] sm:$0xff] %v5743_v3  ;;  %v5752_v51 = vld.sshfl [vmem:[#allocation1 + $0x8] sm:$0xff pattern:$0x73625140]  ;;  %v5795_v3 = vperm.slane %v5723_v17, 2 }
  0xfd   : > { %10261 = vst [vmem:[#allocation193_spill] sm:$0xff] %v5750_v58  ;;  %v5754_v31 = vld.sshfl [vmem:[#allocation1 + $0x10] sm:$0xff pattern:$0x73625140] }
  0xfe   : > { %10262 = vst [vmem:[#allocation194_spill] sm:$0xff] %v5752_v51  ;;  %v5756_v45 = vld.sshfl [vmem:[#allocation1 + $0x18] sm:$0xff pattern:$0x73625140]  ;;  %v1869_v51 = vadd.f32 %v1868_v60, %v1867_v4  ;;  %v2802_v4 = vmul.f32 %v5734_v48, %v5239_v32  ;;  %v5785_v60 = vmul.f32 %v5540_v39, %v5540_v39  ;;  %v5801_v48 = vperm.slane %v5723_v17, 4 }
  0xff   : > { %10263 = vst [vmem:[#allocation195_spill] sm:$0xff] %v5754_v31  ;;  %v5758_v34 = vld.sshfl [vmem:[#allocation1 + $0x20] sm:$0xff pattern:$0x73625140] }
 0x100   : > { %10264 = vst [vmem:[#allocation196_spill] sm:$0xff] %v5756_v45  ;;  %v5766_v0 = vld.sshfl [vmem:[#allocation1 + $0x28] sm:$0xff pattern:$0x73625140]  ;;  %v1871_v18 = vadd.f32 %v1870_v7, %v1869_v51  ;;  %v5789_v7 = vadd.s32 16000, %v278_v42 }
 0x101   : > { %10265 = vst [vmem:[#allocation197_spill] sm:$0xff] %v5758_v34  ;;  %v5768_v58 = vld.sshfl [vmem:[#allocation1 + $0x30] sm:$0xff pattern:$0x73625140]  ;;  %v266_v42 = vld [vmem:[%s4956_s29 + $0x28] sm:$0xff] }
 0x102   : > { %10266 = vst [vmem:[#allocation198_spill] sm:$0xff] %v5762_v14  ;;  %v5770_v12 = vld.sshfl [vmem:[#allocation1 + $0x38] sm:$0xff pattern:$0x73625140] }
 0x103   : > { %10267 = vst [vmem:[#allocation199_spill] sm:$0xff] %v5766_v0  ;;  %v255_v14 = vld [vmem:[%s4950_s25 + $0xd0] sm:$0xff]  ;;  %v258_v0 = vld [vmem:[%s4950_s25 + $0xe8] sm:$0xff] }
 0x104   : > { %10268 = vst [vmem:[#allocation200_spill] sm:$0xff] %v5768_v58 }
 0x105   : > { %10269 = vst [vmem:[#allocation201_spill] sm:$0xff] %v5770_v12 }
 0x106   : > { %938 = vst [vmem:[#allocation1] ss:$4 sm:$0xff] %v253_v20  ;;  %v2957_v20 = vsel %vm1748_vm0, %v2801_v29, 0.0  ;;  %v5798_v29 = vperm.slane %v5723_v17, 3 }
 0x107   : > { %939 = vst [vmem:[#allocation1 + $0x20] ss:$4 sm:$0xff] %v254_v8  ;;  %v1873_v8 = vadd.f32 %v1872_v1, %v1871_v18  ;;  %v2958_v51 = vadd.f32 %v2957_v20, %v2956_v36  ;;  %v2959_v1 = vsel %vm1748_vm0, %v2802_v4, 0.0  ;;  %v256_v18 = vld [vmem:[%s4950_s25 + $0xd8] sm:$0xff]  ;;  %v5812_v36 = vperm.slane %v5723_v17, 6 }
 0x108   : > { %10270 = vst [vmem:[#allocation202_spill] sm:$0xff] %v5776_v54  ;;  %v2961_v20 = vsel %vm1748_vm0, %v2803_v24, 0.0 }
 0x109   : > { %10271 = vst [vmem:[#allocation203_spill] sm:$0xff] %v5785_v60  ;;  %v1875_v53 = vadd.f32 %v1874_v46, %v1873_v8  ;;  %v1878_v46 = vsel %vm1748_vm0, %v5785_v60, 0.0  ;;  %v5809_v8 = vperm.slane %v5723_v17, 5  ;;  %v5827_v60 = vmul.f32 %v5542_v33, %v5542_v33 }
 0x10a   : > { %10272 = vst [vmem:[#allocation204_spill] sm:$0xff] %v5789_v7  ;;  %v2960_v12 = vadd.f32 %v2959_v1, %v2958_v51  ;;  %v2806_v51 = vmul.f32 %v5801_v48, %v5253_v28  ;;  %v5886_v28 = vperm.slane %v266_v42, 6 }
 0x10b   : > { %10273 = vst [vmem:[#allocation205_spill] sm:$0xff] %v5795_v3  ;;  %v1877_v4 = vadd.f32 %v1876_v50, %v1875_v53  ;;  %v5839_v53 = vmul.f32 %v5548_v59, %v5548_v59  ;;  %v2805_v50 = vmul.f32 %v5798_v29, %v5251_v52  ;;  %v5847_v1 = vmul.f32 %v5809_v8, %v5255_v38 }
 0x10c   : > { %10274 = vst [vmem:[#allocation206_spill] sm:$0xff] %v5798_v29  ;;  %v267_v29 = vld [vmem:[%s4956_s29 + $0x30] sm:$0xff]  ;;  %v5888_v52 = vperm.slane %v266_v42, 7 }
 0x10d   : > { %10275 = vst [vmem:[#allocation207_spill] sm:$0xff] %v5801_v48  ;;  %v5815_v54 = vld.sshfl [vmem:[#allocation1] sm:$0xff pattern:$0x73625140]  ;;  %v1880_v48 = vsel %vm1748_vm0, %v5827_v60, 0.0  ;;  %v1882_v38 = vsel %vm1748_vm0, %v5839_v53, 0.0 }
 0x10e   : > { %10276 = vst [vmem:[#allocation208_spill] sm:$0xff] %v5809_v8  ;;  %v5817_v16 = vld.sshfl [vmem:[#allocation1 + $0x8] sm:$0xff pattern:$0x73625140]  ;;  %v5865_v8 = vmul.f32 %v5812_v36, %v5257_v10 }
 0x10f   : > { %10277 = vst [vmem:[#allocation209_spill] sm:$0xff] %v5812_v36  ;;  %v5819_v47 = vld.sshfl [vmem:[#allocation1 + $0x10] sm:$0xff pattern:$0x73625140]  ;;  %v5880_v36 = vperm.slane %v266_v42, 3 }
 0x110   : > { %10278 = vst [vmem:[#allocation210_spill] sm:$0xff] %v5815_v54  ;;  %v5821_v32 = vld.sshfl [vmem:[#allocation1 + $0x18] sm:$0xff pattern:$0x73625140] }
 0x111   : > { %10279 = vst [vmem:[#allocation211_spill] sm:$0xff] %v5817_v16  ;;  %v5823_v7 = vld.sshfl [vmem:[#allocation1 + $0x20] sm:$0xff pattern:$0x73625140]  ;;  %v2804_v16 = vmul.f32 %v5795_v3, %v5243_v35  ;;  %v5850_v3 = vperm.slane %v5723_v17, 7  ;;  %v5854_v35 = vperm.slane %v266_v42, 1  ;;  %v5869_v17 = vmul.f32 %v5552_v2, %v5552_v2 }
 0x112   : > { %10280 = vst [vmem:[#allocation212_spill] sm:$0xff] %v5819_v47  ;;  %v5829_v58 = vld.sshfl [vmem:[#allocation1 + $0x28] sm:$0xff pattern:$0x73625140] }
 0x113   : > { %10281 = vst [vmem:[#allocation213_spill] sm:$0xff] %v5821_v32  ;;  %v5831_v24 = vld.sshfl [vmem:[#allocation1 + $0x30] sm:$0xff pattern:$0x73625140]  ;;  %v5896_v32 = vperm.slane %v267_v29, 2  ;;  %v257_v47 = vld [vmem:[%s4950_s25 + $0xe0] sm:$0xff] }
 0x114   : > { %10282 = vst [vmem:[#allocation214_spill] sm:$0xff] %v5823_v7  ;;  %v5835_v54 = vld.sshfl [vmem:[#allocation1 + $0x38] sm:$0xff pattern:$0x73625140] }
 0x115   : > { %10283 = vst [vmem:[#allocation215_spill] sm:$0xff] %v5827_v60  ;;  %v2963_v60 = vsel %vm1748_vm0, %v2804_v16, 0.0  ;;  %v5894_v16 = vperm.slane %v267_v29, 1 }
 0x116   : > { %10284 = vst [vmem:[#allocation216_spill] sm:$0xff] %v5829_v58  ;;  %v5890_v58 = vperm.slane %v267_v29, 0 }
 0x117   : > { %10285 = vst [vmem:[#allocation217_spill] sm:$0xff] %v5831_v24  ;;  %v1879_v24 = vadd.f32 %v1878_v46, %v1877_v4  ;;  %v5873_v46 = vmul.f32 %v5554_v15, %v5554_v15  ;;  %v5875_v4 = vperm.slane %v266_v42, 2 }
 0x118   : > { %10286 = vst [vmem:[#allocation218_spill] sm:$0xff] %v5835_v54  ;;  %v5858_v54 = vmul.f32 %v5550_v37, %v5550_v37 }
 0x119   : > { %948 = vst [vmem:[#allocation1] ss:$4 sm:$0xff] %v255_v14  ;;  %v5852_v14 = vperm.slane %v266_v42, 0  ;;  %v1881_v10 = vadd.f32 %v1880_v48, %v1879_v24  ;;  %v1886_v48 = vsel %vm1748_vm0, %v5869_v17, 0.0  ;;  %v2965_v24 = vsel %vm1748_vm0, %v2805_v50, 0.0 }
 0x11a   : > { %10287 = vst [vmem:[#allocation219_spill] sm:$0xff] %v5839_v53  ;;  %v1884_v7 = vsel %vm1748_vm0, %v5858_v54, 0.0 }
 0x11b   : > { %949 = vst [vmem:[#allocation1 + $0x20] ss:$4 sm:$0xff] %v256_v18  ;;  %v2962_v18 = vadd.f32 %v2961_v20, %v2960_v12  ;;  %v5882_v12 = vperm.slane %v266_v42, 4  ;;  %v5884_v20 = vperm.slane %v266_v42, 5  ;;  %v1883_v34 = vadd.f32 %v1882_v38, %v1881_v10  ;;  %v10307_v38 = vld [vmem:[#allocation92_spill] sm:$0xff] }
 0x11c   : > { %10288 = vst [vmem:[#allocation220_spill] sm:$0xff] %v5850_v3  ;;  %v1888_v42 = vsel %vm1748_vm0, %v5873_v46, 0.0  ;;  %v5917_v10 = vmul.f32 %v5850_v3, %v5263_v19  ;;  %v10312_v19 = vld [vmem:[#allocation96_spill] sm:$0xff] }
 0x11d   : > { %10289 = vst [vmem:[#allocation221_spill] sm:$0xff] %v5852_v14  ;;  %v2964_v53 = vadd.f32 %v2963_v60, %v2962_v18  ;;  %v5913_v60 = vmul.f32 %v5560_v55, %v5560_v55  ;;  %v5921_v18 = vmul.f32 %v5852_v14, %v10307_v38  ;;  %v10311_v55 = vld [vmem:[#allocation95_spill] sm:$0xff]  ;;  %v5941_v14 = vmul.f32 %v5882_v12, %v10312_v19  ;;  %v10320_v38 = vld [vmem:[#allocation100_spill] sm:$0xff] }
 0x11e   : > { %10290 = vst [vmem:[#allocation222_spill] sm:$0xff] %v5854_v35  ;;  %v5937_v3 = vmul.f32 %v5880_v36, %v10311_v55 }
 0x11f   : > { %10291 = vst [vmem:[#allocation223_spill] sm:$0xff] %v5858_v54  ;;  %v2966_v55 = vadd.f32 %v2965_v24, %v2964_v53  ;;  %v1890_v53 = vsel %vm1748_vm0, %v5913_v60, 0.0 }
 0x120   : > { %10292 = vst [vmem:[#allocation224_spill] sm:$0xff] %v5869_v17  ;;  %v5905_v45 = vld.sshfl [vmem:[#allocation1] sm:$0xff pattern:$0x73625140] }
 0x121   : > { %10293 = vst [vmem:[#allocation225_spill] sm:$0xff] %v5873_v46  ;;  %v5907_v31 = vld.sshfl [vmem:[#allocation1 + $0x8] sm:$0xff pattern:$0x73625140] }
 0x122   : > { %10294 = vst [vmem:[#allocation226_spill] sm:$0xff] %v5875_v4  ;;  %v5909_v54 = vld.sshfl [vmem:[#allocation1 + $0x10] sm:$0xff pattern:$0x73625140]  ;;  %v10308_v46 = vld [vmem:[#allocation93_spill] sm:$0xff] }
 0x123   : > { %10295 = vst [vmem:[#allocation227_spill] sm:$0xff] %v5880_v36  ;;  %v5925_v50 = vmul.f32 %v5854_v35, %v10308_v46  ;;  %v5927_v17 = vld.sshfl [vmem:[#allocation1 + $0x18] sm:$0xff pattern:$0x73625140] }
 0x124   : > { %10296 = vst [vmem:[#allocation228_spill] sm:$0xff] %v5882_v12  ;;  %v5943_v35 = vld.sshfl [vmem:[#allocation1 + $0x28] sm:$0xff pattern:$0x73625140] }
 0x125   : > { %10297 = vst [vmem:[#allocation229_spill] sm:$0xff] %v5884_v20  ;;  %v5945_v46 = vld.sshfl [vmem:[#allocation1 + $0x30] sm:$0xff pattern:$0x73625140] }
 0x126   : > { %10298 = vst [vmem:[#allocation230_spill] sm:$0xff] %v5886_v28  ;;  %v5959_v12 = vld.sshfl [vmem:[#allocation1 + $0x38] sm:$0xff pattern:$0x73625140] }
 0x127   : > { %10299 = vst [vmem:[#allocation231_spill] sm:$0xff] %v5888_v52 }
 0x128   : > { %10300 = vst [vmem:[#allocation232_spill] sm:$0xff] %v5890_v58 }
 0x129   : > { %10301 = vst [vmem:[#allocation233_spill] sm:$0xff] %v5894_v16 }
 0x12a   : > { %10302 = vst [vmem:[#allocation234_spill] sm:$0xff] %v5896_v32 }
 0x12b   : > { %10303 = vst [vmem:[#allocation235_spill] sm:$0xff] %v5905_v45  ;;  %v5933_v45 = vmul.f32 %v5875_v4, %v5316_v26  ;;  %v10317_v26 = vld [vmem:[#allocation99_spill] sm:$0xff] }
 0x12c   : > { %10304 = vst [vmem:[#allocation236_spill] sm:$0xff] %v5907_v31  ;;  %v5929_v31 = vld.sshfl [vmem:[#allocation1 + $0x20] sm:$0xff pattern:$0x73625140]  ;;  %v5957_v36 = vmul.f32 %v5886_v28, %v10317_v26  ;;  %v5972_v28 = vmul.f32 %v5611_v23, %v5611_v23 }
 0x12d   : > { %10305 = vst [vmem:[#allocation237_spill] sm:$0xff] %v5909_v54  ;;  %v1885_v54 = vadd.f32 %v1884_v7, %v1883_v34  ;;  %v5949_v34 = vmul.f32 %v5609_v25, %v5609_v25  ;;  %v10316_v7 = vld [vmem:[#allocation98_spill] sm:$0xff] }
 0x12e   : > { %10306 = vst [vmem:[#allocation238_spill] sm:$0xff] %v5913_v60  ;;  %v5953_v4 = vmul.f32 %v5884_v20, %v10316_v7  ;;  %v2967_v20 = vsel %vm1748_vm0, %v2806_v51, 0.0  ;;  %v5993_v51 = vmul.f32 %v5619_v61, %v5619_v61  ;;  %v1894_v7 = vsel %vm1748_vm0, %v5972_v28, 0.0  ;;  %v10343_v25 = vld [vmem:[#allocation110_spill] sm:$0xff] }
 0x12f   : > { %10309 = vst [vmem:[#allocation239_spill] sm:$0xff] %v5927_v17  ;;  %v1887_v19 = vadd.f32 %v1886_v48, %v1885_v54  ;;  %v5977_v54 = vperm.slane %v267_v29, 3  ;;  %v5979_v48 = vperm.slane %v267_v29, 4  ;;  %v1892_v60 = vsel %vm1748_vm0, %v5949_v34, 0.0 }
 0x130   : > { %10310 = vst [vmem:[#allocation240_spill] sm:$0xff] %v5929_v31  ;;  %v2971_v61 = vsel %vm1748_vm0, %v5865_v8, 0.0 }
 0x131   : > { %10313 = vst [vmem:[#allocation241_spill] sm:$0xff] %v5943_v35  ;;  %v5967_v35 = vmul.f32 %v5890_v58, %v5386_v27  ;;  %v1889_v24 = vadd.f32 %v1888_v42, %v1887_v19  ;;  %v5983_v58 = vperm.slane %v267_v29, 6  ;;  %v5985_v27 = vperm.slane %v267_v29, 7 }
 0x132   : > { %10314 = vst [vmem:[#allocation242_spill] sm:$0xff] %v5945_v46  ;;  %v5963_v46 = vmul.f32 %v5888_v52, %v10320_v38  ;;  %v5981_v52 = vperm.slane %v267_v29, 5  ;;  %v2968_v19 = vadd.f32 %v2967_v20, %v2966_v55  ;;  %v2969_v29 = vsel %vm1748_vm0, %v5847_v1, 0.0  ;;  %v260_v1 = vld [vmem:[%s4950_s25 + $0xf8] sm:$0xf] }
 0x133   : > { %10315 = vst [vmem:[#allocation243_spill] sm:$0xff] %v5949_v34  ;;  %v1891_v42 = vadd.f32 %v1890_v53, %v1889_v24  ;;  %v6013_v55 = vmul.f32 %v5621_v57, %v5621_v57  ;;  %v259_v34 = vld [vmem:[%s4950_s25 + $0xf0] sm:$0xff] }
 0x134   : > { %10318 = vst [vmem:[#allocation244_spill] sm:$0xff] %v5957_v36 }
 0x135   : > { %10319 = vst [vmem:[#allocation245_spill] sm:$0xff] %v5959_v12  ;;  %v1893_v20 = vadd.f32 %v1892_v60, %v1891_v42 }
 0x136   : > { %958 = vst [vmem:[#allocation1] ss:$4 sm:$0xff] %v257_v47  ;;  %v268_v47 = vld [vmem:[%s4956_s29 + $0x38] sm:$0xff] }
 0x137   : > { %10321 = vst [vmem:[#allocation246_spill] sm:$0xff] %v5963_v46  ;;  %v5997_v38 = vperm.slane %v268_v47, 0  ;;  %v5999_v26 = vperm.slane %v268_v47, 1  ;;  %v6005_v12 = vperm.slane %v268_v47, 2  ;;  %v6007_v31 = vperm.slane %v268_v47, 3 }
 0x138   : > { %10322 = vst [vmem:[#allocation247_spill] sm:$0xff] %v5967_v35  ;;  %v6009_v17 = vperm.slane %v268_v47, 4  ;;  %v6015_v53 = vperm.slane %v268_v47, 5  ;;  %v6017_v24 = vperm.slane %v268_v47, 6  ;;  %v1898_v35 = vsel %vm1748_vm0, %v5993_v51, 0.0 }
 0x139   : > { %959 = vst [vmem:[#allocation1 + $0x20] ss:$4 sm:$0xff] %v258_v0  ;;  %v5989_v0 = vmul.f32 %v5613_v13, %v5613_v13  ;;  %v2970_v46 = vadd.f32 %v2969_v29, %v2968_v19  ;;  %v1895_v36 = vadd.f32 %v1894_v7, %v1893_v20  ;;  %v10342_v13 = vld [vmem:[#allocation109_spill] sm:$0xff] }
 0x13a   : > { %10323 = vst [vmem:[#allocation248_spill] sm:$0xff] %v5972_v28  ;;  %v6035_v23 = vmul.f32 %v5894_v16, %v10342_v13  ;;  %v269_v7 = vld [vmem:[%s4956_s29 + $0x40] sm:$0xff] }
 0x13b   : > { %10324 = vst [vmem:[#allocation249_spill] sm:$0xff] %v5977_v54  ;;  %v1896_v28 = vsel %vm1748_vm0, %v5989_v0, 0.0  ;;  %v10348_v20 = vld [vmem:[#allocation113_spill] sm:$0xff] }
 0x13c   : > { %10325 = vst [vmem:[#allocation250_spill] sm:$0xff] %v5979_v48  ;;  %v6056_v16 = vmul.f32 %v5979_v48, %v10348_v20  ;;  %v1897_v13 = vadd.f32 %v1896_v28, %v1895_v36  ;;  %v6076_v48 = vmul.f32 %v5997_v38, %v5459_v44  ;;  %v1900_v28 = vsel %vm1748_vm0, %v6013_v55, 0.0  ;;  %v10398_v20 = vld [vmem:[#allocation185_spill] sm:$0xff] }
 0x13d   : > { %10326 = vst [vmem:[#allocation251_spill] sm:$0xff] %v5981_v52  ;;  %v6027_v57 = vld.sshfl [vmem:[#allocation1] sm:$0xff pattern:$0x73625140]  ;;  %v6092_v36 = vmul.f32 %v6005_v12, %v5463_v40  ;;  %v6094_v44 = vperm.slane %v268_v47, 7  ;;  %v6120_v47 = vmul.f32 %v6017_v24, %v5477_v49 }
 0x13e   : > { %10327 = vst [vmem:[#allocation252_spill] sm:$0xff] %v5983_v58  ;;  %v6029_v60 = vld.sshfl [vmem:[#allocation1 + $0x8] sm:$0xff pattern:$0x73625140] }
 0x13f   : > { %10328 = vst [vmem:[#allocation253_spill] sm:$0xff] %v5985_v27  ;;  %v6031_v42 = vld.sshfl [vmem:[#allocation1 + $0x10] sm:$0xff pattern:$0x73625140] }
 0x140   : > { %10329 = vst [vmem:[#allocation254_spill] sm:$0xff] %v5989_v0  ;;  %v6039_v0 = vmul.f32 %v5896_v32, %v10343_v25  ;;  %v6045_v8 = vld.sshfl [vmem:[#allocation1 + $0x18] sm:$0xff pattern:$0x73625140]  ;;  %v6060_v32 = vmul.f32 %v5981_v52, %v5402_v21  ;;  %v6080_v52 = vmul.f32 %v5999_v26, %v5461_v43 }
 0x141   : > { %10330 = vst [vmem:[#allocation255_spill] sm:$0xff] %v5993_v51  ;;  %v10344_v51 = vld [vmem:[#allocation112_spill] sm:$0xff]  ;;  %v6068_v25 = vld.sshfl [vmem:[#allocation1 + $0x30] sm:$0xff pattern:$0x73625140] }
 0x142   : > { %10331 = vst [vmem:[#allocation256_spill] sm:$0xff] %v5997_v38  ;;  %v6043_v19 = vmul.f32 %v5977_v54, %v10344_v51  ;;  %v6047_v29 = vld.sshfl [vmem:[#allocation1 + $0x20] sm:$0xff pattern:$0x73625140]  ;;  %v6064_v54 = vmul.f32 %v5983_v58, %v5404_v63  ;;  %v6086_v58 = vmul.f32 %v5627_v22, %v5627_v22  ;;  %v2972_v38 = vadd.f32 %v2971_v61, %v2970_v46  ;;  %v10389_v43 = vld [vmem:[#allocation183_spill] sm:$0xff] }
 0x143   : > { %10332 = vst [vmem:[#allocation257_spill] sm:$0xff] %v5999_v26  ;;  %v6066_v51 = vld.sshfl [vmem:[#allocation1 + $0x28] sm:$0xff pattern:$0x73625140]  ;;  %v6098_v26 = vmul.f32 %v6007_v31, %v5465_v6  ;;  %v2973_v61 = vsel %vm1748_vm0, %v5917_v10, 0.0  ;;  %v6116_v46 = vperm.slane %v269_v7, 0 }
 0x144   : > { %10333 = vst [vmem:[#allocation258_spill] sm:$0xff] %v6005_v12  ;;  %v6082_v21 = vld.sshfl [vmem:[#allocation1 + $0x38] sm:$0xff pattern:$0x73625140]  ;;  %v2974_v10 = vadd.f32 %v2973_v61, %v2972_v38  ;;  %v6150_v61 = vmul.f32 %v6094_v44, %v5481_v41 }
 0x145   : > { %10334 = vst [vmem:[#allocation259_spill] sm:$0xff] %v6007_v31  ;;  %v6130_v31 = vperm.slane %v269_v7, 1 }
 0x146   : > { %10335 = vst [vmem:[#allocation260_spill] sm:$0xff] %v6009_v17 }
 0x147   : > { %10336 = vst [vmem:[#allocation261_spill] sm:$0xff] %v6013_v55  ;;  %v6106_v55 = vmul.f32 %v5629_v56, %v5629_v56 }
 0x148   : > { %10337 = vst [vmem:[#allocation262_spill] sm:$0xff] %v6015_v53 }
 0x149   : > { %10338 = vst [vmem:[#allocation263_spill] sm:$0xff] %v6017_v24  ;;  %v2977_v24 = vsel %vm1748_vm0, %v5925_v50, 0.0  ;;  %v6154_v50 = vmul.f32 %v6116_v46, %v5538_v30  ;;  %v2979_v30 = vsel %vm1748_vm0, %v5933_v45, 0.0  ;;  %v2981_v45 = vsel %vm1748_vm0, %v5937_v3, 0.0 }
 0x14a   : > { %10339 = vst [vmem:[#allocation264_spill] sm:$0xff] %v6027_v57  ;;  %v2983_v3 = vsel %vm1748_vm0, %v5941_v14, 0.0  ;;  %v2985_v14 = vsel %vm1748_vm0, %v5953_v4, 0.0 }
 0x14b   : > { %10340 = vst [vmem:[#allocation265_spill] sm:$0xff] %v6029_v60 }
 0x14c   : > { %10341 = vst [vmem:[#allocation266_spill] sm:$0xff] %v6031_v42  ;;  %v6051_v42 = vmul.f32 %v5625_v62, %v5625_v62 }
 0x14d   : > { %10345 = vst [vmem:[#allocation267_spill] sm:$0xff] %v6045_v8 }
 0x14e   : > { %10346 = vst [vmem:[#allocation268_spill] sm:$0xff] %v6047_v29  ;;  %v6072_v29 = vmul.f32 %v5985_v27, %v5410_v9  ;;  %v1899_v27 = vadd.f32 %v1898_v35, %v1897_v13  ;;  %v1902_v12 = vsel %vm1748_vm0, %v6051_v42, 0.0  ;;  %v6112_v35 = vmul.f32 %v6015_v53, %v5475_v11 }
 0x14f   : > { %10347 = vst [vmem:[#allocation269_spill] sm:$0xff] %v6051_v42  ;;  %v1904_v53 = vsel %vm1748_vm0, %v6086_v58, 0.0  ;;  %v6134_v11 = vperm.slane %v269_v7, 3  ;;  %v6237_v9 = vmul.f32 %v10389_v43, %v10389_v43 }
 0x150   : > { %10349 = vst [vmem:[#allocation270_spill] sm:$0xff] %v6066_v51  ;;  %v1901_v13 = vadd.f32 %v1900_v28, %v1899_v27  ;;  %v6132_v28 = vperm.slane %v269_v7, 2 }
 0x151   : > { %10350 = vst [vmem:[#allocation271_spill] sm:$0xff] %v6068_v25 }
 0x152   : > { %10351 = vst [vmem:[#allocation272_spill] sm:$0xff] %v6082_v21  ;;  %v1903_v27 = vadd.f32 %v1902_v12, %v1901_v13  ;;  %v6146_v12 = vperm.slane %v269_v7, 5  ;;  %v10367_v13 = vld [vmem:[#allocation178_spill] sm:$0xff] }
 0x153   : > { %968 = vst [vmem:[#allocation1] ss:$4 sm:$0xff] %v259_v34  ;;  %v6102_v34 = vmul.f32 %v6009_v17, %v5467_v5  ;;  %v10356_v17 = vld [vmem:[#allocation176_spill] sm:$0xff]  ;;  %v1906_v5 = vsel %vm1748_vm0, %v6106_v55, 0.0  ;;  %v6158_v40 = vmul.f32 %v10367_v13, %v10367_v13 }
 0x154   : > { %10352 = vst [vmem:[#allocation273_spill] sm:$0xff] %v6086_v58  ;;  %v6126_v42 = vmul.f32 %v10356_v17, %v10356_v17  ;;  %v6144_v58 = vperm.slane %v269_v7, 4  ;;  %v1905_v38 = vadd.f32 %v1904_v53, %v1903_v27  ;;  %v6164_v53 = vmul.f32 %v6130_v31, %v5540_v39  ;;  %v6167_v27 = vld [vmem:[%s4956_s29 + $0x48] sm:$0xff] }
 0x155   : > { %969 = vst [vmem:[#allocation1 + $0x20] ss:$4 sm:$0xff] %v260_v1  ;;  %v2975_v1 = vsel %vm1748_vm0, %v5921_v18, 0.0  ;;  %v10361_v18 = vld [vmem:[#allocation177_spill] sm:$0xff] }
 0x156   : > { %10353 = vst [vmem:[#allocation274_spill] sm:$0xff] %v6094_v44  ;;  %v6140_v49 = vmul.f32 %v10361_v18, %v10361_v18  ;;  %v2976_v6 = vadd.f32 %v2975_v1, %v2974_v10  ;;  %v1907_v10 = vadd.f32 %v1906_v5, %v1905_v38  ;;  %v6171_v44 = vmul.f32 %v6132_v28, %v5542_v33 }
 0x157   : > { %10354 = vst [vmem:[#allocation275_spill] sm:$0xff] %v6106_v55  ;;  %v1908_v55 = vsel %vm1748_vm0, %v6126_v42, 0.0  ;;  %v6223_v33 = vperm.slane %v6167_v27, 3 }
 0x158   : > { %10355 = vst [vmem:[#allocation276_spill] sm:$0xff] %v6116_v46  ;;  %v2978_v1 = vadd.f32 %v2977_v24, %v2976_v6  ;;  %v6175_v46 = vmul.f32 %v6134_v11, %v5548_v59  ;;  %v1910_v5 = vsel %vm1748_vm0, %v6140_v49, 0.0  ;;  %v6185_v6 = vperm.slane %v269_v7, 6 }
 0x159   : > { %10357 = vst [vmem:[#allocation277_spill] sm:$0xff] %v6126_v42  ;;  %v10372_v42 = vld [vmem:[#allocation180_spill] sm:$0xff]  ;;  %v6189_v24 = vmul.f32 %v6144_v58, %v5550_v37  ;;  %v1909_v38 = vadd.f32 %v1908_v55, %v1907_v10  ;;  %v6209_v10 = vperm.slane %v6167_v27, 1 }
 0x15a   : > { %10358 = vst [vmem:[#allocation278_spill] sm:$0xff] %v6130_v31  ;;  %v6181_v41 = vmul.f32 %v10372_v42, %v10372_v42  ;;  %v10378_v31 = vld [vmem:[#allocation181_spill] sm:$0xff]  ;;  %v2980_v55 = vadd.f32 %v2979_v30, %v2978_v1 }
 0x15b   : > { %10359 = vst [vmem:[#allocation279_spill] sm:$0xff] %v6132_v28  ;;  %v6191_v28 = vperm.slane %v269_v7, 7  ;;  %v6201_v59 = vmul.f32 %v10378_v31, %v10378_v31  ;;  %v1911_v7 = vadd.f32 %v1910_v5, %v1909_v38  ;;  %v6227_v5 = vmul.f32 %v6185_v6, %v5554_v15  ;;  %v10387_v38 = vld [vmem:[#allocation152_spill] sm:$0xff] }
 0x15c   : > { %10360 = vst [vmem:[#allocation280_spill] sm:$0xff] %v6134_v11  ;;  %v6195_v11 = vmul.f32 %v6146_v12, %v5552_v2  ;;  %v10383_v2 = vld [vmem:[#allocation182_spill] sm:$0xff]  ;;  %v2982_v30 = vadd.f32 %v2981_v45, %v2980_v55  ;;  %v10391_v45 = vld [vmem:[#allocation160_spill] sm:$0xff] }
 0x15d   : > { %10362 = vst [vmem:[#allocation281_spill] sm:$0xff] %v6140_v49  ;;  %v1912_v49 = vsel %vm1748_vm0, %v6158_v40, 0.0  ;;  %v6218_v37 = vmul.f32 %v10383_v2, %v10383_v2  ;;  %v6231_v39 = vmul.f32 %v6191_v28, %v10387_v38  ;;  %v10395_v38 = vld [vmem:[#allocation162_spill] sm:$0xff]  ;;  %v10397_v15 = vld [vmem:[#allocation244_spill] sm:$0xff] }
 0x15e   : > { %10363 = vst [vmem:[#allocation282_spill] sm:$0xff] %v6144_v58  ;;  %v6206_v58 = vperm.slane %v6167_v27, 0  ;;  %v1913_v1 = vadd.f32 %v1912_v49, %v1911_v7  ;;  %v2984_v55 = vadd.f32 %v2983_v3, %v2982_v30  ;;  %v2987_v63 = vsel %vm1748_vm0, %v10397_v15, 0.0  ;;  %v10400_v3 = vld [vmem:[#allocation164_spill] sm:$0xff] }
 0x15f   : > { %10364 = vst [vmem:[#allocation283_spill] sm:$0xff] %v6146_v12  ;;  %v6212_v12 = vperm.slane %v6167_v27, 2 }
 0x160   : > { %10365 = vst [vmem:[#allocation284_spill] sm:$0xff] %v6150_v61  ;;  %v6243_v49 = vmul.f32 %v6206_v58, %v10391_v45  ;;  %v2986_v30 = vadd.f32 %v2985_v14, %v2984_v55  ;;  %v1920_v14 = vsel %vm1748_vm0, %v6237_v9, 0.0  ;;  %v10439_v61 = vld [vmem:[#allocation236_spill] sm:$0xff] }
 0x161   : > { %10366 = vst [vmem:[#allocation285_spill] sm:$0xff] %v6154_v50  ;;  %v6251_v4 = vmul.f32 %v6212_v12, %v10395_v38 }
 0x162   : > { %10368 = vst [vmem:[#allocation286_spill] sm:$0xff] %v6158_v40  ;;  %v1914_v40 = vsel %vm1748_vm0, %v6181_v41, 0.0  ;;  %v2988_v55 = vadd.f32 %v2987_v63, %v2986_v30 }
 0x163   : > { %10369 = vst [vmem:[#allocation287_spill] sm:$0xff] %v6164_v53  ;;  %v1915_v7 = vadd.f32 %v1914_v40, %v1913_v1  ;;  %v6263_v40 = vmul.f32 %v6223_v33, %v10400_v3  ;;  %v10402_v1 = vld [vmem:[#allocation193_spill] sm:$0xff] }
 0x164   : > { %10370 = vst [vmem:[#allocation288_spill] sm:$0xff] %v6171_v44  ;;  %v10411_v3 = vld [vmem:[#allocation197_spill] sm:$0xff] }
 0x165   : > { %10371 = vst [vmem:[#allocation289_spill] sm:$0xff] %v6175_v46  ;;  %v10420_v46 = vld [vmem:[#allocation210_spill] sm:$0xff] }
 0x166   : > { %10373 = vst [vmem:[#allocation290_spill] sm:$0xff] %v6181_v41  ;;  %v1916_v41 = vsel %vm1748_vm0, %v6201_v59, 0.0  ;;  %v6307_v44 = vmul.f32 %v10420_v46, %v10420_v46  ;;  %v10427_v46 = vld [vmem:[#allocation213_spill] sm:$0xff] }
 0x167   : > { %10374 = vst [vmem:[#allocation291_spill] sm:$0xff] %v6185_v6  ;;  %v10393_v6 = vld [vmem:[#allocation161_spill] sm:$0xff]  ;;  %v1917_v15 = vadd.f32 %v1916_v41, %v1915_v7  ;;  %v10413_v41 = vld [vmem:[#allocation199_spill] sm:$0xff]  ;;  %v6326_v53 = vmul.f32 %v10427_v46, %v10427_v46  ;;  %v10435_v46 = vld [vmem:[#allocation218_spill] sm:$0xff] }
 0x168   : > { %10375 = vst [vmem:[#allocation292_spill] sm:$0xff] %v6189_v24  ;;  %v6291_v7 = vmul.f32 %v10413_v41, %v10413_v41  ;;  %v10418_v24 = vld [vmem:[#allocation201_spill] sm:$0xff]  ;;  %v10424_v41 = vld [vmem:[#allocation212_spill] sm:$0xff] }
 0x169   : > { %10376 = vst [vmem:[#allocation293_spill] sm:$0xff] %v6191_v28  ;;  %v6247_v28 = vmul.f32 %v6209_v10, %v10393_v6  ;;  %v10406_v6 = vld [vmem:[#allocation246_spill] sm:$0xff] }
 0x16a   : > { %10377 = vst [vmem:[#allocation294_spill] sm:$0xff] %v6195_v11  ;;  %v2989_v45 = vsel %vm1748_vm0, %v10406_v6, 0.0 }
 0x16b   : > { %10379 = vst [vmem:[#allocation295_spill] sm:$0xff] %v6201_v59  ;;  %v6257_v59 = vmul.f32 %v10398_v20, %v10398_v20  ;;  %v2990_v30 = vadd.f32 %v2989_v45, %v2988_v55  ;;  %v6322_v45 = vperm.slane %v6167_v27, 4 }
 0x16c   : > { %10380 = vst [vmem:[#allocation296_spill] sm:$0xff] %v6206_v58  ;;  %v1918_v58 = vsel %vm1748_vm0, %v6218_v37, 0.0 }
 0x16d   : > { %10381 = vst [vmem:[#allocation297_spill] sm:$0xff] %v6209_v10  ;;  %v6267_v10 = vmul.f32 %v10402_v1, %v10402_v1  ;;  %v1919_v6 = vadd.f32 %v1918_v58, %v1917_v15  ;;  %v1922_v63 = vsel %vm1748_vm0, %v6257_v59, 0.0  ;;  %v10422_v58 = vld [vmem:[#allocation211_spill] sm:$0xff] }
 0x16e   : > { %10382 = vst [vmem:[#allocation298_spill] sm:$0xff] %v6212_v12  ;;  %v10404_v12 = vld [vmem:[#allocation194_spill] sm:$0xff]  ;;  %v6311_v15 = vmul.f32 %v10422_v58, %v10422_v58 }
 0x16f   : > { %10384 = vst [vmem:[#allocation299_spill] sm:$0xff] %v6218_v37  ;;  %v6271_v38 = vmul.f32 %v10404_v12, %v10404_v12  ;;  %v10429_v58 = vld [vmem:[#allocation214_spill] sm:$0xff] }
 0x170   : > { %10385 = vst [vmem:[#allocation300_spill] sm:$0xff] %v6223_v33 }
 0x171   : > { %10386 = vst [vmem:[#allocation301_spill] sm:$0xff] %v6227_v5  ;;  %v10416_v5 = vld [vmem:[#allocation200_spill] sm:$0xff] }
 0x172   : > { %10388 = vst [vmem:[#allocation302_spill] sm:$0xff] %v6231_v39  ;;  %v6297_v11 = vmul.f32 %v10416_v5, %v10416_v5  ;;  %v2993_v5 = vsel %vm1748_vm0, %v6035_v23, 0.0 }
 0x173   : > { %10390 = vst [vmem:[#allocation303_spill] sm:$0xff] %v6237_v9  ;;  %v6301_v9 = vmul.f32 %v10418_v24, %v10418_v24  ;;  %v6317_v24 = vmul.f32 %v10424_v41, %v10424_v41  ;;  %v10431_v41 = vld [vmem:[#allocation216_spill] sm:$0xff] }
 0x174   : > { %10392 = vst [vmem:[#allocation304_spill] sm:$0xff] %v6243_v49  ;;  %v10415_v49 = vld [vmem:[#allocation247_spill] sm:$0xff]  ;;  %v6336_v50 = vmul.f32 %v10431_v41, %v10431_v41  ;;  %v2997_v41 = vsel %vm1748_vm0, %v6043_v19, 0.0 }
 0x175   : > { %10394 = vst [vmem:[#allocation305_spill] sm:$0xff] %v6247_v28  ;;  %v10409_v28 = vld [vmem:[#allocation196_spill] sm:$0xff]  ;;  %v2991_v39 = vsel %vm1748_vm0, %v10415_v49, 0.0  ;;  %v1921_v49 = vadd.f32 %v1920_v14, %v1919_v6  ;;  %v6330_v14 = vmul.f32 %v10429_v58, %v10429_v58  ;;  %v2995_v6 = vsel %vm1748_vm0, %v6039_v0, 0.0 }
 0x176   : > { %10396 = vst [vmem:[#allocation306_spill] sm:$0xff] %v6251_v4  ;;  %v10407_v4 = vld [vmem:[#allocation195_spill] sm:$0xff]  ;;  %v6281_v33 = vmul.f32 %v10409_v28, %v10409_v28  ;;  %v2992_v55 = vadd.f32 %v2991_v39, %v2990_v30  ;;  %v1926_v39 = vsel %vm1748_vm0, %v6271_v38, 0.0  ;;  %v6346_v58 = vmul.f32 %v10435_v46, %v10435_v46 }
 0x177   : > { %10399 = vst [vmem:[#allocation244_spill] sm:$0xff] %v6257_v59  ;;  %v6277_v37 = vmul.f32 %v10407_v4, %v10407_v4  ;;  %v1924_v59 = vsel %vm1748_vm0, %v6267_v10, 0.0  ;;  %v1923_v23 = vadd.f32 %v1922_v63, %v1921_v49  ;;  %v10437_v63 = vld [vmem:[#allocation235_spill] sm:$0xff] }
 0x178   : > { %10401 = vst [vmem:[#allocation307_spill] sm:$0xff] %v6263_v40  ;;  %v6287_v40 = vmul.f32 %v10411_v3, %v10411_v3  ;;  %v2994_v30 = vadd.f32 %v2993_v5, %v2992_v55  ;;  %v6350_v0 = vmul.f32 %v10437_v63, %v10437_v63  ;;  %v10441_v55 = vld [vmem:[#allocation165_spill] sm:$0xff] }
 0x179   : > { %10403 = vst [vmem:[#allocation308_spill] sm:$0xff] %v6267_v10  ;;  %v10433_v10 = vld [vmem:[#allocation217_spill] sm:$0xff]  ;;  %v1925_v49 = vadd.f32 %v1924_v59, %v1923_v23  ;;  %v1928_v5 = vsel %vm1748_vm0, %v6277_v37, 0.0  ;;  %v10445_v59 = vld [vmem:[#allocation239_spill] sm:$0xff] }
 0x17a   : > { %10405 = vst [vmem:[#allocation309_spill] sm:$0xff] %v6271_v38  ;;  %v6340_v3 = vmul.f32 %v10433_v10, %v10433_v10  ;;  %v6356_v10 = vmul.f32 %v10439_v61, %v10439_v61  ;;  %v6362_v38 = vmul.f32 %v6322_v45, %v10441_v55  ;;  %v2996_v46 = vadd.f32 %v2995_v6, %v2994_v30  ;;  %v271_v30 = vld [vmem:[%s4956_s29 + $0x50] sm:$0xff] }
 0x17b   : > { %10408 = vst [vmem:[#allocation246_spill] sm:$0xff] %v6277_v37  ;;  %v6370_v23 = vmul.f32 %v10445_v59, %v10445_v59  ;;  %v1927_v19 = vadd.f32 %v1926_v39, %v1925_v49  ;;  %v2999_v61 = vsel %vm1748_vm0, %v6056_v16, 0.0  ;;  %v1930_v6 = vsel %vm1748_vm0, %v6281_v33, 0.0  ;;  %v10453_v39 = vld [vmem:[#allocation245_spill] sm:$0xff] }
 0x17c   : > { %10410 = vst [vmem:[#allocation310_spill] sm:$0xff] %v6281_v33  ;;  %v2998_v55 = vadd.f32 %v2997_v41, %v2996_v46  ;;  %v6391_v16 = vmul.f32 %v10453_v39, %v10453_v39  ;;  %v6401_v46 = vperm.slane %v6167_v27, 6  ;;  %v6406_v39 = vperm.slane %v271_v30, 0 }
 0x17d   : > { %10412 = vst [vmem:[#allocation311_spill] sm:$0xff] %v6287_v40  ;;  %v1929_v49 = vadd.f32 %v1928_v5, %v1927_v19  ;;  %v3003_v5 = vsel %vm1748_vm0, %v6064_v54, 0.0  ;;  %v6412_v19 = vperm.slane %v271_v30, 1  ;;  %v6424_v54 = vperm.slane %v271_v30, 5 }
 0x17e   : > { %10414 = vst [vmem:[#allocation312_spill] sm:$0xff] %v6291_v7  ;;  %v3000_v41 = vadd.f32 %v2999_v61, %v2998_v55  ;;  %v6418_v61 = vperm.slane %v271_v30, 4  ;;  %v1936_v55 = vsel %vm1748_vm0, %v6297_v11, 0.0 }
 0x17f   : > { %10417 = vst [vmem:[#allocation247_spill] sm:$0xff] %v6297_v11  ;;  %v1931_v33 = vadd.f32 %v1930_v6, %v1929_v49  ;;  %v1940_v11 = vsel %vm1748_vm0, %v6307_v44, 0.0 }
 0x180   : > { %10419 = vst [vmem:[#allocation313_spill] sm:$0xff] %v6301_v9 }
 0x181   : > { %10421 = vst [vmem:[#allocation314_spill] sm:$0xff] %v6307_v44  ;;  %v3011_v44 = vsel %vm1748_vm0, %v6092_v36, 0.0  ;;  %v6496_v36 = vmul.f32 %v6045_v8, %v6045_v8 }
 0x182   : > { %10423 = vst [vmem:[#allocation315_spill] sm:$0xff] %v6311_v15 }
 0x183   : > { %10425 = vst [vmem:[#allocation316_spill] sm:$0xff] %v6317_v24 }
 0x184   : > { %10426 = vst [vmem:[#allocation317_spill] sm:$0xff] %v6322_v45 }
 0x185   : > { %10428 = vst [vmem:[#allocation318_spill] sm:$0xff] %v6326_v53 }
 0x186   : > { %10430 = vst [vmem:[#allocation319_spill] sm:$0xff] %v6330_v14 }
 0x187   : > { %10432 = vst [vmem:[#allocation320_spill] sm:$0xff] %v6336_v50 }
 0x188   : > { %10434 = vst [vmem:[#allocation321_spill] sm:$0xff] %v6340_v3 }
 0x189   : > { %10436 = vst [vmem:[#allocation322_spill] sm:$0xff] %v6346_v58  ;;  %v10443_v58 = vld [vmem:[#allocation237_spill] sm:$0xff] }
 0x18a   : > { %10438 = vst [vmem:[#allocation323_spill] sm:$0xff] %v6350_v0  ;;  %v6366_v63 = vmul.f32 %v10443_v58, %v10443_v58  ;;  %v10449_v0 = vld [vmem:[#allocation241_spill] sm:$0xff]  ;;  %v6398_v58 = vperm.slane %v6167_v27, 5 }
 0x18b   : > { %10440 = vst [vmem:[#allocation324_spill] sm:$0xff] %v6356_v10  ;;  %v10447_v10 = vld [vmem:[#allocation240_spill] sm:$0xff]  ;;  %v6380_v45 = vmul.f32 %v10449_v0, %v10449_v0  ;;  %v1932_v0 = vsel %vm1748_vm0, %v6287_v40, 0.0  ;;  %v6414_v40 = vperm.slane %v271_v30, 2 }
 0x18c   : > { %10442 = vst [vmem:[#allocation325_spill] sm:$0xff] %v6362_v38  ;;  %v6376_v37 = vmul.f32 %v10447_v10, %v10447_v10  ;;  %v10451_v38 = vld [vmem:[#allocation242_spill] sm:$0xff]  ;;  %v3001_v10 = vsel %vm1748_vm0, %v6060_v32, 0.0  ;;  %v1934_v32 = vsel %vm1748_vm0, %v6291_v7, 0.0  ;;  %v6428_v6 = vmul.f32 %v6398_v58, %v5625_v62 }
 0x18d   : > { %10444 = vst [vmem:[#allocation326_spill] sm:$0xff] %v6366_v63  ;;  %v6387_v59 = vmul.f32 %v10451_v38, %v10451_v38  ;;  %v6404_v38 = vperm.slane %v6167_v27, 7  ;;  %v3005_v27 = vsel %vm1748_vm0, %v6072_v29, 0.0  ;;  %v3007_v29 = vsel %vm1748_vm0, %v6076_v48, 0.0 }
 0x18e   : > { %10446 = vst [vmem:[#allocation327_spill] sm:$0xff] %v6370_v23  ;;  %v6454_v48 = vmul.f32 %v6414_v40, %v10367_v13  ;;  %v3019_v13 = vsel %vm1748_vm0, %v6120_v47, 0.0 }
 0x18f   : > { %10448 = vst [vmem:[#allocation328_spill] sm:$0xff] %v6376_v37 }
 0x190   : > { %10450 = vst [vmem:[#allocation329_spill] sm:$0xff] %v6380_v45  ;;  %v6416_v45 = vperm.slane %v271_v30, 3 }
 0x191   : > { %10452 = vst [vmem:[#allocation330_spill] sm:$0xff] %v6387_v59  ;;  %v1933_v59 = vadd.f32 %v1932_v0, %v1931_v33  ;;  %v6434_v33 = vmul.f32 %v6401_v46, %v5627_v22  ;;  %v1938_v0 = vsel %vm1748_vm0, %v6301_v9, 0.0  ;;  %v3009_v9 = vsel %vm1748_vm0, %v6080_v52, 0.0  ;;  %v10506_v62 = vld [vmem:[#allocation323_spill] sm:$0xff] }
 0x192   : > { %10454 = vst [vmem:[#allocation331_spill] sm:$0xff] %v6391_v16  ;;  %v3002_v16 = vadd.f32 %v3001_v10, %v3000_v41  ;;  %v6430_v10 = vperm.slane %v271_v30, 6  ;;  %v6442_v41 = vmul.f32 %v6404_v38, %v5629_v56  ;;  %v10503_v56 = vld [vmem:[#allocation287_spill] sm:$0xff] }
 0x193   : > { %10455 = vst [vmem:[#allocation332_spill] sm:$0xff] %v6398_v58  ;;  %v1935_v7 = vadd.f32 %v1934_v32, %v1933_v59  ;;  %v6450_v32 = vmul.f32 %v6412_v19, %v10361_v18  ;;  %v975_v18 = vld.sshfl [vmem:[#allocation1 + $0x28] sm:$0xff pattern:$0x73625140] }
 0x194   : > { %10456 = vst [vmem:[#allocation333_spill] sm:$0xff] %v6401_v46  ;;  %v3004_v49 = vadd.f32 %v3003_v5, %v3002_v16  ;;  %v6446_v16 = vmul.f32 %v6406_v39, %v10356_v17  ;;  %v6474_v52 = vmul.f32 %v6430_v10, %v10389_v43  ;;  %v6510_v43 = vperm.slane %v271_v30, 7  ;;  %v10499_v17 = vld [vmem:[#allocation322_spill] sm:$0xff] }
 0x195   : > { %10457 = vst [vmem:[#allocation334_spill] sm:$0xff] %v6404_v38  ;;  %v1937_v5 = vadd.f32 %v1936_v55, %v1935_v7  ;;  %v6466_v7 = vmul.f32 %v6418_v61, %v10378_v31  ;;  %v10471_v38 = vld [vmem:[#allocation268_spill] sm:$0xff] }
 0x196   : > { %10458 = vst [vmem:[#allocation335_spill] sm:$0xff] %v6406_v39  ;;  %v3006_v59 = vadd.f32 %v3005_v27, %v3004_v49  ;;  %v6462_v39 = vmul.f32 %v6416_v45, %v10372_v42  ;;  %v6470_v49 = vmul.f32 %v6424_v54, %v10383_v2  ;;  %v6502_v46 = vmul.f32 %v10471_v38, %v10471_v38 }
 0x197   : > { %10459 = vst [vmem:[#allocation336_spill] sm:$0xff] %v6412_v19  ;;  %v1939_v55 = vadd.f32 %v1938_v0, %v1937_v5  ;;  %v1942_v0 = vsel %vm1748_vm0, %v6311_v15, 0.0  ;;  %v3013_v19 = vsel %vm1748_vm0, %v6098_v26, 0.0  ;;  %v6506_v15 = vmul.f32 %v6066_v51, %v6066_v51 }
 0x198   : > { %10460 = vst [vmem:[#allocation337_spill] sm:$0xff] %v6414_v40  ;;  %v3008_v27 = vadd.f32 %v3007_v29, %v3006_v59  ;;  %v10465_v40 = vld [vmem:[#allocation204_spill] sm:$0xff]  ;;  %v6485_v29 = vmul.f32 %v6029_v60, %v6029_v60  ;;  %v3015_v26 = vsel %vm1748_vm0, %v6102_v34, 0.0  ;;  %v6534_v34 = vmul.f32 %v6082_v21, %v6082_v21 }
 0x199   : > { %10461 = vst [vmem:[#allocation338_spill] sm:$0xff] %v6416_v45  ;;  %vm532_vm1 = vcmp.lt.s32.totalorder %v10465_v40, 16001  ;;  %v6481_v45 = vmul.f32 %v6027_v57, %v6027_v57  ;;  %v272_v59 = vld [vmem:[%s4956_s29 + $0x58] sm:$0xff] }
 0x19a   : > { %10462 = vst [vmem:[#allocation339_spill] sm:$0xff] %v6418_v61  ;;  %v3010_v5 = vadd.f32 %v3009_v9, %v3008_v27  ;;  %v1941_v61 = vadd.f32 %v1940_v11, %v1939_v55  ;;  %v1944_v9 = vsel %vm1748_vm0, %v6317_v24, 0.0  ;;  %v6512_v2 = vperm.slane %v272_v59, 0 }
 0x19b   : > { %10463 = vst [vmem:[#allocation340_spill] sm:$0xff] %v6424_v54  ;;  %v1946_v11 = vsel %vm1748_vm0, %v6326_v53, 0.0  ;;  %v6518_v55 = vperm.slane %v272_v59, 1  ;;  %v6520_v31 = vperm.slane %v272_v59, 2  ;;  %v6524_v24 = vmul.f32 %v6068_v25, %v6068_v25  ;;  %v10532_v25 = vld [vmem:[#allocation213_spill] sm:$0xff] }
 0x19c   : > { %10464 = vst [vmem:[#allocation341_spill] sm:$0xff] %v6430_v10  ;;  %v10468_v10 = vld [vmem:[#allocation266_spill] sm:$0xff]  ;;  %v3012_v27 = vadd.f32 %v3011_v44, %v3010_v5  ;;  %v1943_v58 = vadd.f32 %v1942_v0, %v1941_v61  ;;  %v6526_v30 = vperm.slane %v272_v59, 3  ;;  %v3017_v61 = vsel %vm1748_vm0, %v6112_v35, 0.0 }
 0x19d   : > { %10466 = vst [vmem:[#allocation342_spill] sm:$0xff] %v6481_v45  ;;  %v6492_v54 = vmul.f32 %v10468_v10, %v10468_v10  ;;  %v6530_v0 = vld.sshfl [vmem:[#allocation1] sm:$0xff pattern:$0x73625140]  ;;  %v1948_v5 = vsel %vm1748_vm0, %v6330_v14, 0.0  ;;  %v6548_v35 = vmul.f32 %v6512_v2, %v10402_v1  ;;  %v1950_v14 = vsel %vm1748_vm0, %v6336_v50, 0.0 }
 0x19e   : > { %10467 = vst [vmem:[#allocation343_spill] sm:$0xff] %v6485_v29  ;;  %v3014_v42 = vadd.f32 %v3013_v19, %v3012_v27  ;;  %v1945_v44 = vadd.f32 %v1944_v9, %v1943_v58  ;;  %v6538_v19 = vperm.slane %v272_v59, 4  ;;  %v6540_v53 = vld.sshfl [vmem:[#allocation1 + $0x8] sm:$0xff pattern:$0x73625140]  ;;  %v6544_v9 = vmul.f32 %v6510_v43, %v10398_v20 }
 0x19f   : > { %10469 = vst [vmem:[#allocation344_spill] sm:$0xff] %v6492_v54  ;;  %v6570_v50 = vmul.f32 %v6526_v30, %v10409_v28  ;;  %v6592_v28 = vperm.slane %v272_v59, 5  ;;  %v10497_v1 = vld [vmem:[#allocation285_spill] sm:$0xff] }
 0x1a0   : > { %10470 = vst [vmem:[#allocation345_spill] sm:$0xff] %v6496_v36  ;;  %v3016_v27 = vadd.f32 %v3015_v26, %v3014_v42  ;;  %v1947_v58 = vadd.f32 %v1946_v11, %v1945_v44  ;;  %v6556_v42 = vmul.f32 %v6518_v55, %v10404_v12  ;;  %v6560_v26 = vmul.f32 %v6520_v31, %v10407_v4  ;;  %v6562_v44 = vld.sshfl [vmem:[#allocation1 + $0x10] sm:$0xff pattern:$0x73625140]  ;;  %v10578_v10 = vld [vmem:[#allocation325_spill] sm:$0xff] }
 0x1a1   : > { %10472 = vst [vmem:[#allocation346_spill] sm:$0xff] %v6502_v46  ;;  %v6574_v12 = vld.sshfl [vmem:[#allocation1 + $0x18] sm:$0xff pattern:$0x73625140]  ;;  %v3023_v20 = vsel %vm1748_vm0, %v10497_v1, 0.0  ;;  %v3025_v1 = vsel %vm1748_vm0, %v10503_v56, 0.0 }
 0x1a2   : > { %10473 = vst [vmem:[#allocation347_spill] sm:$0xff] %v6506_v15  ;;  %v3018_v11 = vadd.f32 %v3017_v61, %v3016_v27  ;;  %v1949_v47 = vadd.f32 %v1948_v5, %v1947_v58  ;;  %v6578_v61 = vmul.f32 %v6540_v53, %v6540_v53  ;;  %v1952_v27 = vsel %vm1748_vm0, %v6340_v3, 0.0  ;;  %v6586_v58 = vld.sshfl [vmem:[#allocation1 + $0x20] sm:$0xff pattern:$0x73625140] }
 0x1a3   : > { %10474 = vst [vmem:[#allocation348_spill] sm:$0xff] %v6510_v43  ;;  %v10489_v43 = vld [vmem:[#allocation284_spill] sm:$0xff]  ;;  %v6598_v3 = vmul.f32 %v6562_v44, %v6562_v44  ;;  %v6615_v22 = vmul.f32 %v6586_v58, %v6586_v58 }
 0x1a4   : > { %10475 = vst [vmem:[#allocation349_spill] sm:$0xff] %v6512_v2  ;;  %v6566_v2 = vmul.f32 %v6530_v0, %v6530_v0  ;;  %v3020_v5 = vadd.f32 %v3019_v13, %v3018_v11  ;;  %v273_v13 = vld [vmem:[%s4956_s29 + $0x60] sm:$0xff]  ;;  %v6603_v11 = vperm.slane %v272_v59, 6 }
 0x1a5   : > { %10476 = vst [vmem:[#allocation350_spill] sm:$0xff] %v6518_v55  ;;  %v3021_v55 = vsel %vm1748_vm0, %v10489_v43, 0.0  ;;  %v1951_v43 = vadd.f32 %v1950_v14, %v1949_v47  ;;  %v6609_v47 = vperm.slane %v272_v59, 7  ;;  %v10508_v59 = vld [vmem:[#allocation199_spill] sm:$0xff]  ;;  %v10510_v56 = vld [vmem:[#allocation288_spill] sm:$0xff]  ;;  %v6651_v21 = vperm.slane %v273_v13, 4 }
 0x1a6   : > { %10477 = vst [vmem:[#allocation351_spill] sm:$0xff] %v6520_v31  ;;  %v10492_v31 = vld [vmem:[#allocation197_spill] sm:$0xff] }
 0x1a7   : > { %10478 = vst [vmem:[#allocation352_spill] sm:$0xff] %v6524_v24  ;;  %v6584_v4 = vmul.f32 %v6538_v19, %v10492_v31  ;;  %v3022_v31 = vadd.f32 %v3021_v55, %v3020_v5  ;;  %v1953_v14 = vadd.f32 %v1952_v27, %v1951_v43  ;;  %v1956_v55 = vsel %vm1748_vm0, %v10506_v62, 0.0 }
 0x1a8   : > { %10479 = vst [vmem:[#allocation353_spill] sm:$0xff] %v6526_v30  ;;  %v6590_v30 = vsel %vm532_vm1, %v975_v18, 0.0  ;;  %v6607_v18 = vmul.f32 %v6574_v12, %v6574_v12  ;;  %v6627_v27 = vmul.f32 %v6592_v28, %v10508_v59  ;;  %v3027_v43 = vsel %vm1748_vm0, %v10510_v56, 0.0  ;;  %v10518_v59 = vld [vmem:[#allocation289_spill] sm:$0xff] }
 0x1a9   : > { %10480 = vst [vmem:[#allocation354_spill] sm:$0xff] %v6530_v0  ;;  %v3024_v5 = vadd.f32 %v3023_v20, %v3022_v31  ;;  %v3029_v56 = vsel %vm1748_vm0, %v10518_v59, 0.0  ;;  %v6649_v0 = vperm.slane %v273_v13, 3  ;;  %v1962_v59 = vsel %vm1748_vm0, %v6370_v23, 0.0 }
 0x1aa   : > { %10481 = vst [vmem:[#allocation355_spill] sm:$0xff] %v6534_v34  ;;  %v1964_v23 = vsel %vm1748_vm0, %v6376_v37, 0.0 }
 0x1ab   : > { %10482 = vst [vmem:[#allocation356_spill] sm:$0xff] %v6538_v19  ;;  %v1954_v19 = vsel %vm1748_vm0, %v10499_v17, 0.0  ;;  %v6619_v17 = vmul.f32 %v6590_v30, %v6590_v30  ;;  %v3026_v31 = vadd.f32 %v3025_v1, %v3024_v5  ;;  %v6653_v1 = vperm.slane %v273_v13, 5  ;;  %v10524_v5 = vld [vmem:[#allocation292_spill] sm:$0xff] }
 0x1ac   : > { %10483 = vst [vmem:[#allocation357_spill] sm:$0xff] %v6540_v53  ;;  %v6633_v53 = vperm.slane %v273_v13, 1 }
 0x1ad   : > { %10484 = vst [vmem:[#allocation358_spill] sm:$0xff] %v6556_v42 }
 0x1ae   : > { %10485 = vst [vmem:[#allocation359_spill] sm:$0xff] %v6560_v26 }
 0x1af   : > { %10486 = vst [vmem:[#allocation360_spill] sm:$0xff] %v6562_v44  ;;  %v6623_v44 = vperm.slane %v273_v13, 0 }
 0x1b0   : > { %10487 = vst [vmem:[#allocation361_spill] sm:$0xff] %v6566_v2 }
 0x1b1   : > { %10488 = vst [vmem:[#allocation362_spill] sm:$0xff] %v6570_v50 }
 0x1b2   : > { %10490 = vst [vmem:[#allocation284_spill] sm:$0xff] %v6574_v12  ;;  %v1955_v12 = vadd.f32 %v1954_v19, %v1953_v14  ;;  %v6639_v19 = vperm.slane %v273_v13, 2  ;;  %v10516_v14 = vld [vmem:[#allocation201_spill] sm:$0xff] }
 0x1b3   : > { %10491 = vst [vmem:[#allocation363_spill] sm:$0xff] %v6578_v61 }
 0x1b4   : > { %10493 = vst [vmem:[#allocation364_spill] sm:$0xff] %v6584_v4  ;;  %v1957_v20 = vadd.f32 %v1956_v55, %v1955_v12  ;;  %v10522_v12 = vld [vmem:[#allocation210_spill] sm:$0xff] }
 0x1b5   : > { %10494 = vst [vmem:[#allocation365_spill] sm:$0xff] %v6586_v58  ;;  %v10511_v58 = vld [vmem:[#allocation324_spill] sm:$0xff]  ;;  %v6657_v55 = vmul.f32 %v6623_v44, %v10522_v12 }
 0x1b6   : > { %10495 = vst [vmem:[#allocation366_spill] sm:$0xff] %v6590_v30  ;;  %v1958_v40 = vsel %vm1748_vm0, %v10511_v58, 0.0  ;;  %v10513_v30 = vld [vmem:[#allocation200_spill] sm:$0xff]  ;;  %v1960_v58 = vsel %vm1748_vm0, %v6366_v63, 0.0  ;;  %v6666_v63 = vperm.slane %v273_v13, 6 }
 0x1b7   : > { %10496 = vst [vmem:[#allocation367_spill] sm:$0xff] %v6592_v28  ;;  %v6637_v62 = vmul.f32 %v6603_v11, %v10513_v30  ;;  %v6643_v28 = vmul.f32 %v6609_v47, %v10516_v14  ;;  %v1959_v30 = vadd.f32 %v1958_v40, %v1957_v20  ;;  %v6664_v14 = vld [vmem:[%s4956_s29 + $0x68] sm:$0xff]  ;;  %v6672_v20 = vperm.slane %v273_v13, 7 }
 0x1b8   : > { %10498 = vst [vmem:[#allocation285_spill] sm:$0xff] %v6598_v3  ;;  %v6691_v13 = vperm.slane %v6664_v14, 0 }
 0x1b9   : > { %10500 = vst [vmem:[#allocation368_spill] sm:$0xff] %v6603_v11  ;;  %v3028_v11 = vadd.f32 %v3027_v43, %v3026_v31  ;;  %v1961_v31 = vadd.f32 %v1960_v58, %v1959_v30 }
 0x1ba   : > { %10501 = vst [vmem:[#allocation369_spill] sm:$0xff] %v6607_v18 }
 0x1bb   : > { %10502 = vst [vmem:[#allocation370_spill] sm:$0xff] %v6609_v47  ;;  %v3031_v47 = vsel %vm1748_vm0, %v10524_v5, 0.0  ;;  %v3030_v40 = vadd.f32 %v3029_v56, %v3028_v11  ;;  %v10531_v5 = vld [vmem:[#allocation294_spill] sm:$0xff]  ;;  %v1963_v58 = vadd.f32 %v1962_v59, %v1961_v31  ;;  %v10537_v56 = vld [vmem:[#allocation216_spill] sm:$0xff]  ;;  %v6707_v31 = vperm.slane %v6664_v14, 1 }
 0x1bc   : > { %10504 = vst [vmem:[#allocation287_spill] sm:$0xff] %v6615_v22 }
 0x1bd   : > { %10505 = vst [vmem:[#allocation371_spill] sm:$0xff] %v6619_v17  ;;  %v3032_v30 = vadd.f32 %v3031_v47, %v3030_v40  ;;  %v10543_v47 = vld [vmem:[#allocation8_spill] sm:$0xff]  ;;  %v1965_v40 = vadd.f32 %v1964_v23, %v1963_v58  ;;  %v6720_v23 = vperm.slane %v6664_v14, 2  ;;  %v10552_v58 = vld [vmem:[#allocation235_spill] sm:$0xff] }
 0x1be   : > { %10507 = vst [vmem:[#allocation372_spill] sm:$0xff] %v6623_v44  ;;  %v10529_v44 = vld [vmem:[#allocation212_spill] sm:$0xff]  ;;  %v2132_v59 = vrot.slane %v10543_v47, 1 }
 0x1bf   : > { %10509 = vst [vmem:[#allocation373_spill] sm:$0xff] %v6627_v27  ;;  %v6676_v12 = vmul.f32 %v6639_v19, %v10529_v44  ;;  %v10540_v44 = vld [vmem:[#allocation329_spill] sm:$0xff] }
 0x1c0   : > { %10512 = vst [vmem:[#allocation288_spill] sm:$0xff] %v6633_v53 }
 0x1c1   : > { %10514 = vst [vmem:[#allocation374_spill] sm:$0xff] %v6637_v62  ;;  %v6684_v62 = vmul.f32 %v6649_v0, %v10532_v25  ;;  %v10541_v25 = vld [vmem:[#allocation217_spill] sm:$0xff] }
 0x1c2   : > { %10515 = vst [vmem:[#allocation375_spill] sm:$0xff] %v6639_v19  ;;  %v6695_v19 = vmul.f32 %v6653_v1, %v10537_v56  ;;  %v10547_v56 = vld [vmem:[#allocation302_spill] sm:$0xff] }
 0x1c3   : > { %10517 = vst [vmem:[#allocation376_spill] sm:$0xff] %v6643_v28  ;;  %v10526_v28 = vld [vmem:[#allocation211_spill] sm:$0xff] }
 0x1c4   : > { %10519 = vst [vmem:[#allocation289_spill] sm:$0xff] %v6649_v0  ;;  %v6670_v43 = vmul.f32 %v6633_v53, %v10526_v28  ;;  %v10534_v53 = vld [vmem:[#allocation214_spill] sm:$0xff]  ;;  %v1966_v0 = vsel %vm1748_vm0, %v10540_v44, 0.0  ;;  %v6703_v28 = vmul.f32 %v6666_v63, %v10541_v25 }
 0x1c5   : > { %10520 = vst [vmem:[#allocation377_spill] sm:$0xff] %v6651_v21  ;;  %v6688_v11 = vmul.f32 %v6651_v21, %v10534_v53  ;;  %v10545_v53 = vld [vmem:[#allocation218_spill] sm:$0xff] }
 0x1c6   : > { %10521 = vst [vmem:[#allocation378_spill] sm:$0xff] %v6653_v1  ;;  %v6711_v1 = vmul.f32 %v6672_v20, %v10545_v53 }
 0x1c7   : > { %10523 = vst [vmem:[#allocation379_spill] sm:$0xff] %v6657_v55  ;;  %v3033_v55 = vsel %vm1748_vm0, %v10531_v5, 0.0  ;;  %v10539_v5 = vld [vmem:[#allocation301_spill] sm:$0xff] }
 0x1c8   : > { %10525 = vst [vmem:[#allocation292_spill] sm:$0xff] %v6666_v63  ;;  %v3035_v37 = vsel %vm1748_vm0, %v10539_v5, 0.0  ;;  %v3034_v21 = vadd.f32 %v3033_v55, %v3032_v30  ;;  %v3037_v5 = vsel %vm1748_vm0, %v10547_v56, 0.0  ;;  %v10549_v63 = vld [vmem:[#allocation9_spill] sm:$0xff]  ;;  %v10550_v55 = vld [vmem:[#allocation10_spill] sm:$0xff]  ;;  %v10555_v56 = vld [vmem:[#allocation331_spill] sm:$0xff] }
 0x1c9   : > { %10527 = vst [vmem:[#allocation380_spill] sm:$0xff] %v6670_v43  ;;  %v2133_v25 = vrot.slane %v10549_v63, 1  ;;  %v2134_v30 = vrot.slane %v10550_v55, 1 }
 0x1ca   : > { %10528 = vst [vmem:[#allocation381_spill] sm:$0xff] %v6672_v20  ;;  %v10554_v20 = vld [vmem:[#allocation304_spill] sm:$0xff] }
 0x1cb   : > { %10530 = vst [vmem:[#allocation382_spill] sm:$0xff] %v6676_v12  ;;  %v3039_v53 = vsel %vm1748_vm0, %v10554_v20, 0.0  ;;  %v10557_v12 = vld [vmem:[#allocation13_spill] sm:$0xff]  ;;  %v1972_v20 = vsel %vm1748_vm0, %v6481_v45, 0.0 }
 0x1cc   : > { %10533 = vst [vmem:[#allocation294_spill] sm:$0xff] %v6684_v62  ;;  %v6724_v62 = vmul.f32 %v6691_v13, %v10552_v58  ;;  %v2136_v43 = vrot.slane %v10557_v12, 1 }
 0x1cd   : > { %10535 = vst [vmem:[#allocation383_spill] sm:$0xff] %v6688_v11  ;;  %v3036_v11 = vadd.f32 %v3035_v37, %v3034_v21  ;;  %v10556_v21 = vld [vmem:[#allocation12_spill] sm:$0xff] }
 0x1ce   : > { %10536 = vst [vmem:[#allocation384_spill] sm:$0xff] %v6691_v13  ;;  %v2135_v37 = vrot.slane %v10556_v21, 1  ;;  %v10561_v13 = vld [vmem:[#allocation305_spill] sm:$0xff] }
 0x1cf   : > { %10538 = vst [vmem:[#allocation385_spill] sm:$0xff] %v6695_v19  ;;  %v10548_v19 = vld [vmem:[#allocation330_spill] sm:$0xff]  ;;  %v3041_v58 = vsel %vm1748_vm0, %v10561_v13, 0.0  ;;  %v1974_v13 = vsel %vm1748_vm0, %v6485_v29, 0.0 }
 0x1d0   : > { %10542 = vst [vmem:[#allocation301_spill] sm:$0xff] %v6703_v28  ;;  %v1968_v44 = vsel %vm1748_vm0, %v10548_v19, 0.0  ;;  %v1967_v28 = vadd.f32 %v1966_v0, %v1965_v40  ;;  %v3038_v19 = vadd.f32 %v3037_v5, %v3036_v11  ;;  %v6733_v0 = vperm.slane %v6664_v14, 3  ;;  %v10559_v40 = vld [vmem:[#allocation236_spill] sm:$0xff] }
 0x1d1   : > { %10544 = vst [vmem:[#allocation8_spill] sm:$0xff] %v6707_v31  ;;  %v6737_v27 = vmul.f32 %v6707_v31, %v10559_v40  ;;  %v10562_v11 = vld [vmem:[#allocation16_spill] sm:$0xff]  ;;  %v10567_v31 = vld [vmem:[#allocation306_spill] sm:$0xff] }
 0x1d2   : > { %10546 = vst [vmem:[#allocation386_spill] sm:$0xff] %v6711_v1  ;;  %v1970_v1 = vsel %vm1748_vm0, %v10555_v56, 0.0  ;;  %v1969_v51 = vadd.f32 %v1968_v44, %v1967_v28  ;;  %v3040_v56 = vadd.f32 %v3039_v53, %v3038_v19  ;;  %v2137_v5 = vrot.slane %v10562_v11, 1  ;;  %v10565_v44 = vld [vmem:[#allocation237_spill] sm:$0xff]  ;;  %v10568_v53 = vld [vmem:[#allocation19_spill] sm:$0xff]  ;;  %v10575_v19 = vld [vmem:[#allocation26_spill] sm:$0xff] }
 0x1d3   : > { %10551 = vst [vmem:[#allocation302_spill] sm:$0xff] %v6720_v23  ;;  %v6746_v28 = vperm.slane %v6664_v14, 4  ;;  %v6750_v8 = vmul.f32 %v6720_v23, %v10565_v44  ;;  %v3043_v40 = vsel %vm1748_vm0, %v10567_v31, 0.0  ;;  %v10573_v23 = vld [vmem:[#allocation307_spill] sm:$0xff]  ;;  %v1976_v31 = vsel %vm1748_vm0, %v6492_v54, 0.0 }
 0x1d4   : > { %10553 = vst [vmem:[#allocation9_spill] sm:$0xff] %v6724_v62  ;;  %v10563_v62 = vld [vmem:[#allocation17_spill] sm:$0xff]  ;;  %v1971_v4 = vadd.f32 %v1970_v1, %v1969_v51  ;;  %v3042_v45 = vadd.f32 %v3041_v58, %v3040_v56  ;;  %v6759_v51 = vperm.slane %v6664_v14, 5  ;;  %v10571_v1 = vld [vmem:[#allocation239_spill] sm:$0xff]  ;;  %v3045_v44 = vsel %vm1748_vm0, %v10573_v23, 0.0 }
 0x1d5   : > { %10558 = vst [vmem:[#allocation10_spill] sm:$0xff] %v6733_v0  ;;  %v6763_v26 = vmul.f32 %v6733_v0, %v10571_v1  ;;  %v10574_v58 = vld [vmem:[#allocation25_spill] sm:$0xff]  ;;  %v3047_v0 = vsel %vm1748_vm0, %v10578_v10, 0.0  ;;  %v10579_v1 = vld [vmem:[#allocation27_spill] sm:$0xff]  ;;  %v1978_v23 = vsel %vm1748_vm0, %v6496_v36, 0.0  ;;  %v6781_v54 = vperm.slane %v6664_v14, 6 }
 0x1d6   : > { %10560 = vst [vmem:[#allocation304_spill] sm:$0xff] %v6737_v27  ;;  %v10569_v27 = vld [vmem:[#allocation23_spill] sm:$0xff]  ;;  %v1973_v38 = vadd.f32 %v1972_v20, %v1971_v4  ;;  %v3044_v29 = vadd.f32 %v3043_v40, %v3042_v45  ;;  %v10576_v4 = vld [vmem:[#allocation240_spill] sm:$0xff]  ;;  %v10583_v10 = vld [vmem:[#allocation30_spill] sm:$0xff]  ;;  %v2386_v56 = vmul.f32 %v2134_v30, %v10550_v55  ;;  %v1984_v30 = vsel %vm1748_vm0, %v6524_v24, 0.0 }
 0x1d7   : > { %10564 = vst [vmem:[#allocation12_spill] sm:$0xff] %v6746_v28  ;;  %v6773_v20 = vmul.f32 %v6746_v28, %v10576_v4  ;;  %v10581_v40 = vld [vmem:[#allocation28_spill] sm:$0xff]  ;;  %v3049_v28 = vsel %vm1748_vm0, %v6428_v6, 0.0  ;;  %v1982_v6 = vsel %vm1748_vm0, %v6506_v15, 0.0  ;;  %v6802_v4 = vperm.slane %v6664_v14, 7 }
 0x1d8   : > { %10566 = vst [vmem:[#allocation305_spill] sm:$0xff] %v6750_v8  ;;  %v1975_v50 = vadd.f32 %v1974_v13, %v1973_v38  ;;  %v3046_v45 = vadd.f32 %v3045_v44, %v3044_v29  ;;  %v10582_v38 = vld [vmem:[#allocation241_spill] sm:$0xff]  ;;  %v2384_v29 = vmul.f32 %v2132_v59, %v10543_v47  ;;  %v3055_v14 = vsel %vm1748_vm0, %v6446_v16, 0.0 }
 0x1d9   : > { %10570 = vst [vmem:[#allocation306_spill] sm:$0xff] %v6759_v51  ;;  %v6786_v13 = vmul.f32 %v6759_v51, %v10582_v38  ;;  %v6818_v51 = vld [vmem:[%s4956_s29 + $0x70] sm:$0xff]  ;;  %v3057_v16 = vsel %vm1748_vm0, %v6450_v32, 0.0 }
 0x1da   : > { %10572 = vst [vmem:[#allocation387_spill] sm:$0xff] %v6763_v26  ;;  %v1977_v8 = vadd.f32 %v1976_v31, %v1975_v50  ;;  %v1980_v26 = vsel %vm1748_vm0, %v6502_v46, 0.0  ;;  %v3048_v36 = vadd.f32 %v3047_v0, %v3046_v45  ;;  %v3051_v50 = vsel %vm1748_vm0, %v6434_v33, 0.0  ;;  %v10586_v0 = vld [vmem:[#allocation242_spill] sm:$0xff] }
 0x1db   : > { %10577 = vst [vmem:[#allocation307_spill] sm:$0xff] %v6773_v20  ;;  %v10584_v20 = vld [vmem:[#allocation31_spill] sm:$0xff]  ;;  %v2385_v31 = vmul.f32 %v2133_v25, %v10549_v63  ;;  %v6806_v45 = vmul.f32 %v6781_v54, %v10586_v0  ;;  %v3053_v33 = vsel %vm1748_vm0, %v6442_v41, 0.0  ;;  %v2387_v25 = vmul.f32 %v2135_v37, %v10556_v21 }
 0x1dc   : > { %10580 = vst [vmem:[#allocation325_spill] sm:$0xff] %v6781_v54  ;;  %v1979_v44 = vadd.f32 %v1978_v23, %v1977_v8  ;;  %v3050_v59 = vadd.f32 %v3049_v28, %v3048_v36  ;;  %v10587_v23 = vld [vmem:[#allocation32_spill] sm:$0xff]  ;;  %v2510_v46 = vsel %vm1748_vm0, %v2384_v29, 0.0  ;;  %v2388_v36 = vmul.f32 %v2136_v43, %v10557_v12 }
 0x1dd   : > { %10585 = vst [vmem:[#allocation388_spill] sm:$0xff] %v6802_v4  ;;  %v2511_v41 = vsel %vm1748_vm0, %v2385_v31, 0.0  ;;  %v1986_v37 = vsel %vm1748_vm0, %v6534_v34, 0.0  ;;  %v2389_v29 = vmul.f32 %v2137_v5, %v10562_v11  ;;  %v1988_v43 = vsel %vm1748_vm0, %v6566_v2, 0.0  ;;  %v10617_v34 = vld [vmem:[#allocation267_spill] sm:$0xff] }
 0x1de   : > { %v1981_v8 = vadd.f32 %v1980_v26, %v1979_v44  ;;  %v3052_v15 = vadd.f32 %v3051_v50, %v3050_v59  ;;  %v2513_v26 = vsel %vm1748_vm0, %v2386_v56, 0.0  ;;  %v10588_v44 = vld [vmem:[#allocation41_spill] sm:$0xff]  ;;  %v2512_v59 = vadd.f32 %v2511_v41, %v2510_v46 }
 0x1df   : > { %v6833_v56 = vperm.slane %v6818_v51, 0  ;;  %v3059_v46 = vsel %vm1748_vm0, %v6454_v48, 0.0  ;;  %v2517_v5 = vsel %vm1748_vm0, %v2388_v36, 0.0  ;;  %v10592_v48 = vrot.slane %v10568_v53, 1 }
 0x1e0   : > { %v1983_v54 = vadd.f32 %v1982_v6, %v1981_v8  ;;  %v3054_v28 = vadd.f32 %v3053_v33, %v3052_v15  ;;  %v2515_v6 = vsel %vm1748_vm0, %v2387_v25, 0.0  ;;  %v2514_v8 = vadd.f32 %v2513_v26, %v2512_v59  ;;  %v10591_v25 = vld [vmem:[#allocation245_spill] sm:$0xff] }
 0x1e1   : > { %10589 = vst [vmem:[#allocation389_spill] sm:$0xff] %v6833_v56  ;;  %v1990_v33 = vsel %vm1748_vm0, %v6578_v61, 0.0  ;;  %v1992_v36 = vsel %vm1748_vm0, %v6598_v3, 0.0 }
 0x1e2   : > { %v1985_v42 = vadd.f32 %v1984_v30, %v1983_v54  ;;  %v3056_v31 = vadd.f32 %v3055_v14, %v3054_v28  ;;  %v10590_v54 = vrot.slane %v10563_v62, 1  ;;  %v6845_v30 = vmul.f32 %v6802_v4, %v10591_v25 }
 0x1e3   : > { %v2516_v14 = vadd.f32 %v2515_v6, %v2514_v8  ;;  %v2519_v28 = vsel %vm1748_vm0, %v2389_v29, 0.0  ;;  %v1994_v29 = vsel %vm1748_vm0, %v6607_v18, 0.0  ;;  %v10595_v8 = vld [vmem:[#allocation43_spill] sm:$0xff] }
 0x1e4   : > { %v1987_v15 = vadd.f32 %v1986_v37, %v1985_v42  ;;  %v2390_v32 = vmul.f32 %v10590_v54, %v10563_v62  ;;  %v3058_v41 = vadd.f32 %v3057_v16, %v3056_v31  ;;  %v3061_v42 = vsel %vm1748_vm0, %v6462_v39, 0.0  ;;  %v10593_v54 = vld [vmem:[#allocation42_spill] sm:$0xff] }
 0x1e5   : > { %v2391_v37 = vmul.f32 %v10592_v48, %v10568_v53  ;;  %v2518_v61 = vadd.f32 %v2517_v5, %v2516_v14  ;;  %v3063_v16 = vsel %vm1748_vm0, %v6466_v7, 0.0  ;;  %v10594_v39 = vrot.slane %v10569_v27, 1  ;;  %v10690_v53 = vld [vmem:[#allocation386_spill] sm:$0xff] }
 0x1e6   : > { %v1989_v26 = vadd.f32 %v1988_v43, %v1987_v15  ;;  %v3060_v59 = vadd.f32 %v3059_v46, %v3058_v41  ;;  %v2521_v43 = vsel %vm1748_vm0, %v2390_v32, 0.0  ;;  %v3065_v5 = vsel %vm1748_vm0, %v6470_v49, 0.0 }
 0x1e7   : > { %v2392_v6 = vmul.f32 %v10594_v39, %v10569_v27  ;;  %v2520_v46 = vadd.f32 %v2519_v28, %v2518_v61  ;;  %v10596_v7 = vrot.slane %v10574_v58, 1  ;;  %v2523_v14 = vsel %vm1748_vm0, %v2391_v37, 0.0 }
 0x1e8   : > { %v1991_v2 = vadd.f32 %v1990_v33, %v1989_v26  ;;  %v3062_v31 = vadd.f32 %v3061_v42, %v3060_v59  ;;  %v1996_v32 = vsel %vm1748_vm0, %v6615_v22, 0.0  ;;  %v6874_v26 = vperm.slane %v6818_v51, 1  ;;  %v10615_v22 = vld [vmem:[#allocation58_spill] sm:$0xff] }
 0x1e9   : > { %v2393_v33 = vmul.f32 %v10596_v7, %v10574_v58  ;;  %v2522_v48 = vadd.f32 %v2521_v43, %v2520_v46  ;;  %v10598_v49 = vrot.slane %v10575_v19, 1  ;;  %v2525_v28 = vsel %vm1748_vm0, %v2392_v6, 0.0  ;;  %v10601_v7 = vld [vmem:[#allocation45_spill] sm:$0xff]  ;;  %v10677_v58 = vld [vmem:[#allocation94_spill] sm:$0xff] }
 0x1ea   : > { %v1993_v41 = vadd.f32 %v1992_v36, %v1991_v2  ;;  %10597 = vst [vmem:[#allocation390_spill] sm:$0xff] %v6874_v26  ;;  %v3064_v42 = vadd.f32 %v3063_v16, %v3062_v31  ;;  %v3067_v2 = vsel %vm1748_vm0, %v6474_v52, 0.0  ;;  %v1998_v37 = vsel %vm1748_vm0, %v6619_v17, 0.0 }
 0x1eb   : > { %v2394_v61 = vmul.f32 %v10598_v49, %v10575_v19  ;;  %v6886_v36 = vmul.f32 %v6833_v56, %v6027_v57  ;;  %v2524_v16 = vadd.f32 %v2523_v14, %v2522_v48  ;;  %v10599_v52 = vrot.slane %v10579_v1, 1  ;;  %v10603_v48 = vld [vmem:[#allocation46_spill] sm:$0xff]  ;;  %v10626_v56 = vld [vmem:[#allocation61_spill] sm:$0xff] }
 0x1ec   : > { %v1995_v59 = vadd.f32 %v1994_v29, %v1993_v41  ;;  %v3066_v39 = vadd.f32 %v3065_v5, %v3064_v42  ;;  %v3069_v29 = vsel %vm1748_vm0, %v6544_v9, 0.0  ;;  %v2527_v46 = vsel %vm1748_vm0, %v2393_v33, 0.0 }
 0x1ed   : > { %v2395_v31 = vmul.f32 %v10599_v52, %v10579_v1  ;;  %v6895_v6 = vperm.slane %v6818_v51, 2  ;;  %v2526_v15 = vadd.f32 %v2525_v28, %v2524_v16  ;;  %v3071_v5 = vsel %vm1748_vm0, %v6548_v35, 0.0  ;;  %v10604_v28 = vld [vmem:[#allocation358_spill] sm:$0xff]  ;;  %v10666_v1 = vld [vmem:[#allocation80_spill] sm:$0xff] }
 0x1ee   : > { %v1997_v43 = vadd.f32 %v1996_v32, %v1995_v59  ;;  %v3068_v41 = vadd.f32 %v3067_v2, %v3066_v39  ;;  %v10602_v9 = vrot.slane %v10581_v40, 1  ;;  %v2529_v32 = vsel %vm1748_vm0, %v2394_v61, 0.0  ;;  %v10605_v39 = vld [vmem:[#allocation47_spill] sm:$0xff] }
 0x1ef   : > { %10600 = vst [vmem:[#allocation391_spill] sm:$0xff] %v6895_v6  ;;  %v6906_v33 = vmul.f32 %v6874_v26, %v6029_v60  ;;  %v2528_v2 = vadd.f32 %v2527_v46, %v2526_v15  ;;  %v10606_v16 = vrot.slane %v10583_v10, 1  ;;  %v2531_v61 = vsel %vm1748_vm0, %v2395_v31, 0.0  ;;  %v10609_v15 = vld [vmem:[#allocation266_spill] sm:$0xff]  ;;  %v10610_v46 = vld [vmem:[#allocation359_spill] sm:$0xff]  ;;  %v10625_v26 = vld [vmem:[#allocation373_spill] sm:$0xff] }
 0x1f0   : > { %v1999_v50 = vadd.f32 %v1998_v37, %v1997_v43  ;;  %v2396_v14 = vmul.f32 %v10602_v9, %v10581_v40  ;;  %v3070_v42 = vadd.f32 %v3069_v29, %v3068_v41  ;;  %v3073_v37 = vsel %vm1748_vm0, %v10604_v28, 0.0  ;;  %v10608_v29 = vld [vmem:[#allocation48_spill] sm:$0xff] }
 0x1f1   : > { %v2397_v43 = vmul.f32 %v10606_v16, %v10583_v10  ;;  %v6917_v52 = vperm.slane %v6818_v51, 3  ;;  %v2530_v59 = vadd.f32 %v2529_v32, %v2528_v2  ;;  %v3075_v28 = vsel %vm1748_vm0, %v10610_v46, 0.0  ;;  %v10614_v2 = vld [vmem:[#allocation362_spill] sm:$0xff] }
 0x1f2   : > { %2000 = vadd.xlane.f32.xlu0 %v1999_v50  ;;  %v3072_v9 = vadd.f32 %v3071_v5, %v3070_v42  ;;  %v6922_v50 = vmul.f32 %v6895_v6, %v10609_v15  ;;  %v10611_v35 = vrot.slane %v10584_v20, 1  ;;  %v2533_v31 = vsel %vm1748_vm0, %v2396_v14, 0.0  ;;  %v10613_v42 = vld [vmem:[#allocation50_spill] sm:$0xff]  ;;  %v10622_v6 = vld [vmem:[#allocation268_spill] sm:$0xff] }
 0x1f3   : > { %10607 = vst [vmem:[#allocation358_spill] sm:$0xff] %v6917_v52  ;;  %v6931_v49 = vperm.slane %v6818_v51, 4  ;;  %v2532_v32 = vadd.f32 %v2531_v61, %v2530_v59  ;;  %v3077_v17 = vsel %vm1748_vm0, %v10614_v2, 0.0  ;;  %v10616_v46 = vrot.slane %v10587_v23, 1  ;;  %v10620_v2 = vld [vmem:[#allocation364_spill] sm:$0xff]  ;;  %v10627_v15 = vld [vmem:[#allocation62_spill] sm:$0xff] }
 0x1f4   : > { %v2398_v16 = vmul.f32 %v10611_v35, %v10584_v20  ;;  %v3074_v5 = vadd.f32 %v3073_v37, %v3072_v9  ;;  %v2535_v35 = vsel %vm1748_vm0, %v2397_v43, 0.0  ;;  %v6943_v14 = vmul.f32 %v6917_v52, %v10617_v34  ;;  %v10618_v9 = vld [vmem:[#allocation59_spill] sm:$0xff]  ;;  %v10655_v20 = vld [vmem:[#allocation382_spill] sm:$0xff] }
 0x1f5   : > { %10612 = vst [vmem:[#allocation359_spill] sm:$0xff] %v6931_v49  ;;  %v2399_v3 = vmul.f32 %v10616_v46, %v10587_v23  ;;  %v2534_v59 = vadd.f32 %v2533_v31, %v2532_v32  ;;  %v6947_v61 = vperm.slane %v6818_v51, 5  ;;  %v3079_v18 = vsel %vm1748_vm0, %v10620_v2, 0.0  ;;  %v276_v34 = vld [vmem:[%s4956_s29 + $0x78] sm:$0x3f] }
 0x1f6   : > { %v3076_v37 = vadd.f32 %v3075_v28, %v3074_v5  ;;  %v10621_v46 = vrot.slane %v10588_v44, 1  ;;  %v2537_v43 = vsel %vm1748_vm0, %v2398_v16, 0.0  ;;  %v6957_v52 = vmul.f32 %v6931_v49, %v10622_v6  ;;  %v10623_v5 = vld [vmem:[#allocation60_spill] sm:$0xff]  ;;  %v10633_v6 = vld [vmem:[#allocation65_spill] sm:$0xff] }
 0x1f7   : > { %10619 = vst [vmem:[#allocation362_spill] sm:$0xff] %v6947_v61  ;;  %v2536_v31 = vadd.f32 %v2535_v35, %v2534_v59  ;;  %v6961_v32 = vperm.slane %v6818_v51, 6  ;;  %v3081_v2 = vsel %vm1748_vm0, %v10625_v26, 0.0  ;;  %v6973_v35 = vperm.slane %v6818_v51, 7  ;;  %v10630_v59 = vld [vmem:[#allocation270_spill] sm:$0xff] }
 0x1f8   : > { %v2400_v24 = vmul.f32 %v10621_v46, %v10588_v44  ;;  %v3078_v28 = vadd.f32 %v3077_v17, %v3076_v37  ;;  %v2539_v46 = vsel %vm1748_vm0, %v2399_v3, 0.0  ;;  %v10628_v17 = vrot.slane %v10593_v54, 1  ;;  %v10631_v26 = vld [vmem:[#allocation374_spill] sm:$0xff] }
 0x1f9   : > { %10624 = vst [vmem:[#allocation364_spill] sm:$0xff] %v6961_v32  ;;  %v2538_v41 = vadd.f32 %v2537_v43, %v2536_v31  ;;  %v6977_v49 = vmul.f32 %v6947_v61, %v10630_v59  ;;  %v3083_v4 = vsel %vm1748_vm0, %v10631_v26, 0.0  ;;  %v10635_v43 = vld [vmem:[#allocation271_spill] sm:$0xff]  ;;  %v10637_v31 = vld [vmem:[#allocation376_spill] sm:$0xff]  ;;  %v10638_v59 = vld [vmem:[#allocation66_spill] sm:$0xff]  ;;  %v7006_v0 = vperm.slane %v276_v34, 2 }
 0x1fa   : > { %v3080_v16 = vadd.f32 %v3079_v18, %v3078_v28  ;;  %v2401_v37 = vmul.f32 %v10628_v17, %v10593_v54  ;;  %10629 = vst [vmem:[#allocation373_spill] sm:$0xff] %v6973_v35  ;;  %v2541_v3 = vsel %vm1748_vm0, %v2400_v24, 0.0  ;;  %v10632_v28 = vld [vmem:[#allocation64_spill] sm:$0xff]  ;;  %v6984_v17 = vperm.slane %v276_v34, 0  ;;  %v10646_v54 = vld [vmem:[#allocation75_spill] sm:$0xff] }
 0x1fb   : > { %v2540_v25 = vadd.f32 %v2539_v46, %v2538_v41  ;;  %v6988_v51 = vmul.f32 %v6961_v32, %v10635_v43  ;;  %v3085_v61 = vsel %vm1748_vm0, %v10637_v31, 0.0  ;;  %v10639_v24 = vrot.slane %v10595_v8, 1  ;;  %v10641_v46 = vld [vmem:[#allocation272_spill] sm:$0xff]  ;;  %v10643_v32 = vld [vmem:[#allocation379_spill] sm:$0xff]  ;;  %v10644_v31 = vld [vmem:[#allocation74_spill] sm:$0xff] }
 0x1fc   : > { %v3082_v18 = vadd.f32 %v3081_v2, %v3080_v16  ;;  %10634 = vst [vmem:[#allocation374_spill] sm:$0xff] %v6984_v17  ;;  %v2543_v57 = vsel %vm1748_vm0, %v2401_v37, 0.0  ;;  %v6997_v41 = vperm.slane %v276_v34, 1  ;;  %v7001_v60 = vmul.f32 %v6973_v35, %v10641_v46  ;;  %v10648_v37 = vld [vmem:[#allocation354_spill] sm:$0xff] }
 0x1fd   : > { %10636 = vst [vmem:[#allocation392_spill] sm:$0xff] %v6988_v51  ;;  %v2402_v2 = vmul.f32 %v10639_v24, %v10595_v8  ;;  %v2542_v16 = vadd.f32 %v2541_v3, %v2540_v25  ;;  %v3087_v43 = vsel %vm1748_vm0, %v10643_v32, 0.0  ;;  %v7009_v25 = vperm.slane %v276_v34, 3  ;;  %v10650_v8 = vld [vmem:[#allocation380_spill] sm:$0xff] }
 0x1fe   : > { %v3084_v26 = vadd.f32 %v3083_v4, %v3082_v18  ;;  %10640 = vst [vmem:[#allocation376_spill] sm:$0xff] %v6997_v41  ;;  %v1369_v4 = vperm.slane %v276_v34, 5  ;;  %v7013_v3 = vmul.f32 %v6984_v17, %v10648_v37  ;;  %v3089_v35 = vsel %vm1748_vm0, %v10650_v8, 0.0  ;;  %v10656_v17 = vld [vmem:[#allocation76_spill] sm:$0xff]  ;;  %v10657_v8 = vld [vmem:[#allocation78_spill] sm:$0xff] }
 0x1ff   : > { %10642 = vst [vmem:[#allocation393_spill] sm:$0xff] %v7001_v60  ;;  %v2544_v46 = vadd.f32 %v2543_v57, %v2542_v16  ;;  %v7017_v44 = vperm.slane %v276_v34, 4  ;;  %v10652_v38 = vrot.slane %v10601_v7, 1  ;;  %v3091_v37 = vsel %vm1748_vm0, %v10655_v20, 0.0  ;;  %v10660_v16 = vld [vmem:[#allocation360_spill] sm:$0xff]  ;;  %v10665_v20 = vld [vmem:[#allocation294_spill] sm:$0xff] }
 0x200   : > { %10645 = vst [vmem:[#allocation379_spill] sm:$0xff] %v7006_v0  ;;  %v3086_v18 = vadd.f32 %v3085_v61, %v3084_v26  ;;  %v2545_v61 = vsel %vm1748_vm0, %v2402_v2, 0.0  ;;  %v10653_v26 = vld [vmem:[#allocation357_spill] sm:$0xff]  ;;  %v2166_v10 = vrot.slane %v10656_v17, 1  ;;  %v3093_v40 = vsel %vm1748_vm0, %v10665_v20, 0.0 }
 0x201   : > { %10647 = vst [vmem:[#allocation394_spill] sm:$0xff] %v7009_v25  ;;  %v2403_v23 = vmul.f32 %v10652_v38, %v10601_v7  ;;  %v7025_v24 = vmul.f32 %v6997_v41, %v10653_v26  ;;  %v7037_v38 = vmul.f32 %v7006_v0, %v10660_v16  ;;  %v10663_v26 = vld [vmem:[#allocation284_spill] sm:$0xff]  ;;  %v2169_v57 = vrot.slane %v10666_v1, 1  ;;  %v10667_v34 = vld [vmem:[#allocation365_spill] sm:$0xff]  ;;  %v10670_v0 = vld [vmem:[#allocation366_spill] sm:$0xff] }
 0x202   : > { %10649 = vst [vmem:[#allocation354_spill] sm:$0xff] %v7013_v3  ;;  %v3088_v32 = vadd.f32 %v3087_v43, %v3086_v18  ;;  %v7033_v43 = vsel %vm532_vm1, %v1369_v4, 0.0  ;;  %v10662_v18 = vld [vmem:[#allocation79_spill] sm:$0xff]  ;;  %v7042_v41 = vmul.f32 %v7009_v25, %v10663_v26  ;;  %v7049_v4 = vmul.f32 %v7017_v44, %v10667_v34  ;;  %v10683_v3 = vld [vmem:[#allocation301_spill] sm:$0xff] }
 0x203   : > { %10651 = vst [vmem:[#allocation380_spill] sm:$0xff] %v7017_v44  ;;  %v2168_v7 = vrot.slane %v10662_v18, 1  ;;  %v2547_v16 = vsel %vm1748_vm0, %v2403_v23, 0.0  ;;  %v7057_v26 = vmul.f32 %v7033_v43, %v10670_v0  ;;  %v10672_v25 = vld [vmem:[#allocation383_spill] sm:$0xff]  ;;  %v10675_v44 = vld [vmem:[#allocation92_spill] sm:$0xff]  ;;  %v10697_v62 = vrot.slane %v10633_v6, 1 }
 0x204   : > { %10654 = vst [vmem:[#allocation357_spill] sm:$0xff] %v7025_v24  ;;  %v3090_v2 = vadd.f32 %v3089_v35, %v3088_v32  ;;  %v2546_v24 = vadd.f32 %v2545_v61, %v2544_v46  ;;  %v10669_v35 = vrot.slane %v10603_v48, 1  ;;  %v3095_v20 = vsel %vm1748_vm0, %v10672_v25, 0.0  ;;  %v10674_v61 = vld [vmem:[#allocation83_spill] sm:$0xff] }
 0x205   : > { %10659 = vst [vmem:[#allocation382_spill] sm:$0xff] %v7033_v43  ;;  %v10679_v43 = vrot.slane %v10605_v39, 1  ;;  %v10680_v25 = vrot.slane %v10608_v29, 1  ;;  %v2414_v11 = vmul.f32 %v10697_v62, %v10633_v6  ;;  %v10704_v62 = vrot.slane %v10646_v54, 1 }
 0x206   : > { %10661 = vst [vmem:[#allocation204_spill] sm:$0xff] %v7037_v38  ;;  %v3092_v19 = vadd.f32 %v3091_v37, %v3090_v2  ;;  %v2404_v32 = vmul.f32 %v10669_v35, %v10603_v48  ;;  %v10676_v2 = vld [vmem:[#allocation93_spill] sm:$0xff]  ;;  %v2548_v27 = vadd.f32 %v2547_v16, %v2546_v24  ;;  %v10686_v16 = vrot.slane %v10623_v5, 1 }
 0x207   : > { %10664 = vst [vmem:[#allocation360_spill] sm:$0xff] %v7042_v41  ;;  %v10673_v41 = vld [vmem:[#allocation81_spill] sm:$0xff]  ;;  %v2405_v0 = vmul.f32 %v10679_v43, %v10605_v39  ;;  %v10684_v43 = vrot.slane %v10615_v22, 1  ;;  %v7126_v6 = vmul.f32 %v10704_v62, %v10646_v54  ;;  %v10708_v12 = vrot.slane %v10657_v8, 1  ;;  %v10710_v62 = vld [vmem:[#allocation387_spill] sm:$0xff] }
 0x208   : > { %10668 = vst [vmem:[#allocation284_spill] sm:$0xff] %v7049_v4  ;;  %v2170_v46 = vrot.slane %v10673_v41, 1  ;;  %v3094_v34 = vadd.f32 %v3093_v40, %v3092_v19  ;;  %v10678_v48 = vld [vmem:[#allocation385_spill] sm:$0xff]  ;;  %v10681_v19 = vld [vmem:[#allocation95_spill] sm:$0xff]  ;;  %v10682_v4 = vrot.slane %v10613_v42, 1  ;;  %v2549_v35 = vsel %vm1748_vm0, %v2404_v32, 0.0 }
 0x209   : > { %10671 = vst [vmem:[#allocation294_spill] sm:$0xff] %v7057_v26  ;;  %v3097_v23 = vsel %vm1748_vm0, %v10678_v48, 0.0  ;;  %v2406_v26 = vmul.f32 %v10680_v25, %v10608_v29  ;;  %v3099_v48 = vsel %vm1748_vm0, %v10683_v3, 0.0  ;;  %v2408_v39 = vmul.f32 %v10684_v43, %v10615_v22  ;;  %v10687_v40 = vld [vmem:[#allocation96_spill] sm:$0xff]  ;;  %v10691_v22 = vld [vmem:[#allocation99_spill] sm:$0xff] }
 0x20a   : > { %v3096_v38 = vadd.f32 %v3095_v20, %v3094_v34  ;;  %v2407_v37 = vmul.f32 %v10682_v4, %v10613_v42  ;;  %v10685_v25 = vrot.slane %v10618_v9, 1  ;;  %v2410_v20 = vmul.f32 %v10686_v16, %v10623_v5  ;;  %v10688_v42 = vld [vmem:[#allocation98_spill] sm:$0xff] }
 0x20b   : > { %v10689_v3 = vrot.slane %v10626_v56, 1  ;;  %v3101_v43 = vsel %vm1748_vm0, %v10690_v53, 0.0  ;;  %v2550_v60 = vadd.f32 %v2549_v35, %v2548_v27  ;;  %v10694_v32 = vrot.slane %v10632_v28, 1  ;;  %v10696_v53 = vld [vmem:[#allocation108_spill] sm:$0xff] }
 0x20c   : > { %v2409_v24 = vmul.f32 %v10685_v25, %v10618_v9  ;;  %v3098_v34 = vadd.f32 %v3097_v23, %v3096_v38  ;;  %v10692_v25 = vrot.slane %v10627_v15, 1  ;;  %v10693_v38 = vld [vmem:[#allocation100_spill] sm:$0xff]  ;;  %v2551_v5 = vsel %vm1748_vm0, %v2405_v0, 0.0  ;;  %v10711_v23 = vld [vmem:[#allocation117_spill] sm:$0xff] }
 0x20d   : > { %v2411_v29 = vmul.f32 %v10689_v3, %v10626_v56  ;;  %v2413_v4 = vmul.f32 %v10694_v32, %v10632_v28  ;;  %v10695_v3 = vld [vmem:[#allocation9_spill] sm:$0xff]  ;;  %v10698_v27 = vrot.slane %v10638_v59, 1  ;;  %v10701_v0 = vrot.slane %v10644_v31, 1 }
 0x20e   : > { %v2412_v9 = vmul.f32 %v10692_v25, %v10627_v15  ;;  %v3100_v16 = vadd.f32 %v3099_v48, %v3098_v34  ;;  %v3103_v56 = vsel %vm1748_vm0, %v10695_v3, 0.0  ;;  %v10699_v34 = vld [vmem:[#allocation109_spill] sm:$0xff]  ;;  %v10702_v3 = vld [vmem:[#allocation304_spill] sm:$0xff]  ;;  %v7130_v32 = vmul.f32 %v2166_v10, %v10656_v17 }
 0x20f   : > { %v2415_v35 = vmul.f32 %v10698_v27, %v10638_v59  ;;  %v2416_v28 = vmul.f32 %v10701_v0, %v10644_v31  ;;  %v3105_v51 = vsel %vm1748_vm0, %v10702_v3, 0.0  ;;  %v2552_v27 = vadd.f32 %v2551_v5, %v2550_v60  ;;  %v10706_v0 = vld [vmem:[#allocation305_spill] sm:$0xff]  ;;  %v10707_v3 = vld [vmem:[#allocation114_spill] sm:$0xff]  ;;  %v10709_v5 = vld [vmem:[#allocation115_spill] sm:$0xff] }
 0x210   : > { %v3102_v48 = vadd.f32 %v3101_v43, %v3100_v16  ;;  %v10705_v16 = vld [vmem:[#allocation113_spill] sm:$0xff]  ;;  %v2553_v59 = vsel %vm1748_vm0, %v2406_v26, 0.0  ;;  %v3107_v31 = vsel %vm1748_vm0, %v10706_v0, 0.0  ;;  %v7139_v15 = vmul.f32 %v10708_v12, %v10657_v8 }
 0x211   : > { %v7142_v60 = vmul.f32 %v2168_v7, %v10662_v18  ;;  %v7146_v10 = vmul.f32 %v2169_v57, %v10666_v1  ;;  %v2555_v26 = vsel %vm1748_vm0, %v2407_v37, 0.0  ;;  %v3109_v0 = vsel %vm1748_vm0, %v10710_v62, 0.0  ;;  %v10713_v57 = vld [vmem:[#allocation307_spill] sm:$0xff]  ;;  %v10714_v37 = vld [vmem:[#allocation126_spill] sm:$0xff] }
 0x212   : > { %v3104_v43 = vadd.f32 %v3103_v56, %v3102_v48  ;;  %v2554_v17 = vadd.f32 %v2553_v59, %v2552_v27  ;;  %v2557_v12 = vsel %vm1748_vm0, %v2408_v39, 0.0  ;;  %v7154_v7 = vmul.f32 %v2170_v46, %v10673_v41 }
 0x213   : > { %v3111_v48 = vsel %vm1748_vm0, %v10713_v57, 0.0  ;;  %v10715_v62 = vrot.slane %v10674_v61, 1  ;;  %v7167_v39 = vsel %vm1748_vm0, %v2411_v29, 0.0  ;;  %v3113_v27 = vsel %vm1748_vm0, %v6786_v13, 0.0 }
 0x214   : > { %v3106_v56 = vadd.f32 %v3105_v51, %v3104_v43  ;;  %10712 = vst [vmem:[#allocation365_spill] sm:$0xff] %v7154_v7  ;;  %v2559_v51 = vsel %vm1748_vm0, %v2409_v24, 0.0  ;;  %v2561_v43 = vsel %vm1748_vm0, %v2410_v20, 0.0  ;;  %v7171_v24 = vsel %vm1748_vm0, %v2412_v9, 0.0  ;;  %v10721_v9 = vld [vmem:[#allocation37_spill] sm:$0xff] }
 0x215   : > { %v7164_v25 = vmul.f32 %v10715_v62, %v10674_v61  ;;  %v7174_v20 = vsel %vm1748_vm0, %v2413_v4, 0.0  ;;  %v2556_v62 = vadd.f32 %v2555_v26, %v2554_v17  ;;  %v7184_v29 = vsel %vm1748_vm0, %v2414_v11, 0.0  ;;  %v10722_v61 = vld [vmem:[#allocation38_spill] sm:$0xff]  ;;  %v10725_v11 = vld [vmem:[#allocation39_spill] sm:$0xff] }
 0x216   : > { %v3108_v8 = vadd.f32 %v3107_v31, %v3106_v56  ;;  %v10717_v31 = vld [vmem:[#allocation127_spill] sm:$0xff]  ;;  %v10718_v56 = vrot.slane %v10675_v44, 1  ;;  %v3542_v1 = vrot.slane %v10721_v9, 7  ;;  %v3543_v4 = vrot.slane %v10722_v61, 7  ;;  %v10729_v9 = vld [vmem:[#allocation40_spill] sm:$0xff] }
 0x217   : > { %10716 = vst [vmem:[#allocation383_spill] sm:$0xff] %v7164_v25  ;;  %v3115_v41 = vsel %vm1748_vm0, %v6806_v45, 0.0  ;;  %v10723_v13 = vrot.slane %v10676_v2, 1  ;;  %v7197_v17 = vsel %vm1748_vm0, %v2415_v35, 0.0  ;;  %v3544_v26 = vrot.slane %v10725_v11, 7  ;;  %v10730_v35 = vld [vmem:[#allocation54_spill] sm:$0xff] }
 0x218   : > { %v3110_v59 = vadd.f32 %v3109_v0, %v3108_v8  ;;  %v7181_v57 = vmul.f32 %v10718_v56, %v10675_v44  ;;  %v10720_v0 = vld [vmem:[#allocation128_spill] sm:$0xff]  ;;  %v10727_v46 = vrot.slane %v10677_v58, 1  ;;  %v3545_v45 = vrot.slane %v10729_v9, 7 }
 0x219   : > { %v7194_v18 = vmul.f32 %v10723_v13, %v10676_v2  ;;  %v3117_v44 = vsel %vm1748_vm0, %v6845_v30, 0.0  ;;  %v2558_v13 = vadd.f32 %v2557_v12, %v2556_v62  ;;  %v7210_v2 = vsel %vm1748_vm0, %v2416_v28, 0.0  ;;  %v10735_v30 = vld [vmem:[#allocation56_spill] sm:$0xff]  ;;  %v10736_v62 = vld [vmem:[#allocation71_spill] sm:$0xff] }
 0x21a   : > { %10719 = vst [vmem:[#allocation385_spill] sm:$0xff] %v7181_v57  ;;  %v3112_v8 = vadd.f32 %v3111_v48, %v3110_v59  ;;  %v7204_v61 = vmul.f32 %v10727_v46, %v10677_v58  ;;  %v3546_v54 = vrot.slane %v10730_v35, 7  ;;  %v10732_v56 = vrot.slane %v10681_v19, 1  ;;  %v10734_v46 = vld [vmem:[#allocation55_spill] sm:$0xff]  ;;  %v10743_v59 = vld [vmem:[#allocation88_spill] sm:$0xff] }
 0x21b   : > { %10724 = vst [vmem:[#allocation301_spill] sm:$0xff] %v7194_v18  ;;  %v3547_v58 = vrot.slane %v10734_v46, 7  ;;  %v3119_v9 = vsel %vm1748_vm0, %v6886_v36, 0.0  ;;  %v3548_v12 = vrot.slane %v10735_v30, 7  ;;  %v3549_v28 = vrot.slane %v10736_v62, 7 }
 0x21c   : > { %v3114_v48 = vadd.f32 %v3113_v27, %v3112_v8  ;;  %10728 = vst [vmem:[#allocation386_spill] sm:$0xff] %v7204_v61  ;;  %v7217_v18 = vmul.f32 %v10732_v56, %v10681_v19  ;;  %v10737_v61 = vld [vmem:[#allocation72_spill] sm:$0xff]  ;;  %v10739_v8 = vrot.slane %v10687_v40, 1  ;;  %v10741_v56 = vld [vmem:[#allocation73_spill] sm:$0xff]  ;;  %v3121_v46 = vsel %vm1748_vm0, %v6906_v33, 0.0 }
 0x21d   : > { %v3550_v57 = vrot.slane %v10737_v61, 7  ;;  %v3551_v19 = vrot.slane %v10741_v56, 7  ;;  %v2560_v36 = vadd.f32 %v2559_v51, %v2558_v13  ;;  %v3553_v62 = vrot.slane %v10743_v59, 7  ;;  %v10749_v51 = vld [vmem:[#allocation91_spill] sm:$0xff] }
 0x21e   : > { %v3116_v11 = vadd.f32 %v3115_v41, %v3114_v48  ;;  %10733 = vst [vmem:[#allocation9_spill] sm:$0xff] %v7217_v18  ;;  %v7229_v27 = vmul.f32 %v10739_v8, %v10687_v40  ;;  %v10742_v18 = vld [vmem:[#allocation87_spill] sm:$0xff]  ;;  %v10747_v8 = vld [vmem:[#allocation90_spill] sm:$0xff]  ;;  %v3123_v56 = vsel %vm1748_vm0, %v6922_v50, 0.0  ;;  %v3555_v13 = vrot.slane %v10749_v51, 7 }
 0x21f   : > { %v3552_v30 = vrot.slane %v10742_v18, 7  ;;  %v3554_v40 = vrot.slane %v10747_v8, 7  ;;  %v10750_v18 = vld [vmem:[#allocation105_spill] sm:$0xff]  ;;  %v3125_v8 = vsel %vm1748_vm0, %v6943_v14, 0.0  ;;  %v10754_v50 = vld [vmem:[#allocation143_spill] sm:$0xff]  ;;  %v2562_v33 = vadd.f32 %v2561_v43, %v2560_v36  ;;  %v10758_v14 = vld [vmem:[#allocation144_spill] sm:$0xff] }
 0x220   : > { %v3118_v35 = vadd.f32 %v3117_v44, %v3116_v11  ;;  %10740 = vst [vmem:[#allocation304_spill] sm:$0xff] %v7229_v27  ;;  %v10745_v11 = vrot.slane %v10688_v42, 1  ;;  %v10752_v44 = vld [vmem:[#allocation106_spill] sm:$0xff]  ;;  %v10755_v27 = vld [vmem:[#allocation121_spill] sm:$0xff]  ;;  %v10759_v43 = vrot.slane %v10696_v53, 1  ;;  %v7281_v41 = vmul.f32 %v3544_v26, %v10550_v55 }
 0x221   : > { %v10766_v55 = vld [vmem:[#allocation13_spill] sm:$0xff] }
 0x222   : > { %v3120_v25 = vadd.f32 %v3119_v9, %v3118_v35  ;;  %v7240_v48 = vmul.f32 %v10745_v11, %v10688_v42  ;;  %v10751_v9 = vrot.slane %v10691_v22, 1  ;;  %v3557_v11 = vrot.slane %v10752_v44, 7  ;;  %v10753_v42 = vld [vmem:[#allocation107_spill] sm:$0xff] }
 0x223   : > { %v7266_v44 = vmul.f32 %v3542_v1, %v10543_v47  ;;  %v7274_v36 = vmul.f32 %v10759_v43, %v10696_v53  ;;  %v7284_v47 = vmul.f32 %v3545_v45, %v10556_v21  ;;  %v3129_v1 = vsel %vm1748_vm0, %v6977_v49, 0.0  ;;  %v10767_v21 = vld [vmem:[#allocation16_spill] sm:$0xff] }
 0x224   : > { %10746 = vst [vmem:[#allocation305_spill] sm:$0xff] %v7240_v48  ;;  %v3122_v59 = vadd.f32 %v3121_v46, %v3120_v25  ;;  %v7251_v35 = vmul.f32 %v10751_v9, %v10691_v22  ;;  %v10756_v25 = vrot.slane %v10693_v38, 1  ;;  %v10757_v9 = vld [vmem:[#allocation122_spill] sm:$0xff]  ;;  %v3127_v48 = vsel %vm1748_vm0, %v6957_v52, 0.0  ;;  %v10762_v52 = vld [vmem:[#allocation145_spill] sm:$0xff]  ;;  %v10770_v22 = vld [vmem:[#allocation147_spill] sm:$0xff] }
 0x225   : > { %10760 = vst [vmem:[#allocation387_spill] sm:$0xff] %v7274_v36  ;;  %v10763_v43 = vrot.slane %v10699_v34, 1  ;;  %v7297_v26 = vmul.f32 %v3546_v54, %v10766_v55  ;;  %v7300_v45 = vmul.f32 %v3547_v58, %v10767_v21  ;;  %v10776_v55 = vld [vmem:[#allocation17_spill] sm:$0xff]  ;;  %v10778_v58 = vld [vmem:[#allocation19_spill] sm:$0xff]  ;;  %v10781_v53 = vld [vmem:[#allocation112_spill] sm:$0xff] }
 0x226   : > { %v3124_v7 = vadd.f32 %v3123_v56, %v3122_v59  ;;  %v7262_v46 = vmul.f32 %v10756_v25, %v10693_v38  ;;  %v7277_v59 = vmul.f32 %v3543_v4, %v10549_v63  ;;  %v10761_v25 = vld [vmem:[#allocation123_spill] sm:$0xff]  ;;  %v2564_v63 = vadd.f32 %v7167_v39, %v2562_v33  ;;  %v10765_v4 = vld [vmem:[#allocation124_spill] sm:$0xff]  ;;  %v10771_v38 = vld [vmem:[#allocation110_spill] sm:$0xff] }
 0x227   : > { %v3561_v61 = vrot.slane %v10761_v25, 7  ;;  %v7292_v51 = vmul.f32 %v10763_v43, %v10699_v34  ;;  %10768 = vst [vmem:[#allocation13_spill] sm:$0xff] %v7300_v45  ;;  %v10769_v25 = vld [vmem:[#allocation392_spill] sm:$0xff]  ;;  %v10772_v43 = vrot.slane %v10771_v38, 1  ;;  %v10774_v39 = vld [vmem:[#allocation137_spill] sm:$0xff]  ;;  %v7317_v21 = vmul.f32 %v3549_v28, %v10778_v58 }
 0x228   : > { %v3126_v56 = vadd.f32 %v3125_v8, %v3124_v7  ;;  %v3562_v8 = vrot.slane %v10765_v4, 7  ;;  %v3131_v49 = vsel %vm1748_vm0, %v10769_v25, 0.0  ;;  %v7314_v4 = vmul.f32 %v3548_v12, %v10776_v55  ;;  %v10780_v25 = vld [vmem:[#allocation148_spill] sm:$0xff]  ;;  %v10786_v12 = vld [vmem:[#allocation23_spill] sm:$0xff]  ;;  %v10788_v28 = vld [vmem:[#allocation25_spill] sm:$0xff] }
 0x229   : > { %10764 = vst [vmem:[#allocation307_spill] sm:$0xff] %v7292_v51  ;;  %v7308_v34 = vmul.f32 %v10772_v43, %v10771_v38  ;;  %v10782_v36 = vrot.slane %v10781_v53, 1  ;;  %v2566_v43 = vadd.f32 %v7171_v24, %v2564_v63  ;;  %v10785_v38 = vld [vmem:[#allocation354_spill] sm:$0xff]  ;;  %v7330_v55 = vmul.f32 %v3550_v57, %v10786_v12  ;;  %v10790_v51 = vld [vmem:[#allocation149_spill] sm:$0xff] }
 0x22a   : > { %v3128_v7 = vadd.f32 %v3127_v48, %v3126_v56  ;;  %v3563_v48 = vrot.slane %v10774_v39, 7  ;;  %v10775_v56 = vld [vmem:[#allocation393_spill] sm:$0xff]  ;;  %10777 = vst [vmem:[#allocation392_spill] sm:$0xff] %v7314_v4  ;;  %v10784_v39 = vld [vmem:[#allocation140_spill] sm:$0xff]  ;;  %v7333_v58 = vmul.f32 %v3551_v19, %v10788_v28  ;;  %v10797_v12 = vld [vmem:[#allocation150_spill] sm:$0xff] }
 0x22b   : > { %10773 = vst [vmem:[#allocation16_spill] sm:$0xff] %v7308_v34  ;;  %v3133_v54 = vsel %vm1748_vm0, %v10775_v56, 0.0  ;;  %v7323_v45 = vmul.f32 %v10782_v36, %v10781_v53  ;;  %v3135_v56 = vsel %vm1748_vm0, %v10785_v38, 0.0  ;;  %v10791_v36 = vrot.slane %v10705_v16, 1  ;;  %v10793_v24 = vld [vmem:[#allocation141_spill] sm:$0xff]  ;;  %v10798_v19 = vld [vmem:[#allocation27_spill] sm:$0xff] }
 0x22c   : > { %v3130_v33 = vadd.f32 %v3129_v1, %v3128_v7  ;;  %10779 = vst [vmem:[#allocation393_spill] sm:$0xff] %v7317_v21  ;;  %v3564_v1 = vrot.slane %v10784_v39, 7  ;;  %v3565_v63 = vrot.slane %v10793_v24, 7  ;;  %v10794_v39 = vld [vmem:[#allocation26_spill] sm:$0xff]  ;;  %v10796_v38 = vld [vmem:[#allocation357_spill] sm:$0xff]  ;;  %v7349_v28 = vmul.f32 %v3553_v62, %v10798_v19 }
 0x22d   : > { %10783 = vst [vmem:[#allocation17_spill] sm:$0xff] %v7323_v45  ;;  %v7339_v53 = vmul.f32 %v10791_v36, %v10705_v16  ;;  %v3137_v57 = vsel %vm1748_vm0, %v10796_v38, 0.0  ;;  %v10800_v34 = vrot.slane %v10707_v3, 1  ;;  %v2568_v36 = vadd.f32 %v7174_v20, %v2566_v43  ;;  %v10802_v24 = vld [vmem:[#allocation142_spill] sm:$0xff]  ;;  %v10806_v45 = vld [vmem:[#allocation152_spill] sm:$0xff]  ;;  %v10834_v20 = vld [vmem:[#allocation43_spill] sm:$0xff] }
 0x22e   : > { %v3132_v7 = vadd.f32 %v3131_v49, %v3130_v33  ;;  %10787 = vst [vmem:[#allocation19_spill] sm:$0xff] %v7330_v55  ;;  %v7343_v49 = vmul.f32 %v3552_v30, %v10794_v39  ;;  %v3566_v16 = vrot.slane %v10802_v24, 7  ;;  %v10803_v30 = vld [vmem:[#allocation28_spill] sm:$0xff]  ;;  %v10807_v62 = vld [vmem:[#allocation30_spill] sm:$0xff]  ;;  %v10812_v24 = vld [vmem:[#allocation31_spill] sm:$0xff] }
 0x22f   : > { %10789 = vst [vmem:[#allocation354_spill] sm:$0xff] %v7333_v58  ;;  %v7354_v58 = vmul.f32 %v10800_v34, %v10707_v3  ;;  %v7359_v39 = vmul.f32 %v3554_v40, %v10803_v30  ;;  %v7365_v19 = vmul.f32 %v3555_v13, %v10807_v62  ;;  %v10809_v34 = vrot.slane %v10709_v5, 1  ;;  %v10818_v62 = vld [vmem:[#allocation160_spill] sm:$0xff]  ;;  %v10883_v55 = vld [vmem:[#allocation217_spill] sm:$0xff] }
 0x230   : > { %10792 = vst [vmem:[#allocation23_spill] sm:$0xff] %v7339_v53  ;;  %v3134_v33 = vadd.f32 %v3133_v54, %v3132_v7  ;;  %v10805_v7 = vld [vmem:[#allocation204_spill] sm:$0xff]  ;;  %v10813_v40 = vrot.slane %v10750_v18, 7  ;;  %v2570_v43 = vadd.f32 %v7184_v29, %v2568_v36  ;;  %v10830_v29 = vrot.slane %v10714_v37, 1  ;;  %v10832_v18 = vld [vmem:[#allocation294_spill] sm:$0xff] }
 0x231   : > { %10795 = vst [vmem:[#allocation25_spill] sm:$0xff] %v7343_v49  ;;  %v3139_v38 = vsel %vm1748_vm0, %v10805_v7, 0.0  ;;  %v7370_v3 = vmul.f32 %v10809_v34, %v10709_v5  ;;  %v10817_v49 = vld [vmem:[#allocation360_spill] sm:$0xff]  ;;  %v10819_v34 = vrot.slane %v10711_v23, 1  ;;  %v10910_v53 = vld [vmem:[#allocation130_spill] sm:$0xff] }
 0x232   : > { %10799 = vst [vmem:[#allocation26_spill] sm:$0xff] %v7349_v28  ;;  %v3136_v54 = vadd.f32 %v3135_v56, %v3134_v33  ;;  %v7376_v30 = vmul.f32 %v10813_v40, %v10812_v24  ;;  %v10815_v56 = vld [vmem:[#allocation32_spill] sm:$0xff]  ;;  %v3141_v13 = vsel %vm1748_vm0, %v10817_v49, 0.0  ;;  %v10822_v24 = vld [vmem:[#allocation41_spill] sm:$0xff]  ;;  %v10823_v40 = vrot.slane %v10753_v42, 7 }
 0x233   : > { %10801 = vst [vmem:[#allocation357_spill] sm:$0xff] %v7354_v58  ;;  %v7379_v33 = vmul.f32 %v3557_v11, %v10815_v56  ;;  %v7387_v5 = vmul.f32 %v10819_v34, %v10711_v23  ;;  %v10829_v34 = vld [vmem:[#allocation161_spill] sm:$0xff]  ;;  %v7407_v36 = vmul.f32 %v10830_v29, %v10714_v37  ;;  %v10839_v23 = vld [vmem:[#allocation162_spill] sm:$0xff]  ;;  %v10840_v29 = vrot.slane %v10717_v31, 1  ;;  %v10897_v58 = vld [vmem:[#allocation268_spill] sm:$0xff] }
 0x234   : > { %10804 = vst [vmem:[#allocation27_spill] sm:$0xff] %v7359_v39  ;;  %v3138_v7 = vadd.f32 %v3137_v57, %v3136_v54  ;;  %v7394_v11 = vmul.f32 %v10823_v40, %v10822_v24  ;;  %v10825_v57 = vld [vmem:[#allocation42_spill] sm:$0xff]  ;;  %v10826_v54 = vrot.slane %v10755_v27, 7  ;;  %v3145_v24 = vsel %vm1748_vm0, %v10832_v18, 0.0  ;;  %v10853_v42 = vld [vmem:[#allocation165_spill] sm:$0xff]  ;;  %v10871_v27 = vld [vmem:[#allocation195_spill] sm:$0xff] }
 0x235   : > { %10808 = vst [vmem:[#allocation28_spill] sm:$0xff] %v7365_v19  ;;  %v10828_v19 = vld [vmem:[#allocation284_spill] sm:$0xff]  ;;  %v7424_v37 = vmul.f32 %v10840_v29, %v10717_v31  ;;  %v2572_v40 = vadd.f32 %v7197_v17, %v2570_v43  ;;  %v10854_v17 = vld [vmem:[#allocation166_spill] sm:$0xff]  ;;  %v10862_v29 = vld [vmem:[#allocation177_spill] sm:$0xff] }
 0x236   : > { %10810 = vst [vmem:[#allocation204_spill] sm:$0xff] %v7370_v3  ;;  %v7399_v49 = vmul.f32 %v10826_v54, %v10825_v57  ;;  %v3140_v56 = vadd.f32 %v3139_v38, %v3138_v7  ;;  %v10835_v57 = vrot.slane %v10757_v9, 7  ;;  %v10837_v38 = vld [vmem:[#allocation45_spill] sm:$0xff]  ;;  %v10844_v9 = vld [vmem:[#allocation46_spill] sm:$0xff]  ;;  %v10851_v31 = vld [vmem:[#allocation48_spill] sm:$0xff] }
 0x237   : > { %10814 = vst [vmem:[#allocation30_spill] sm:$0xff] %v7376_v30  ;;  %v7418_v7 = vmul.f32 %v3561_v61, %v10837_v38  ;;  %v7442_v18 = vmul.f32 %v3564_v1, %v10851_v31  ;;  %v10863_v1 = vld [vmem:[#allocation178_spill] sm:$0xff]  ;;  %v10865_v43 = vld [vmem:[#allocation181_spill] sm:$0xff]  ;;  %v2574_v31 = vadd.f32 %v7210_v2, %v2572_v40  ;;  %v10893_v40 = vld [vmem:[#allocation264_spill] sm:$0xff] }
 0x238   : > { %10816 = vst [vmem:[#allocation31_spill] sm:$0xff] %v7379_v33  ;;  %v3143_v33 = vsel %vm1748_vm0, %v10828_v19, 0.0  ;;  %v7415_v54 = vmul.f32 %v10835_v57, %v10834_v20  ;;  %v3142_v19 = vadd.f32 %v3141_v13, %v3140_v56  ;;  %v7430_v20 = vmul.f32 %v3562_v8, %v10844_v9  ;;  %v10846_v57 = vld [vmem:[#allocation47_spill] sm:$0xff]  ;;  %v10855_v9 = vld [vmem:[#allocation50_spill] sm:$0xff] }
 0x239   : > { %10820 = vst [vmem:[#allocation32_spill] sm:$0xff] %v7387_v5  ;;  %v7433_v61 = vmul.f32 %v3563_v48, %v10846_v57  ;;  %v10848_v56 = vrot.slane %v10720_v0, 1  ;;  %v7447_v8 = vmul.f32 %v3565_v63, %v10855_v9  ;;  %v10857_v48 = vld [vmem:[#allocation58_spill] sm:$0xff]  ;;  %v10874_v9 = vld [vmem:[#allocation199_spill] sm:$0xff] }
 0x23a   : > { %10824 = vst [vmem:[#allocation360_spill] sm:$0xff] %v7394_v11  ;;  %v10843_v11 = vld [vmem:[#allocation164_spill] sm:$0xff]  ;;  %v3144_v13 = vadd.f32 %v3143_v33, %v3142_v19  ;;  %v7450_v57 = vmul.f32 %v3566_v16, %v10857_v48  ;;  %v10859_v19 = vld [vmem:[#allocation167_spill] sm:$0xff]  ;;  %v10866_v63 = vld [vmem:[#allocation182_spill] sm:$0xff] }
 0x23b   : > { %10827 = vst [vmem:[#allocation41_spill] sm:$0xff] %v7399_v49  ;;  %v7438_v38 = vmul.f32 %v10848_v56, %v10720_v0  ;;  %v10860_v56 = vld [vmem:[#allocation168_spill] sm:$0xff]  ;;  %v10867_v16 = vld [vmem:[#allocation183_spill] sm:$0xff]  ;;  %v10870_v0 = vld [vmem:[#allocation194_spill] sm:$0xff] }
 0x23c   : > { %10831 = vst [vmem:[#allocation42_spill] sm:$0xff] %v7407_v36  ;;  %v3146_v33 = vadd.f32 %v3145_v24, %v3144_v13  ;;  %v10864_v49 = vld [vmem:[#allocation180_spill] sm:$0xff]  ;;  %v10868_v24 = vld [vmem:[#allocation185_spill] sm:$0xff]  ;;  %v2577_v13 = vsel %vm1748_vm0, %v7130_v32, 0.0  ;;  %v10877_v5 = vld [vmem:[#allocation210_spill] sm:$0xff] }
 0x23d   : > { %10836 = vst [vmem:[#allocation284_spill] sm:$0xff] %v7415_v54  ;;  %v10875_v48 = vld [vmem:[#allocation200_spill] sm:$0xff]  ;;  %v10876_v36 = vld [vmem:[#allocation201_spill] sm:$0xff] }
 0x23e   : > { %10838 = vst [vmem:[#allocation294_spill] sm:$0xff] %v7418_v7  ;;  %3147 = vadd.xlane.f32.xlu1 %v3146_v33  ;;  %v2575_v7 = vsel %vm1748_vm0, %v7126_v6, 0.0  ;;  %v10873_v33 = vld [vmem:[#allocation197_spill] sm:$0xff]  ;;  %v2581_v6 = vsel %vm1748_vm0, %v7142_v60, 0.0 }
 0x23f   : > { %10841 = vst [vmem:[#allocation43_spill] sm:$0xff] %v7424_v37  ;;  %v2576_v39 = vadd.f32 %v2575_v7, %v2574_v31  ;;  %v2579_v37 = vsel %vm1748_vm0, %v7139_v15, 0.0  ;;  %v2583_v7 = vsel %vm1748_vm0, %v7146_v10, 0.0  ;;  %v10896_v15 = vld [vmem:[#allocation267_spill] sm:$0xff]  ;;  %v10899_v32 = vld [vmem:[#allocation365_spill] sm:$0xff] }
 0x240   : > { %10845 = vst [vmem:[#allocation45_spill] sm:$0xff] %v7430_v20  ;;  %v10861_v20 = vld [vmem:[#allocation176_spill] sm:$0xff] }
 0x241   : > { %10847 = vst [vmem:[#allocation46_spill] sm:$0xff] %v7433_v61  ;;  %v10869_v61 = vld [vmem:[#allocation193_spill] sm:$0xff]  ;;  %v2578_v21 = vadd.f32 %v2577_v13, %v2576_v39  ;;  %v2585_v39 = vsel %vm1748_vm0, %v10899_v32, 0.0  ;;  %v7516_v3 = vld.sshfl [vmem:[#allocation1 + $0x18] sm:$0xff pattern:$0x73625140] }
 0x242   : > { %10849 = vst [vmem:[#allocation47_spill] sm:$0xff] %v7438_v38  ;;  %v10894_v38 = vld [vmem:[#allocation265_spill] sm:$0xff]  ;;  %v10906_v13 = vld [vmem:[#allocation383_spill] sm:$0xff]  ;;  %v10912_v32 = vld [vmem:[#allocation132_spill] sm:$0xff] }
 0x243   : > { %10852 = vst [vmem:[#allocation48_spill] sm:$0xff] %v7442_v18  ;;  %v10872_v18 = vld [vmem:[#allocation196_spill] sm:$0xff]  ;;  %v2580_v30 = vadd.f32 %v2579_v37, %v2578_v21  ;;  %v7513_v37 = vld.sshfl [vmem:[#allocation1 + $0x10] sm:$0xff pattern:$0x73625140]  ;;  %v2587_v10 = vsel %vm1748_vm0, %v10906_v13, 0.0 }
 0x244   : > { %10856 = vst [vmem:[#allocation50_spill] sm:$0xff] %v7447_v8  ;;  %v10895_v8 = vld [vmem:[#allocation266_spill] sm:$0xff]  ;;  %v7507_v2 = vld.sshfl [vmem:[#allocation1] sm:$0xff pattern:$0x73625140]  ;;  %v10913_v13 = vrot.slane %v10912_v32, 1 }
 0x245   : > { %10858 = vst [vmem:[#allocation58_spill] sm:$0xff] %v7450_v57  ;;  %v2582_v54 = vadd.f32 %v2581_v6, %v2580_v30  ;;  %v7510_v30 = vld.sshfl [vmem:[#allocation1 + $0x8] sm:$0xff pattern:$0x73625140] }
 0x246   : > { %10902 = vst [vmem:[#allocation365_spill] sm:$0xff] %v7507_v2  ;;  %v7521_v28 = vld.sshfl [vmem:[#allocation1 + $0x20] sm:$0xff pattern:$0x73625140] }
 0x247   : > { %v2584_v31 = vadd.f32 %v2583_v7, %v2582_v54  ;;  %10903 = vst [vmem:[#allocation395_spill] sm:$0xff] %v7510_v30  ;;  %v10908_v2 = vld [vmem:[#allocation129_spill] sm:$0xff] }
 0x248   : > { %10904 = vst [vmem:[#allocation396_spill] sm:$0xff] %v7513_v37  ;;  %v10909_v6 = vrot.slane %v10908_v2, 1  ;;  %v10911_v37 = vrot.slane %v10910_v53, 1  ;;  %v10914_v21 = vld [vmem:[#allocation133_spill] sm:$0xff] }
 0x249   : > { %10905 = vst [vmem:[#allocation397_spill] sm:$0xff] %v7516_v3  ;;  %v2586_v57 = vadd.f32 %v2585_v39, %v2584_v31  ;;  %v7538_v3 = vmul.f32 %v10913_v13, %v10912_v32  ;;  %v10915_v54 = vrot.slane %v10914_v21, 1  ;;  %v10916_v7 = vld [vmem:[#allocation385_spill] sm:$0xff]  ;;  %v10921_v13 = vrot.slane %v10758_v14, 1 }
 0x24a   : > { %v7528_v30 = vmul.f32 %v10909_v6, %v10908_v2  ;;  %v7533_v4 = vmul.f32 %v10911_v37, %v10910_v53  ;;  %v2589_v6 = vsel %vm1748_vm0, %v10916_v7, 0.0  ;;  %v10917_v2 = vld [vmem:[#allocation134_spill] sm:$0xff]  ;;  %v10919_v37 = vrot.slane %v10754_v50, 1 }
 0x24b   : > { %v7543_v60 = vmul.f32 %v10915_v54, %v10914_v21  ;;  %v10918_v31 = vrot.slane %v10917_v2, 1  ;;  %v7560_v32 = vmul.f32 %v10921_v13, %v10758_v14  ;;  %v2588_v54 = vadd.f32 %v2587_v10, %v2586_v57  ;;  %v10932_v14 = vld [vmem:[#allocation386_spill] sm:$0xff] }
 0x24c   : > { %v7555_v53 = vmul.f32 %v10919_v37, %v10754_v50  ;;  %v10922_v21 = vrot.slane %v10762_v52, 1  ;;  %v10924_v37 = vrot.slane %v10780_v25, 1  ;;  %v10926_v57 = vrot.slane %v10790_v51, 1 }
 0x24d   : > { %v7550_v39 = vmul.f32 %v10918_v31, %v10917_v2  ;;  %v10923_v31 = vrot.slane %v10770_v22, 1 }
 0x24e   : > { %10920 = vst [vmem:[#allocation383_spill] sm:$0xff] %v7555_v53  ;;  %v7565_v7 = vmul.f32 %v10922_v21, %v10762_v52  ;;  %v7575_v50 = vmul.f32 %v10924_v37, %v10780_v25  ;;  %v10925_v53 = vld [vmem:[#allocation301_spill] sm:$0xff]  ;;  %v7582_v10 = vmul.f32 %v10926_v57, %v10790_v51  ;;  %v10927_v21 = vrot.slane %v10797_v12, 1 }
 0x24f   : > { %v7570_v2 = vmul.f32 %v10923_v31, %v10770_v22  ;;  %v2591_v13 = vsel %vm1748_vm0, %v10925_v53, 0.0  ;;  %v10928_v31 = vrot.slane %v10806_v45, 1  ;;  %v2590_v37 = vadd.f32 %v2589_v6, %v2588_v54 }
 0x250   : > { %v7587_v52 = vmul.f32 %v10927_v21, %v10797_v12  ;;  %v10929_v25 = vrot.slane %v10818_v62, 1  ;;  %v10930_v57 = vrot.slane %v10829_v34, 1  ;;  %v10931_v21 = vrot.slane %v10839_v23, 1 }
 0x251   : > { %v7592_v22 = vmul.f32 %v10928_v31, %v10806_v45  ;;  %v2593_v31 = vsel %vm1748_vm0, %v10932_v14, 0.0  ;;  %v10933_v6 = vrot.slane %v10843_v11, 1  ;;  %v10939_v45 = vld [vmem:[#allocation9_spill] sm:$0xff] }
 0x252   : > { %v7597_v53 = vmul.f32 %v10929_v25, %v10818_v62  ;;  %v7602_v51 = vmul.f32 %v10930_v57, %v10829_v34  ;;  %v7607_v12 = vmul.f32 %v10931_v21, %v10839_v23  ;;  %v10934_v25 = vrot.slane %v10853_v42, 1 }
 0x253   : > { %v7614_v54 = vmul.f32 %v10933_v6, %v10843_v11  ;;  %v10935_v57 = vrot.slane %v10854_v17, 1  ;;  %v2592_v21 = vadd.f32 %v2591_v13, %v2590_v37  ;;  %v10936_v23 = vrot.slane %v10859_v19, 1 }
 0x254   : > { %v7619_v62 = vmul.f32 %v10934_v25, %v10853_v42  ;;  %v10937_v6 = vrot.slane %v10860_v56, 1  ;;  %v10938_v25 = vrot.slane %v10861_v20, 1  ;;  %v10940_v13 = vrot.slane %v10862_v29, 1 }
 0x255   : > { %v7624_v34 = vmul.f32 %v10935_v57, %v10854_v17  ;;  %v7629_v14 = vmul.f32 %v10936_v23, %v10859_v19  ;;  %v2595_v57 = vsel %vm1748_vm0, %v10939_v45, 0.0  ;;  %v10941_v23 = vrot.slane %v10863_v1, 1 }
 0x256   : > { %v7634_v11 = vmul.f32 %v10937_v6, %v10860_v56  ;;  %v7639_v42 = vmul.f32 %v10938_v25, %v10861_v20  ;;  %v7646_v37 = vmul.f32 %v10940_v13, %v10862_v29  ;;  %v10942_v6 = vrot.slane %v10864_v49, 1  ;;  %v10944_v20 = vld [vmem:[#allocation304_spill] sm:$0xff] }
 0x257   : > { %v7651_v19 = vmul.f32 %v10941_v23, %v10863_v1  ;;  %v2594_v25 = vadd.f32 %v2593_v31, %v2592_v21  ;;  %v2597_v17 = vsel %vm1748_vm0, %v10944_v20, 0.0  ;;  %v3920_v45 = vsel %vm3156_vm2, %v7266_v44, 0.0 }
 0x258   : > { %v7656_v56 = vmul.f32 %v10942_v6, %v10864_v49  ;;  %v3921_v13 = vsel %vm3156_vm2, %v7277_v59, 0.0  ;;  %v3923_v29 = vsel %vm3156_vm2, %v7281_v41, 0.0  ;;  %v10945_v23 = vrot.slane %v10865_v43, 1 }
 0x259   : > { %v10946_v31 = vrot.slane %v10866_v63, 1  ;;  %v2596_v20 = vadd.f32 %v2595_v57, %v2594_v25  ;;  %v3922_v6 = vadd.f32 %v3921_v13, %v3920_v45  ;;  %v10947_v44 = vrot.slane %v10867_v16, 1 }
 0x25a   : > { %10943 = vst [vmem:[#allocation385_spill] sm:$0xff] %v7656_v56  ;;  %v7669_v1 = vmul.f32 %v10945_v23, %v10865_v43  ;;  %v10948_v41 = vrot.slane %v10868_v24, 1  ;;  %v10949_v56 = vld [vmem:[#allocation305_spill] sm:$0xff]  ;;  %v3925_v43 = vsel %vm3156_vm2, %v7284_v47, 0.0  ;;  %v10950_v57 = vrot.slane %v10869_v61, 1 }
 0x25b   : > { %v7674_v21 = vmul.f32 %v10946_v31, %v10866_v63  ;;  %v7679_v49 = vmul.f32 %v10947_v44, %v10867_v16  ;;  %v2599_v23 = vsel %vm1748_vm0, %v10949_v56, 0.0  ;;  %v10951_v45 = vrot.slane %v10870_v0, 1  ;;  %v10977_v16 = vld [vmem:[#allocation387_spill] sm:$0xff] }
 0x25c   : > { %v7684_v59 = vmul.f32 %v10948_v41, %v10868_v24  ;;  %v7693_v25 = vmul.f32 %v10950_v57, %v10869_v61  ;;  %v2598_v31 = vadd.f32 %v2597_v17, %v2596_v20  ;;  %v3924_v44 = vadd.f32 %v3923_v29, %v3922_v6 }
 0x25d   : > { %v7698_v13 = vmul.f32 %v10951_v45, %v10870_v0  ;;  %v10953_v41 = vrot.slane %v10871_v27, 1  ;;  %v10955_v47 = vrot.slane %v10872_v18, 1  ;;  %v2601_v57 = vsel %vm1748_vm0, %v7251_v35, 0.0 }
 0x25e   : > { %v3927_v61 = vsel %vm3156_vm2, %v7297_v26, 0.0  ;;  %v10957_v17 = vrot.slane %v10873_v33, 1  ;;  %v10959_v20 = vrot.slane %v10874_v9, 1  ;;  %v2600_v45 = vadd.f32 %v2599_v23, %v2598_v31  ;;  %v10968_v31 = vld [vmem:[#allocation211_spill] sm:$0xff] }
 0x25f   : > { %10952 = vst [vmem:[#allocation301_spill] sm:$0xff] %v7698_v13  ;;  %v7703_v24 = vmul.f32 %v10953_v41, %v10871_v27  ;;  %v7708_v56 = vmul.f32 %v10955_v47, %v10872_v18  ;;  %v3926_v41 = vadd.f32 %v3925_v43, %v3924_v44  ;;  %v10961_v47 = vrot.slane %v10875_v48, 1 }
 0x260   : > { %v7717_v29 = vmul.f32 %v10957_v17, %v10873_v33  ;;  %v7722_v6 = vmul.f32 %v10959_v20, %v10874_v9  ;;  %v10963_v35 = vrot.slane %v10876_v36, 1  ;;  %v2603_v17 = vsel %vm1748_vm0, %v7262_v46, 0.0  ;;  %v10965_v33 = vld [vmem:[#allocation13_spill] sm:$0xff] }
 0x261   : > { %10954 = vst [vmem:[#allocation386_spill] sm:$0xff] %v7703_v24  ;;  %v7727_v18 = vmul.f32 %v10961_v47, %v10875_v48  ;;  %v3929_v27 = vsel %vm3156_vm2, %v10965_v33, 0.0  ;;  %v10966_v23 = vrot.slane %v10877_v5, 1  ;;  %v10969_v44 = vrot.slane %v10968_v31, 1  ;;  %v10974_v46 = vld [vmem:[#allocation213_spill] sm:$0xff] }
 0x262   : > { %10956 = vst [vmem:[#allocation9_spill] sm:$0xff] %v7708_v56  ;;  %v7732_v26 = vmul.f32 %v10963_v35, %v10876_v36  ;;  %v2602_v47 = vadd.f32 %v2601_v57, %v2600_v45  ;;  %v3928_v48 = vadd.f32 %v3927_v61, %v3926_v41  ;;  %v10971_v35 = vld [vmem:[#allocation212_spill] sm:$0xff]  ;;  %v10975_v33 = vrot.slane %v10974_v46, 1 }
 0x263   : > { %10958 = vst [vmem:[#allocation304_spill] sm:$0xff] %v7717_v29  ;;  %v7741_v43 = vmul.f32 %v10966_v23, %v10877_v5  ;;  %v7746_v20 = vmul.f32 %v10969_v44, %v10968_v31  ;;  %v10972_v36 = vrot.slane %v10971_v35, 1  ;;  %v2605_v23 = vsel %vm1748_vm0, %v10977_v16, 0.0  ;;  %v10978_v5 = vld [vmem:[#allocation392_spill] sm:$0xff]  ;;  %v10979_v44 = vld [vmem:[#allocation214_spill] sm:$0xff] }
 0x264   : > { %10960 = vst [vmem:[#allocation305_spill] sm:$0xff] %v7722_v6  ;;  %v7756_v0 = vmul.f32 %v10975_v33, %v10974_v46  ;;  %v3931_v63 = vsel %vm3156_vm2, %v10978_v5, 0.0  ;;  %v10980_v57 = vrot.slane %v10979_v44, 1  ;;  %v10982_v45 = vld [vmem:[#allocation216_spill] sm:$0xff]  ;;  %v3930_v31 = vadd.f32 %v3929_v27, %v3928_v48  ;;  %v10987_v16 = vld [vmem:[#allocation218_spill] sm:$0xff] }
 0x265   : > { %10962 = vst [vmem:[#allocation398_spill] sm:$0xff] %v7727_v18  ;;  %v7751_v9 = vmul.f32 %v10972_v36, %v10971_v35  ;;  %v10983_v36 = vrot.slane %v10982_v45, 1  ;;  %v2604_v35 = vadd.f32 %v2603_v17, %v2602_v47  ;;  %v10985_v33 = vrot.slane %v10883_v55, 1  ;;  %v10995_v48 = vld [vmem:[#allocation236_spill] sm:$0xff]  ;;  %v11099_v18 = vld [vmem:[#allocation226_spill] sm:$0xff] }
 0x266   : > { %10964 = vst [vmem:[#allocation399_spill] sm:$0xff] %v7732_v26  ;;  %v7765_v61 = vmul.f32 %v10980_v57, %v10979_v44  ;;  %v10988_v5 = vrot.slane %v10987_v16, 1  ;;  %v10991_v44 = vld [vmem:[#allocation393_spill] sm:$0xff]  ;;  %v10996_v47 = vrot.slane %v10995_v48, 1  ;;  %v11104_v29 = vld [vmem:[#allocation228_spill] sm:$0xff] }
 0x267   : > { %10967 = vst [vmem:[#allocation13_spill] sm:$0xff] %v7741_v43  ;;  %v7770_v41 = vmul.f32 %v10983_v36, %v10982_v45  ;;  %v7775_v46 = vmul.f32 %v10985_v33, %v10883_v55  ;;  %v10992_v36 = vld [vmem:[#allocation235_spill] sm:$0xff]  ;;  %v2606_v55 = vadd.f32 %v2605_v23, %v2604_v35  ;;  %v3932_v45 = vadd.f32 %v3931_v63, %v3930_v31  ;;  %v11009_v31 = vld [vmem:[#allocation241_spill] sm:$0xff] }
 0x268   : > { %10970 = vst [vmem:[#allocation400_spill] sm:$0xff] %v7746_v20  ;;  %v10993_v17 = vrot.slane %v10992_v36, 1  ;;  %v7794_v33 = vmul.f32 %v10996_v47, %v10995_v48  ;;  %v11006_v47 = vld [vmem:[#allocation240_spill] sm:$0xff]  ;;  %v11010_v23 = vrot.slane %v11009_v31, 1  ;;  %v11087_v20 = vld [vmem:[#allocation207_spill] sm:$0xff]  ;;  %v11091_v43 = vld [vmem:[#allocation209_spill] sm:$0xff] }
 0x269   : > { %10973 = vst [vmem:[#allocation401_spill] sm:$0xff] %v7751_v9  ;;  %v10990_v9 = vld [vmem:[#allocation307_spill] sm:$0xff]  ;;  %v11007_v35 = vrot.slane %v11006_v47, 1  ;;  %v11095_v26 = vld [vmem:[#allocation221_spill] sm:$0xff] }
 0x26a   : > { %10976 = vst [vmem:[#allocation402_spill] sm:$0xff] %v7756_v0  ;;  %v7780_v0 = vmul.f32 %v10988_v5, %v10987_v16  ;;  %v2607_v57 = vsel %vm1748_vm0, %v10990_v9, 0.0  ;;  %v7789_v27 = vmul.f32 %v10993_v17, %v10992_v36  ;;  %v10998_v5 = vld [vmem:[#allocation237_spill] sm:$0xff]  ;;  %v11001_v9 = vld [vmem:[#allocation239_spill] sm:$0xff] }
 0x26b   : > { %10981 = vst [vmem:[#allocation387_spill] sm:$0xff] %v7765_v61  ;;  %v3933_v61 = vsel %vm3156_vm2, %v10991_v44, 0.0  ;;  %v10999_v16 = vrot.slane %v10998_v5, 1  ;;  %v11002_v44 = vrot.slane %v11001_v9, 1  ;;  %v11005_v36 = vld [vmem:[#allocation19_spill] sm:$0xff]  ;;  %v7813_v63 = vmul.f32 %v11007_v35, %v11006_v47  ;;  %v11019_v47 = vld [vmem:[#allocation354_spill] sm:$0xff] }
 0x26c   : > { %10984 = vst [vmem:[#allocation392_spill] sm:$0xff] %v7770_v41  ;;  %v11004_v41 = vld [vmem:[#allocation16_spill] sm:$0xff]  ;;  %v3934_v48 = vadd.f32 %v3933_v61, %v3932_v45  ;;  %v11022_v45 = vrot.slane %v10894_v38, 1 }
 0x26d   : > { %10986 = vst [vmem:[#allocation403_spill] sm:$0xff] %v7775_v46  ;;  %v7804_v46 = vmul.f32 %v11002_v44, %v11001_v9  ;;  %v2609_v17 = vsel %vm1748_vm0, %v11004_v41, 0.0  ;;  %v11012_v44 = vld [vmem:[#allocation242_spill] sm:$0xff]  ;;  %v11015_v41 = vld [vmem:[#allocation245_spill] sm:$0xff] }
 0x26e   : > { %10989 = vst [vmem:[#allocation404_spill] sm:$0xff] %v7780_v0  ;;  %v7799_v0 = vmul.f32 %v10999_v16, %v10998_v5  ;;  %v7818_v16 = vmul.f32 %v11010_v23, %v11009_v31  ;;  %v2608_v5 = vadd.f32 %v2607_v57, %v2606_v55  ;;  %v11013_v9 = vrot.slane %v11012_v44, 1 }
 0x26f   : > { %10994 = vst [vmem:[#allocation307_spill] sm:$0xff] %v7789_v27  ;;  %v3935_v27 = vsel %vm3156_vm2, %v11005_v36, 0.0  ;;  %v11016_v36 = vrot.slane %v11015_v41, 1  ;;  %v11020_v55 = vrot.slane %v10893_v40, 1  ;;  %v7842_v57 = vmul.f32 %v11022_v45, %v10894_v38  ;;  %v11032_v45 = vld [vmem:[#allocation11_spill] sm:$0xff]  ;;  %v11036_v38 = vld [vmem:[#allocation357_spill] sm:$0xff] }
 0x270   : > { %10997 = vst [vmem:[#allocation393_spill] sm:$0xff] %v7794_v33  ;;  %v11018_v33 = vld [vmem:[#allocation17_spill] sm:$0xff]  ;;  %v3936_v23 = vadd.f32 %v3935_v27, %v3934_v48 }
 0x271   : > { %11000 = vst [vmem:[#allocation405_spill] sm:$0xff] %v7799_v0  ;;  %v7828_v0 = vmul.f32 %v11016_v36, %v11015_v41  ;;  %v2611_v35 = vsel %vm1748_vm0, %v11018_v33, 0.0  ;;  %v7837_v61 = vmul.f32 %v11020_v55, %v10893_v40  ;;  %v11024_v36 = vrot.slane %v10895_v8, 1  ;;  %v11029_v40 = vld [vmem:[#allocation25_spill] sm:$0xff] }
 0x272   : > { %11003 = vst [vmem:[#allocation406_spill] sm:$0xff] %v7804_v46  ;;  %v7823_v46 = vmul.f32 %v11013_v9, %v11012_v44  ;;  %v2610_v9 = vadd.f32 %v2609_v17, %v2608_v5  ;;  %v11026_v33 = vrot.slane %v10896_v15, 1  ;;  %v11028_v44 = vld [vmem:[#allocation23_spill] sm:$0xff]  ;;  %v3939_v31 = vsel %vm3156_vm2, %v11029_v40, 0.0 }
 0x273   : > { %11008 = vst [vmem:[#allocation16_spill] sm:$0xff] %v7813_v63  ;;  %v3937_v63 = vsel %vm3156_vm2, %v11019_v47, 0.0  ;;  %v7847_v41 = vmul.f32 %v11024_v36, %v10895_v8  ;;  %v2613_v55 = vsel %vm1748_vm0, %v11028_v44, 0.0  ;;  %v11030_v5 = vrot.slane %v10897_v58, 1  ;;  %v11033_v8 = vld [vmem:[#allocation270_spill] sm:$0xff] }
 0x274   : > { %11011 = vst [vmem:[#allocation19_spill] sm:$0xff] %v7818_v16  ;;  %v7852_v47 = vmul.f32 %v11026_v33, %v10896_v15  ;;  %v2612_v48 = vadd.f32 %v2611_v35, %v2610_v9  ;;  %v3938_v17 = vadd.f32 %v3937_v63, %v3936_v23  ;;  %v3157_v36 = vsel %vm3156_vm2, %v11032_v45, 0.0  ;;  %v11042_v45 = vld [vmem:[#allocation15_spill] sm:$0xff]  ;;  %v11083_v16 = vld [vmem:[#allocation205_spill] sm:$0xff] }
 0x275   : > { %11014 = vst [vmem:[#allocation407_spill] sm:$0xff] %v7823_v46  ;;  %v7861_v27 = vmul.f32 %v11030_v5, %v10897_v58  ;;  %v11034_v33 = vrot.slane %v11033_v8, 1  ;;  %v2615_v44 = vsel %vm1748_vm0, %v11036_v38, 0.0  ;;  %v11039_v58 = vld [vmem:[#allocation271_spill] sm:$0xff]  ;;  %v11079_v46 = vld [vmem:[#allocation190_spill] sm:$0xff] }
 0x276   : > { %11017 = vst [vmem:[#allocation408_spill] sm:$0xff] %v7828_v0  ;;  %v11040_v63 = vrot.slane %v11039_v58, 1  ;;  %v2614_v9 = vadd.f32 %v2613_v55, %v2612_v48  ;;  %v3940_v23 = vadd.f32 %v3939_v31, %v3938_v17  ;;  %v11048_v0 = vld [vmem:[#allocation365_spill] sm:$0xff]  ;;  %v11051_v17 = vld [vmem:[#allocation18_spill] sm:$0xff] }
 0x277   : > { %11021 = vst [vmem:[#allocation17_spill] sm:$0xff] %v7837_v61  ;;  %v7868_v15 = vmul.f32 %v11034_v33, %v11033_v8  ;;  %v3160_v33 = vsel %vm3156_vm2, %v11042_v45, 0.0  ;;  %v11043_v8 = vld [vmem:[#allocation272_spill] sm:$0xff]  ;;  %v3162_v45 = vsel %vm3156_vm2, %v11051_v17, 0.0  ;;  %v11061_v17 = vld [vmem:[#allocation397_spill] sm:$0xff] }
 0x278   : > { %11023 = vst [vmem:[#allocation354_spill] sm:$0xff] %v7842_v57  ;;  %v7879_v35 = vmul.f32 %v11040_v63, %v11039_v58  ;;  %v11047_v57 = vld [vmem:[#allocation27_spill] sm:$0xff]  ;;  %v11049_v63 = vrot.slane %v11048_v0, 1  ;;  %v2616_v31 = vadd.f32 %v2615_v44, %v2614_v9 }
 0x279   : > { %11025 = vst [vmem:[#allocation409_spill] sm:$0xff] %v7847_v41  ;;  %v11038_v41 = vld [vmem:[#allocation14_spill] sm:$0xff]  ;;  %v11052_v58 = vld [vmem:[#allocation395_spill] sm:$0xff] }
 0x27a   : > { %11027 = vst [vmem:[#allocation410_spill] sm:$0xff] %v7852_v47  ;;  %v11037_v47 = vld [vmem:[#allocation26_spill] sm:$0xff]  ;;  %v3158_v5 = vsel %vm3156_vm2, %v11038_v41, 0.0  ;;  %v3943_v41 = vsel %vm3156_vm2, %v11047_v57, 0.0  ;;  %v7895_v55 = vmul.f32 %v11048_v0, %v11049_v63  ;;  %v11056_v57 = vld [vmem:[#allocation28_spill] sm:$0xff] }
 0x27b   : > { %11031 = vst [vmem:[#allocation23_spill] sm:$0xff] %v7861_v27  ;;  %v3941_v40 = vsel %vm3156_vm2, %v11037_v47, 0.0  ;;  %v11046_v27 = vld [vmem:[#allocation204_spill] sm:$0xff]  ;;  %v3159_v61 = vadd.f32 %v3158_v5, %v3157_v36  ;;  %v3945_v36 = vsel %vm3156_vm2, %v11056_v57, 0.0  ;;  %v11065_v57 = vld [vmem:[#allocation30_spill] sm:$0xff] }
 0x27c   : > { %11035 = vst [vmem:[#allocation25_spill] sm:$0xff] %v7868_v15  ;;  %v11044_v15 = vrot.slane %v11043_v8, 1  ;;  %v2617_v47 = vsel %vm1748_vm0, %v11046_v27, 0.0  ;;  %v3942_v48 = vadd.f32 %v3941_v40, %v3940_v23  ;;  %v11055_v27 = vld [vmem:[#allocation32_spill] sm:$0xff] }
 0x27d   : > { %11041 = vst [vmem:[#allocation11_spill] sm:$0xff] %v7879_v35  ;;  %v3161_v5 = vadd.f32 %v3160_v33, %v3159_v61  ;;  %v11057_v35 = vld [vmem:[#allocation396_spill] sm:$0xff]  ;;  %v2618_v40 = vadd.f32 %v2617_v47, %v2616_v31  ;;  %v3947_v61 = vsel %vm3156_vm2, %v11065_v57, 0.0  ;;  %v11073_v57 = vld [vmem:[#allocation31_spill] sm:$0xff] }
 0x27e   : > { %v7886_v38 = vmul.f32 %v11044_v15, %v11043_v8  ;;  %11050 = vst [vmem:[#allocation26_spill] sm:$0xff] %v7895_v55  ;;  %v11053_v15 = vrot.slane %v11052_v58, 1  ;;  %v11058_v0 = vrot.slane %v11057_v35, 1  ;;  %v3944_v9 = vadd.f32 %v3943_v41, %v3942_v48  ;;  %v11060_v23 = vld [vmem:[#allocation20_spill] sm:$0xff]  ;;  %v11068_v48 = vld [vmem:[#allocation21_spill] sm:$0xff] }
 0x27f   : > { %v3164_v63 = vsel %vm3156_vm2, %v11060_v23, 0.0  ;;  %v3163_v33 = vadd.f32 %v3162_v45, %v3161_v5  ;;  %v11069_v23 = vld [vmem:[#allocation366_spill] sm:$0xff]  ;;  %v3949_v45 = vsel %vm3156_vm2, %v11073_v57, 0.0 }
 0x280   : > { %11045 = vst [vmem:[#allocation357_spill] sm:$0xff] %v7886_v38  ;;  %v7902_v8 = vmul.f32 %v11052_v58, %v11053_v15  ;;  %v2619_v38 = vsel %vm1748_vm0, %v11055_v27, 0.0  ;;  %v7911_v44 = vmul.f32 %v11057_v35, %v11058_v0  ;;  %v11062_v58 = vrot.slane %v11061_v17, 1  ;;  %v11064_v27 = vld [vmem:[#allocation42_spill] sm:$0xff] }
 0x281   : > { %v11066_v35 = vrot.slane %v7521_v28, 1  ;;  %v2620_v41 = vadd.f32 %v2619_v38, %v2618_v40  ;;  %v3946_v31 = vadd.f32 %v3945_v36, %v3944_v9  ;;  %v3166_v0 = vsel %vm3156_vm2, %v11068_v48, 0.0  ;;  %v11075_v36 = vld [vmem:[#allocation22_spill] sm:$0xff]  ;;  %v11076_v9 = vld [vmem:[#allocation47_spill] sm:$0xff] }
 0x282   : > { %11054 = vst [vmem:[#allocation14_spill] sm:$0xff] %v7902_v8  ;;  %v7918_v15 = vmul.f32 %v11061_v17, %v11062_v58  ;;  %v2621_v8 = vsel %vm1748_vm0, %v11064_v27, 0.0  ;;  %v11070_v17 = vrot.slane %v11069_v23, 1  ;;  %v11072_v27 = vld [vmem:[#allocation43_spill] sm:$0xff]  ;;  %v3165_v5 = vadd.f32 %v3164_v63, %v3163_v33 }
 0x283   : > { %11059 = vst [vmem:[#allocation15_spill] sm:$0xff] %v7911_v44  ;;  %v7927_v47 = vmul.f32 %v7521_v28, %v11066_v35  ;;  %v2622_v44 = vadd.f32 %v2621_v8, %v2620_v41  ;;  %v11074_v28 = vld [vmem:[#allocation175_spill] sm:$0xff]  ;;  %v3948_v38 = vadd.f32 %v3947_v61, %v3946_v31  ;;  %v3168_v40 = vsel %vm3156_vm2, %v11075_v36, 0.0  ;;  %v11080_v8 = vld [vmem:[#allocation24_spill] sm:$0xff]  ;;  %v11082_v36 = vld [vmem:[#allocation41_spill] sm:$0xff] }
 0x284   : > { %11063 = vst [vmem:[#allocation204_spill] sm:$0xff] %v7918_v15  ;;  %v7934_v58 = vmul.f32 %v11070_v17, %v11069_v23  ;;  %v2623_v15 = vsel %vm1748_vm0, %v11072_v27, 0.0  ;;  %v2625_v48 = vsel %vm1748_vm0, %v11076_v9, 0.0  ;;  %v11078_v23 = vld [vmem:[#allocation360_spill] sm:$0xff]  ;;  %v3167_v27 = vadd.f32 %v3166_v0, %v3165_v5  ;;  %v11081_v41 = vld [vmem:[#allocation191_spill] sm:$0xff]  ;;  %v11085_v5 = vld [vmem:[#allocation206_spill] sm:$0xff] }
 0x285   : > { %11067 = vst [vmem:[#allocation27_spill] sm:$0xff] %v7927_v47  ;;  %v11077_v47 = vld [vmem:[#allocation189_spill] sm:$0xff]  ;;  %v2624_v55 = vadd.f32 %v2623_v15, %v2622_v44  ;;  %v3950_v63 = vadd.f32 %v3949_v45, %v3948_v38  ;;  %v3170_v33 = vsel %vm3156_vm2, %v11080_v8, 0.0  ;;  %v2627_v61 = vsel %vm1748_vm0, %v7528_v30, 0.0  ;;  %v11086_v8 = vld [vmem:[#allocation284_spill] sm:$0xff] }
 0x286   : > { %11071 = vst [vmem:[#allocation365_spill] sm:$0xff] %v7934_v58  ;;  %v3951_v58 = vsel %vm3156_vm2, %v11078_v23, 0.0  ;;  %v3953_v9 = vsel %vm3156_vm2, %v11082_v36, 0.0  ;;  %v3169_v17 = vadd.f32 %v3168_v40, %v3167_v27  ;;  %v11084_v44 = vld [vmem:[#allocation29_spill] sm:$0xff]  ;;  %v2629_v45 = vsel %vm1748_vm0, %v7533_v4, 0.0  ;;  %v11089_v27 = vld [vmem:[#allocation208_spill] sm:$0xff] }
 0x287   : > { %v2626_v35 = vadd.f32 %v2625_v48, %v2624_v55  ;;  %v3952_v0 = vadd.f32 %v3951_v58, %v3950_v63  ;;  %v3172_v15 = vsel %vm3156_vm2, %v11084_v44, 0.0  ;;  %v3955_v30 = vsel %vm3156_vm2, %v11086_v8, 0.0  ;;  %v11088_v55 = vld [vmem:[#allocation33_spill] sm:$0xff]  ;;  %v11090_v44 = vld [vmem:[#allocation294_spill] sm:$0xff] }
 0x288   : > { %v3171_v31 = vadd.f32 %v3170_v33, %v3169_v17  ;;  %v3174_v48 = vsel %vm3156_vm2, %v11088_v55, 0.0  ;;  %v2631_v58 = vsel %vm1748_vm0, %v7538_v3, 0.0  ;;  %v3957_v4 = vsel %vm3156_vm2, %v11090_v44, 0.0  ;;  %v11094_v55 = vld [vmem:[#allocation45_spill] sm:$0xff]  ;;  %v11103_v44 = vld [vmem:[#allocation48_spill] sm:$0xff] }
 0x289   : > { %v2628_v57 = vadd.f32 %v2627_v61, %v2626_v35  ;;  %v3954_v40 = vadd.f32 %v3953_v9, %v3952_v0  ;;  %v11092_v35 = vld [vmem:[#allocation34_spill] sm:$0xff]  ;;  %v2633_v61 = vsel %vm1748_vm0, %v7543_v60, 0.0  ;;  %v11093_v9 = vld [vmem:[#allocation220_spill] sm:$0xff]  ;;  %v3959_v3 = vsel %vm3156_vm2, %v11094_v55, 0.0 }
 0x28a   : > { %v3173_v38 = vadd.f32 %v3172_v15, %v3171_v31  ;;  %v3176_v33 = vsel %vm3156_vm2, %v11092_v35, 0.0  ;;  %v11098_v35 = vld [vmem:[#allocation46_spill] sm:$0xff] }
 0x28b   : > { %v2630_v23 = vadd.f32 %v2629_v45, %v2628_v57  ;;  %v3956_v17 = vadd.f32 %v3955_v30, %v3954_v40  ;;  %v11096_v57 = vld [vmem:[#allocation35_spill] sm:$0xff]  ;;  %v2635_v45 = vsel %vm1748_vm0, %v7550_v39, 0.0  ;;  %v11097_v30 = vld [vmem:[#allocation222_spill] sm:$0xff]  ;;  %v3961_v60 = vsel %vm3156_vm2, %v11098_v35, 0.0 }
 0x28c   : > { %v3175_v63 = vadd.f32 %v3174_v48, %v3173_v38  ;;  %v3178_v15 = vsel %vm3156_vm2, %v11096_v57, 0.0  ;;  %v3963_v39 = vsel %vm3156_vm2, %v11103_v44, 0.0  ;;  %v11109_v55 = vld [vmem:[#allocation50_spill] sm:$0xff] }
 0x28d   : > { %v2632_v36 = vadd.f32 %v2631_v58, %v2630_v23  ;;  %v3958_v31 = vadd.f32 %v3957_v4, %v3956_v17  ;;  %v11100_v23 = vld [vmem:[#allocation36_spill] sm:$0xff]  ;;  %v11101_v58 = vld [vmem:[#allocation383_spill] sm:$0xff]  ;;  %v3965_v57 = vsel %vm3156_vm2, %v11109_v55, 0.0 }
 0x28e   : > { %v3177_v0 = vadd.f32 %v3176_v33, %v3175_v63  ;;  %v3180_v48 = vsel %vm3156_vm2, %v11100_v23, 0.0  ;;  %v2637_v4 = vsel %vm1748_vm0, %v11101_v58, 0.0  ;;  %v11102_v17 = vld [vmem:[#allocation227_spill] sm:$0xff] }
 0x28f   : > { %v2634_v8 = vadd.f32 %v2633_v61, %v2632_v36  ;;  %v3960_v38 = vadd.f32 %v3959_v3, %v3958_v31  ;;  %v11105_v36 = vld [vmem:[#allocation44_spill] sm:$0xff]  ;;  %v2639_v61 = vsel %vm1748_vm0, %v7560_v32, 0.0  ;;  %v11106_v3 = vld [vmem:[#allocation59_spill] sm:$0xff]  ;;  %v11113_v32 = vld [vmem:[#allocation157_spill] sm:$0xff] }
 0x290   : > { %v3179_v40 = vadd.f32 %v3178_v15, %v3177_v0  ;;  %v3182_v33 = vsel %vm3156_vm2, %v11105_v36, 0.0  ;;  %v11107_v31 = vld [vmem:[#allocation156_spill] sm:$0xff]  ;;  %v11110_v0 = vld [vmem:[#allocation229_spill] sm:$0xff]  ;;  %v11114_v35 = vrot.slane %v11113_v32, 7 }
 0x291   : > { %v2636_v6 = vadd.f32 %v2635_v45, %v2634_v8  ;;  %v3962_v63 = vadd.f32 %v3961_v60, %v3960_v38  ;;  %v11108_v23 = vrot.slane %v11107_v31, 7  ;;  %v11111_v45 = vld [vmem:[#allocation49_spill] sm:$0xff]  ;;  %v2641_v38 = vsel %vm1748_vm0, %v7565_v7, 0.0  ;;  %v11112_v36 = vld [vmem:[#allocation60_spill] sm:$0xff]  ;;  %v11115_v31 = vld [vmem:[#allocation58_spill] sm:$0xff] }
 0x292   : > { %v3181_v56 = vadd.f32 %v3180_v48, %v3179_v40  ;;  %v3184_v60 = vsel %vm3156_vm2, %v11111_v45, 0.0  ;;  %v3820_v24 = vmul.f32 %v11114_v35, %v11112_v36  ;;  %v11116_v40 = vld [vmem:[#allocation230_spill] sm:$0xff]  ;;  %v11118_v45 = vld [vmem:[#allocation61_spill] sm:$0xff]  ;;  %v11119_v7 = vld [vmem:[#allocation159_spill] sm:$0xff] }
 0x293   : > { %v3819_v58 = vmul.f32 %v11108_v23, %v11106_v3  ;;  %v2638_v44 = vadd.f32 %v2637_v4, %v2636_v6  ;;  %v3964_v15 = vadd.f32 %v3963_v39, %v3962_v63  ;;  %v3967_v3 = vsel %vm3156_vm2, %v11115_v31, 0.0  ;;  %v11117_v4 = vld [vmem:[#allocation51_spill] sm:$0xff] }
 0x294   : > { %v3183_v23 = vadd.f32 %v3182_v33, %v3181_v56  ;;  %v3186_v39 = vsel %vm3156_vm2, %v11117_v4, 0.0  ;;  %v2643_v63 = vsel %vm1748_vm0, %v7570_v2, 0.0  ;;  %v11120_v8 = vrot.slane %v11119_v7, 7  ;;  %v11121_v31 = vld [vmem:[#allocation231_spill] sm:$0xff]  ;;  %v11124_v4 = vld [vmem:[#allocation173_spill] sm:$0xff] }
 0x295   : > { %v2640_v55 = vadd.f32 %v2639_v61, %v2638_v44  ;;  %v3966_v48 = vadd.f32 %v3965_v57, %v3964_v15  ;;  %v3969_v35 = vsel %vm3156_vm2, %v3819_v58, 0.0  ;;  %v11122_v61 = vld [vmem:[#allocation52_spill] sm:$0xff]  ;;  %v2645_v44 = vsel %vm1748_vm0, %v7575_v50, 0.0  ;;  %v11123_v15 = vld [vmem:[#allocation62_spill] sm:$0xff] }
 0x296   : > { %v3821_v13 = vmul.f32 %v11120_v8, %v11118_v45  ;;  %v3185_v36 = vadd.f32 %v3184_v60, %v3183_v23  ;;  %v3188_v57 = vsel %vm3156_vm2, %v11122_v61, 0.0  ;;  %v11125_v2 = vrot.slane %v11124_v4, 7  ;;  %v11126_v58 = vld [vmem:[#allocation232_spill] sm:$0xff]  ;;  %v11127_v23 = vld [vmem:[#allocation53_spill] sm:$0xff]  ;;  %v11129_v61 = vld [vmem:[#allocation174_spill] sm:$0xff] }
 0x297   : > { %v2642_v32 = vadd.f32 %v2641_v38, %v2640_v55  ;;  %v3968_v33 = vadd.f32 %v3967_v3, %v3966_v48  ;;  %v3971_v7 = vsel %vm3156_vm2, %v3820_v24, 0.0  ;;  %v3190_v3 = vsel %vm3156_vm2, %v11127_v23, 0.0  ;;  %v11128_v48 = vld [vmem:[#allocation64_spill] sm:$0xff]  ;;  %v11131_v24 = vld [vmem:[#allocation233_spill] sm:$0xff] }
 0x298   : > { %v3822_v6 = vmul.f32 %v11125_v2, %v11123_v15  ;;  %v3187_v8 = vadd.f32 %v3186_v39, %v3185_v36  ;;  %v2647_v55 = vsel %vm1748_vm0, %v7582_v10, 0.0  ;;  %v11130_v50 = vrot.slane %v11129_v61, 7 }
 0x299   : > { %v2644_v45 = vadd.f32 %v2643_v63, %v2642_v32  ;;  %v3970_v38 = vadd.f32 %v3969_v35, %v3968_v33  ;;  %v3973_v4 = vsel %vm3156_vm2, %v3821_v13, 0.0  ;;  %v11132_v63 = vld [vmem:[#allocation57_spill] sm:$0xff]  ;;  %v2649_v36 = vsel %vm1748_vm0, %v7587_v52, 0.0  ;;  %v11135_v13 = vld [vmem:[#allocation234_spill] sm:$0xff] }
 0x29a   : > { %v3823_v56 = vmul.f32 %v11130_v50, %v11128_v48  ;;  %v3189_v15 = vadd.f32 %v3188_v57, %v3187_v8  ;;  %v3192_v35 = vsel %vm3156_vm2, %v11132_v63, 0.0  ;;  %v11133_v33 = vld [vmem:[#allocation65_spill] sm:$0xff]  ;;  %v11134_v10 = vrot.slane %v11074_v28, 7  ;;  %v11136_v8 = vld [vmem:[#allocation63_spill] sm:$0xff] }
 0x29b   : > { %v2646_v2 = vadd.f32 %v2645_v44, %v2644_v45  ;;  %v3972_v32 = vadd.f32 %v3971_v7, %v3970_v38  ;;  %v3975_v60 = vsel %vm3156_vm2, %v3822_v6, 0.0  ;;  %v3194_v7 = vsel %vm3156_vm2, %v11136_v8, 0.0  ;;  %v11137_v38 = vld [vmem:[#allocation66_spill] sm:$0xff]  ;;  %v11139_v6 = vld [vmem:[#allocation249_spill] sm:$0xff] }
 0x29c   : > { %v3824_v23 = vmul.f32 %v11134_v10, %v11133_v33  ;;  %v3191_v48 = vadd.f32 %v3190_v3, %v3189_v15  ;;  %v2651_v45 = vsel %vm1748_vm0, %v7592_v22, 0.0  ;;  %v11138_v52 = vrot.slane %v11077_v47, 7  ;;  %v11140_v15 = vld [vmem:[#allocation67_spill] sm:$0xff] }
 0x29d   : > { %v2648_v50 = vadd.f32 %v2647_v55, %v2646_v2  ;;  %v3974_v44 = vadd.f32 %v3973_v4, %v3972_v32  ;;  %v3977_v39 = vsel %vm3156_vm2, %v3823_v56, 0.0  ;;  %v3196_v4 = vsel %vm3156_vm2, %v11140_v15, 0.0  ;;  %v11141_v32 = vld [vmem:[#allocation74_spill] sm:$0xff]  ;;  %v11143_v56 = vld [vmem:[#allocation75_spill] sm:$0xff] }
 0x29e   : > { %v3825_v63 = vmul.f32 %v11138_v52, %v11137_v38  ;;  %v3193_v33 = vadd.f32 %v3192_v35, %v3191_v48  ;;  %v2653_v2 = vsel %vm1748_vm0, %v7597_v53, 0.0  ;;  %v11142_v22 = vrot.slane %v11079_v46, 7  ;;  %v11146_v53 = vld [vmem:[#allocation76_spill] sm:$0xff] }
 0x29f   : > { %v2650_v10 = vadd.f32 %v2649_v36, %v2648_v50  ;;  %v3976_v55 = vadd.f32 %v3975_v60, %v3974_v44  ;;  %v3979_v57 = vsel %vm3156_vm2, %v3824_v23, 0.0  ;;  %v11144_v35 = vrot.slane %v11081_v41, 7  ;;  %v11145_v60 = vld [vmem:[#allocation68_spill] sm:$0xff] }
 0x2a0   : > { %v3826_v8 = vmul.f32 %v11142_v22, %v11141_v32  ;;  %v3195_v38 = vadd.f32 %v3194_v7, %v3193_v33  ;;  %v3198_v50 = vsel %vm3156_vm2, %v11145_v60, 0.0  ;;  %v2655_v44 = vsel %vm1748_vm0, %v7602_v51, 0.0  ;;  %v11151_v51 = vld [vmem:[#allocation250_spill] sm:$0xff] }
 0x2a1   : > { %v2652_v52 = vadd.f32 %v2651_v45, %v2650_v10  ;;  %v3827_v36 = vmul.f32 %v11144_v35, %v11143_v56  ;;  %v3978_v48 = vadd.f32 %v3977_v39, %v3976_v55  ;;  %v11147_v15 = vrot.slane %v11083_v16, 7  ;;  %v11148_v45 = vld [vmem:[#allocation78_spill] sm:$0xff]  ;;  %v11150_v39 = vld [vmem:[#allocation69_spill] sm:$0xff] }
 0x2a2   : > { %v3981_v32 = vsel %vm3156_vm2, %v3825_v63, 0.0  ;;  %v3197_v23 = vadd.f32 %v3196_v4, %v3195_v38  ;;  %v11149_v33 = vrot.slane %v11085_v5, 7  ;;  %v3200_v55 = vsel %vm3156_vm2, %v11150_v39, 0.0  ;;  %v11152_v63 = vld [vmem:[#allocation79_spill] sm:$0xff] }
 0x2a3   : > { %v3828_v3 = vmul.f32 %v11147_v15, %v11146_v53  ;;  %v2654_v7 = vadd.f32 %v2653_v2, %v2652_v52  ;;  %v3980_v22 = vadd.f32 %v3979_v57, %v3978_v48  ;;  %v2657_v56 = vsel %vm1748_vm0, %v7607_v12, 0.0  ;;  %v11154_v52 = vld [vmem:[#allocation70_spill] sm:$0xff] }
 0x2a4   : > { %v3829_v10 = vmul.f32 %v11149_v33, %v11148_v45  ;;  %v3983_v60 = vsel %vm3156_vm2, %v3826_v8, 0.0  ;;  %v3199_v53 = vadd.f32 %v3198_v50, %v3197_v23  ;;  %v11153_v4 = vrot.slane %v11087_v20, 7  ;;  %v11155_v45 = vld [vmem:[#allocation80_spill] sm:$0xff] }
 0x2a5   : > { %v2656_v15 = vadd.f32 %v2655_v44, %v2654_v7  ;;  %v3982_v38 = vadd.f32 %v3981_v32, %v3980_v22  ;;  %v3202_v57 = vsel %vm3156_vm2, %v11154_v52, 0.0  ;;  %v2659_v48 = vsel %vm1748_vm0, %v7614_v54, 0.0  ;;  %v11157_v44 = vld [vmem:[#allocation81_spill] sm:$0xff]  ;;  %v11160_v54 = vld [vmem:[#allocation83_spill] sm:$0xff] }
 0x2a6   : > { %v3830_v2 = vmul.f32 %v11153_v4, %v11152_v63  ;;  %v11156_v12 = vrot.slane %v11089_v27, 7  ;;  %v3985_v39 = vsel %vm3156_vm2, %v3827_v36, 0.0  ;;  %v3201_v8 = vadd.f32 %v3200_v55, %v3199_v53  ;;  %v11159_v32 = vld [vmem:[#allocation77_spill] sm:$0xff] }
 0x2a7   : > { %v2658_v50 = vadd.f32 %v2657_v56, %v2656_v15  ;;  %v11158_v23 = vrot.slane %v11091_v43, 7  ;;  %v3984_v63 = vadd.f32 %v3983_v60, %v3982_v38  ;;  %v3204_v22 = vsel %vm3156_vm2, %v11159_v32, 0.0  ;;  %v11162_v56 = vld [vmem:[#allocation92_spill] sm:$0xff]  ;;  %v11164_v60 = vld [vmem:[#allocation82_spill] sm:$0xff] }
 0x2a8   : > { %v3831_v33 = vmul.f32 %v11156_v12, %v11155_v45  ;;  %v2661_v4 = vsel %vm1748_vm0, %v7619_v62, 0.0  ;;  %v11161_v52 = vrot.slane %v11093_v9, 7  ;;  %v3987_v45 = vsel %vm3156_vm2, %v3828_v3, 0.0  ;;  %v11165_v62 = vld [vmem:[#allocation251_spill] sm:$0xff]  ;;  %v11166_v3 = vld [vmem:[#allocation93_spill] sm:$0xff] }
 0x2a9   : > { %v3832_v7 = vmul.f32 %v11158_v23, %v11157_v44  ;;  %v3203_v36 = vadd.f32 %v3202_v57, %v3201_v8  ;;  %v2660_v55 = vadd.f32 %v2659_v48, %v2658_v50  ;;  %v11163_v53 = vrot.slane %v11095_v26, 7  ;;  %v11168_v50 = vld [vmem:[#allocation84_spill] sm:$0xff] }
 0x2aa   : > { %v3833_v35 = vmul.f32 %v11161_v52, %v11160_v54  ;;  %v3986_v12 = vadd.f32 %v3985_v39, %v3984_v63  ;;  %v3206_v38 = vsel %vm3156_vm2, %v11164_v60, 0.0  ;;  %v2663_v44 = vsel %vm1748_vm0, %v7624_v34, 0.0 }
 0x2ab   : > { %v3834_v15 = vmul.f32 %v11163_v53, %v11162_v56  ;;  %v3989_v32 = vsel %vm3156_vm2, %v3829_v10, 0.0  ;;  %v3205_v54 = vadd.f32 %v3204_v22, %v3203_v36  ;;  %v2662_v52 = vadd.f32 %v2661_v4, %v2660_v55  ;;  %v11169_v56 = vld [vmem:[#allocation94_spill] sm:$0xff]  ;;  %v11171_v4 = vld [vmem:[#allocation95_spill] sm:$0xff] }
 0x2ac   : > { %v11167_v57 = vrot.slane %v11097_v30, 7  ;;  %v3988_v8 = vadd.f32 %v3987_v45, %v3986_v12  ;;  %v3208_v39 = vsel %vm3156_vm2, %v11168_v50, 0.0  ;;  %v2665_v63 = vsel %vm1748_vm0, %v7629_v14, 0.0  ;;  %v11173_v45 = vld [vmem:[#allocation85_spill] sm:$0xff]  ;;  %v11174_v14 = vld [vmem:[#allocation96_spill] sm:$0xff] }
 0x2ad   : > { %v11170_v34 = vrot.slane %v11099_v18, 7  ;;  %v3991_v60 = vsel %vm3156_vm2, %v3830_v2, 0.0  ;;  %v3207_v10 = vadd.f32 %v3206_v38, %v3205_v54  ;;  %v2664_v22 = vadd.f32 %v2663_v44, %v2662_v52  ;;  %v11176_v44 = vld [vmem:[#allocation98_spill] sm:$0xff] }
 0x2ae   : > { %v3835_v48 = vmul.f32 %v11167_v57, %v11166_v3  ;;  %v11172_v36 = vrot.slane %v11102_v17, 7  ;;  %v3990_v3 = vadd.f32 %v3989_v32, %v3988_v8  ;;  %v3210_v12 = vsel %vm3156_vm2, %v11173_v45, 0.0  ;;  %v11178_v32 = vld [vmem:[#allocation86_spill] sm:$0xff] }
 0x2af   : > { %v3836_v53 = vmul.f32 %v11170_v34, %v11169_v56  ;;  %v2667_v57 = vsel %vm1748_vm0, %v7634_v11, 0.0  ;;  %v11175_v50 = vrot.slane %v11104_v29, 7  ;;  %v3993_v56 = vsel %vm3156_vm2, %v3831_v33, 0.0  ;;  %v11179_v11 = vld [vmem:[#allocation252_spill] sm:$0xff]  ;;  %v11180_v33 = vld [vmem:[#allocation99_spill] sm:$0xff] }
 0x2b0   : > { %v3837_v55 = vmul.f32 %v11172_v36, %v11171_v4  ;;  %v3209_v2 = vadd.f32 %v3208_v39, %v3207_v10  ;;  %v2666_v38 = vadd.f32 %v2665_v63, %v2664_v22  ;;  %v11177_v54 = vrot.slane %v11110_v0, 7  ;;  %v11182_v22 = vld [vmem:[#allocation89_spill] sm:$0xff] }
 0x2b1   : > { %v3838_v23 = vmul.f32 %v11175_v50, %v11174_v14  ;;  %v3992_v34 = vadd.f32 %v3991_v60, %v3990_v3  ;;  %v3212_v8 = vsel %vm3156_vm2, %v11178_v32, 0.0  ;;  %v2669_v4 = vsel %vm1748_vm0, %v7639_v42, 0.0 }
 0x2b2   : > { %v3839_v52 = vmul.f32 %v11177_v54, %v11176_v44  ;;  %v3995_v45 = vsel %vm3156_vm2, %v3832_v7, 0.0  ;;  %v3211_v14 = vadd.f32 %v3210_v12, %v3209_v2  ;;  %v2668_v50 = vadd.f32 %v2667_v57, %v2666_v38  ;;  %v11183_v44 = vld [vmem:[#allocation253_spill] sm:$0xff]  ;;  %v11184_v7 = vld [vmem:[#allocation100_spill] sm:$0xff] }
 0x2b3   : > { %v11181_v39 = vrot.slane %v11116_v40, 7  ;;  %v3994_v10 = vadd.f32 %v3993_v56, %v3992_v34  ;;  %v3214_v60 = vsel %vm3156_vm2, %v11182_v22, 0.0  ;;  %v2671_v3 = vsel %vm1748_vm0, %v7646_v37, 0.0  ;;  %v11186_v38 = vld [vmem:[#allocation97_spill] sm:$0xff]  ;;  %v11350_v40 = vld [vmem:[#allocation188_spill] sm:$0xff] }
 0x2b4   : > { %v3997_v42 = vsel %vm3156_vm2, %v3833_v35, 0.0  ;;  %v3213_v32 = vadd.f32 %v3212_v8, %v3211_v14  ;;  %v2670_v36 = vadd.f32 %v2669_v4, %v2668_v50  ;;  %v11185_v12 = vrot.slane %v11121_v31, 7  ;;  %v11188_v35 = vld [vmem:[#allocation108_spill] sm:$0xff]  ;;  %v11190_v50 = vld [vmem:[#allocation101_spill] sm:$0xff] }
 0x2b5   : > { %v3840_v63 = vmul.f32 %v11181_v39, %v11180_v33  ;;  %v3996_v2 = vadd.f32 %v3995_v45, %v3994_v10  ;;  %v3216_v56 = vsel %vm3156_vm2, %v11186_v38, 0.0  ;;  %v2673_v34 = vsel %vm1748_vm0, %v7651_v19, 0.0  ;;  %v11187_v33 = vld [vmem:[#allocation256_spill] sm:$0xff]  ;;  %v11191_v10 = vld [vmem:[#allocation385_spill] sm:$0xff] }
 0x2b6   : > { %v3841_v57 = vmul.f32 %v11185_v12, %v11184_v7  ;;  %v3999_v37 = vsel %vm3156_vm2, %v3834_v15, 0.0  ;;  %v3215_v22 = vadd.f32 %v3214_v60, %v3213_v32  ;;  %v2672_v54 = vadd.f32 %v2671_v3, %v2670_v36  ;;  %v11192_v12 = vld [vmem:[#allocation257_spill] sm:$0xff]  ;;  %v11195_v32 = vld [vmem:[#allocation102_spill] sm:$0xff] }
 0x2b7   : > { %v11189_v8 = vrot.slane %v11126_v58, 7  ;;  %v3998_v14 = vadd.f32 %v3997_v42, %v3996_v2  ;;  %v3218_v45 = vsel %vm3156_vm2, %v11190_v50, 0.0  ;;  %v2675_v7 = vsel %vm1748_vm0, %v11191_v10, 0.0  ;;  %v11193_v15 = vld [vmem:[#allocation109_spill] sm:$0xff] }
 0x2b8   : > { %v4001_v19 = vsel %vm3156_vm2, %v3835_v48, 0.0  ;;  %v3217_v39 = vadd.f32 %v3216_v56, %v3215_v22  ;;  %v2674_v31 = vadd.f32 %v2673_v34, %v2672_v54  ;;  %v11194_v36 = vrot.slane %v11131_v24, 7  ;;  %v11197_v48 = vld [vmem:[#allocation110_spill] sm:$0xff]  ;;  %v11199_v22 = vld [vmem:[#allocation103_spill] sm:$0xff]  ;;  %v11355_v58 = vld [vmem:[#allocation185_spill] sm:$0xff] }
 0x2b9   : > { %v3842_v4 = vmul.f32 %v11189_v8, %v11188_v35  ;;  %v4000_v3 = vadd.f32 %v3999_v37, %v3998_v14  ;;  %v3220_v42 = vsel %vm3156_vm2, %v11195_v32, 0.0  ;;  %v2677_v2 = vsel %vm1748_vm0, %v7669_v1, 0.0  ;;  %v11196_v35 = vld [vmem:[#allocation258_spill] sm:$0xff] }
 0x2ba   : > { %v3843_v60 = vmul.f32 %v11194_v36, %v11193_v15  ;;  %v4003_v50 = vsel %vm3156_vm2, %v3836_v53, 0.0  ;;  %v3219_v10 = vadd.f32 %v3218_v45, %v3217_v39  ;;  %v2676_v38 = vadd.f32 %v2675_v7, %v2674_v31  ;;  %v11200_v15 = vld [vmem:[#allocation259_spill] sm:$0xff]  ;;  %v11201_v53 = vld [vmem:[#allocation112_spill] sm:$0xff] }
 0x2bb   : > { %v11198_v54 = vrot.slane %v11135_v13, 7  ;;  %v4002_v34 = vadd.f32 %v4001_v19, %v4000_v3  ;;  %v3222_v37 = vsel %vm3156_vm2, %v11199_v22, 0.0  ;;  %v2679_v14 = vsel %vm1748_vm0, %v7674_v21, 0.0  ;;  %v11203_v7 = vld [vmem:[#allocation104_spill] sm:$0xff]  ;;  %v11337_v13 = vld [vmem:[#allocation178_spill] sm:$0xff] }
 0x2bc   : > { %v4005_v1 = vsel %vm3156_vm2, %v3837_v55, 0.0  ;;  %v3221_v32 = vadd.f32 %v3220_v42, %v3219_v10  ;;  %v2678_v8 = vadd.f32 %v2677_v2, %v2676_v38  ;;  %v11202_v31 = vrot.slane %v11139_v6, 7  ;;  %v11205_v55 = vld [vmem:[#allocation113_spill] sm:$0xff]  ;;  %v11207_v10 = vld [vmem:[#allocation111_spill] sm:$0xff] }
 0x2bd   : > { %v3844_v56 = vmul.f32 %v11198_v54, %v11197_v48  ;;  %v4004_v45 = vadd.f32 %v4003_v50, %v4002_v34  ;;  %v3224_v19 = vsel %vm3156_vm2, %v11203_v7, 0.0  ;;  %v2681_v3 = vsel %vm1748_vm0, %v7679_v49, 0.0  ;;  %v11204_v48 = vld [vmem:[#allocation260_spill] sm:$0xff] }
 0x2be   : > { %v3845_v39 = vmul.f32 %v11202_v31, %v11201_v53  ;;  %v4007_v21 = vsel %vm3156_vm2, %v3838_v23, 0.0  ;;  %v3223_v22 = vadd.f32 %v3222_v37, %v3221_v32  ;;  %v2680_v36 = vadd.f32 %v2679_v14, %v2678_v8  ;;  %v11208_v53 = vld [vmem:[#allocation262_spill] sm:$0xff]  ;;  %v11211_v32 = vld [vmem:[#allocation116_spill] sm:$0xff] }
 0x2bf   : > { %v11206_v38 = vrot.slane %v11151_v51, 7  ;;  %v4006_v2 = vadd.f32 %v4005_v1, %v4004_v45  ;;  %v3226_v50 = vsel %vm3156_vm2, %v11207_v10, 0.0  ;;  %v2683_v34 = vsel %vm1748_vm0, %v7684_v59, 0.0  ;;  %v11209_v23 = vld [vmem:[#allocation114_spill] sm:$0xff] }
 0x2c0   : > { %v4009_v49 = vsel %vm3156_vm2, %v3839_v52, 0.0  ;;  %v3225_v7 = vadd.f32 %v3224_v19, %v3223_v22  ;;  %v2682_v54 = vadd.f32 %v2681_v3, %v2680_v36  ;;  %v11210_v8 = vrot.slane %v11165_v62, 7  ;;  %v11213_v52 = vld [vmem:[#allocation115_spill] sm:$0xff]  ;;  %v11215_v22 = vld [vmem:[#allocation118_spill] sm:$0xff] }
 0x2c1   : > { %v3846_v42 = vmul.f32 %v11206_v38, %v11205_v55  ;;  %v4008_v14 = vadd.f32 %v4007_v21, %v4006_v2  ;;  %v3228_v1 = vsel %vm3156_vm2, %v11211_v32, 0.0  ;;  %v2685_v45 = vsel %vm1748_vm0, %v7693_v25, 0.0  ;;  %v11212_v55 = vld [vmem:[#allocation263_spill] sm:$0xff]  ;;  %v11216_v2 = vld [vmem:[#allocation301_spill] sm:$0xff] }
 0x2c2   : > { %v3847_v37 = vmul.f32 %v11210_v8, %v11209_v23  ;;  %v4011_v59 = vsel %vm3156_vm2, %v3840_v63, 0.0  ;;  %v3227_v10 = vadd.f32 %v3226_v50, %v3225_v7  ;;  %v2684_v31 = vadd.f32 %v2683_v34, %v2682_v54  ;;  %v11217_v8 = vld [vmem:[#allocation274_spill] sm:$0xff]  ;;  %v11218_v63 = vld [vmem:[#allocation117_spill] sm:$0xff]  ;;  %v11220_v7 = vld [vmem:[#allocation119_spill] sm:$0xff] }
 0x2c3   : > { %v11214_v36 = vrot.slane %v11179_v11, 7  ;;  %v4010_v3 = vadd.f32 %v4009_v49, %v4008_v14  ;;  %v3230_v21 = vsel %vm3156_vm2, %v11215_v22, 0.0  ;;  %v2687_v23 = vsel %vm1748_vm0, %v11216_v2, 0.0  ;;  %v11221_v14 = vld [vmem:[#allocation386_spill] sm:$0xff] }
 0x2c4   : > { %v4013_v25 = vsel %vm3156_vm2, %v3841_v57, 0.0  ;;  %v3229_v38 = vadd.f32 %v3228_v1, %v3227_v10  ;;  %v2686_v62 = vadd.f32 %v2685_v45, %v2684_v31  ;;  %v11219_v54 = vrot.slane %v11183_v44, 7  ;;  %v11223_v57 = vld [vmem:[#allocation126_spill] sm:$0xff]  ;;  %v11225_v10 = vld [vmem:[#allocation120_spill] sm:$0xff] }
 0x2c5   : > { %v3848_v19 = vmul.f32 %v11214_v36, %v11213_v52  ;;  %v4012_v34 = vadd.f32 %v4011_v59, %v4010_v3  ;;  %v3232_v49 = vsel %vm3156_vm2, %v11220_v7, 0.0  ;;  %v2689_v52 = vsel %vm1748_vm0, %v11221_v14, 0.0  ;;  %v11222_v36 = vld [vmem:[#allocation276_spill] sm:$0xff]  ;;  %v11226_v3 = vld [vmem:[#allocation9_spill] sm:$0xff] }
 0x2c6   : > { %v3849_v50 = vmul.f32 %v11219_v54, %v11218_v63  ;;  %v4015_v2 = vsel %vm3156_vm2, %v3842_v4, 0.0  ;;  %v3231_v32 = vadd.f32 %v3230_v21, %v3229_v38  ;;  %v2688_v11 = vadd.f32 %v2687_v23, %v2686_v62  ;;  %v11227_v54 = vld [vmem:[#allocation278_spill] sm:$0xff]  ;;  %v11228_v4 = vld [vmem:[#allocation127_spill] sm:$0xff]  ;;  %v11230_v23 = vld [vmem:[#allocation125_spill] sm:$0xff] }
 0x2c7   : > { %v11224_v31 = vrot.slane %v11187_v33, 7  ;;  %v4014_v45 = vadd.f32 %v4013_v25, %v4012_v34  ;;  %v3234_v59 = vsel %vm3156_vm2, %v11225_v10, 0.0  ;;  %v2691_v63 = vsel %vm1748_vm0, %v11226_v3, 0.0  ;;  %v11231_v34 = vld [vmem:[#allocation304_spill] sm:$0xff] }
 0x2c8   : > { %v4017_v14 = vsel %vm3156_vm2, %v3843_v60, 0.0  ;;  %v3233_v22 = vadd.f32 %v3232_v49, %v3231_v32  ;;  %v2690_v44 = vadd.f32 %v2689_v52, %v2688_v11  ;;  %v11229_v62 = vrot.slane %v11192_v12, 7  ;;  %v11233_v60 = vld [vmem:[#allocation128_spill] sm:$0xff]  ;;  %v11235_v52 = vld [vmem:[#allocation131_spill] sm:$0xff] }
 0x2c9   : > { %v3850_v1 = vmul.f32 %v11224_v31, %v11223_v57  ;;  %v4016_v21 = vadd.f32 %v4015_v2, %v4014_v45  ;;  %v3236_v25 = vsel %vm3156_vm2, %v11230_v23, 0.0  ;;  %v2693_v57 = vsel %vm1748_vm0, %v11231_v34, 0.0  ;;  %v11232_v31 = vld [vmem:[#allocation279_spill] sm:$0xff]  ;;  %v11236_v45 = vld [vmem:[#allocation305_spill] sm:$0xff] }
 0x2ca   : > { %v3851_v38 = vmul.f32 %v11229_v62, %v11228_v4  ;;  %v4019_v3 = vsel %vm3156_vm2, %v3844_v56, 0.0  ;;  %v3235_v7 = vadd.f32 %v3234_v59, %v3233_v22  ;;  %v2692_v33 = vadd.f32 %v2691_v63, %v2690_v44  ;;  %v11237_v62 = vld [vmem:[#allocation280_spill] sm:$0xff]  ;;  %v11238_v56 = vld [vmem:[#allocation129_spill] sm:$0xff]  ;;  %v11240_v63 = vld [vmem:[#allocation135_spill] sm:$0xff] }
 0x2cb   : > { %v11234_v11 = vrot.slane %v11196_v35, 7  ;;  %v4018_v49 = vadd.f32 %v4017_v14, %v4016_v21  ;;  %v3238_v2 = vsel %vm3156_vm2, %v11235_v52, 0.0  ;;  %v2695_v4 = vsel %vm1748_vm0, %v11236_v45, 0.0  ;;  %v11241_v21 = vld [vmem:[#allocation398_spill] sm:$0xff] }
 0x2cc   : > { %v4021_v34 = vsel %vm3156_vm2, %v3845_v39, 0.0  ;;  %v3237_v10 = vadd.f32 %v3236_v25, %v3235_v7  ;;  %v2694_v12 = vadd.f32 %v2693_v57, %v2692_v33  ;;  %v11239_v44 = vrot.slane %v11200_v15, 7  ;;  %v11243_v39 = vld [vmem:[#allocation130_spill] sm:$0xff]  ;;  %v11245_v57 = vld [vmem:[#allocation136_spill] sm:$0xff] }
 0x2cd   : > { %v3852_v32 = vmul.f32 %v11234_v11, %v11233_v60  ;;  %v4020_v59 = vadd.f32 %v4019_v3, %v4018_v49  ;;  %v3240_v14 = vsel %vm3156_vm2, %v11240_v63, 0.0  ;;  %v2697_v60 = vsel %vm1748_vm0, %v11241_v21, 0.0  ;;  %v11242_v11 = vld [vmem:[#allocation282_spill] sm:$0xff]  ;;  %v11246_v49 = vld [vmem:[#allocation399_spill] sm:$0xff] }
 0x2ce   : > { %v3853_v22 = vmul.f32 %v11239_v44, %v11238_v56  ;;  %v4023_v45 = vsel %vm3156_vm2, %v3846_v42, 0.0  ;;  %v3239_v23 = vadd.f32 %v3238_v2, %v3237_v10  ;;  %v2696_v35 = vadd.f32 %v2695_v4, %v2694_v12  ;;  %v11247_v44 = vld [vmem:[#allocation283_spill] sm:$0xff]  ;;  %v11248_v42 = vld [vmem:[#allocation132_spill] sm:$0xff]  ;;  %v11250_v4 = vld [vmem:[#allocation138_spill] sm:$0xff] }
 0x2cf   : > { %v11244_v33 = vrot.slane %v11204_v48, 7  ;;  %v4022_v25 = vadd.f32 %v4021_v34, %v4020_v59  ;;  %v3242_v3 = vsel %vm3156_vm2, %v11245_v57, 0.0  ;;  %v2699_v56 = vsel %vm1748_vm0, %v11246_v49, 0.0  ;;  %v11251_v59 = vld [vmem:[#allocation13_spill] sm:$0xff] }
 0x2d0   : > { %v4025_v21 = vsel %vm3156_vm2, %v3847_v37, 0.0  ;;  %v3241_v52 = vadd.f32 %v3240_v14, %v3239_v23  ;;  %v2698_v15 = vadd.f32 %v2697_v60, %v2696_v35  ;;  %v11249_v12 = vrot.slane %v11208_v53, 7  ;;  %v11253_v37 = vld [vmem:[#allocation133_spill] sm:$0xff]  ;;  %v11255_v60 = vld [vmem:[#allocation139_spill] sm:$0xff] }
 0x2d1   : > { %v3854_v7 = vmul.f32 %v11244_v33, %v11243_v39  ;;  %v4024_v2 = vadd.f32 %v4023_v45, %v4022_v25  ;;  %v3244_v34 = vsel %vm3156_vm2, %v11250_v4, 0.0  ;;  %v2701_v39 = vsel %vm1748_vm0, %v11251_v59, 0.0  ;;  %v11252_v33 = vld [vmem:[#allocation291_spill] sm:$0xff]  ;;  %v11256_v25 = vld [vmem:[#allocation400_spill] sm:$0xff] }
 0x2d2   : > { %v3855_v10 = vmul.f32 %v11249_v12, %v11248_v42  ;;  %v4027_v49 = vsel %vm3156_vm2, %v3848_v19, 0.0  ;;  %v3243_v63 = vadd.f32 %v3242_v3, %v3241_v52  ;;  %v2700_v48 = vadd.f32 %v2699_v56, %v2698_v15  ;;  %v11257_v12 = vld [vmem:[#allocation293_spill] sm:$0xff]  ;;  %v11258_v19 = vld [vmem:[#allocation134_spill] sm:$0xff] }
 0x2d3   : > { %v11254_v35 = vrot.slane %v11212_v55, 7  ;;  %v4026_v14 = vadd.f32 %v4025_v21, %v4024_v2  ;;  %v3246_v45 = vsel %vm3156_vm2, %v11255_v60, 0.0  ;;  %v2703_v42 = vsel %vm1748_vm0, %v11256_v25, 0.0  ;;  %v11260_v56 = vld [vmem:[#allocation146_spill] sm:$0xff]  ;;  %v11261_v2 = vld [vmem:[#allocation401_spill] sm:$0xff] }
 0x2d4   : > { %v4029_v59 = vsel %vm3156_vm2, %v3849_v50, 0.0  ;;  %v3245_v57 = vadd.f32 %v3244_v34, %v3243_v63  ;;  %v2702_v53 = vadd.f32 %v2701_v39, %v2700_v48  ;;  %v11259_v15 = vrot.slane %v11217_v8, 7  ;;  %v11263_v50 = vld [vmem:[#allocation143_spill] sm:$0xff] }
 0x2d5   : > { %v3856_v23 = vmul.f32 %v11254_v35, %v11253_v37  ;;  %v4028_v3 = vadd.f32 %v4027_v49, %v4026_v14  ;;  %v3248_v21 = vsel %vm3156_vm2, %v11260_v56, 0.0  ;;  %v2705_v37 = vsel %vm1748_vm0, %v11261_v2, 0.0  ;;  %v11262_v35 = vld [vmem:[#allocation296_spill] sm:$0xff]  ;;  %v11265_v39 = vld [vmem:[#allocation151_spill] sm:$0xff]  ;;  %v11266_v14 = vld [vmem:[#allocation402_spill] sm:$0xff] }
 0x2d6   : > { %v3857_v52 = vmul.f32 %v11259_v15, %v11258_v19  ;;  %v4031_v25 = vsel %vm3156_vm2, %v3850_v1, 0.0  ;;  %v3247_v4 = vadd.f32 %v3246_v45, %v3245_v57  ;;  %v2704_v55 = vadd.f32 %v2703_v42, %v2702_v53  ;;  %v11267_v15 = vld [vmem:[#allocation297_spill] sm:$0xff]  ;;  %v11268_v1 = vld [vmem:[#allocation144_spill] sm:$0xff] }
 0x2d7   : > { %v11264_v48 = vrot.slane %v11222_v36, 7  ;;  %v4030_v34 = vadd.f32 %v4029_v59, %v4028_v3  ;;  %v3250_v49 = vsel %vm3156_vm2, %v11265_v39, 0.0  ;;  %v2707_v19 = vsel %vm1748_vm0, %v11266_v14, 0.0  ;;  %v11270_v42 = vld [vmem:[#allocation153_spill] sm:$0xff]  ;;  %v11271_v3 = vld [vmem:[#allocation387_spill] sm:$0xff] }
 0x2d8   : > { %v4033_v2 = vsel %vm3156_vm2, %v3851_v38, 0.0  ;;  %v3249_v60 = vadd.f32 %v3248_v21, %v3247_v4  ;;  %v2706_v8 = vadd.f32 %v2705_v37, %v2704_v55  ;;  %v11269_v53 = vrot.slane %v11227_v54, 7  ;;  %v11273_v38 = vld [vmem:[#allocation145_spill] sm:$0xff]  ;;  %v11275_v37 = vld [vmem:[#allocation154_spill] sm:$0xff] }
 0x2d9   : > { %v3858_v63 = vmul.f32 %v11264_v48, %v11263_v50  ;;  %v4032_v45 = vadd.f32 %v4031_v25, %v4030_v34  ;;  %v3252_v59 = vsel %vm3156_vm2, %v11270_v42, 0.0  ;;  %v2709_v50 = vsel %vm1748_vm0, %v11271_v3, 0.0  ;;  %v11272_v48 = vld [vmem:[#allocation298_spill] sm:$0xff]  ;;  %v11276_v34 = vld [vmem:[#allocation392_spill] sm:$0xff] }
 0x2da   : > { %v3859_v57 = vmul.f32 %v11269_v53, %v11268_v1  ;;  %v4035_v14 = vsel %vm3156_vm2, %v3852_v32, 0.0  ;;  %v3251_v56 = vadd.f32 %v3250_v49, %v3249_v60  ;;  %v2708_v36 = vadd.f32 %v2707_v19, %v2706_v8  ;;  %v11277_v53 = vld [vmem:[#allocation300_spill] sm:$0xff]  ;;  %v11278_v60 = vld [vmem:[#allocation147_spill] sm:$0xff] }
 0x2db   : > { %v11274_v55 = vrot.slane %v11232_v31, 7  ;;  %v4034_v21 = vadd.f32 %v4033_v2, %v4032_v45  ;;  %v3254_v25 = vsel %vm3156_vm2, %v11275_v37, 0.0  ;;  %v2711_v1 = vsel %vm1748_vm0, %v11276_v34, 0.0  ;;  %v11281_v45 = vld [vmem:[#allocation403_spill] sm:$0xff]  ;;  %v11282_v37 = vld [vmem:[#allocation317_spill] sm:$0xff] }
 0x2dc   : > { %v4037_v3 = vsel %vm3156_vm2, %v3853_v22, 0.0  ;;  %v3253_v39 = vadd.f32 %v3252_v59, %v3251_v56  ;;  %v2710_v32 = vadd.f32 %v2709_v50, %v2708_v36  ;;  %v11279_v8 = vrot.slane %v11237_v62, 7  ;;  %v11283_v56 = vld [vmem:[#allocation148_spill] sm:$0xff] }
 0x2dd   : > { %v8335_v4 = vmul.f32 %v11274_v55, %v11273_v38  ;;  %v4036_v19 = vadd.f32 %v4035_v14, %v4034_v21  ;;  %v11280_v38 = vld [vmem:[#allocation155_spill] sm:$0xff]  ;;  %v2713_v55 = vsel %vm1748_vm0, %v11281_v45, 0.0  ;;  %v3618_v34 = vrot.slane %v11282_v37, 7  ;;  %v11286_v21 = vld [vmem:[#allocation404_spill] sm:$0xff] }
 0x2de   : > { %v8346_v49 = vmul.f32 %v11279_v8, %v11278_v60  ;;  %v3256_v2 = vsel %vm3156_vm2, %v11280_v38, 0.0  ;;  %v4039_v42 = vsel %vm3156_vm2, %v3854_v7, 0.0  ;;  %v3255_v31 = vadd.f32 %v3254_v25, %v3253_v39  ;;  %v11285_v60 = vld [vmem:[#allocation158_spill] sm:$0xff]  ;;  %v11287_v38 = vld [vmem:[#allocation332_spill] sm:$0xff]  ;;  %v11288_v39 = vld [vmem:[#allocation149_spill] sm:$0xff] }
 0x2df   : > { %v2712_v22 = vadd.f32 %v2711_v1, %v2710_v32  ;;  %v11284_v36 = vrot.slane %v11242_v11, 7  ;;  %v4038_v50 = vadd.f32 %v4037_v3, %v4036_v19  ;;  %v3258_v14 = vsel %vm3156_vm2, %v11285_v60, 0.0  ;;  %v11291_v19 = vld [vmem:[#allocation307_spill] sm:$0xff]  ;;  %v11292_v60 = vld [vmem:[#allocation333_spill] sm:$0xff] }
 0x2e0   : > { %v2715_v8 = vsel %vm1748_vm0, %v11286_v21, 0.0  ;;  %v3619_v45 = vrot.slane %v11287_v38, 7  ;;  %v4041_v37 = vsel %vm3156_vm2, %v3855_v10, 0.0  ;;  %v3257_v62 = vadd.f32 %v3256_v2, %v3255_v31  ;;  %v11293_v31 = vld [vmem:[#allocation150_spill] sm:$0xff] }
 0x2e1   : > { %v8357_v59 = vmul.f32 %v11284_v36, %v11283_v56  ;;  %v2714_v7 = vadd.f32 %v2713_v55, %v2712_v22  ;;  %v11289_v25 = vrot.slane %v11247_v44, 7  ;;  %v4040_v32 = vadd.f32 %v4039_v42, %v4038_v50  ;;  %v11290_v56 = vld [vmem:[#allocation163_spill] sm:$0xff]  ;;  %v11296_v50 = vld [vmem:[#allocation393_spill] sm:$0xff] }
 0x2e2   : > { %v3260_v3 = vsel %vm3156_vm2, %v11290_v56, 0.0  ;;  %v2717_v36 = vsel %vm1748_vm0, %v11291_v19, 0.0  ;;  %v3620_v21 = vrot.slane %v11292_v60, 7  ;;  %v4043_v38 = vsel %vm3156_vm2, %v3856_v23, 0.0  ;;  %v11297_v56 = vld [vmem:[#allocation334_spill] sm:$0xff] }
 0x2e3   : > { %v8368_v1 = vmul.f32 %v11289_v25, %v11288_v39  ;;  %v3259_v11 = vadd.f32 %v3258_v14, %v3257_v62  ;;  %v2716_v10 = vadd.f32 %v2715_v8, %v2714_v7  ;;  %v11294_v2 = vrot.slane %v11252_v33, 7  ;;  %v11295_v39 = vld [vmem:[#allocation169_spill] sm:$0xff]  ;;  %v11298_v62 = vld [vmem:[#allocation152_spill] sm:$0xff] }
 0x2e4   : > { %v4042_v22 = vadd.f32 %v4041_v37, %v4040_v32  ;;  %v3262_v42 = vsel %vm3156_vm2, %v11295_v39, 0.0  ;;  %v2719_v25 = vsel %vm1748_vm0, %v11296_v50, 0.0  ;;  %v3621_v19 = vrot.slane %v11297_v56, 7  ;;  %v11301_v32 = vld [vmem:[#allocation405_spill] sm:$0xff]  ;;  %v11302_v39 = vld [vmem:[#allocation335_spill] sm:$0xff] }
 0x2e5   : > { %v8379_v55 = vmul.f32 %v11294_v2, %v11293_v31  ;;  %v4045_v60 = vsel %vm3156_vm2, %v3857_v52, 0.0  ;;  %v3261_v44 = vadd.f32 %v3260_v3, %v3259_v11  ;;  %v2718_v23 = vadd.f32 %v2717_v36, %v2716_v10  ;;  %v11300_v31 = vld [vmem:[#allocation170_spill] sm:$0xff]  ;;  %v11303_v11 = vld [vmem:[#allocation160_spill] sm:$0xff] }
 0x2e6   : > { %v11299_v14 = vrot.slane %v11257_v12, 7  ;;  %v4044_v7 = vadd.f32 %v4043_v38, %v4042_v22  ;;  %v3264_v37 = vsel %vm3156_vm2, %v11300_v31, 0.0  ;;  %v2721_v2 = vsel %vm1748_vm0, %v11301_v32, 0.0  ;;  %v11306_v22 = vld [vmem:[#allocation406_spill] sm:$0xff]  ;;  %v11307_v31 = vld [vmem:[#allocation336_spill] sm:$0xff] }
 0x2e7   : > { %v3622_v50 = vrot.slane %v11302_v39, 7  ;;  %v4047_v56 = vsel %vm3156_vm2, %v3858_v63, 0.0  ;;  %v3263_v33 = vadd.f32 %v3262_v42, %v3261_v44  ;;  %v2720_v52 = vadd.f32 %v2719_v25, %v2718_v23  ;;  %v11308_v44 = vld [vmem:[#allocation161_spill] sm:$0xff] }
 0x2e8   : > { %v8390_v8 = vmul.f32 %v11299_v14, %v11298_v62  ;;  %v11304_v3 = vrot.slane %v11262_v35, 7  ;;  %v4046_v10 = vadd.f32 %v4045_v60, %v4044_v7  ;;  %v11305_v62 = vld [vmem:[#allocation171_spill] sm:$0xff]  ;;  %v2723_v14 = vsel %vm1748_vm0, %v11306_v22, 0.0  ;;  %v11311_v7 = vld [vmem:[#allocation16_spill] sm:$0xff]  ;;  %v11313_v35 = vld [vmem:[#allocation162_spill] sm:$0xff] }
 0x2e9   : > { %v3266_v38 = vsel %vm3156_vm2, %v11305_v62, 0.0  ;;  %v3623_v32 = vrot.slane %v11307_v31, 7  ;;  %v4049_v39 = vsel %vm3156_vm2, %v3859_v57, 0.0  ;;  %v3265_v12 = vadd.f32 %v3264_v37, %v3263_v33  ;;  %v11312_v62 = vld [vmem:[#allocation337_spill] sm:$0xff] }
 0x2ea   : > { %v8401_v36 = vmul.f32 %v11304_v3, %v11303_v11  ;;  %v2722_v63 = vadd.f32 %v2721_v2, %v2720_v52  ;;  %v11309_v42 = vrot.slane %v11267_v15, 7  ;;  %v4048_v23 = vadd.f32 %v4047_v56, %v4046_v10  ;;  %v11310_v11 = vld [vmem:[#allocation172_spill] sm:$0xff]  ;;  %v11315_v2 = vld [vmem:[#allocation338_spill] sm:$0xff]  ;;  %v11316_v10 = vld [vmem:[#allocation19_spill] sm:$0xff] }
 0x2eb   : > { %v3268_v60 = vsel %vm3156_vm2, %v11310_v11, 0.0  ;;  %v2725_v3 = vsel %vm1748_vm0, %v11311_v7, 0.0  ;;  %v3624_v22 = vrot.slane %v11312_v62, 7  ;;  %v11314_v31 = vrot.slane %v11272_v48, 7  ;;  %v11317_v11 = vld [vmem:[#allocation164_spill] sm:$0xff]  ;;  %v11319_v48 = vld [vmem:[#allocation179_spill] sm:$0xff] }
 0x2ec   : > { %v8412_v25 = vmul.f32 %v11309_v42, %v11308_v44  ;;  %v3267_v33 = vadd.f32 %v3266_v38, %v3265_v12  ;;  %v2724_v37 = vadd.f32 %v2723_v14, %v2722_v63  ;;  %v3625_v52 = vrot.slane %v11315_v2, 7  ;;  %v11320_v38 = vld [vmem:[#allocation339_spill] sm:$0xff]  ;;  %v11322_v63 = vld [vmem:[#allocation165_spill] sm:$0xff] }
 0x2ed   : > { %v8422_v57 = vmul.f32 %v11314_v31, %v11313_v35  ;;  %v4050_v44 = vadd.f32 %v4049_v39, %v4048_v23  ;;  %v4051_v56 = vsel %vm3156_vm2, %v8335_v4, 0.0  ;;  %v2727_v42 = vsel %vm1748_vm0, %v11316_v10, 0.0  ;;  %v11321_v31 = vld [vmem:[#allocation340_spill] sm:$0xff]  ;;  %v11323_v4 = vld [vmem:[#allocation407_spill] sm:$0xff]  ;;  %v11324_v2 = vld [vmem:[#allocation341_spill] sm:$0xff] }
 0x2ee   : > { %v11318_v7 = vrot.slane %v11277_v53, 7  ;;  %v3269_v15 = vadd.f32 %v3268_v60, %v3267_v33  ;;  %v3270_v35 = vsel %vm3156_vm2, %v11319_v48, 0.0  ;;  %v2726_v12 = vadd.f32 %v2725_v3, %v2724_v37  ;;  %v11325_v53 = vld [vmem:[#allocation166_spill] sm:$0xff] }
 0x2ef   : > { %v3626_v14 = vrot.slane %v11320_v38, 7  ;;  %v3627_v39 = vrot.slane %v11321_v31, 7  ;;  %v8439_v23 = vmul.f32 %v3618_v34, %v11322_v63  ;;  %v2729_v10 = vsel %vm1748_vm0, %v11323_v4, 0.0  ;;  %v11327_v31 = vld [vmem:[#allocation408_spill] sm:$0xff] }
 0x2f0   : > { %v8432_v62 = vmul.f32 %v11318_v7, %v11317_v11  ;;  %v3628_v54 = vrot.slane %v11324_v2, 7  ;;  %v8445_v11 = vmul.f32 %v3619_v45, %v11325_v53  ;;  %v4052_v60 = vadd.f32 %v4051_v56, %v4050_v44  ;;  %v11326_v7 = vld [vmem:[#allocation167_spill] sm:$0xff]  ;;  %v11328_v63 = vld [vmem:[#allocation348_spill] sm:$0xff]  ;;  %v11331_v44 = vld [vmem:[#allocation349_spill] sm:$0xff] }
 0x2f1   : > { %v2728_v33 = vadd.f32 %v2727_v42, %v2726_v12  ;;  %v8448_v48 = vmul.f32 %v3620_v21, %v11326_v7  ;;  %v4053_v3 = vsel %vm3156_vm2, %v8346_v49, 0.0  ;;  %v3271_v37 = vadd.f32 %v3270_v35, %v3269_v15  ;;  %v11329_v4 = vld [vmem:[#allocation168_spill] sm:$0xff]  ;;  %v11332_v21 = vld [vmem:[#allocation350_spill] sm:$0xff]  ;;  %v11334_v15 = vld [vmem:[#allocation17_spill] sm:$0xff] }
 0x2f2   : > { %v2731_v34 = vsel %vm1748_vm0, %v11327_v31, 0.0  ;;  %v3629_v38 = vrot.slane %v11328_v63, 7  ;;  %v8456_v51 = vmul.f32 %v3621_v19, %v11329_v4  ;;  %v11330_v2 = vld [vmem:[#allocation184_spill] sm:$0xff]  ;;  %v3630_v56 = vrot.slane %v11331_v44, 7  ;;  %v11335_v35 = vld [vmem:[#allocation351_spill] sm:$0xff]  ;;  %v11336_v63 = vld [vmem:[#allocation177_spill] sm:$0xff] }
 0x2f3   : > { %v3272_v53 = vsel %vm3156_vm2, %v11330_v2, 0.0  ;;  %v2730_v45 = vadd.f32 %v2729_v10, %v2728_v33  ;;  %v3631_v42 = vrot.slane %v11332_v21, 7  ;;  %v11333_v12 = vld [vmem:[#allocation176_spill] sm:$0xff]  ;;  %v2733_v49 = vsel %vm1748_vm0, %v11334_v15, 0.0  ;;  %v11338_v21 = vld [vmem:[#allocation354_spill] sm:$0xff] }
 0x2f4   : > { %v8463_v7 = vmul.f32 %v3622_v50, %v11333_v12  ;;  %v3632_v31 = vrot.slane %v11335_v35, 7  ;;  %v8469_v6 = vmul.f32 %v3623_v32, %v11336_v63  ;;  %v4054_v19 = vadd.f32 %v4053_v3, %v4052_v60  ;;  %v11339_v12 = vld [vmem:[#allocation353_spill] sm:$0xff]  ;;  %v11340_v15 = vld [vmem:[#allocation180_spill] sm:$0xff]  ;;  %v11341_v35 = vld [vmem:[#allocation186_spill] sm:$0xff] }
 0x2f5   : > { %v2732_v4 = vadd.f32 %v2731_v34, %v2730_v45  ;;  %v8472_v2 = vmul.f32 %v3624_v22, %v11337_v13  ;;  %v4055_v10 = vsel %vm3156_vm2, %v8357_v59, 0.0  ;;  %v3273_v33 = vadd.f32 %v3272_v53, %v3271_v37  ;;  %v11342_v3 = vld [vmem:[#allocation356_spill] sm:$0xff]  ;;  %v11343_v13 = vld [vmem:[#allocation181_spill] sm:$0xff]  ;;  %v11345_v53 = vld [vmem:[#allocation367_spill] sm:$0xff] }
 0x2f6   : > { %v2735_v50 = vsel %vm1748_vm0, %v11338_v21, 0.0  ;;  %v3633_v44 = vrot.slane %v11339_v12, 7  ;;  %v8480_v24 = vmul.f32 %v3625_v52, %v11340_v15  ;;  %v3274_v32 = vsel %vm3156_vm2, %v11341_v35, 0.0  ;;  %v11344_v37 = vld [vmem:[#allocation409_spill] sm:$0xff]  ;;  %v11346_v52 = vld [vmem:[#allocation187_spill] sm:$0xff]  ;;  %v11347_v35 = vld [vmem:[#allocation182_spill] sm:$0xff] }
 0x2f7   : > { %v2734_v60 = vadd.f32 %v2733_v49, %v2732_v4  ;;  %v8486_v22 = vmul.f32 %v3626_v14, %v11343_v13  ;;  %v4057_v59 = vsel %vm3156_vm2, %v8368_v1, 0.0  ;;  %v2737_v63 = vsel %vm1748_vm0, %v11344_v37, 0.0  ;;  %v11348_v13 = vld [vmem:[#allocation410_spill] sm:$0xff]  ;;  %v11349_v34 = vld [vmem:[#allocation368_spill] sm:$0xff]  ;;  %v11351_v45 = vld [vmem:[#allocation183_spill] sm:$0xff] }
 0x2f8   : > { %v4056_v21 = vadd.f32 %v4055_v10, %v4054_v19  ;;  %v3276_v15 = vsel %vm3156_vm2, %v11346_v52, 0.0  ;;  %v8496_v49 = vmul.f32 %v3627_v39, %v11347_v35  ;;  %v4059_v14 = vsel %vm3156_vm2, %v8379_v55, 0.0 }
 0x2f9   : > { %v2736_v12 = vadd.f32 %v2735_v50, %v2734_v60  ;;  %v3275_v4 = vadd.f32 %v3274_v32, %v3273_v33  ;;  %v2739_v1 = vsel %vm1748_vm0, %v11348_v13, 0.0  ;;  %v3278_v19 = vsel %vm3156_vm2, %v11350_v40, 0.0  ;;  %v11352_v60 = vld [vmem:[#allocation23_spill] sm:$0xff]  ;;  %v11353_v33 = vld [vmem:[#allocation370_spill] sm:$0xff]  ;;  %v11354_v13 = vld [vmem:[#allocation192_spill] sm:$0xff] }
 0x2fa   : > { %v4058_v37 = vadd.f32 %v4057_v59, %v4056_v21  ;;  %v8506_v52 = vmul.f32 %v3628_v54, %v11351_v45  ;;  %v4061_v39 = vsel %vm3156_vm2, %v8390_v8, 0.0  ;;  %v2741_v55 = vsel %vm1748_vm0, %v11352_v60, 0.0  ;;  %v11357_v45 = vld [vmem:[#allocation372_spill] sm:$0xff]  ;;  %v11358_v60 = vld [vmem:[#allocation198_spill] sm:$0xff]  ;;  %v11359_v32 = vld [vmem:[#allocation193_spill] sm:$0xff] }
 0x2fb   : > { %v2738_v10 = vadd.f32 %v2737_v63, %v2736_v12  ;;  %v3277_v50 = vadd.f32 %v3276_v15, %v3275_v4  ;;  %v3280_v59 = vsel %vm3156_vm2, %v11354_v13, 0.0  ;;  %v8516_v40 = vmul.f32 %v3629_v38, %v11355_v58  ;;  %v11356_v63 = vld [vmem:[#allocation25_spill] sm:$0xff]  ;;  %v11363_v15 = vld [vmem:[#allocation194_spill] sm:$0xff] }
 0x2fc   : > { %v4060_v35 = vadd.f32 %v4059_v14, %v4058_v37  ;;  %v4063_v54 = vsel %vm3156_vm2, %v8401_v36, 0.0  ;;  %v2743_v8 = vsel %vm1748_vm0, %v11356_v63, 0.0  ;;  %v3282_v14 = vsel %vm3156_vm2, %v11358_v60, 0.0  ;;  %v11362_v63 = vld [vmem:[#allocation202_spill] sm:$0xff] }
 0x2fd   : > { %v2740_v21 = vadd.f32 %v2739_v1, %v2738_v10  ;;  %v3279_v12 = vadd.f32 %v3278_v19, %v3277_v50  ;;  %v8526_v13 = vmul.f32 %v3630_v56, %v11359_v32  ;;  %v4065_v58 = vsel %vm3156_vm2, %v8412_v25, 0.0  ;;  %v11360_v1 = vld [vmem:[#allocation11_spill] sm:$0xff]  ;;  %v11361_v19 = vld [vmem:[#allocation288_spill] sm:$0xff]  ;;  %v11364_v32 = vld [vmem:[#allocation357_spill] sm:$0xff] }
 0x2fe   : > { %v4062_v4 = vadd.f32 %v4061_v39, %v4060_v35  ;;  %v2745_v36 = vsel %vm1748_vm0, %v11360_v1, 0.0  ;;  %v3284_v39 = vsel %vm3156_vm2, %v11362_v63, 0.0  ;;  %v8536_v60 = vmul.f32 %v3631_v42, %v11363_v15  ;;  %v11366_v1 = vld [vmem:[#allocation203_spill] sm:$0xff]  ;;  %v11368_v15 = vld [vmem:[#allocation26_spill] sm:$0xff] }
 0x2ff   : > { %v2742_v37 = vadd.f32 %v2741_v55, %v2740_v21  ;;  %v3281_v38 = vadd.f32 %v3280_v59, %v3279_v12  ;;  %v4067_v56 = vsel %vm3156_vm2, %v8422_v57, 0.0  ;;  %v2747_v25 = vsel %vm1748_vm0, %v11364_v32, 0.0  ;;  %v11365_v59 = vld [vmem:[#allocation375_spill] sm:$0xff]  ;;  %v11371_v21 = vld [vmem:[#allocation196_spill] sm:$0xff] }
 0x300   : > { %v4064_v50 = vadd.f32 %v4063_v54, %v4062_v4  ;;  %v3286_v54 = vsel %vm3156_vm2, %v11366_v1, 0.0  ;;  %v11367_v10 = vld [vmem:[#allocation195_spill] sm:$0xff]  ;;  %v4069_v42 = vsel %vm3156_vm2, %v8432_v62, 0.0  ;;  %v2749_v57 = vsel %vm1748_vm0, %v11368_v15, 0.0 }
 0x301   : > { %v2744_v35 = vadd.f32 %v2743_v8, %v2742_v37  ;;  %v3283_v55 = vadd.f32 %v3282_v14, %v3281_v38  ;;  %v8546_v63 = vmul.f32 %v3632_v31, %v11367_v10  ;;  %v11369_v14 = vld [vmem:[#allocation289_spill] sm:$0xff]  ;;  %v11370_v32 = vld [vmem:[#allocation215_spill] sm:$0xff]  ;;  %v8556_v1 = vmul.f32 %v3633_v44, %v11371_v21  ;;  %v11372_v10 = vld [vmem:[#allocation14_spill] sm:$0xff] }
 0x302   : > { %v4066_v12 = vadd.f32 %v4065_v58, %v4064_v50  ;;  %v3288_v58 = vsel %vm3156_vm2, %v11370_v32, 0.0  ;;  %v4071_v31 = vsel %vm3156_vm2, %v8439_v23, 0.0  ;;  %v2751_v62 = vsel %vm1748_vm0, %v11372_v10, 0.0  ;;  %v11374_v15 = vld [vmem:[#allocation219_spill] sm:$0xff]  ;;  %v11375_v37 = vld [vmem:[#allocation197_spill] sm:$0xff] }
 0x303   : > { %v2746_v4 = vadd.f32 %v2745_v36, %v2744_v35  ;;  %v3285_v8 = vadd.f32 %v3284_v39, %v3283_v55  ;;  %v11373_v39 = vld [vmem:[#allocation377_spill] sm:$0xff]  ;;  %v4073_v44 = vsel %vm3156_vm2, %v8445_v11, 0.0  ;;  %v11377_v21 = vld [vmem:[#allocation15_spill] sm:$0xff] }
 0x304   : > { %v4068_v38 = vadd.f32 %v4067_v56, %v4066_v12  ;;  %v3290_v56 = vsel %vm3156_vm2, %v11374_v15, 0.0 }
 0x305   : > { %v2748_v50 = vadd.f32 %v2747_v25, %v2746_v4  ;;  %v3287_v36 = vadd.f32 %v3286_v54, %v3285_v8  ;;  %v11376_v25 = vrot.slane %v11342_v3, 7  ;;  %v2753_v54 = vsel %vm1748_vm0, %v11377_v21, 0.0  ;;  %v11378_v8 = vld [vmem:[#allocation378_spill] sm:$0xff] }
 0x306   : > { %v4070_v55 = vadd.f32 %v4069_v42, %v4068_v38  ;;  %v11379_v42 = vld [vmem:[#allocation223_spill] sm:$0xff] }
 0x307   : > { %v2750_v12 = vadd.f32 %v2749_v57, %v2748_v50  ;;  %v8568_v4 = vmul.f32 %v11376_v25, %v11375_v37  ;;  %v3289_v23 = vadd.f32 %v3288_v58, %v3287_v36  ;;  %v3292_v38 = vsel %vm3156_vm2, %v11379_v42, 0.0  ;;  %v11380_v57 = vld [vmem:[#allocation199_spill] sm:$0xff]  ;;  %v11382_v58 = vld [vmem:[#allocation204_spill] sm:$0xff] }
 0x308   : > { %v4072_v10 = vadd.f32 %v4071_v31, %v4070_v55  ;;  %v11381_v50 = vrot.slane %v11345_v53, 7  ;;  %v4075_v37 = vsel %vm3156_vm2, %v8448_v48, 0.0  ;;  %v2755_v36 = vsel %vm1748_vm0, %v11382_v58, 0.0  ;;  %v11383_v25 = vld [vmem:[#allocation292_spill] sm:$0xff] }
 0x309   : > { %v2752_v15 = vadd.f32 %v2751_v62, %v2750_v12  ;;  %v3291_v11 = vadd.f32 %v3290_v56, %v3289_v23  ;;  %v11384_v31 = vld [vmem:[#allocation224_spill] sm:$0xff]  ;;  %v11386_v12 = vrot.slane %v11349_v34, 7  ;;  %v11387_v56 = vld [vmem:[#allocation27_spill] sm:$0xff] }
 0x30a   : > { %v8580_v35 = vmul.f32 %v11381_v50, %v11380_v57  ;;  %v4074_v32 = vadd.f32 %v4073_v44, %v4072_v10  ;;  %v3294_v55 = vsel %vm3156_vm2, %v11384_v31, 0.0  ;;  %v11385_v62 = vld [vmem:[#allocation200_spill] sm:$0xff]  ;;  %v4077_v57 = vsel %vm3156_vm2, %v8456_v51, 0.0  ;;  %v11388_v50 = vld [vmem:[#allocation381_spill] sm:$0xff] }
 0x30b   : > { %v2754_v42 = vadd.f32 %v2753_v54, %v2752_v15  ;;  %v8592_v53 = vmul.f32 %v11386_v12, %v11385_v62  ;;  %v3293_v48 = vadd.f32 %v3292_v38, %v3291_v11  ;;  %v2757_v23 = vsel %vm1748_vm0, %v11387_v56, 0.0  ;;  %v11389_v44 = vld [vmem:[#allocation225_spill] sm:$0xff]  ;;  %v11391_v38 = vld [vmem:[#allocation238_spill] sm:$0xff] }
 0x30c   : > { %v4076_v21 = vadd.f32 %v4075_v37, %v4074_v32  ;;  %v3296_v10 = vsel %vm3156_vm2, %v11389_v44, 0.0  ;;  %v11390_v54 = vld [vmem:[#allocation365_spill] sm:$0xff]  ;;  %v4079_v62 = vsel %vm3156_vm2, %v8463_v7, 0.0  ;;  %v4081_v51 = vsel %vm3156_vm2, %v8469_v6, 0.0  ;;  %v11395_v7 = vld [vmem:[#allocation384_spill] sm:$0xff] }
 0x30d   : > { %v2756_v31 = vadd.f32 %v2755_v36, %v2754_v42  ;;  %v2759_v15 = vsel %vm1748_vm0, %v11390_v54, 0.0  ;;  %v3295_v12 = vadd.f32 %v3294_v55, %v3293_v48  ;;  %v3298_v11 = vsel %vm3156_vm2, %v11391_v38, 0.0  ;;  %v11392_v56 = vld [vmem:[#allocation37_spill] sm:$0xff]  ;;  %v11393_v36 = vld [vmem:[#allocation38_spill] sm:$0xff]  ;;  %v11394_v54 = vld [vmem:[#allocation39_spill] sm:$0xff] }
 0x30e   : > { %v4078_v34 = vadd.f32 %v4077_v57, %v4076_v21  ;;  %v4182_v32 = vmul.f32 %v11392_v56, %v11392_v56  ;;  %v4183_v42 = vmul.f32 %v11393_v36, %v11393_v36  ;;  %v4184_v58 = vmul.f32 %v11394_v54, %v11394_v54  ;;  %v11396_v21 = vld [vmem:[#allocation201_spill] sm:$0xff]  ;;  %v11398_v38 = vld [vmem:[#allocation243_spill] sm:$0xff]  ;;  %v11400_v55 = vld [vmem:[#allocation248_spill] sm:$0xff] }
 0x30f   : > { %v2758_v37 = vadd.f32 %v2757_v23, %v2756_v31  ;;  %v3297_v44 = vadd.f32 %v3296_v10, %v3295_v12  ;;  %v11397_v57 = vrot.slane %v11353_v33, 7  ;;  %v3300_v3 = vsel %vm3156_vm2, %v11398_v38, 0.0  ;;  %v11399_v31 = vld [vmem:[#allocation40_spill] sm:$0xff] }
 0x310   : > { %v4080_v48 = vadd.f32 %v4079_v62, %v4078_v34  ;;  %v4083_v23 = vsel %vm3156_vm2, %v8472_v2, 0.0  ;;  %v4185_v12 = vmul.f32 %v11399_v31, %v11399_v31  ;;  %v4085_v54 = vsel %vm3156_vm2, %v8480_v24, 0.0  ;;  %v11414_v31 = vld [vmem:[#allocation269_spill] sm:$0xff] }
 0x311   : > { %v8619_v6 = vmul.f32 %v11397_v57, %v11396_v21  ;;  %v2760_v56 = vadd.f32 %v2759_v15, %v2758_v37  ;;  %v3299_v10 = vadd.f32 %v3298_v11, %v3297_v44  ;;  %v3302_v21 = vsel %vm3156_vm2, %v11400_v55, 0.0  ;;  %v11401_v57 = vld [vmem:[#allocation54_spill] sm:$0xff] }
 0x312   : > { %v4082_v36 = vadd.f32 %v4081_v51, %v4080_v48  ;;  %v4308_v34 = vsel %vm1748_vm0, %v4182_v32, 0.0  ;;  %v4186_v15 = vmul.f32 %v11401_v57, %v11401_v57  ;;  %v4309_v2 = vsel %vm1748_vm0, %v4183_v42, 0.0  ;;  %v11402_v37 = vld [vmem:[#allocation210_spill] sm:$0xff] }
 0x313   : > { %2761 = vadd.xlane.f32.xlu0 %v2760_v56  ;;  %v3301_v62 = vadd.f32 %v3300_v3, %v3299_v10  ;;  %v4311_v11 = vsel %vm1748_vm0, %v4184_v58, 0.0  ;;  %v11403_v51 = vrot.slane %v11357_v45, 7  ;;  %v11404_v48 = vld [vmem:[#allocation254_spill] sm:$0xff]  ;;  %v4310_v38 = vadd.f32 %v4309_v2, %v4308_v34  ;;  %v11405_v56 = vld [vmem:[#allocation55_spill] sm:$0xff]  ;;  %v11406_v58 = vld [vmem:[#allocation8_spill] sm:$0xff] }
 0x314   : > { %v4084_v24 = vadd.f32 %v4083_v23, %v4082_v36  ;;  %v3304_v55 = vsel %vm3156_vm2, %v11404_v48, 0.0  ;;  %v4087_v3 = vsel %vm3156_vm2, %v8486_v22, 0.0  ;;  %v4187_v10 = vmul.f32 %v11405_v56, %v11405_v56  ;;  %v11407_v45 = vld [vmem:[#allocation255_spill] sm:$0xff]  ;;  %v11408_v2 = vld [vmem:[#allocation56_spill] sm:$0xff] }
 0x315   : > { %v8639_v44 = vmul.f32 %v11403_v51, %v11402_v37  ;;  %v3303_v32 = vadd.f32 %v3302_v21, %v3301_v62  ;;  %v4313_v42 = vsel %vm1748_vm0, %v4185_v12, 0.0  ;;  %v3306_v37 = vsel %vm3156_vm2, %v11407_v45, 0.0  ;;  %v11409_v62 = vld [vmem:[#allocation211_spill] sm:$0xff] }
 0x316   : > { %v4086_v57 = vadd.f32 %v4085_v54, %v4084_v24  ;;  %v4312_v23 = vadd.f32 %v4311_v11, %v4310_v38  ;;  %v4089_v36 = vsel %vm3156_vm2, %v8496_v49, 0.0  ;;  %v4188_v22 = vmul.f32 %v11408_v2, %v11408_v2  ;;  %v11411_v54 = vld [vmem:[#allocation261_spill] sm:$0xff]  ;;  %v11421_v56 = vld [vmem:[#allocation275_spill] sm:$0xff] }
 0x317   : > { %v3305_v34 = vadd.f32 %v3304_v55, %v3303_v32  ;;  %v4315_v21 = vsel %vm1748_vm0, %v4186_v15, 0.0  ;;  %v11410_v51 = vrot.slane %v11361_v19, 7  ;;  %v3308_v24 = vsel %vm3156_vm2, %v11411_v54, 0.0  ;;  %v11412_v55 = vld [vmem:[#allocation71_spill] sm:$0xff]  ;;  %v11413_v15 = vld [vmem:[#allocation302_spill] sm:$0xff] }
 0x318   : > { %v4088_v48 = vadd.f32 %v4087_v3, %v4086_v57  ;;  %v4314_v45 = vadd.f32 %v4313_v42, %v4312_v23  ;;  %v4091_v11 = vsel %vm3156_vm2, %v8506_v52, 0.0  ;;  %v4189_v38 = vmul.f32 %v11412_v55, %v11412_v55  ;;  %v11415_v23 = vld [vmem:[#allocation72_spill] sm:$0xff]  ;;  %v11428_v55 = vld [vmem:[#allocation281_spill] sm:$0xff] }
 0x319   : > { %v8659_v12 = vmul.f32 %v11410_v51, %v11409_v62  ;;  %v3307_v49 = vadd.f32 %v3306_v37, %v3305_v34  ;;  %v4317_v32 = vsel %vm1748_vm0, %v4187_v10, 0.0  ;;  %v3310_v62 = vsel %vm3156_vm2, %v11414_v31, 0.0  ;;  %v11416_v34 = vld [vmem:[#allocation212_spill] sm:$0xff] }
 0x31a   : > { %v4090_v2 = vadd.f32 %v4089_v36, %v4088_v48  ;;  %v4316_v3 = vadd.f32 %v4315_v21, %v4314_v45  ;;  %v4093_v57 = vsel %vm3156_vm2, %v8516_v40, 0.0  ;;  %v4190_v52 = vmul.f32 %v11415_v23, %v11415_v23  ;;  %v11418_v36 = vld [vmem:[#allocation273_spill] sm:$0xff] }
 0x31b   : > { %v3309_v42 = vadd.f32 %v3308_v24, %v3307_v49  ;;  %v4319_v37 = vsel %vm1748_vm0, %v4188_v22, 0.0  ;;  %v11417_v51 = vrot.slane %v11365_v59, 7  ;;  %v3312_v48 = vsel %vm3156_vm2, %v11418_v36, 0.0  ;;  %v11419_v24 = vld [vmem:[#allocation73_spill] sm:$0xff]  ;;  %v11420_v22 = vld [vmem:[#allocation10_spill] sm:$0xff] }
 0x31c   : > { %v4092_v54 = vadd.f32 %v4091_v11, %v4090_v2  ;;  %v4318_v31 = vadd.f32 %v4317_v32, %v4316_v3  ;;  %v4095_v21 = vsel %vm3156_vm2, %v8526_v13, 0.0  ;;  %v4191_v45 = vmul.f32 %v11419_v24, %v11419_v24  ;;  %v11422_v3 = vld [vmem:[#allocation87_spill] sm:$0xff]  ;;  %v11435_v24 = vld [vmem:[#allocation290_spill] sm:$0xff] }
 0x31d   : > { %v8679_v10 = vmul.f32 %v11417_v51, %v11416_v34  ;;  %v3311_v40 = vadd.f32 %v3310_v62, %v3309_v42  ;;  %v4321_v49 = vsel %vm1748_vm0, %v4189_v38, 0.0  ;;  %v3314_v34 = vsel %vm3156_vm2, %v11421_v56, 0.0  ;;  %v11423_v42 = vld [vmem:[#allocation213_spill] sm:$0xff] }
 0x31e   : > { %v4094_v23 = vadd.f32 %v4093_v57, %v4092_v54  ;;  %v4320_v11 = vadd.f32 %v4319_v37, %v4318_v31  ;;  %v4097_v2 = vsel %vm3156_vm2, %v8536_v60, 0.0  ;;  %v4192_v13 = vmul.f32 %v11422_v3, %v11422_v3  ;;  %v11425_v57 = vld [vmem:[#allocation277_spill] sm:$0xff] }
 0x31f   : > { %v3313_v32 = vadd.f32 %v3312_v48, %v3311_v40  ;;  %v4323_v62 = vsel %vm1748_vm0, %v4190_v52, 0.0  ;;  %v11424_v51 = vrot.slane %v11369_v14, 7  ;;  %v3316_v54 = vsel %vm3156_vm2, %v11425_v57, 0.0  ;;  %v11426_v48 = vld [vmem:[#allocation88_spill] sm:$0xff] }
 0x320   : > { %v4096_v36 = vadd.f32 %v4095_v21, %v4094_v23  ;;  %v4322_v56 = vadd.f32 %v4321_v49, %v4320_v11  ;;  %v4099_v37 = vsel %vm3156_vm2, %v8546_v63, 0.0  ;;  %v4193_v31 = vmul.f32 %v11426_v48, %v11426_v48  ;;  %v11427_v52 = vld [vmem:[#allocation12_spill] sm:$0xff]  ;;  %v11429_v11 = vld [vmem:[#allocation90_spill] sm:$0xff]  ;;  %v11442_v48 = vld [vmem:[#allocation299_spill] sm:$0xff] }
 0x321   : > { %v8699_v38 = vmul.f32 %v11424_v51, %v11423_v42  ;;  %v3315_v60 = vadd.f32 %v3314_v34, %v3313_v32  ;;  %v4325_v40 = vsel %vm1748_vm0, %v4191_v45, 0.0  ;;  %v3318_v42 = vsel %vm3156_vm2, %v11428_v55, 0.0  ;;  %v11430_v32 = vld [vmem:[#allocation214_spill] sm:$0xff] }
 0x322   : > { %v4098_v3 = vadd.f32 %v4097_v2, %v4096_v36  ;;  %v4324_v21 = vadd.f32 %v4323_v62, %v4322_v56  ;;  %v4101_v23 = vsel %vm3156_vm2, %v8556_v1, 0.0  ;;  %v4194_v63 = vmul.f32 %v11429_v11, %v11429_v11  ;;  %v11432_v2 = vld [vmem:[#allocation286_spill] sm:$0xff] }
 0x323   : > { %v3317_v49 = vadd.f32 %v3316_v54, %v3315_v60  ;;  %v4327_v34 = vsel %vm1748_vm0, %v4192_v13, 0.0  ;;  %v11431_v51 = vrot.slane %v11373_v39, 7  ;;  %v3320_v36 = vsel %vm3156_vm2, %v11432_v2, 0.0  ;;  %v11433_v54 = vld [vmem:[#allocation91_spill] sm:$0xff]  ;;  %v11434_v13 = vld [vmem:[#allocation306_spill] sm:$0xff] }
 0x324   : > { %v4100_v57 = vadd.f32 %v4099_v37, %v4098_v3  ;;  %v4326_v55 = vadd.f32 %v4325_v40, %v4324_v21  ;;  %v4103_v62 = vsel %vm3156_vm2, %v8568_v4, 0.0  ;;  %v4195_v56 = vmul.f32 %v11433_v54, %v11433_v54  ;;  %v11436_v21 = vld [vmem:[#allocation105_spill] sm:$0xff]  ;;  %v11439_v54 = vld [vmem:[#allocation295_spill] sm:$0xff] }
 0x325   : > { %v8719_v45 = vmul.f32 %v11431_v51, %v11430_v32  ;;  %v3319_v1 = vadd.f32 %v3318_v42, %v3317_v49  ;;  %v4329_v60 = vsel %vm1748_vm0, %v4193_v31, 0.0  ;;  %v3322_v32 = vsel %vm3156_vm2, %v11435_v24, 0.0  ;;  %v11437_v49 = vld [vmem:[#allocation216_spill] sm:$0xff] }
 0x326   : > { %v4102_v11 = vadd.f32 %v4101_v23, %v4100_v57  ;;  %v4328_v37 = vadd.f32 %v4327_v34, %v4326_v55  ;;  %v4105_v3 = vsel %vm3156_vm2, %v8580_v35, 0.0  ;;  %v4196_v4 = vmul.f32 %v11436_v21, %v11436_v21  ;;  %v11440_v35 = vld [vmem:[#allocation106_spill] sm:$0xff] }
 0x327   : > { %v3321_v40 = vadd.f32 %v3320_v36, %v3319_v1  ;;  %v4331_v42 = vsel %vm1748_vm0, %v4194_v63, 0.0  ;;  %v11438_v51 = vrot.slane %v11378_v8, 7  ;;  %v3324_v23 = vsel %vm3156_vm2, %v11439_v54, 0.0  ;;  %v11441_v1 = vld [vmem:[#allocation325_spill] sm:$0xff]  ;;  %v11449_v63 = vld [vmem:[#allocation244_spill] sm:$0xff] }
 0x328   : > { %v4104_v2 = vadd.f32 %v4103_v62, %v4102_v11  ;;  %v4330_v57 = vadd.f32 %v4329_v60, %v4328_v37  ;;  %v4107_v24 = vsel %vm3156_vm2, %v8592_v53, 0.0  ;;  %v4197_v36 = vmul.f32 %v11440_v35, %v11440_v35  ;;  %v11443_v37 = vld [vmem:[#allocation107_spill] sm:$0xff] }
 0x329   : > { %v3895_v31 = vmul.f32 %v11438_v51, %v11437_v49  ;;  %v3323_v34 = vadd.f32 %v3322_v32, %v3321_v40  ;;  %v4333_v55 = vsel %vm1748_vm0, %v4195_v56, 0.0  ;;  %v3326_v49 = vsel %vm3156_vm2, %v11442_v48, 0.0  ;;  %v11444_v40 = vld [vmem:[#allocation217_spill] sm:$0xff]  ;;  %v11446_v35 = vld [vmem:[#allocation303_spill] sm:$0xff] }
 0x32a   : > { %v4106_v21 = vadd.f32 %v4105_v3, %v4104_v2  ;;  %v4332_v62 = vadd.f32 %v4331_v42, %v4330_v57  ;;  %v4109_v11 = vsel %vm3156_vm2, %v8619_v6, 0.0  ;;  %v4198_v53 = vmul.f32 %v11443_v37, %v11443_v37  ;;  %v11447_v6 = vld [vmem:[#allocation121_spill] sm:$0xff] }
 0x32b   : > { %v3325_v60 = vadd.f32 %v3324_v23, %v3323_v34  ;;  %v4335_v32 = vsel %vm1748_vm0, %v4196_v4, 0.0  ;;  %v11445_v51 = vrot.slane %v11383_v25, 7  ;;  %v3328_v3 = vsel %vm3156_vm2, %v11446_v35, 0.0  ;;  %v11448_v34 = vld [vmem:[#allocation388_spill] sm:$0xff]  ;;  %v11456_v4 = vld [vmem:[#allocation309_spill] sm:$0xff] }
 0x32c   : > { %v4108_v54 = vadd.f32 %v4107_v24, %v4106_v21  ;;  %v4334_v2 = vadd.f32 %v4333_v55, %v4332_v62  ;;  %v4111_v48 = vsel %vm3156_vm2, %v8639_v44, 0.0  ;;  %v4199_v23 = vmul.f32 %v11447_v6, %v11447_v6  ;;  %v11450_v62 = vld [vmem:[#allocation122_spill] sm:$0xff]  ;;  %v11453_v6 = vld [vmem:[#allocation308_spill] sm:$0xff] }
 0x32d   : > { %v3896_v56 = vmul.f32 %v11445_v51, %v11444_v40  ;;  %v3327_v42 = vadd.f32 %v3326_v49, %v3325_v60  ;;  %v4337_v57 = vsel %vm1748_vm0, %v4197_v36, 0.0  ;;  %v3330_v40 = vsel %vm3156_vm2, %v11449_v63, 0.0  ;;  %v11451_v60 = vld [vmem:[#allocation218_spill] sm:$0xff] }
 0x32e   : > { %v4110_v37 = vadd.f32 %v4109_v11, %v4108_v54  ;;  %v4336_v24 = vadd.f32 %v4335_v32, %v4334_v2  ;;  %v4113_v21 = vsel %vm3156_vm2, %v8659_v12, 0.0  ;;  %v4200_v44 = vmul.f32 %v11450_v62, %v11450_v62  ;;  %v11454_v12 = vld [vmem:[#allocation123_spill] sm:$0xff] }
 0x32f   : > { %v3329_v55 = vadd.f32 %v3328_v3, %v3327_v42  ;;  %v4339_v49 = vsel %vm1748_vm0, %v4198_v53, 0.0  ;;  %v11452_v51 = vrot.slane %v11388_v50, 7  ;;  %v3332_v11 = vsel %vm3156_vm2, %v11453_v6, 0.0  ;;  %v11455_v42 = vld [vmem:[#allocation389_spill] sm:$0xff]  ;;  %v11463_v53 = vld [vmem:[#allocation310_spill] sm:$0xff] }
 0x330   : > { %v4112_v35 = vadd.f32 %v4111_v48, %v4110_v37  ;;  %v4338_v54 = vadd.f32 %v4337_v57, %v4336_v24  ;;  %v4115_v63 = vsel %vm3156_vm2, %v8679_v10, 0.0  ;;  %v4201_v3 = vmul.f32 %v11454_v12, %v11454_v12  ;;  %v11457_v24 = vld [vmem:[#allocation124_spill] sm:$0xff]  ;;  %v11460_v12 = vld [vmem:[#allocation246_spill] sm:$0xff] }
 0x331   : > { %v3897_v36 = vmul.f32 %v11452_v51, %v11451_v60  ;;  %v3331_v32 = vadd.f32 %v3330_v40, %v3329_v55  ;;  %v4341_v2 = vsel %vm1748_vm0, %v4199_v23, 0.0  ;;  %v3334_v60 = vsel %vm3156_vm2, %v11456_v4, 0.0  ;;  %v11458_v55 = vld [vmem:[#allocation235_spill] sm:$0xff] }
 0x332   : > { %v4114_v62 = vadd.f32 %v4113_v21, %v4112_v35  ;;  %v4340_v48 = vadd.f32 %v4339_v49, %v4338_v54  ;;  %v4117_v37 = vsel %vm3156_vm2, %v8699_v38, 0.0  ;;  %v4202_v10 = vmul.f32 %v11457_v24, %v11457_v24  ;;  %v11461_v38 = vld [vmem:[#allocation137_spill] sm:$0xff] }
 0x333   : > { %v3333_v57 = vadd.f32 %v3332_v11, %v3331_v32  ;;  %v4343_v40 = vsel %vm1748_vm0, %v4200_v44, 0.0  ;;  %v11459_v51 = vrot.slane %v11395_v7, 7  ;;  %v3336_v21 = vsel %vm3156_vm2, %v11460_v12, 0.0  ;;  %v11462_v32 = vld [vmem:[#allocation390_spill] sm:$0xff]  ;;  %v11470_v44 = vld [vmem:[#allocation312_spill] sm:$0xff] }
 0x334   : > { %v4116_v6 = vadd.f32 %v4115_v63, %v4114_v62  ;;  %v4342_v35 = vadd.f32 %v4341_v2, %v4340_v48  ;;  %v4119_v4 = vsel %vm3156_vm2, %v8719_v45, 0.0  ;;  %v4203_v11 = vmul.f32 %v11461_v38, %v11461_v38  ;;  %v11464_v2 = vld [vmem:[#allocation140_spill] sm:$0xff]  ;;  %v11467_v38 = vld [vmem:[#allocation311_spill] sm:$0xff] }
 0x335   : > { %v3898_v23 = vmul.f32 %v11459_v51, %v11458_v55  ;;  %v3335_v49 = vadd.f32 %v3334_v60, %v3333_v57  ;;  %v4345_v54 = vsel %vm1748_vm0, %v4201_v3, 0.0  ;;  %v3338_v55 = vsel %vm3156_vm2, %v11463_v53, 0.0  ;;  %v11465_v60 = vld [vmem:[#allocation236_spill] sm:$0xff] }
 0x336   : > { %v4118_v24 = vadd.f32 %v4117_v37, %v4116_v6  ;;  %v4344_v63 = vadd.f32 %v4343_v40, %v4342_v35  ;;  %v4121_v62 = vsel %vm3156_vm2, %v3895_v31, 0.0  ;;  %v4204_v48 = vmul.f32 %v11464_v2, %v11464_v2  ;;  %v11468_v35 = vld [vmem:[#allocation141_spill] sm:$0xff] }
 0x337   : > { %v3337_v51 = vadd.f32 %v3336_v21, %v3335_v49  ;;  %v4347_v45 = vsel %vm1748_vm0, %v4202_v10, 0.0  ;;  %v11466_v57 = vrot.slane %v11406_v58, 7  ;;  %v3340_v37 = vsel %vm3156_vm2, %v11467_v38, 0.0  ;;  %v11469_v49 = vld [vmem:[#allocation391_spill] sm:$0xff]  ;;  %v11478_v2 = vld [vmem:[#allocation313_spill] sm:$0xff] }
 0x338   : > { %v4120_v3 = vadd.f32 %v4119_v4, %v4118_v24  ;;  %v4346_v6 = vadd.f32 %v4345_v54, %v4344_v63  ;;  %v4123_v53 = vsel %vm3156_vm2, %v3896_v56, 0.0  ;;  %v4205_v31 = vmul.f32 %v11468_v35, %v11468_v35  ;;  %v11474_v38 = vld [vmem:[#allocation247_spill] sm:$0xff] }
 0x339   : > { %v3899_v12 = vmul.f32 %v11466_v57, %v11465_v60  ;;  %v3339_v40 = vadd.f32 %v3338_v55, %v3337_v51  ;;  %v4349_v21 = vsel %vm1748_vm0, %v4203_v11, 0.0  ;;  %v3342_v58 = vsel %vm3156_vm2, %v11470_v44, 0.0  ;;  %v11471_v57 = vld [vmem:[#allocation142_spill] sm:$0xff]  ;;  %v11472_v55 = vld [vmem:[#allocation237_spill] sm:$0xff] }
 0x33a   : > { %v4122_v10 = vadd.f32 %v4121_v62, %v4120_v3  ;;  %v4348_v60 = vadd.f32 %v4347_v45, %v4346_v6  ;;  %v4125_v4 = vsel %vm3156_vm2, %v3897_v36, 0.0  ;;  %v4206_v54 = vmul.f32 %v11471_v57, %v11471_v57  ;;  %v11475_v6 = vld [vmem:[#allocation156_spill] sm:$0xff] }
 0x33b   : > { %v3341_v24 = vadd.f32 %v3340_v37, %v3339_v40  ;;  %v4351_v56 = vsel %vm1748_vm0, %v4204_v48, 0.0  ;;  %v11473_v63 = vrot.slane %v11413_v15, 7  ;;  %v3344_v62 = vsel %vm3156_vm2, %v11474_v38, 0.0  ;;  %v11476_v40 = vld [vmem:[#allocation239_spill] sm:$0xff] }
 0x33c   : > { %v4124_v11 = vadd.f32 %v4123_v53, %v4122_v10  ;;  %v4350_v3 = vadd.f32 %v4349_v21, %v4348_v60  ;;  %v4127_v44 = vsel %vm3156_vm2, %v3898_v23, 0.0  ;;  %v4207_v36 = vmul.f32 %v11475_v6, %v11475_v6  ;;  %v11479_v60 = vld [vmem:[#allocation157_spill] sm:$0xff]  ;;  %v11482_v6 = vld [vmem:[#allocation314_spill] sm:$0xff] }
 0x33d   : > { %v3900_v51 = vmul.f32 %v11473_v63, %v11472_v55  ;;  %v3343_v45 = vadd.f32 %v3342_v58, %v3341_v24  ;;  %v4353_v37 = vsel %vm1748_vm0, %v4205_v31, 0.0  ;;  %v11477_v48 = vrot.slane %v11420_v22, 7  ;;  %v11480_v24 = vld [vmem:[#allocation240_spill] sm:$0xff] }
 0x33e   : > { %v4126_v57 = vadd.f32 %v4125_v4, %v4124_v11  ;;  %v3346_v53 = vsel %vm3156_vm2, %v11478_v2, 0.0  ;;  %v4352_v10 = vadd.f32 %v4351_v56, %v4350_v3  ;;  %v4129_v55 = vsel %vm3156_vm2, %v3899_v12, 0.0  ;;  %v11483_v3 = vld [vmem:[#allocation159_spill] sm:$0xff] }
 0x33f   : > { %v3901_v35 = vmul.f32 %v11477_v48, %v11476_v40  ;;  %v3345_v21 = vadd.f32 %v3344_v62, %v3343_v45  ;;  %v4208_v58 = vmul.f32 %v11479_v60, %v11479_v60  ;;  %v4355_v23 = vsel %vm1748_vm0, %v4206_v54, 0.0  ;;  %v11484_v45 = vld [vmem:[#allocation241_spill] sm:$0xff]  ;;  %v11486_v60 = vld [vmem:[#allocation315_spill] sm:$0xff] }
 0x340   : > { %v11481_v31 = vrot.slane %v11427_v52, 7  ;;  %v4128_v38 = vadd.f32 %v4127_v44, %v4126_v57  ;;  %v3348_v4 = vsel %vm3156_vm2, %v11482_v6, 0.0  ;;  %v4354_v11 = vadd.f32 %v4353_v37, %v4352_v10  ;;  %v11487_v10 = vld [vmem:[#allocation173_spill] sm:$0xff] }
 0x341   : > { %v4131_v2 = vsel %vm3156_vm2, %v3900_v51, 0.0  ;;  %v3347_v56 = vadd.f32 %v3346_v53, %v3345_v21  ;;  %v4209_v12 = vmul.f32 %v11483_v3, %v11483_v3  ;;  %v4357_v62 = vsel %vm1748_vm0, %v4207_v36, 0.0  ;;  %v11488_v21 = vld [vmem:[#allocation242_spill] sm:$0xff]  ;;  %v11490_v3 = vld [vmem:[#allocation316_spill] sm:$0xff] }
 0x342   : > { %v3902_v63 = vmul.f32 %v11481_v31, %v11480_v24  ;;  %v11485_v54 = vrot.slane %v11434_v13, 7  ;;  %v4130_v48 = vadd.f32 %v4129_v55, %v4128_v38  ;;  %v3350_v44 = vsel %vm3156_vm2, %v11486_v60, 0.0  ;;  %v11493_v60 = vld [vmem:[#allocation318_spill] sm:$0xff] }
 0x343   : > { %v4356_v57 = vadd.f32 %v4355_v23, %v4354_v11  ;;  %v4133_v24 = vsel %vm3156_vm2, %v3901_v35, 0.0  ;;  %v3349_v37 = vadd.f32 %v3348_v4, %v3347_v56  ;;  %v4210_v51 = vmul.f32 %v11487_v10, %v11487_v10  ;;  %v11491_v11 = vld [vmem:[#allocation245_spill] sm:$0xff] }
 0x344   : > { %v3903_v40 = vmul.f32 %v11485_v54, %v11484_v45  ;;  %v4359_v53 = vsel %vm1748_vm0, %v4208_v58, 0.0  ;;  %v11489_v36 = vrot.slane %v11441_v1, 7  ;;  %v4132_v6 = vadd.f32 %v4131_v2, %v4130_v48 }
 0x345   : > { %v3352_v55 = vsel %vm3156_vm2, %v11490_v3, 0.0  ;;  %v4358_v38 = vadd.f32 %v4357_v62, %v4356_v57  ;;  %v4135_v45 = vsel %vm3156_vm2, %v3902_v63, 0.0  ;;  %v3351_v23 = vadd.f32 %v3350_v44, %v3349_v37  ;;  %v11495_v37 = vld [vmem:[#allocation319_spill] sm:$0xff] }
 0x346   : > { %v3904_v31 = vmul.f32 %v11489_v36, %v11488_v21  ;;  %v4211_v35 = vmul.f32 %v11129_v61, %v11129_v61  ;;  %v4361_v4 = vsel %vm1748_vm0, %v4209_v12, 0.0  ;;  %v11492_v58 = vrot.slane %v11448_v34, 7  ;;  %v11494_v61 = vld [vmem:[#allocation358_spill] sm:$0xff] }
 0x347   : > { %v4134_v54 = vadd.f32 %v4133_v24, %v4132_v6  ;;  %v3354_v2 = vsel %vm3156_vm2, %v11493_v60, 0.0  ;;  %v4360_v48 = vadd.f32 %v4359_v53, %v4358_v38  ;;  %v4137_v10 = vsel %vm3156_vm2, %v3903_v40, 0.0  ;;  %v11496_v24 = vld [vmem:[#allocation264_spill] sm:$0xff]  ;;  %v11498_v38 = vld [vmem:[#allocation265_spill] sm:$0xff] }
 0x348   : > { %v3905_v56 = vmul.f32 %v11492_v58, %v11491_v11  ;;  %v3353_v62 = vadd.f32 %v3352_v55, %v3351_v23  ;;  %v4212_v63 = vmul.f32 %v11074_v28, %v11074_v28  ;;  %v4363_v44 = vsel %vm1748_vm0, %v4210_v51, 0.0  ;;  %v11500_v11 = vld [vmem:[#allocation320_spill] sm:$0xff] }
 0x349   : > { %v3657_v57 = vrot.slane %v11494_v61, 7  ;;  %v4136_v12 = vadd.f32 %v4135_v45, %v4134_v54  ;;  %v3356_v21 = vsel %vm3156_vm2, %v11495_v37, 0.0  ;;  %v4362_v36 = vadd.f32 %v4361_v4, %v4360_v48 }
 0x34a   : > { %v11497_v6 = vrot.slane %v11455_v42, 7  ;;  %v4139_v53 = vsel %vm3156_vm2, %v3904_v31, 0.0  ;;  %v3355_v40 = vadd.f32 %v3354_v2, %v3353_v62  ;;  %v4365_v55 = vsel %vm1748_vm0, %v4211_v35, 0.0  ;;  %v11501_v2 = vld [vmem:[#allocation359_spill] sm:$0xff]  ;;  %v11502_v62 = vld [vmem:[#allocation321_spill] sm:$0xff] }
 0x34b   : > { %v11499_v28 = vrot.slane %v11462_v32, 7  ;;  %v4138_v23 = vadd.f32 %v4137_v10, %v4136_v12  ;;  %v3358_v45 = vsel %vm3156_vm2, %v11500_v11, 0.0  ;;  %v4364_v58 = vadd.f32 %v4363_v44, %v4362_v36  ;;  %v11503_v10 = vld [vmem:[#allocation362_spill] sm:$0xff] }
 0x34c   : > { %v3906_v3 = vmul.f32 %v11497_v6, %v11496_v24  ;;  %v4141_v4 = vsel %vm3156_vm2, %v3905_v56, 0.0  ;;  %v3357_v54 = vadd.f32 %v3356_v21, %v3355_v40  ;;  %v4213_v60 = vmul.f32 %v11077_v47, %v11077_v47  ;;  %v11504_v6 = vld [vmem:[#allocation266_spill] sm:$0xff]  ;;  %v11506_v40 = vld [vmem:[#allocation267_spill] sm:$0xff] }
 0x34d   : > { %v3907_v51 = vmul.f32 %v11499_v28, %v11498_v38  ;;  %v4367_v31 = vsel %vm1748_vm0, %v4212_v63, 0.0  ;;  %v3658_v48 = vrot.slane %v11501_v2, 7  ;;  %v4140_v35 = vadd.f32 %v4139_v53, %v4138_v23  ;;  %v11507_v63 = vld [vmem:[#allocation322_spill] sm:$0xff] }
 0x34e   : > { %v3360_v37 = vsel %vm3156_vm2, %v11502_v62, 0.0  ;;  %v4366_v24 = vadd.f32 %v4365_v55, %v4364_v58  ;;  %v3659_v12 = vrot.slane %v11503_v10, 7  ;;  %v11505_v44 = vrot.slane %v11469_v49, 7  ;;  %v11508_v62 = vld [vmem:[#allocation364_spill] sm:$0xff] }
 0x34f   : > { %v4143_v56 = vsel %vm3156_vm2, %v3906_v3, 0.0  ;;  %v3359_v21 = vadd.f32 %v3358_v45, %v3357_v54  ;;  %v3909_v47 = vmul.f32 %v3657_v57, %v11506_v40  ;;  %v4142_v38 = vadd.f32 %v4141_v4, %v4140_v35  ;;  %v11509_v3 = vld [vmem:[#allocation323_spill] sm:$0xff]  ;;  %v11510_v57 = vld [vmem:[#allocation373_spill] sm:$0xff]  ;;  %v11511_v54 = vld [vmem:[#allocation268_spill] sm:$0xff] }
 0x350   : > { %v3908_v36 = vmul.f32 %v11505_v44, %v11504_v6  ;;  %v3362_v28 = vsel %vm3156_vm2, %v11507_v63, 0.0  ;;  %v4368_v53 = vadd.f32 %v4367_v31, %v4366_v24  ;;  %v4145_v23 = vsel %vm3156_vm2, %v3907_v51, 0.0  ;;  %v11512_v51 = vld [vmem:[#allocation270_spill] sm:$0xff]  ;;  %v11513_v40 = vld [vmem:[#allocation324_spill] sm:$0xff] }
 0x351   : > { %v3361_v11 = vadd.f32 %v3360_v37, %v3359_v21  ;;  %v4214_v55 = vmul.f32 %v11079_v46, %v11079_v46  ;;  %v4369_v58 = vsel %vm1748_vm0, %v4213_v60, 0.0  ;;  %v3660_v6 = vrot.slane %v11508_v62, 7 }
 0x352   : > { %v4144_v44 = vadd.f32 %v4143_v56, %v4142_v38  ;;  %v3364_v45 = vsel %vm3156_vm2, %v11509_v3, 0.0  ;;  %v3661_v4 = vrot.slane %v11510_v57, 7  ;;  %v3910_v35 = vmul.f32 %v3658_v48, %v11511_v54  ;;  %v11514_v57 = vld [vmem:[#allocation374_spill] sm:$0xff] }
 0x353   : > { %v4147_v31 = vsel %vm3156_vm2, %v3908_v36, 0.0  ;;  %v3363_v24 = vadd.f32 %v3362_v28, %v3361_v11  ;;  %v3911_v37 = vmul.f32 %v3659_v12, %v11512_v51  ;;  %v3366_v46 = vsel %vm3156_vm2, %v11513_v40, 0.0  ;;  %v11515_v36 = vld [vmem:[#allocation326_spill] sm:$0xff]  ;;  %v11516_v12 = vld [vmem:[#allocation376_spill] sm:$0xff]  ;;  %v11517_v11 = vld [vmem:[#allocation271_spill] sm:$0xff] }
 0x354   : > { %v4146_v21 = vadd.f32 %v4145_v23, %v4144_v44  ;;  %v4370_v60 = vadd.f32 %v4369_v58, %v4368_v53  ;;  %v4149_v63 = vsel %vm3156_vm2, %v3909_v47, 0.0  ;;  %v4215_v38 = vmul.f32 %v11081_v41, %v11081_v41  ;;  %v11518_v47 = vld [vmem:[#allocation272_spill] sm:$0xff]  ;;  %v11519_v51 = vld [vmem:[#allocation327_spill] sm:$0xff] }
 0x355   : > { %v3365_v56 = vadd.f32 %v3364_v45, %v3363_v24  ;;  %v4371_v3 = vsel %vm1748_vm0, %v4214_v55, 0.0  ;;  %v3662_v48 = vrot.slane %v11514_v57, 7  ;;  %v3368_v28 = vsel %vm3156_vm2, %v11515_v36, 0.0 }
 0x356   : > { %v4148_v54 = vadd.f32 %v4147_v31, %v4146_v21  ;;  %v3663_v23 = vrot.slane %v11516_v12, 7  ;;  %v3912_v44 = vmul.f32 %v3660_v6, %v11517_v11  ;;  %v4151_v53 = vsel %vm3156_vm2, %v3910_v35, 0.0  ;;  %v11520_v12 = vld [vmem:[#allocation379_spill] sm:$0xff]  ;;  %v11521_v35 = vld [vmem:[#allocation328_spill] sm:$0xff] }
 0x357   : > { %v3367_v58 = vadd.f32 %v3366_v46, %v3365_v56  ;;  %v3913_v45 = vmul.f32 %v3661_v4, %v11518_v47  ;;  %v3370_v41 = vsel %vm3156_vm2, %v11519_v51, 0.0  ;;  %v4372_v55 = vadd.f32 %v4371_v3, %v4370_v60  ;;  %v11522_v4 = vld [vmem:[#allocation394_spill] sm:$0xff]  ;;  %v4746_v56 = vld.sshfl [vmem:[#allocation1] sm:$0xff pattern:$0x73625140] }
 0x358   : > { %v4150_v24 = vadd.f32 %v4149_v63, %v4148_v54  ;;  %v4153_v40 = vsel %vm3156_vm2, %v3911_v37, 0.0  ;;  %v4216_v21 = vmul.f32 %v11083_v16, %v11083_v16  ;;  %v4373_v36 = vsel %vm1748_vm0, %v4215_v38, 0.0  ;;  %v4747_v37 = vld.sshfl [vmem:[#allocation1 + $0x8] sm:$0xff pattern:$0x73625140] }
 0x359   : > { %v3369_v31 = vadd.f32 %v3368_v28, %v3367_v58  ;;  %v3664_v6 = vrot.slane %v11520_v12, 7  ;;  %v3372_v46 = vsel %vm3156_vm2, %v11521_v35, 0.0  ;;  %v3665_v63 = vrot.slane %v11522_v4, 7  ;;  %v11523_v47 = vld [vmem:[#allocation329_spill] sm:$0xff]  ;;  %v11524_v4 = vld [vmem:[#allocation380_spill] sm:$0xff] }
 0x35a   : > { %v4152_v11 = vadd.f32 %v4151_v53, %v4150_v24  ;;  %v3914_v54 = vmul.f32 %v4746_v56, %v3662_v48  ;;  %v4155_v60 = vsel %vm3156_vm2, %v3912_v44, 0.0  ;;  %v3915_v28 = vmul.f32 %v4747_v37, %v3663_v23  ;;  %v11525_v44 = vld [vmem:[#allocation330_spill] sm:$0xff]  ;;  %v11527_v37 = vld [vmem:[#allocation331_spill] sm:$0xff] }
 0x35b   : > { %v3371_v3 = vadd.f32 %v3370_v41, %v3369_v31  ;;  %v3374_v16 = vsel %vm3156_vm2, %v11523_v47, 0.0  ;;  %v4374_v38 = vadd.f32 %v4373_v36, %v4372_v55  ;;  %v4157_v51 = vsel %vm3156_vm2, %v3913_v45, 0.0  ;;  %v11526_v23 = vld [vmem:[#allocation382_spill] sm:$0xff]  ;;  %v4749_v45 = vld.sshfl [vmem:[#allocation1 + $0x18] sm:$0xff pattern:$0x73625140] }
 0x35c   : > { %v4154_v58 = vadd.f32 %v4153_v40, %v4152_v11  ;;  %v4217_v24 = vmul.f32 %v11085_v5, %v11085_v5  ;;  %v4375_v35 = vsel %vm1748_vm0, %v4216_v21, 0.0  ;;  %v3666_v48 = vrot.slane %v11524_v4, 7  ;;  %v4748_v31 = vld.sshfl [vmem:[#allocation1 + $0x10] sm:$0xff pattern:$0x73625140] }
 0x35d   : > { %v3373_v53 = vadd.f32 %v3372_v46, %v3371_v3  ;;  %v3376_v41 = vsel %vm3156_vm2, %v11525_v44, 0.0  ;;  %v3667_v40 = vrot.slane %v11526_v23, 7  ;;  %v3916_v11 = vmul.f32 %v4748_v31, %v3664_v6  ;;  %v11528_v6 = vld [vmem:[#allocation342_spill] sm:$0xff] }
 0x35e   : > { %v4156_v56 = vadd.f32 %v4155_v60, %v4154_v58  ;;  %v4159_v55 = vsel %vm3156_vm2, %v3914_v54, 0.0  ;;  %v3917_v46 = vmul.f32 %v4749_v45, %v3665_v63  ;;  %v3378_v5 = vsel %vm3156_vm2, %v11527_v37, 0.0  ;;  %v11532_v37 = vld [vmem:[#allocation345_spill] sm:$0xff] }
 0x35f   : > { %v3375_v36 = vadd.f32 %v3374_v16, %v3373_v53  ;;  %v4376_v21 = vadd.f32 %v4375_v35, %v4374_v38  ;;  %v4161_v47 = vsel %vm3156_vm2, %v3915_v28, 0.0  ;;  %v4218_v58 = vmul.f32 %v11087_v20, %v11087_v20  ;;  %v4750_v16 = vld.sshfl [vmem:[#allocation1 + $0x20] sm:$0xff pattern:$0x73625140]  ;;  %v11530_v35 = vld [vmem:[#allocation343_spill] sm:$0xff] }
 0x360   : > { %v4158_v3 = vadd.f32 %v4157_v51, %v4156_v56  ;;  %v4377_v44 = vsel %vm1748_vm0, %v4217_v24, 0.0  ;;  %v3380_v54 = vsel %vm3156_vm2, %v11528_v6, 0.0  ;;  %v3918_v53 = vmul.f32 %v4750_v16, %v3666_v48  ;;  %v11529_v56 = vld [vmem:[#allocation366_spill] sm:$0xff]  ;;  %v11531_v48 = vld [vmem:[#allocation344_spill] sm:$0xff] }
 0x361   : > { %v3377_v60 = vadd.f32 %v3376_v41, %v3375_v36  ;;  %v4163_v63 = vsel %vm3156_vm2, %v3916_v11, 0.0  ;;  %v3919_v31 = vmul.f32 %v3667_v40, %v11529_v56  ;;  %v3382_v28 = vsel %vm3156_vm2, %v11530_v35, 0.0 }
 0x362   : > { %v4160_v23 = vadd.f32 %v4159_v55, %v4158_v3  ;;  %v4378_v41 = vadd.f32 %v4377_v44, %v4376_v21  ;;  %v4165_v20 = vsel %vm3156_vm2, %v3917_v46, 0.0  ;;  %v4219_v24 = vmul.f32 %v11089_v27, %v11089_v27  ;;  %v11533_v44 = vld [vmem:[#allocation346_spill] sm:$0xff] }
 0x363   : > { %v3379_v51 = vadd.f32 %v3378_v5, %v3377_v60  ;;  %v4379_v55 = vsel %vm1748_vm0, %v4218_v58, 0.0  ;;  %v3384_v11 = vsel %vm3156_vm2, %v11531_v48, 0.0  ;;  %v4167_v3 = vsel %vm3156_vm2, %v3918_v53, 0.0  ;;  %v11534_v53 = vld [vmem:[#allocation347_spill] sm:$0xff]  ;;  %v11537_v48 = vld [vmem:[#allocation361_spill] sm:$0xff] }
 0x364   : > { %v4162_v38 = vadd.f32 %v4161_v47, %v4160_v23  ;;  %v3386_v5 = vsel %vm3156_vm2, %v11532_v37, 0.0  ;;  %v4380_v21 = vadd.f32 %v4379_v55, %v4378_v41  ;;  %v4169_v46 = vsel %vm3156_vm2, %v3919_v31, 0.0 }
 0x365   : > { %v3381_v36 = vadd.f32 %v3380_v54, %v3379_v51  ;;  %v4220_v27 = vmul.f32 %v11091_v43, %v11091_v43  ;;  %v4381_v60 = vsel %vm1748_vm0, %v4219_v24, 0.0  ;;  %v3388_v6 = vsel %vm3156_vm2, %v11533_v44, 0.0  ;;  %v11535_v43 = vld [vmem:[#allocation352_spill] sm:$0xff] }
 0x366   : > { %v4164_v45 = vadd.f32 %v4163_v63, %v4162_v38  ;;  %v3390_v63 = vsel %vm3156_vm2, %v11534_v53, 0.0  ;;  %v4382_v51 = vadd.f32 %v4381_v60, %v4380_v21  ;;  %v4221_v31 = vmul.f32 %v11093_v9, %v11093_v9 }
 0x367   : > { %v3383_v40 = vadd.f32 %v3382_v28, %v3381_v36  ;;  %v4383_v38 = vsel %vm1748_vm0, %v4220_v27, 0.0  ;;  %v3392_v35 = vsel %vm3156_vm2, %v11535_v43, 0.0  ;;  %v4222_v41 = vmul.f32 %v11095_v26, %v11095_v26  ;;  %v11538_v26 = vld [vmem:[#allocation363_spill] sm:$0xff]  ;;  %v11542_v43 = vld [vmem:[#allocation230_spill] sm:$0xff] }
 0x368   : > { %v4166_v23 = vadd.f32 %v4165_v20, %v4164_v45  ;;  %v11536_v20 = vld [vmem:[#allocation355_spill] sm:$0xff]  ;;  %v4384_v24 = vadd.f32 %v4383_v38, %v4382_v51  ;;  %v4223_v45 = vmul.f32 %v11097_v30, %v11097_v30  ;;  %v4385_v9 = vsel %vm1748_vm0, %v4221_v31, 0.0 }
 0x369   : > { %v3385_v47 = vadd.f32 %v3384_v11, %v3383_v40  ;;  %v3394_v36 = vsel %vm3156_vm2, %v11536_v20, 0.0  ;;  %v3396_v11 = vsel %vm3156_vm2, %v11537_v48, 0.0  ;;  %v4224_v40 = vmul.f32 %v11099_v18, %v11099_v18  ;;  %v11541_v51 = vld [vmem:[#allocation287_spill] sm:$0xff]  ;;  %v11545_v48 = vld [vmem:[#allocation232_spill] sm:$0xff] }
 0x36a   : > { %v4168_v58 = vadd.f32 %v4167_v3, %v4166_v23  ;;  %v4387_v23 = vsel %vm1748_vm0, %v4222_v41, 0.0  ;;  %v3398_v37 = vsel %vm3156_vm2, %v11538_v26, 0.0  ;;  %v4389_v30 = vsel %vm1748_vm0, %v4223_v45, 0.0 }
 0x36b   : > { %v3387_v54 = vadd.f32 %v3386_v5, %v3385_v47  ;;  %v4386_v5 = vadd.f32 %v4385_v9, %v4384_v24  ;;  %v11539_v47 = vld [vmem:[#allocation285_spill] sm:$0xff]  ;;  %v4226_v18 = vmul.f32 %v11104_v29, %v11104_v29  ;;  %v4391_v44 = vsel %vm1748_vm0, %v4224_v40, 0.0  ;;  %v11544_v24 = vld [vmem:[#allocation231_spill] sm:$0xff] }
 0x36c   : > { %v4170_v16 = vadd.f32 %v4169_v46, %v4168_v58  ;;  %v4225_v46 = vmul.f32 %v11102_v17, %v11102_v17  ;;  %v3400_v27 = vsel %vm3156_vm2, %v11539_v47, 0.0  ;;  %v4227_v17 = vmul.f32 %v11110_v0, %v11110_v0 }
 0x36d   : > { %v3389_v56 = vadd.f32 %v3388_v6, %v3387_v54  ;;  %v4388_v60 = vadd.f32 %v4387_v23, %v4386_v5  ;;  %v11540_v6 = vld [vmem:[#allocation369_spill] sm:$0xff]  ;;  %v4228_v29 = vmul.f32 %v11542_v43, %v11542_v43  ;;  %v4229_v0 = vmul.f32 %v11544_v24, %v11544_v24 }
 0x36e   : > { %4171 = vadd.xlane.f32.xlu2 %v4170_v16  ;;  %v3402_v54 = vsel %vm3156_vm2, %v11540_v6, 0.0  ;;  %v11546_v23 = vld [vmem:[#allocation233_spill] sm:$0xff] }
 0x36f   : > { %v3391_v28 = vadd.f32 %v3390_v63, %v3389_v56  ;;  %v4390_v16 = vadd.f32 %v4389_v30, %v4388_v60  ;;  %v4393_v63 = vsel %vm1748_vm0, %v4225_v46, 0.0  ;;  %v3404_v56 = vsel %vm3156_vm2, %v11541_v51, 0.0 }
 0x370   : > { %v4231_v26 = vmul.f32 %v11546_v23, %v11546_v23 }
 0x371   : > { %v3393_v55 = vadd.f32 %v3392_v35, %v3391_v28  ;;  %v4392_v31 = vadd.f32 %v4391_v44, %v4390_v16  ;;  %v4395_v35 = vsel %vm1748_vm0, %v4226_v18, 0.0  ;;  %v11543_v28 = vld [vmem:[#allocation371_spill] sm:$0xff]  ;;  %v11549_v44 = vld [vmem:[#allocation250_spill] sm:$0xff] }
 0x372   : > { %v3406_v41 = vsel %vm3156_vm2, %v11543_v28, 0.0  ;;  %v4234_v6 = vmul.f32 %v11549_v44, %v11549_v44 }
 0x373   : > { %v3395_v3 = vadd.f32 %v3394_v36, %v3393_v55  ;;  %v4394_v20 = vadd.f32 %v4393_v63, %v4392_v31  ;;  %v4397_v55 = vsel %vm1748_vm0, %v4227_v17, 0.0 }
 0x375   : > { %v3397_v21 = vadd.f32 %v3396_v11, %v3395_v3  ;;  %v4396_v45 = vadd.f32 %v4395_v35, %v4394_v20  ;;  %v4230_v11 = vmul.f32 %v11545_v48, %v11545_v48  ;;  %v4399_v3 = vsel %vm1748_vm0, %v4228_v29, 0.0  ;;  %v11552_v29 = vld [vmem:[#allocation253_spill] sm:$0xff]  ;;  %v11553_v20 = vld [vmem:[#allocation256_spill] sm:$0xff] }
 0x376   : > { %v4237_v35 = vmul.f32 %v11552_v29, %v11552_v29 }
 0x377   : > { %v3399_v58 = vadd.f32 %v3398_v37, %v3397_v21  ;;  %v4398_v40 = vadd.f32 %v4397_v55, %v4396_v45  ;;  %v4401_v37 = vsel %vm1748_vm0, %v4229_v0, 0.0  ;;  %v11547_v21 = vld [vmem:[#allocation234_spill] sm:$0xff]  ;;  %v4403_v30 = vsel %vm1748_vm0, %v4230_v11, 0.0  ;;  %v11554_v55 = vld [vmem:[#allocation257_spill] sm:$0xff] }
 0x378   : > { %v4232_v46 = vmul.f32 %v11547_v21, %v11547_v21  ;;  %v4239_v45 = vmul.f32 %v11554_v55, %v11554_v55  ;;  %v11555_v11 = vld [vmem:[#allocation258_spill] sm:$0xff] }
 0x379   : > { %v3401_v53 = vadd.f32 %v3400_v27, %v3399_v58  ;;  %v4400_v5 = vadd.f32 %v4399_v3, %v4398_v40  ;;  %v11548_v27 = vld [vmem:[#allocation249_spill] sm:$0xff]  ;;  %v4405_v58 = vsel %vm1748_vm0, %v4231_v26, 0.0  ;;  %v4240_v3 = vmul.f32 %v11555_v11, %v11555_v11  ;;  %v11556_v26 = vld [vmem:[#allocation259_spill] sm:$0xff] }
 0x37a   : > { %v4233_v60 = vmul.f32 %v11548_v27, %v11548_v27 }
 0x37b   : > { %v3403_v38 = vadd.f32 %v3402_v54, %v3401_v53  ;;  %v4402_v47 = vadd.f32 %v4401_v37, %v4400_v5  ;;  %v4407_v54 = vsel %vm1748_vm0, %v4232_v46, 0.0  ;;  %v11550_v53 = vld [vmem:[#allocation251_spill] sm:$0xff]  ;;  %v4241_v37 = vmul.f32 %v11556_v26, %v11556_v26  ;;  %v11557_v46 = vld [vmem:[#allocation260_spill] sm:$0xff] }
 0x37c   : > { %v4235_v17 = vmul.f32 %v11550_v53, %v11550_v53  ;;  %v4409_v63 = vsel %vm1748_vm0, %v4233_v60, 0.0  ;;  %v4421_v5 = vsel %vm1748_vm0, %v4239_v45, 0.0  ;;  %v11558_v60 = vld [vmem:[#allocation262_spill] sm:$0xff]  ;;  %v11564_v45 = vld [vmem:[#allocation280_spill] sm:$0xff] }
 0x37d   : > { %v3405_v36 = vadd.f32 %v3404_v56, %v3403_v38  ;;  %v4404_v18 = vadd.f32 %v4403_v30, %v4402_v47  ;;  %v11551_v56 = vld [vmem:[#allocation252_spill] sm:$0xff]  ;;  %v4411_v38 = vsel %vm1748_vm0, %v4234_v6, 0.0  ;;  %v4242_v30 = vmul.f32 %v11557_v46, %v11557_v46  ;;  %v11559_v6 = vld [vmem:[#allocation263_spill] sm:$0xff] }
 0x37e   : > { %v4236_v31 = vmul.f32 %v11551_v56, %v11551_v56  ;;  %v4413_v28 = vsel %vm1748_vm0, %v4235_v17, 0.0  ;;  %v4423_v47 = vsel %vm1748_vm0, %v4240_v3, 0.0  ;;  %v11560_v17 = vld [vmem:[#allocation274_spill] sm:$0xff] }
 0x37f   : > { %v3407_v9 = vadd.f32 %v3406_v41, %v3405_v36  ;;  %v4406_v16 = vadd.f32 %v4405_v58, %v4404_v18  ;;  %v4238_v36 = vmul.f32 %v11553_v20, %v11553_v20  ;;  %v4243_v58 = vmul.f32 %v11558_v60, %v11558_v60  ;;  %v11565_v3 = vld [vmem:[#allocation282_spill] sm:$0xff] }
 0x380   : > { %v4415_v24 = vsel %vm1748_vm0, %v4236_v31, 0.0  ;;  %v4425_v18 = vsel %vm1748_vm0, %v4241_v37, 0.0  ;;  %v11561_v31 = vld [vmem:[#allocation276_spill] sm:$0xff]  ;;  %v11566_v37 = vld [vmem:[#allocation283_spill] sm:$0xff] }
 0x381   : > { %3408 = vadd.xlane.f32.xlu1 %v3407_v9  ;;  %v4408_v51 = vadd.f32 %v4407_v54, %v4406_v16  ;;  %v4417_v9 = vsel %vm1748_vm0, %v4237_v35, 0.0  ;;  %v4419_v40 = vsel %vm1748_vm0, %v4238_v36, 0.0  ;;  %v4244_v54 = vmul.f32 %v11559_v6, %v11559_v6  ;;  %v11562_v35 = vld [vmem:[#allocation278_spill] sm:$0xff]  ;;  %v11563_v36 = vld [vmem:[#allocation279_spill] sm:$0xff] }
 0x382   : > { %v4427_v16 = vsel %vm1748_vm0, %v4242_v30, 0.0  ;;  %v11567_v30 = vld [vmem:[#allocation291_spill] sm:$0xff] }
 0x383   : > { %v4410_v43 = vadd.f32 %v4409_v63, %v4408_v51  ;;  %v4245_v63 = vmul.f32 %v11560_v17, %v11560_v17  ;;  %v4429_v51 = vsel %vm1748_vm0, %v4243_v58, 0.0  ;;  %v11568_v58 = vld [vmem:[#allocation293_spill] sm:$0xff] }
 0x385   : > { %v4412_v41 = vadd.f32 %v4411_v38, %v4410_v43  ;;  %v4246_v38 = vmul.f32 %v11561_v31, %v11561_v31  ;;  %v4431_v43 = vsel %vm1748_vm0, %v4244_v54, 0.0  ;;  %v11569_v54 = vld [vmem:[#allocation296_spill] sm:$0xff] }
 0x387   : > { %v4414_v0 = vadd.f32 %v4413_v28, %v4412_v41  ;;  %v4247_v28 = vmul.f32 %v11562_v35, %v11562_v35  ;;  %v4433_v41 = vsel %vm1748_vm0, %v4245_v63, 0.0  ;;  %v11570_v63 = vld [vmem:[#allocation297_spill] sm:$0xff] }
 0x389   : > { %v4416_v48 = vadd.f32 %v4415_v24, %v4414_v0  ;;  %v4248_v24 = vmul.f32 %v11563_v36, %v11563_v36  ;;  %v4435_v0 = vsel %vm1748_vm0, %v4246_v38, 0.0  ;;  %v11571_v38 = vld [vmem:[#allocation298_spill] sm:$0xff] }
 0x38b   : > { %v4418_v23 = vadd.f32 %v4417_v9, %v4416_v48  ;;  %v4249_v9 = vmul.f32 %v11564_v45, %v11564_v45  ;;  %v4437_v48 = vsel %vm1748_vm0, %v4247_v28, 0.0  ;;  %v11572_v28 = vld [vmem:[#allocation300_spill] sm:$0xff] }
 0x38d   : > { %v4420_v21 = vadd.f32 %v4419_v40, %v4418_v23  ;;  %v4250_v40 = vmul.f32 %v11565_v3, %v11565_v3  ;;  %v4439_v23 = vsel %vm1748_vm0, %v4248_v24, 0.0  ;;  %v11573_v24 = vld [vmem:[#allocation317_spill] sm:$0xff] }
 0x38f   : > { %v4422_v27 = vadd.f32 %v4421_v5, %v4420_v21  ;;  %v4251_v5 = vmul.f32 %v11566_v37, %v11566_v37  ;;  %v4441_v21 = vsel %vm1748_vm0, %v4249_v9, 0.0  ;;  %v11574_v9 = vld [vmem:[#allocation332_spill] sm:$0xff] }
 0x391   : > { %v4424_v44 = vadd.f32 %v4423_v47, %v4422_v27  ;;  %v4252_v47 = vmul.f32 %v11567_v30, %v11567_v30  ;;  %v4443_v27 = vsel %vm1748_vm0, %v4250_v40, 0.0  ;;  %v11575_v40 = vld [vmem:[#allocation333_spill] sm:$0xff] }
 0x393   : > { %v4426_v53 = vadd.f32 %v4425_v18, %v4424_v44  ;;  %v4253_v18 = vmul.f32 %v11568_v58, %v11568_v58  ;;  %v4445_v44 = vsel %vm1748_vm0, %v4251_v5, 0.0  ;;  %v11576_v5 = vld [vmem:[#allocation334_spill] sm:$0xff] }
 0x395   : > { %v4428_v56 = vadd.f32 %v4427_v16, %v4426_v53  ;;  %v4254_v16 = vmul.f32 %v11569_v54, %v11569_v54  ;;  %v4447_v53 = vsel %vm1748_vm0, %v4252_v47, 0.0  ;;  %v11577_v47 = vld [vmem:[#allocation335_spill] sm:$0xff] }
 0x397   : > { %v4430_v29 = vadd.f32 %v4429_v51, %v4428_v56  ;;  %v4255_v51 = vmul.f32 %v11570_v63, %v11570_v63  ;;  %v4449_v56 = vsel %vm1748_vm0, %v4253_v18, 0.0  ;;  %v11578_v18 = vld [vmem:[#allocation336_spill] sm:$0xff] }
 0x399   : > { %v4432_v20 = vadd.f32 %v4431_v43, %v4430_v29  ;;  %v4256_v43 = vmul.f32 %v11571_v38, %v11571_v38  ;;  %v4451_v29 = vsel %vm1748_vm0, %v4254_v16, 0.0  ;;  %v11579_v16 = vld [vmem:[#allocation337_spill] sm:$0xff] }
 0x39b   : > { %v4434_v55 = vadd.f32 %v4433_v41, %v4432_v20  ;;  %v4257_v41 = vmul.f32 %v11572_v28, %v11572_v28  ;;  %v4453_v20 = vsel %vm1748_vm0, %v4255_v51, 0.0  ;;  %v11580_v51 = vld [vmem:[#allocation338_spill] sm:$0xff] }
 0x39d   : > { %v4436_v11 = vadd.f32 %v4435_v0, %v4434_v55  ;;  %v4258_v0 = vmul.f32 %v11573_v24, %v11573_v24  ;;  %v4455_v55 = vsel %vm1748_vm0, %v4256_v43, 0.0  ;;  %v11581_v43 = vld [vmem:[#allocation339_spill] sm:$0xff] }
 0x39f   : > { %v4438_v26 = vadd.f32 %v4437_v48, %v4436_v11  ;;  %v4259_v48 = vmul.f32 %v11574_v9, %v11574_v9  ;;  %v4457_v11 = vsel %vm1748_vm0, %v4257_v41, 0.0  ;;  %v11582_v41 = vld [vmem:[#allocation340_spill] sm:$0xff] }
 0x3a1   : > { %v4440_v46 = vadd.f32 %v4439_v23, %v4438_v26  ;;  %v4260_v23 = vmul.f32 %v11575_v40, %v11575_v40  ;;  %v4459_v26 = vsel %vm1748_vm0, %v4258_v0, 0.0  ;;  %v11583_v0 = vld [vmem:[#allocation341_spill] sm:$0xff] }
 0x3a3   : > { %v4442_v60 = vadd.f32 %v4441_v21, %v4440_v46  ;;  %v4261_v21 = vmul.f32 %v11576_v5, %v11576_v5  ;;  %v4461_v46 = vsel %vm1748_vm0, %v4259_v48, 0.0  ;;  %v11584_v48 = vld [vmem:[#allocation348_spill] sm:$0xff] }
 0x3a5   : > { %v4444_v6 = vadd.f32 %v4443_v27, %v4442_v60  ;;  %v4262_v27 = vmul.f32 %v11577_v47, %v11577_v47  ;;  %v4463_v60 = vsel %vm1748_vm0, %v4260_v23, 0.0  ;;  %v11585_v23 = vld [vmem:[#allocation349_spill] sm:$0xff] }
 0x3a7   : > { %v4446_v17 = vadd.f32 %v4445_v44, %v4444_v6  ;;  %v4263_v44 = vmul.f32 %v11578_v18, %v11578_v18  ;;  %v4465_v6 = vsel %vm1748_vm0, %v4261_v21, 0.0  ;;  %v11586_v21 = vld [vmem:[#allocation350_spill] sm:$0xff] }
 0x3a9   : > { %v4448_v31 = vadd.f32 %v4447_v53, %v4446_v17  ;;  %v4264_v53 = vmul.f32 %v11579_v16, %v11579_v16  ;;  %v4467_v17 = vsel %vm1748_vm0, %v4262_v27, 0.0  ;;  %v11587_v27 = vld [vmem:[#allocation351_spill] sm:$0xff] }
 0x3ab   : > { %v4450_v35 = vadd.f32 %v4449_v56, %v4448_v31  ;;  %v4265_v56 = vmul.f32 %v11580_v51, %v11580_v51  ;;  %v4469_v31 = vsel %vm1748_vm0, %v4263_v44, 0.0  ;;  %v11588_v44 = vld [vmem:[#allocation353_spill] sm:$0xff] }
 0x3ad   : > { %v4452_v36 = vadd.f32 %v4451_v29, %v4450_v35  ;;  %v4266_v29 = vmul.f32 %v11581_v43, %v11581_v43  ;;  %v4471_v35 = vsel %vm1748_vm0, %v4264_v53, 0.0  ;;  %v11589_v53 = vld [vmem:[#allocation356_spill] sm:$0xff] }
 0x3af   : > { %v4454_v45 = vadd.f32 %v4453_v20, %v4452_v36  ;;  %v4267_v20 = vmul.f32 %v11582_v41, %v11582_v41  ;;  %v4473_v36 = vsel %vm1748_vm0, %v4265_v56, 0.0  ;;  %v11590_v56 = vld [vmem:[#allocation367_spill] sm:$0xff] }
 0x3b1   : > { %v4456_v3 = vadd.f32 %v4455_v55, %v4454_v45  ;;  %v4268_v55 = vmul.f32 %v11583_v0, %v11583_v0  ;;  %v4475_v45 = vsel %vm1748_vm0, %v4266_v29, 0.0  ;;  %v11591_v29 = vld [vmem:[#allocation368_spill] sm:$0xff] }
 0x3b2   : > { %v11592_v0 = vld [vmem:[#allocation372_spill] sm:$0xff] }
 0x3b3   : > { %v4458_v37 = vadd.f32 %v4457_v11, %v4456_v3  ;;  %v4269_v11 = vmul.f32 %v11584_v48, %v11584_v48  ;;  %v4477_v3 = vsel %vm1748_vm0, %v4267_v20, 0.0  ;;  %v4277_v20 = vmul.f32 %v11353_v33, %v11353_v33 }
 0x3b4   : > { %v4279_v48 = vmul.f32 %v11361_v19, %v11361_v19 }
 0x3b5   : > { %v4460_v30 = vadd.f32 %v4459_v26, %v4458_v37  ;;  %v4270_v26 = vmul.f32 %v11585_v23, %v11585_v23  ;;  %v4479_v37 = vsel %vm1748_vm0, %v4268_v55, 0.0  ;;  %v4278_v55 = vmul.f32 %v11592_v0, %v11592_v0 }
 0x3b7   : > { %v4462_v58 = vadd.f32 %v4461_v46, %v4460_v30  ;;  %v4271_v46 = vmul.f32 %v11586_v21, %v11586_v21  ;;  %v4481_v30 = vsel %vm1748_vm0, %v4269_v11, 0.0  ;;  %v4497_v11 = vsel %vm1748_vm0, %v4277_v20, 0.0 }
 0x3b8   : > { %v4499_v33 = vsel %vm1748_vm0, %v4278_v55, 0.0  ;;  %v4282_v21 = vmul.f32 %v11373_v39, %v11373_v39  ;;  %v4293_v20 = vmul.f32 %v11448_v34, %v11448_v34  ;;  %v4295_v55 = vmul.f32 %v11462_v32, %v11462_v32 }
 0x3b9   : > { %v4464_v54 = vadd.f32 %v4463_v60, %v4462_v58  ;;  %v4272_v60 = vmul.f32 %v11587_v27, %v11587_v27  ;;  %v4483_v58 = vsel %vm1748_vm0, %v4270_v26, 0.0  ;;  %v4281_v26 = vmul.f32 %v11369_v14, %v11369_v14 }
 0x3ba   : > { %v4284_v27 = vmul.f32 %v11383_v25, %v11383_v25  ;;  %v4507_v14 = vsel %vm1748_vm0, %v4282_v21, 0.0  ;;  %v11594_v21 = vld [vmem:[#allocation373_spill] sm:$0xff] }
 0x3bb   : > { %v4466_v63 = vadd.f32 %v4465_v6, %v4464_v54  ;;  %v4273_v6 = vmul.f32 %v11588_v44, %v11588_v44  ;;  %v4485_v54 = vsel %vm1748_vm0, %v4271_v46, 0.0  ;;  %v4286_v44 = vmul.f32 %v11395_v7, %v11395_v7 }
 0x3bd   : > { %v4468_v38 = vadd.f32 %v4467_v17, %v4466_v63  ;;  %v4274_v17 = vmul.f32 %v11589_v53, %v11589_v53  ;;  %v4487_v63 = vsel %vm1748_vm0, %v4272_v60, 0.0 }
 0x3bf   : > { %v4470_v28 = vadd.f32 %v4469_v31, %v4468_v38  ;;  %v4275_v31 = vmul.f32 %v11590_v56, %v11590_v56  ;;  %v4489_v38 = vsel %vm1748_vm0, %v4273_v6, 0.0 }
 0x3c1   : > { %v4472_v24 = vadd.f32 %v4471_v35, %v4470_v28  ;;  %v4276_v35 = vmul.f32 %v11591_v29, %v11591_v29  ;;  %v4491_v28 = vsel %vm1748_vm0, %v4274_v17, 0.0  ;;  %v4288_v17 = vmul.f32 %v11413_v15, %v11413_v15 }
 0x3c2   : > { %v4291_v29 = vmul.f32 %v11434_v13, %v11434_v13 }
 0x3c3   : > { %v4474_v9 = vadd.f32 %v4473_v36, %v4472_v24  ;;  %v4493_v36 = vsel %vm1748_vm0, %v4275_v31, 0.0  ;;  %v4290_v31 = vmul.f32 %v11427_v52, %v11427_v52 }
 0x3c4   : > { %v4525_v52 = vsel %vm1748_vm0, %v4291_v29, 0.0  ;;  %v3148_v29 = vpop.xlane.xlu1 %3147 }
 0x3c5   : > { %v4476_v40 = vadd.f32 %v4475_v45, %v4474_v9  ;;  %v4495_v45 = vsel %vm1748_vm0, %v4276_v35, 0.0 }
 0x3c7   : > { %v4478_v5 = vadd.f32 %v4477_v3, %v4476_v40  ;;  %v4280_v40 = vmul.f32 %v11365_v59, %v11365_v59  ;;  %v4505_v59 = vsel %vm1748_vm0, %v4281_v26, 0.0 }
 0x3c9   : > { %v4480_v47 = vadd.f32 %v4479_v37, %v4478_v5  ;;  %v4501_v37 = vsel %vm1748_vm0, %v4279_v48, 0.0  ;;  %v4503_v19 = vsel %vm1748_vm0, %v4280_v40, 0.0  ;;  %v4298_v40 = vmul.f32 %v11501_v2, %v11501_v2 }
 0x3cb   : > { %v4482_v18 = vadd.f32 %v4481_v30, %v4480_v47  ;;  %v4283_v30 = vmul.f32 %v11378_v8, %v11378_v8  ;;  %v4511_v8 = vsel %vm1748_vm0, %v4284_v27, 0.0 }
 0x3cd   : > { %v4484_v16 = vadd.f32 %v4483_v58, %v4482_v18  ;;  %v4285_v58 = vmul.f32 %v11388_v50, %v11388_v50  ;;  %v4509_v39 = vsel %vm1748_vm0, %v4283_v30, 0.0  ;;  %v4515_v50 = vsel %vm1748_vm0, %v4286_v44, 0.0 }
 0x3ce   : > { %v4302_v30 = vmul.f32 %v11514_v57, %v11514_v57 }
 0x3cf   : > { %v4486_v51 = vadd.f32 %v4485_v54, %v4484_v16  ;;  %v11593_v54 = vld [vmem:[#allocation8_spill] sm:$0xff]  ;;  %v4513_v25 = vsel %vm1748_vm0, %v4285_v58, 0.0 }
 0x3d0   : > { %v4287_v16 = vmul.f32 %v11593_v54, %v11593_v54  ;;  %v4547_v58 = vsel %vm1748_vm0, %v4302_v30, 0.0 }
 0x3d1   : > { %v4488_v43 = vadd.f32 %v4487_v63, %v4486_v51  ;;  %v4289_v51 = vmul.f32 %v11420_v22, %v11420_v22  ;;  %v4523_v22 = vsel %vm1748_vm0, %v4290_v31, 0.0  ;;  %v2001_v31 = vpop.xlane.xlu0 %2000 }
 0x3d2   : > { %v4517_v7 = vsel %vm1748_vm0, %v4287_v16, 0.0 }
 0x3d3   : > { %v4490_v41 = vadd.f32 %v4489_v38, %v4488_v43  ;;  %v4519_v38 = vsel %vm1748_vm0, %v4288_v17, 0.0  ;;  %v4521_v15 = vsel %vm1748_vm0, %v4289_v51, 0.0 }
 0x3d5   : > { %v4492_v24 = vadd.f32 %v4491_v28, %v4490_v41  ;;  %v4292_v28 = vmul.f32 %v11441_v1, %v11441_v1  ;;  %v4529_v1 = vsel %vm1748_vm0, %v4293_v20, 0.0 }
 0x3d7   : > { %v4494_v9 = vadd.f32 %v4493_v36, %v4492_v24  ;;  %v4294_v24 = vmul.f32 %v11455_v42, %v11455_v42  ;;  %v4527_v13 = vsel %vm1748_vm0, %v4292_v28, 0.0  ;;  %v4533_v42 = vsel %vm1748_vm0, %v4295_v55, 0.0 }
 0x3d9   : > { %v4496_v3 = vadd.f32 %v4495_v45, %v4494_v9  ;;  %v4296_v9 = vmul.f32 %v11469_v49, %v11469_v49  ;;  %v4531_v34 = vsel %vm1748_vm0, %v4294_v24, 0.0 }
 0x3db   : > { %v4498_v23 = vadd.f32 %v4497_v11, %v4496_v3  ;;  %v4297_v11 = vmul.f32 %v11494_v61, %v11494_v61  ;;  %v4535_v32 = vsel %vm1748_vm0, %v4296_v9, 0.0  ;;  %v4539_v61 = vsel %vm1748_vm0, %v4298_v40, 0.0 }
 0x3dd   : > { %v4500_v5 = vadd.f32 %v4499_v33, %v4498_v23  ;;  %v4299_v23 = vmul.f32 %v11503_v10, %v11503_v10  ;;  %v4537_v49 = vsel %vm1748_vm0, %v4297_v11, 0.0 }
 0x3df   : > { %v4502_v46 = vadd.f32 %v4501_v37, %v4500_v5  ;;  %v4300_v37 = vmul.f32 %v11508_v62, %v11508_v62  ;;  %v4541_v2 = vsel %vm1748_vm0, %v4299_v23, 0.0 }
 0x3e1   : > { %v4504_v47 = vadd.f32 %v4503_v19, %v4502_v46  ;;  %v4301_v19 = vmul.f32 %v11594_v21, %v11594_v21  ;;  %v4543_v10 = vsel %vm1748_vm0, %v4300_v37, 0.0 }
 0x3e3   : > { %v4506_v60 = vadd.f32 %v4505_v59, %v4504_v47  ;;  %v11595_v47 = vld [vmem:[#allocation376_spill] sm:$0xff]  ;;  %v4545_v62 = vsel %vm1748_vm0, %v4301_v19, 0.0 }
 0x3e4   : > { %v4303_v27 = vmul.f32 %v11595_v47, %v11595_v47 }
 0x3e5   : > { %v4508_v18 = vadd.f32 %v4507_v14, %v4506_v60  ;;  %v4304_v60 = vmul.f32 %v11520_v12, %v11520_v12 }
 0x3e6   : > { %v4549_v57 = vsel %vm1748_vm0, %v4303_v27, 0.0 }
 0x3e7   : > { %v4510_v6 = vadd.f32 %v4509_v39, %v4508_v18  ;;  %v11596_v18 = vld [vmem:[#allocation394_spill] sm:$0xff]  ;;  %v4551_v54 = vsel %vm1748_vm0, %v4304_v60, 0.0 }
 0x3e8   : > { %v4305_v44 = vmul.f32 %v11596_v18, %v11596_v18 }
 0x3e9   : > { %v4512_v53 = vadd.f32 %v4511_v8, %v4510_v6  ;;  %v4306_v6 = vmul.f32 %v11524_v4, %v11524_v4  ;;  %v4867_v4 = vmov 0.0  }
 0x3ea   : > { %228 = vst.msk [vmem:[%s9263_s30] sm:$0x7] %vm227_vm3, %v4867_v4 }
 0x3eb   : > { %v4514_v63 = vadd.f32 %v4513_v25, %v4512_v53  ;;  %v11597_v25 = vld [vmem:[#allocation382_spill] sm:$0xff]  ;;  %v4553_v53 = vsel %vm1748_vm0, %v4305_v44, 0.0 }
 0x3ec   : > { %v4307_v12 = vmul.f32 %v11597_v25, %v11597_v25 }
 0x3ed   : > { %v4516_v56 = vadd.f32 %v4515_v50, %v4514_v63  ;;  %v4555_v50 = vsel %vm1748_vm0, %v4306_v6, 0.0 }
 0x3ee   : > { %v4557_v51 = vsel %vm1748_vm0, %v4307_v12, 0.0 }
 0x3ef   : > { %v4518_v43 = vadd.f32 %v4517_v7, %v4516_v56 }
 0x3f1   : > { %v4520_v35 = vadd.f32 %v4519_v38, %v4518_v43  ;;  %v2002_v38 = vld [vmem:[%s9263_s30] sm:$0x1]  ;;  %v3153_v28 = vld [vmem:[%s9263_s30 + $0x2] sm:$0x1] }
 0x3f2   : > { %v2003_v43 = vadd.f32 %v2002_v38, %v2001_v31 }
 0x3f3   : > { %v4522_v41 = vadd.f32 %v4521_v15, %v4520_v35  ;;  %v2762_v15 = vpop.xlane.xlu0 %2761  ;;  %v2767_v35 = vld [vmem:[%s9263_s30 + $0x1] sm:$0x1] }
 0x3f4   : > { %2005 = vst.msk [vmem:[%s9263_s30] sm:$0x1] %vm2004_vm4, %v2003_v43  ;;  %v3409_v24 = vpop.xlane.xlu1 %3408 }
 0x3f5   : > { %v4524_v36 = vadd.f32 %v4523_v22, %v4522_v41  ;;  %v2768_v22 = vadd.f32 %v2767_v35, %v2762_v15  ;;  %v3154_v41 = vadd.f32 %v3153_v28, %v3148_v29 }
 0x3f7   : > { %v4526_v0 = vadd.f32 %v4525_v52, %v4524_v36  ;;  %2769 = vst.msk [vmem:[%s9263_s30 + $0x1] sm:$0x1] %vm2004_vm4, %v2768_v22  ;;  %v4172_v36 = vpop.xlane.xlu2 %4171 }
 0x3f8   : > { %3155 = vst.msk [vmem:[%s9263_s30 + $0x2] sm:$0x1] %vm2004_vm4, %v3154_v41 }
 0x3f9   : > { %v4528_v45 = vadd.f32 %v4527_v13, %v4526_v0  ;;  %v3412_v13 = vrot.slane %v3409_v24, 1  ;;  %v4175_v0 = vrot.slane %v4172_v36, 1 }
 0x3fb   : > { %v4530_v48 = vadd.f32 %v4529_v1, %v4528_v45  ;;  %v2763_v20 = vld [vmem:[%s9263_s30] sm:$0x1] }
 0x3fc   : > { %v2764_v52 = vadd.f32 %v2763_v20, %v2762_v15 }
 0x3fd   : > { %v4532_v3 = vadd.f32 %v4531_v34, %v4530_v48 }
 0x3fe   : > { %2766 = vst.msk [vmem:[%s9263_s30] sm:$0x1] %vm2765_vm5, %v2764_v52  ;;  %v3410_v55 = vld [vmem:[%s9263_s30 + $0x1] sm:$0x1] }
 0x3ff   : > { %v4534_v33 = vadd.f32 %v4533_v42, %v4532_v3  ;;  %v3414_v1 = vadd.f32 %v3412_v13, %v3410_v55  ;;  %v4179_v45 = vld [vmem:[%s9263_s30 + $0x2] sm:$0x1] }
 0x400   : > { %v4180_v34 = vadd.f32 %v4179_v45, %v4175_v0 }
 0x401   : > { %v4536_v26 = vadd.f32 %v4535_v32, %v4534_v33  ;;  %3415 = vst.msk [vmem:[%s9263_s30 + $0x1] sm:$0x1] %vm2765_vm5, %v3414_v1 }
 0x402   : > { %4181 = vst.msk [vmem:[%s9263_s30 + $0x2] sm:$0x1] %vm2765_vm5, %v4180_v34 }
 0x403   : > { %v4538_v5 = vadd.f32 %v4537_v49, %v4536_v26 }
 0x405   : > { %v4540_v46 = vadd.f32 %v4539_v61, %v4538_v5  ;;  %v3149_v9 = vld [vmem:[%s9263_s30] sm:$0x1] }
 0x406   : > { %v3150_v48 = vadd.f32 %v3149_v9, %v3148_v29 }
 0x407   : > { %v4542_v59 = vadd.f32 %v4541_v2, %v4540_v46 }
 0x408   : > { %3152 = vst.msk [vmem:[%s9263_s30] sm:$0x1] %vm3151_vm6, %v3150_v48  ;;  %v4173_v11 = vld [vmem:[%s9263_s30 + $0x1] sm:$0x1] }
 0x409   : > { %v4544_v14 = vadd.f32 %v4543_v10, %v4542_v59  ;;  %v4177_v42 = vadd.f32 %v4175_v0, %v4173_v11  ;;  %v4561_v3 = vld [vmem:[%s9263_s30 + $0x2] sm:$0x1] }
 0x40b   : > { %v4546_v39 = vadd.f32 %v4545_v62, %v4544_v14  ;;  %4178 = vst.msk [vmem:[%s9263_s30 + $0x1] sm:$0x1] %vm3151_vm6, %v4177_v42 }
 0x40d   : > { %v4548_v8 = vadd.f32 %v4547_v58, %v4546_v39 }
 0x40f   : > { %v4550_v16 = vadd.f32 %v4549_v57, %v4548_v8 }
 0x411   : > { %v4552_v17 = vadd.f32 %v4551_v54, %v4550_v16 }
 0x413   : > { %v4554_v63 = vadd.f32 %v4553_v53, %v4552_v17 }
 0x415   : > { %v4556_v7 = vadd.f32 %v4555_v50, %v4554_v63 }
 0x417   : > { %v4558_v56 = vadd.f32 %v4557_v51, %v4556_v7 }
 0x419   : > { %4559 = vadd.xlane.f32.xlu2 %v4558_v56 }
 0x48c   : > { %v4560_v40 = vpop.xlane.xlu2 %4559 }
 0x48d   : > { %v4562_v32 = vadd.f32 %v4561_v3, %v4560_v40 }
 0x48f   : > { %4563 = vst.msk [vmem:[%s9263_s30 + $0x2] sm:$0x1] %vm3151_vm6, %v4562_v32 }
 0x490 PF: > { %s18_s14 = sadd.s32 1, %s4865_s14   ;;  %s11598_s9 = smov %s4849_s10 }
 0x491   : > { %p15_p0 = scmp.ge.s32.totalorder %s18_s14, 4   ;;  %s11599_s10 = smov %s4853_s11 }
 0x492   : > { %s11600_s11 = smov %s4928_s20  ;;  %s11601_s12 = smov %s4861_s13 }
 0x493   : > { %s11602_s13 = smov %s11604_s16  ;;  %17 = sbr.rel (!%p15_p0) target bundleno = 6 (0x6), region = 86 }
 0x498   :  { %4583 = vsyncpa [#allocation3], 1 }
 0x499   :  { %4585 = vsyncpa [#allocation3 + $0x1], 1 }
 0x49a   :  { %4586 = vsyncpa [#allocation5], 1 }
 0x49b   :  { %4588 = vsyncpa [#allocation5 + $0x1], 1 }

</bundles_post_ra>
